<compile_context>
chip_gen: v6e
topology: v6e:2x2x1
jax: 0.10.0
libtpu: 0.0.40
codegen_flags: <defaults>
</compile_context>

<pallas_src>
import functools

import jax
import jax.numpy as jnp
from jax.experimental import pallas as pl
from jax.experimental.pallas import tpu as pltpu

LN_EPS = 1e-5                      # torch.nn.LayerNorm default
_INV_SQRT2 = 0.7071067811865476
_SQRT_2_OVER_PI = 0.7978845608028654


def _gelu(v, approximate):
    if approximate:
        # tanh approximation: relieves the VALU when the erf polynomial binds (v6e/v7x).
        return 0.5 * v * (1.0 + jnp.tanh(_SQRT_2_OVER_PI * (v + 0.044715 * v * v * v)))
    # Exact erf GELU (PyTorch F.gelu default).
    return 0.5 * v * (1.0 + jax.lax.erf(v * _INV_SQRT2))


def _layernorm(v, w, b):
    mu = jnp.mean(v, axis=-1, keepdims=True)
    vc = v - mu
    var = jnp.mean(vc * vc, axis=-1, keepdims=True)
    return vc * jax.lax.rsqrt(var + LN_EPS) * w + b


def mixer_block_kernel(x_ref, w_ref, vrow_ref, bcol_ref, o_ref, *, approximate_gelu=False):
    B, C, T = x_ref.shape

    x = x_ref[...].astype(jnp.float32)                  # (B, C, T) f32 working copy

    vrow = vrow_ref[...]                                # (6, D) f32, row-oriented params
    ln1_w, ln1_b = vrow[0:1], vrow[1:2]                 # (1, D) each
    ln2_w, ln2_b = vrow[2:3], vrow[3:4]
    cb1, cb2 = vrow[4:5], vrow[5:6]

    bcol = bcol_ref[...]                                # (D, 2) f32, column-oriented params
    tb1c, tb2c = bcol[:, 0:1], bcol[:, 1:2]             # (D, 1) each

    tw1 = w_ref[0]                                      # (H, C) bf16  (torch (out, in))
    tw2 = w_ref[1]                                      # (C, H) bf16  (torch (out, in))
    cw1 = w_ref[2]                                      # (T, H) bf16  ((in, out))
    cw2 = w_ref[3]                                      # (H, T) bf16  ((in, out))

    # ---------------- token-mixing branch (transpose-free, batched over B) ----------------
    y1 = _layernorm(x, ln1_w, ln1_b).astype(jnp.bfloat16)            # (B, C, T)
    # (C, B*T): lane-aligned last-axis concat of per-sample slices. With T % 128 == 0 this
    # is just vreg re-labelling (no cross-lane shuffles), and the two token matmuls below
    # get a B*T-wide output N-dim instead of B tiny 128-wide dots.
    y1w = jnp.concatenate([y1[b] for b in range(B)], axis=-1)        # (C, B*T) bf16
    hT = jnp.dot(tw1, y1w, preferred_element_type=jnp.float32)       # (H, B*T) f32
    hT = _gelu(hT + tb1c, approximate_gelu)
    oT = jnp.dot(tw2, hT.astype(jnp.bfloat16),
                 preferred_element_type=jnp.float32) + tb2c          # (C, B*T) f32
    tok = jnp.stack([oT[:, b * T:(b + 1) * T] for b in range(B)])    # back to (B, C, T)
    x1 = x + tok                                                     # residual 1

    # -------- channel-mixing branch (batch folded into the matmul M dimension) --------
    y2 = _layernorm(x1, ln2_w, ln2_b)                                # (B, C, T)
    y2_2d = y2.reshape(B * C, T).astype(jnp.bfloat16)
    h2 = _gelu(jnp.dot(y2_2d, cw1, preferred_element_type=jnp.float32) + cb1,
               approximate_gelu)                                     # (B*C, H)
    c_out = jnp.dot(h2.astype(jnp.bfloat16), cw2,
                    preferred_element_type=jnp.float32) + cb2        # (B*C, T)

    o_ref[...] = (x1 + c_out.reshape(B, C, T)).astype(o_ref.dtype)   # residual 2


def _pick_batch_tile(n, d, block_batch):
    """Largest divisor of n that fits a conservative VMEM budget and keeps the pipeline fed."""
    # ~40*D*D bytes of live f32/bf16 intermediates per sample in the body; keep the working
    # set around <= 20 MiB so tiles fit v7x's 64 MiB VMEM (with double-buffered bf16 I/O
    # blocks + the resident weight stack) and never spill on v5e/v6e either.
    vmem_cap = max(1, (20 * 1024 * 1024) // (40 * d * d))
    target = max(1, min(block_batch, n, vmem_cap))
    # Keep >= 2 grid steps per TensorCore (v7x has 2 TCs => aim for >= 4 steps total) when
    # n allows, so each core's block DMA hides behind the previous step's compute.
    if n >= 4:
        target = min(target, max(1, n // 4))
    elif n >= 2:
        target = min(target, max(1, n // 2))
    # Largest divisor of n <= target. Prime n degrades to 1-sample steps (perf cliff only).
    # TODO(synk): pad / mask a remainder tile to avoid the prime-N batch-tile cliff.
    return max(b for b in range(1, target + 1) if n % b == 0)


_PARAM_SINGLE_BUFFER_OK = None   # lazily resolved: does this JAX honor pl.Buffered(1)?


def mixer_block(x, w_stack, vrow, bcol, *, block_batch=8,
                vmem_limit_bytes=48 * 1024 * 1024,
                single_buffer_params=True, approximate_gelu=False):
    """x: (N, C, T) (bf16 recommended); w_stack: (4, D, D) bf16; vrow: (6, D) f32; bcol: (D, 2) f32."""
    global _PARAM_SINGLE_BUFFER_OK
    N, C, T = x.shape
    assert C == T, "MixerBlock requires mlp_dim == channels_dim"

    B = _pick_batch_tile(N, C, block_batch)
    grid = (N // B,)

    kernel = functools.partial(mixer_block_kernel, approximate_gelu=approximate_gelu)

    def build(param_mode):
        def param_spec(shape):
            zero_map = lambda i, _nd=len(shape): (0,) * _nd
            if param_mode is None:
                return pl.BlockSpec(shape, zero_map)
            # Grid-invariant stream: single-buffer to save VMEM (matters at large D / v7x).
            return pl.BlockSpec(shape, zero_map, pipeline_mode=param_mode)

        grid_spec = pltpu.PrefetchScalarGridSpec(
            num_scalar_prefetch=0,
            grid=grid,
            in_specs=[
                pl.BlockSpec((B, C, T), lambda i: (i, 0, 0)),
                param_spec(w_stack.shape),
                param_spec(vrow.shape),
                param_spec(bcol.shape),
            ],
            out_specs=pl.BlockSpec((B, C, T), lambda i: (i, 0, 0)),
        )
        return pl.pallas_call(
            kernel,
            out_shape=jax.ShapeDtypeStruct((N, C, T), x.dtype),
            grid_spec=grid_spec,
            compiler_params=pltpu.CompilerParams(
                dimension_semantics=("parallel",),
                vmem_limit_bytes=vmem_limit_bytes,
            ),
        )

    args = (x, w_stack, vrow, bcol)
    if single_buffer_params and _PARAM_SINGLE_BUFFER_OK is not False:
        try:
            out = build(pl.Buffered(1))(*args)
            if _PARAM_SINGLE_BUFFER_OK is None:
                jax.block_until_ready(out)   # surface any deferred compile/runtime error once
                _PARAM_SINGLE_BUFFER_OK = True
            return out
        except Exception:
            _PARAM_SINGLE_BUFFER_OK = False  # this JAX build rejects it; use default buffering
    return build(None)(*args)


# ---------------- parameter packing (from torch-convention params) ----------------
def pack_params(torch_params, compute_dtype=jnp.bfloat16):
    """torch_params: (ln1_w, ln1_b, tw1, tb1, tw2, tb2, ln2_w, ln2_b, cw1, cb1, cw2, cb2)
    with nn.Linear weights in torch (out, in) form and 1-D biases / LN params."""
    (ln1_w, ln1_b, tw1, tb1, tw2, tb2,
     ln2_w, ln2_b, cw1, cb1, cw2, cb2) = torch_params
    # Token weights kept (out, in) so the kernel computes W @ Y (transpose-free);
    # channel weights transposed to (in, out) so the kernel computes Y @ W.
    w_stack = jnp.stack([tw1, tw2, cw1.T, cw2.T]).astype(compute_dtype)            # (4, D, D)
    vrow = jnp.stack([ln1_w, ln1_b, ln2_w, ln2_b, cb1, cb2]).astype(jnp.float32)   # (6, D) rows
    bcol = jnp.stack([tb1, tb2], axis=-1).astype(jnp.float32)                      # (D, 2) cols
    return w_stack, vrow, bcol


# ---------------- plain-JAX reference (for correctness check) ----------------
def mixer_block_ref(x, torch_params):
    (ln1_w, ln1_b, tw1, tb1, tw2, tb2,
     ln2_w, ln2_b, cw1, cb1, cw2, cb2) = torch_params

    def ln(v, w, b):
        mu = v.mean(-1, keepdims=True)
        var = ((v - mu) ** 2).mean(-1, keepdims=True)
        return (v - mu) / jnp.sqrt(var + LN_EPS) * w + b

    def mlp(v, w1, b1, w2, b2):
        h = jax.nn.gelu(v @ w1.T + b1, approximate=False)
        return h @ w2.T + b2

    y = ln(x, ln1_w, ln1_b)
    y = jnp.swapaxes(y, 1, 2)                 # n c t -> n t c
    y = mlp(y, tw1, tb1, tw2, tb2)
    y = jnp.swapaxes(y, 1, 2)                 # n t c -> n c t
    x = x + y
    y = ln(x, ln2_w, ln2_b)
    return x + mlp(y, cw1, cb1, cw2, cb2)


def make_params(key, dim, dtype=jnp.float32):
    ks = jax.random.split(key, 12)
    w = lambda k: jax.random.normal(k, (dim, dim), dtype) * 0.05   # torch (out, in)
    v = lambda k: jax.random.normal(k, (dim,), dtype) * 0.05
    ln1_w = 1.0 + jax.random.normal(ks[0], (dim,), dtype) * 0.01
    ln1_b = jax.random.normal(ks[1], (dim,), dtype) * 0.01
    ln2_w = 1.0 + jax.random.normal(ks[2], (dim,), dtype) * 0.01
    ln2_b = jax.random.normal(ks[3], (dim,), dtype) * 0.01
    return (ln1_w, ln1_b,
            w(ks[4]), v(ks[5]), w(ks[6]), v(ks[7]),     # tokens_mlp dense1/dense2
            ln2_w, ln2_b,
            w(ks[8]), v(ks[9]), w(ks[10]), v(ks[11]))   # channel_mlp dense1/dense2


if __name__ == "__main__":
    key = jax.random.PRNGKey(0)
    k_x, k_p = jax.random.split(key)

    N = 8
    DIM = 128         # mlp_dim == channels_dim (required by the module); lane-dense tiles

    # bf16 HBM I/O for the activation (the kernel upcasts to f32 internally).
    x = jax.random.normal(k_x, (N, DIM, DIM), jnp.float32).astype(jnp.bfloat16)
    torch_params = make_params(k_p, DIM)
    w_stack, vrow, bcol = pack_params(torch_params)

    out = jax.block_until_ready(mixer_block(x, w_stack, vrow, bcol, block_batch=8))

    # f32 reference computed from the same bf16 input values.
    ref = mixer_block_ref(x.astype(jnp.float32), torch_params)

    assert out.shape == (N, DIM, DIM) and out.dtype == x.dtype
    out_f32 = out.astype(jnp.float32)
    max_err = float(jnp.max(jnp.abs(out_f32 - ref)))
    # bf16 MXU operands + bf16 output rounding with f32 accumulation / LN / GELU in-kernel.
    assert jnp.allclose(out_f32, ref, atol=4e-2, rtol=4e-2), (
        f"mismatch vs reference (max |diff| = {max_err})")

    print("KERNEL_OK")
</pallas_src>

<mosaic_0001>
module attributes {stable_mosaic.version = 11 : i64} {
  func.func @mixer_block_kernel(%arg0: i32, %arg1: memref<2x128x128xbf16, #tpu.memory_space<vmem>>, %arg2: memref<4x128x128xbf16, #tpu.memory_space<vmem>>, %arg3: memref<6x128xf32, #tpu.memory_space<vmem>>, %arg4: memref<128x2xf32, #tpu.memory_space<vmem>>, %arg5: memref<2x128x128xbf16, #tpu.memory_space<vmem>>) attributes {dimension_semantics = [#tpu.dimension_semantics<parallel>], iteration_bounds = array<i64: 4>, scalar_prefetch = 0 : i64, scratch_operands = 0 : i64, tpu.core_type = #tpu.core_type<tc>, window_params = [{transform_indices = @transform_0, window_bounds = array<i64: 2, 128, 128>}, {pipeline_mode = #tpu.pipeline_mode<synchronous>, transform_indices = @transform_1, window_bounds = array<i64: 4, 128, 128>}, {pipeline_mode = #tpu.pipeline_mode<synchronous>, transform_indices = @transform_2, window_bounds = array<i64: 6, 128>}, {pipeline_mode = #tpu.pipeline_mode<synchronous>, transform_indices = @transform_3, window_bounds = array<i64: 128, 2>}, {transform_indices = @transform_4, window_bounds = array<i64: 2, 128, 128>}]} {
    %c0 = arith.constant 0 : index
    %c0_0 = arith.constant 0 : index
    %c0_1 = arith.constant 0 : index
    %0 = vector.load %arg1[%c0, %c0_0, %c0_1] : memref<2x128x128xbf16, #tpu.memory_space<vmem>>, vector<2x128x128xbf16>
    %1 = arith.extf %0 : vector<2x128x128xbf16> to vector<2x128x128xf32>
    %c0_2 = arith.constant 0 : index
    %c0_3 = arith.constant 0 : index
    %2 = vector.load %arg3[%c0_2, %c0_3] : memref<6x128xf32, #tpu.memory_space<vmem>>, vector<6x128xf32>
    %3 = vector.extract_strided_slice %2 {offsets = [0, 0], sizes = [1, 128], strides = [1, 1]} : vector<6x128xf32> to vector<1x128xf32>
    %4 = vector.extract_strided_slice %2 {offsets = [1, 0], sizes = [1, 128], strides = [1, 1]} : vector<6x128xf32> to vector<1x128xf32>
    %5 = vector.extract_strided_slice %2 {offsets = [2, 0], sizes = [1, 128], strides = [1, 1]} : vector<6x128xf32> to vector<1x128xf32>
    %6 = vector.extract_strided_slice %2 {offsets = [3, 0], sizes = [1, 128], strides = [1, 1]} : vector<6x128xf32> to vector<1x128xf32>
    %7 = vector.extract_strided_slice %2 {offsets = [4, 0], sizes = [1, 128], strides = [1, 1]} : vector<6x128xf32> to vector<1x128xf32>
    %8 = vector.extract_strided_slice %2 {offsets = [5, 0], sizes = [1, 128], strides = [1, 1]} : vector<6x128xf32> to vector<1x128xf32>
    %c0_4 = arith.constant 0 : index
    %c0_5 = arith.constant 0 : index
    %9 = vector.load %arg4[%c0_4, %c0_5] : memref<128x2xf32, #tpu.memory_space<vmem>>, vector<128x2xf32>
    %10 = vector.extract_strided_slice %9 {offsets = [0, 0], sizes = [128, 1], strides = [1, 1]} : vector<128x2xf32> to vector<128x1xf32>
    %11 = vector.extract_strided_slice %9 {offsets = [0, 1], sizes = [128, 1], strides = [1, 1]} : vector<128x2xf32> to vector<128x1xf32>
    %c0_6 = arith.constant 0 : index
    %c0_7 = arith.constant 0 : index
    %c0_8 = arith.constant 0 : index
    %12 = vector.load %arg2[%c0_6, %c0_7, %c0_8] : memref<4x128x128xbf16, #tpu.memory_space<vmem>>, vector<1x128x128xbf16>
    %13 = vector.shape_cast %12 : vector<1x128x128xbf16> to vector<128x128xbf16>
    %c1 = arith.constant 1 : index
    %c0_9 = arith.constant 0 : index
    %c0_10 = arith.constant 0 : index
    %14 = vector.load %arg2[%c1, %c0_9, %c0_10] : memref<4x128x128xbf16, #tpu.memory_space<vmem>>, vector<1x128x128xbf16>
    %15 = vector.shape_cast %14 : vector<1x128x128xbf16> to vector<128x128xbf16>
    %c2 = arith.constant 2 : index
    %c0_11 = arith.constant 0 : index
    %c0_12 = arith.constant 0 : index
    %16 = vector.load %arg2[%c2, %c0_11, %c0_12] : memref<4x128x128xbf16, #tpu.memory_space<vmem>>, vector<1x128x128xbf16>
    %17 = vector.shape_cast %16 : vector<1x128x128xbf16> to vector<128x128xbf16>
    %c3 = arith.constant 3 : index
    %c0_13 = arith.constant 0 : index
    %c0_14 = arith.constant 0 : index
    %18 = vector.load %arg2[%c3, %c0_13, %c0_14] : memref<4x128x128xbf16, #tpu.memory_space<vmem>>, vector<1x128x128xbf16>
    %19 = vector.shape_cast %18 : vector<1x128x128xbf16> to vector<128x128xbf16>
    %cst = arith.constant dense<0.000000e+00> : vector<2x128xf32>
    %20 = vector.multi_reduction <add>, %1, %cst [2] : vector<2x128x128xf32> to vector<2x128xf32>
    %21 = vector.shape_cast %20 : vector<2x128xf32> to vector<2x128x1xf32>
    %cst_15 = arith.constant 1.280000e+02 : f32
    %22 = vector.broadcast %cst_15 : f32 to vector<2x128x1xf32>
    %23 = arith.divf %21, %22 : vector<2x128x1xf32>
    %24 = vector.broadcast %23 : vector<2x128x1xf32> to vector<2x128x128xf32>
    %25 = arith.subf %1, %24 : vector<2x128x128xf32>
    %26 = arith.mulf %25, %25 : vector<2x128x128xf32>
    %cst_16 = arith.constant dense<0.000000e+00> : vector<2x128xf32>
    %27 = vector.multi_reduction <add>, %26, %cst_16 [2] : vector<2x128x128xf32> to vector<2x128xf32>
    %28 = vector.shape_cast %27 : vector<2x128xf32> to vector<2x128x1xf32>
    %cst_17 = arith.constant 1.280000e+02 : f32
    %29 = vector.broadcast %cst_17 : f32 to vector<2x128x1xf32>
    %30 = arith.divf %28, %29 : vector<2x128x1xf32>
    %cst_18 = arith.constant 9.99999974E-6 : f32
    %31 = vector.broadcast %cst_18 : f32 to vector<2x128x1xf32>
    %32 = arith.addf %30, %31 : vector<2x128x1xf32>
    %33 = math.rsqrt %32 : vector<2x128x1xf32>
    %34 = vector.broadcast %33 : vector<2x128x1xf32> to vector<2x128x128xf32>
    %35 = arith.mulf %25, %34 : vector<2x128x128xf32>
    %36 = vector.shape_cast %3 : vector<1x128xf32> to vector<1x1x128xf32>
    %37 = vector.broadcast %36 : vector<1x1x128xf32> to vector<2x128x128xf32>
    %38 = arith.mulf %35, %37 : vector<2x128x128xf32>
    %39 = vector.shape_cast %4 : vector<1x128xf32> to vector<1x1x128xf32>
    %40 = vector.broadcast %39 : vector<1x1x128xf32> to vector<2x128x128xf32>
    %41 = arith.addf %38, %40 : vector<2x128x128xf32>
    %42 = arith.truncf %41 : vector<2x128x128xf32> to vector<2x128x128xbf16>
    %43 = vector.extract_strided_slice %42 {offsets = [0, 0, 0], sizes = [1, 128, 128], strides = [1, 1, 1]} : vector<2x128x128xbf16> to vector<1x128x128xbf16>
    %44 = vector.shape_cast %43 : vector<1x128x128xbf16> to vector<128x128xbf16>
    %45 = vector.extract_strided_slice %42 {offsets = [1, 0, 0], sizes = [1, 128, 128], strides = [1, 1, 1]} : vector<2x128x128xbf16> to vector<1x128x128xbf16>
    %46 = vector.shape_cast %45 : vector<1x128x128xbf16> to vector<128x128xbf16>
    %47 = tpu.concatenate %44, %46 in 1 : vector<128x128xbf16>, vector<128x128xbf16> -> vector<128x256xbf16>
    %cst_19 = arith.constant dense<0.000000e+00> : vector<128x256xf32>
    %48 = tpu.matmul %13, %47, %cst_19 {dimension_numbers = #tpu.dot_dimension_numbers<[1], [0], [0], [1], [0, 0, 1, 1], [], []>} : vector<128x128xbf16>, vector<128x256xbf16>, vector<128x256xf32> -> vector<128x256xf32>
    %49 = vector.broadcast %10 : vector<128x1xf32> to vector<128x256xf32>
    %50 = arith.addf %48, %49 : vector<128x256xf32>
    %cst_20 = arith.constant 5.000000e-01 : f32
    %51 = vector.broadcast %cst_20 : f32 to vector<128x256xf32>
    %52 = arith.mulf %51, %50 : vector<128x256xf32>
    %cst_21 = arith.constant 0.707106769 : f32
    %53 = vector.broadcast %cst_21 : f32 to vector<128x256xf32>
    %54 = arith.mulf %50, %53 : vector<128x256xf32>
    %55 = math.erf %54 : vector<128x256xf32>
    %cst_22 = arith.constant 1.000000e+00 : f32
    %56 = vector.broadcast %cst_22 : f32 to vector<128x256xf32>
    %57 = arith.addf %56, %55 : vector<128x256xf32>
    %58 = arith.mulf %52, %57 : vector<128x256xf32>
    %59 = arith.truncf %58 : vector<128x256xf32> to vector<128x256xbf16>
    %cst_23 = arith.constant dense<0.000000e+00> : vector<128x256xf32>
    %60 = tpu.matmul %15, %59, %cst_23 {dimension_numbers = #tpu.dot_dimension_numbers<[1], [0], [0], [1], [0, 0, 1, 1], [], []>} : vector<128x128xbf16>, vector<128x256xbf16>, vector<128x256xf32> -> vector<128x256xf32>
    %61 = vector.broadcast %11 : vector<128x1xf32> to vector<128x256xf32>
    %62 = arith.addf %60, %61 : vector<128x256xf32>
    %63 = vector.extract_strided_slice %62 {offsets = [0, 0], sizes = [128, 128], strides = [1, 1]} : vector<128x256xf32> to vector<128x128xf32>
    %64 = vector.extract_strided_slice %62 {offsets = [0, 128], sizes = [128, 128], strides = [1, 1]} : vector<128x256xf32> to vector<128x128xf32>
    %65 = vector.shape_cast %63 : vector<128x128xf32> to vector<1x128x128xf32>
    %66 = vector.shape_cast %64 : vector<128x128xf32> to vector<1x128x128xf32>
    %67 = tpu.concatenate %65, %66 in 0 : vector<1x128x128xf32>, vector<1x128x128xf32> -> vector<2x128x128xf32>
    %68 = arith.addf %1, %67 : vector<2x128x128xf32>
    %cst_24 = arith.constant dense<0.000000e+00> : vector<2x128xf32>
    %69 = vector.multi_reduction <add>, %68, %cst_24 [2] : vector<2x128x128xf32> to vector<2x128xf32>
    %70 = vector.shape_cast %69 : vector<2x128xf32> to vector<2x128x1xf32>
    %cst_25 = arith.constant 1.280000e+02 : f32
    %71 = vector.broadcast %cst_25 : f32 to vector<2x128x1xf32>
    %72 = arith.divf %70, %71 : vector<2x128x1xf32>
    %73 = vector.broadcast %72 : vector<2x128x1xf32> to vector<2x128x128xf32>
    %74 = arith.subf %68, %73 : vector<2x128x128xf32>
    %75 = arith.mulf %74, %74 : vector<2x128x128xf32>
    %cst_26 = arith.constant dense<0.000000e+00> : vector<2x128xf32>
    %76 = vector.multi_reduction <add>, %75, %cst_26 [2] : vector<2x128x128xf32> to vector<2x128xf32>
    %77 = vector.shape_cast %76 : vector<2x128xf32> to vector<2x128x1xf32>
    %cst_27 = arith.constant 1.280000e+02 : f32
    %78 = vector.broadcast %cst_27 : f32 to vector<2x128x1xf32>
    %79 = arith.divf %77, %78 : vector<2x128x1xf32>
    %cst_28 = arith.constant 9.99999974E-6 : f32
    %80 = vector.broadcast %cst_28 : f32 to vector<2x128x1xf32>
    %81 = arith.addf %79, %80 : vector<2x128x1xf32>
    %82 = math.rsqrt %81 : vector<2x128x1xf32>
    %83 = vector.broadcast %82 : vector<2x128x1xf32> to vector<2x128x128xf32>
    %84 = arith.mulf %74, %83 : vector<2x128x128xf32>
    %85 = vector.shape_cast %5 : vector<1x128xf32> to vector<1x1x128xf32>
    %86 = vector.broadcast %85 : vector<1x1x128xf32> to vector<2x128x128xf32>
    %87 = arith.mulf %84, %86 : vector<2x128x128xf32>
    %88 = vector.shape_cast %6 : vector<1x128xf32> to vector<1x1x128xf32>
    %89 = vector.broadcast %88 : vector<1x1x128xf32> to vector<2x128x128xf32>
    %90 = arith.addf %87, %89 : vector<2x128x128xf32>
    %91 = vector.shape_cast %90 : vector<2x128x128xf32> to vector<256x128xf32>
    %92 = arith.truncf %91 : vector<256x128xf32> to vector<256x128xbf16>
    %cst_29 = arith.constant dense<0.000000e+00> : vector<256x128xf32>
    %93 = tpu.matmul %92, %17, %cst_29 {dimension_numbers = #tpu.dot_dimension_numbers<[1], [0], [0], [1], [0, 0, 1, 1], [], []>} : vector<256x128xbf16>, vector<128x128xbf16>, vector<256x128xf32> -> vector<256x128xf32>
    %94 = vector.broadcast %7 : vector<1x128xf32> to vector<256x128xf32>
    %95 = arith.addf %93, %94 : vector<256x128xf32>
    %cst_30 = arith.constant 5.000000e-01 : f32
    %96 = vector.broadcast %cst_30 : f32 to vector<256x128xf32>
    %97 = arith.mulf %96, %95 : vector<256x128xf32>
    %cst_31 = arith.constant 0.707106769 : f32
    %98 = vector.broadcast %cst_31 : f32 to vector<256x128xf32>
    %99 = arith.mulf %95, %98 : vector<256x128xf32>
    %100 = math.erf %99 : vector<256x128xf32>
    %cst_32 = arith.constant 1.000000e+00 : f32
    %101 = vector.broadcast %cst_32 : f32 to vector<256x128xf32>
    %102 = arith.addf %101, %100 : vector<256x128xf32>
    %103 = arith.mulf %97, %102 : vector<256x128xf32>
    %104 = arith.truncf %103 : vector<256x128xf32> to vector<256x128xbf16>
    %cst_33 = arith.constant dense<0.000000e+00> : vector<256x128xf32>
    %105 = tpu.matmul %104, %19, %cst_33 {dimension_numbers = #tpu.dot_dimension_numbers<[1], [0], [0], [1], [0, 0, 1, 1], [], []>} : vector<256x128xbf16>, vector<128x128xbf16>, vector<256x128xf32> -> vector<256x128xf32>
    %106 = vector.broadcast %8 : vector<1x128xf32> to vector<256x128xf32>
    %107 = arith.addf %105, %106 : vector<256x128xf32>
    %108 = vector.shape_cast %107 : vector<256x128xf32> to vector<2x128x128xf32>
    %109 = arith.addf %68, %108 : vector<2x128x128xf32>
    %110 = arith.truncf %109 : vector<2x128x128xf32> to vector<2x128x128xbf16>
    %c0_34 = arith.constant 0 : index
    %c0_35 = arith.constant 0 : index
    %c0_36 = arith.constant 0 : index
    %111 = vector.load %arg5[%c0_34, %c0_35, %c0_36] : memref<2x128x128xbf16, #tpu.memory_space<vmem>>, vector<2x128x128xbf16>
    tpu.vector_store %arg5[%c0_34, %c0_35, %c0_36], %110 {strides = array<i32>} : memref<2x128x128xbf16, #tpu.memory_space<vmem>>, vector<2x128x128xbf16>,
    return
  }
  func.func @transform_0(%arg0: i32) -> (i32, i32, i32) {
    %c0_i32 = arith.constant 0 : i32
    %c0_i32_0 = arith.constant 0 : i32
    %c0_i32_1 = arith.constant 0 : i32
    return %arg0, %c0_i32, %c0_i32_0 : i32, i32, i32
  }
  func.func @transform_1(%arg0: i32) -> (i32, i32, i32) {
    %c0_i32 = arith.constant 0 : i32
    %c0_i32_0 = arith.constant 0 : i32
    %c0_i32_1 = arith.constant 0 : i32
    %c0_i32_2 = arith.constant 0 : i32
    return %c0_i32, %c0_i32_0, %c0_i32_1 : i32, i32, i32
  }
  func.func @transform_2(%arg0: i32) -> (i32, i32) {
    %c0_i32 = arith.constant 0 : i32
    %c0_i32_0 = arith.constant 0 : i32
    %c0_i32_1 = arith.constant 0 : i32
    return %c0_i32, %c0_i32_0 : i32, i32
  }
  func.func @transform_3(%arg0: i32) -> (i32, i32) {
    %c0_i32 = arith.constant 0 : i32
    %c0_i32_0 = arith.constant 0 : i32
    %c0_i32_1 = arith.constant 0 : i32
    return %c0_i32, %c0_i32_0 : i32, i32
  }
  func.func @transform_4(%arg0: i32) -> (i32, i32, i32) {
    %c0_i32 = arith.constant 0 : i32
    %c0_i32_0 = arith.constant 0 : i32
    %c0_i32_1 = arith.constant 0 : i32
    return %arg0, %c0_i32, %c0_i32_0 : i32, i32, i32
  }
}

module attributes {stable_mosaic.version = 11 : i64} {
  func.func @mixer_block_kernel(%arg0: i32, %arg1: memref<2x128x128xbf16, #tpu.memory_space<vmem>>, %arg2: memref<4x128x128xbf16, #tpu.memory_space<vmem>>, %arg3: memref<6x128xf32, #tpu.memory_space<vmem>>, %arg4: memref<128x2xf32, #tpu.memory_space<vmem>>, %arg5: memref<2x128x128xbf16, #tpu.memory_space<vmem>>) attributes {dimension_semantics = [#tpu.dimension_semantics<parallel>], iteration_bounds = array<i64: 4>, scalar_prefetch = 0 : i64, scratch_operands = 0 : i64, tpu.core_type = #tpu.core_type<tc>, window_params = [{transform_indices = @transform_0, window_bounds = array<i64: 2, 128, 128>}, {pipeline_mode = #tpu.pipeline_mode<synchronous>, transform_indices = @transform_1, window_bounds = array<i64: 4, 128, 128>}, {pipeline_mode = #tpu.pipeline_mode<synchronous>, transform_indices = @transform_2, window_bounds = array<i64: 6, 128>}, {pipeline_mode = #tpu.pipeline_mode<synchronous>, transform_indices = @transform_3, window_bounds = array<i64: 128, 2>}, {transform_indices = @transform_4, window_bounds = array<i64: 2, 128, 128>}]} {
    %c0 = arith.constant 0 : index
    %c0_0 = arith.constant 0 : index
    %c0_1 = arith.constant 0 : index
    %0 = vector.load %arg1[%c0, %c0_0, %c0_1] : memref<2x128x128xbf16, #tpu.memory_space<vmem>>, vector<2x128x128xbf16>
    %1 = arith.extf %0 : vector<2x128x128xbf16> to vector<2x128x128xf32>
    %c0_2 = arith.constant 0 : index
    %c0_3 = arith.constant 0 : index
    %2 = vector.load %arg3[%c0_2, %c0_3] : memref<6x128xf32, #tpu.memory_space<vmem>>, vector<6x128xf32>
    %3 = vector.extract_strided_slice %2 {offsets = [0, 0], sizes = [1, 128], strides = [1, 1]} : vector<6x128xf32> to vector<1x128xf32>
    %4 = vector.extract_strided_slice %2 {offsets = [1, 0], sizes = [1, 128], strides = [1, 1]} : vector<6x128xf32> to vector<1x128xf32>
    %5 = vector.extract_strided_slice %2 {offsets = [2, 0], sizes = [1, 128], strides = [1, 1]} : vector<6x128xf32> to vector<1x128xf32>
    %6 = vector.extract_strided_slice %2 {offsets = [3, 0], sizes = [1, 128], strides = [1, 1]} : vector<6x128xf32> to vector<1x128xf32>
    %7 = vector.extract_strided_slice %2 {offsets = [4, 0], sizes = [1, 128], strides = [1, 1]} : vector<6x128xf32> to vector<1x128xf32>
    %8 = vector.extract_strided_slice %2 {offsets = [5, 0], sizes = [1, 128], strides = [1, 1]} : vector<6x128xf32> to vector<1x128xf32>
    %c0_4 = arith.constant 0 : index
    %c0_5 = arith.constant 0 : index
    %9 = vector.load %arg4[%c0_4, %c0_5] : memref<128x2xf32, #tpu.memory_space<vmem>>, vector<128x2xf32>
    %10 = vector.extract_strided_slice %9 {offsets = [0, 0], sizes = [128, 1], strides = [1, 1]} : vector<128x2xf32> to vector<128x1xf32>
    %11 = vector.extract_strided_slice %9 {offsets = [0, 1], sizes = [128, 1], strides = [1, 1]} : vector<128x2xf32> to vector<128x1xf32>
    %c0_6 = arith.constant 0 : index
    %c0_7 = arith.constant 0 : index
    %c0_8 = arith.constant 0 : index
    %12 = vector.load %arg2[%c0_6, %c0_7, %c0_8] : memref<4x128x128xbf16, #tpu.memory_space<vmem>>, vector<1x128x128xbf16>
    %13 = vector.shape_cast %12 : vector<1x128x128xbf16> to vector<128x128xbf16>
    %c1 = arith.constant 1 : index
    %c0_9 = arith.constant 0 : index
    %c0_10 = arith.constant 0 : index
    %14 = vector.load %arg2[%c1, %c0_9, %c0_10] : memref<4x128x128xbf16, #tpu.memory_space<vmem>>, vector<1x128x128xbf16>
    %15 = vector.shape_cast %14 : vector<1x128x128xbf16> to vector<128x128xbf16>
    %c2 = arith.constant 2 : index
    %c0_11 = arith.constant 0 : index
    %c0_12 = arith.constant 0 : index
    %16 = vector.load %arg2[%c2, %c0_11, %c0_12] : memref<4x128x128xbf16, #tpu.memory_space<vmem>>, vector<1x128x128xbf16>
    %17 = vector.shape_cast %16 : vector<1x128x128xbf16> to vector<128x128xbf16>
    %c3 = arith.constant 3 : index
    %c0_13 = arith.constant 0 : index
    %c0_14 = arith.constant 0 : index
    %18 = vector.load %arg2[%c3, %c0_13, %c0_14] : memref<4x128x128xbf16, #tpu.memory_space<vmem>>, vector<1x128x128xbf16>
    %19 = vector.shape_cast %18 : vector<1x128x128xbf16> to vector<128x128xbf16>
    %cst = arith.constant dense<0.000000e+00> : vector<2x128xf32>
    %20 = vector.multi_reduction <add>, %1, %cst [2] : vector<2x128x128xf32> to vector<2x128xf32>
    %21 = vector.shape_cast %20 : vector<2x128xf32> to vector<2x128x1xf32>
    %cst_15 = arith.constant 1.280000e+02 : f32
    %22 = vector.broadcast %cst_15 : f32 to vector<2x128x1xf32>
    %23 = arith.divf %21, %22 : vector<2x128x1xf32>
    %24 = vector.broadcast %23 : vector<2x128x1xf32> to vector<2x128x128xf32>
    %25 = arith.subf %1, %24 : vector<2x128x128xf32>
    %26 = arith.mulf %25, %25 : vector<2x128x128xf32>
    %cst_16 = arith.constant dense<0.000000e+00> : vector<2x128xf32>
    %27 = vector.multi_reduction <add>, %26, %cst_16 [2] : vector<2x128x128xf32> to vector<2x128xf32>
    %28 = vector.shape_cast %27 : vector<2x128xf32> to vector<2x128x1xf32>
    %cst_17 = arith.constant 1.280000e+02 : f32
    %29 = vector.broadcast %cst_17 : f32 to vector<2x128x1xf32>
    %30 = arith.divf %28, %29 : vector<2x128x1xf32>
    %cst_18 = arith.constant 9.99999974E-6 : f32
    %31 = vector.broadcast %cst_18 : f32 to vector<2x128x1xf32>
    %32 = arith.addf %30, %31 : vector<2x128x1xf32>
    %33 = math.rsqrt %32 : vector<2x128x1xf32>
    %34 = vector.broadcast %33 : vector<2x128x1xf32> to vector<2x128x128xf32>
    %35 = arith.mulf %25, %34 : vector<2x128x128xf32>
    %36 = vector.shape_cast %3 : vector<1x128xf32> to vector<1x1x128xf32>
    %37 = vector.broadcast %36 : vector<1x1x128xf32> to vector<2x128x128xf32>
    %38 = arith.mulf %35, %37 : vector<2x128x128xf32>
    %39 = vector.shape_cast %4 : vector<1x128xf32> to vector<1x1x128xf32>
    %40 = vector.broadcast %39 : vector<1x1x128xf32> to vector<2x128x128xf32>
    %41 = arith.addf %38, %40 : vector<2x128x128xf32>
    %42 = arith.truncf %41 : vector<2x128x128xf32> to vector<2x128x128xbf16>
    %43 = vector.extract_strided_slice %42 {offsets = [0, 0, 0], sizes = [1, 128, 128], strides = [1, 1, 1]} : vector<2x128x128xbf16> to vector<1x128x128xbf16>
    %44 = vector.shape_cast %43 : vector<1x128x128xbf16> to vector<128x128xbf16>
    %45 = vector.extract_strided_slice %42 {offsets = [1, 0, 0], sizes = [1, 128, 128], strides = [1, 1, 1]} : vector<2x128x128xbf16> to vector<1x128x128xbf16>
    %46 = vector.shape_cast %45 : vector<1x128x128xbf16> to vector<128x128xbf16>
    %47 = tpu.concatenate %44, %46 in 1 : vector<128x128xbf16>, vector<128x128xbf16> -> vector<128x256xbf16>
    %cst_19 = arith.constant dense<0.000000e+00> : vector<128x256xf32>
    %48 = tpu.matmul %13, %47, %cst_19 {dimension_numbers = #tpu.dot_dimension_numbers<[1], [0], [0], [1], [0, 0, 1, 1], [], []>} : vector<128x128xbf16>, vector<128x256xbf16>, vector<128x256xf32> -> vector<128x256xf32>
    %49 = vector.broadcast %10 : vector<128x1xf32> to vector<128x256xf32>
    %50 = arith.addf %48, %49 : vector<128x256xf32>
    %cst_20 = arith.constant 5.000000e-01 : f32
    %51 = vector.broadcast %cst_20 : f32 to vector<128x256xf32>
    %52 = arith.mulf %51, %50 : vector<128x256xf32>
    %cst_21 = arith.constant 0.707106769 : f32
    %53 = vector.broadcast %cst_21 : f32 to vector<128x256xf32>
    %54 = arith.mulf %50, %53 : vector<128x256xf32>
    %55 = math.erf %54 : vector<128x256xf32>
    %cst_22 = arith.constant 1.000000e+00 : f32
    %56 = vector.broadcast %cst_22 : f32 to vector<128x256xf32>
    %57 = arith.addf %56, %55 : vector<128x256xf32>
    %58 = arith.mulf %52, %57 : vector<128x256xf32>
    %59 = arith.truncf %58 : vector<128x256xf32> to vector<128x256xbf16>
    %cst_23 = arith.constant dense<0.000000e+00> : vector<128x256xf32>
    %60 = tpu.matmul %15, %59, %cst_23 {dimension_numbers = #tpu.dot_dimension_numbers<[1], [0], [0], [1], [0, 0, 1, 1], [], []>} : vector<128x128xbf16>, vector<128x256xbf16>, vector<128x256xf32> -> vector<128x256xf32>
    %61 = vector.broadcast %11 : vector<128x1xf32> to vector<128x256xf32>
    %62 = arith.addf %60, %61 : vector<128x256xf32>
    %63 = vector.extract_strided_slice %62 {offsets = [0, 0], sizes = [128, 128], strides = [1, 1]} : vector<128x256xf32> to vector<128x128xf32>
    %64 = vector.extract_strided_slice %62 {offsets = [0, 128], sizes = [128, 128], strides = [1, 1]} : vector<128x256xf32> to vector<128x128xf32>
    %65 = vector.shape_cast %63 : vector<128x128xf32> to vector<1x128x128xf32>
    %66 = vector.shape_cast %64 : vector<128x128xf32> to vector<1x128x128xf32>
    %67 = tpu.concatenate %65, %66 in 0 : vector<1x128x128xf32>, vector<1x128x128xf32> -> vector<2x128x128xf32>
    %68 = arith.addf %1, %67 : vector<2x128x128xf32>
    %cst_24 = arith.constant dense<0.000000e+00> : vector<2x128xf32>
    %69 = vector.multi_reduction <add>, %68, %cst_24 [2] : vector<2x128x128xf32> to vector<2x128xf32>
    %70 = vector.shape_cast %69 : vector<2x128xf32> to vector<2x128x1xf32>
    %cst_25 = arith.constant 1.280000e+02 : f32
    %71 = vector.broadcast %cst_25 : f32 to vector<2x128x1xf32>
    %72 = arith.divf %70, %71 : vector<2x128x1xf32>
    %73 = vector.broadcast %72 : vector<2x128x1xf32> to vector<2x128x128xf32>
    %74 = arith.subf %68, %73 : vector<2x128x128xf32>
    %75 = arith.mulf %74, %74 : vector<2x128x128xf32>
    %cst_26 = arith.constant dense<0.000000e+00> : vector<2x128xf32>
    %76 = vector.multi_reduction <add>, %75, %cst_26 [2] : vector<2x128x128xf32> to vector<2x128xf32>
    %77 = vector.shape_cast %76 : vector<2x128xf32> to vector<2x128x1xf32>
    %cst_27 = arith.constant 1.280000e+02 : f32
    %78 = vector.broadcast %cst_27 : f32 to vector<2x128x1xf32>
    %79 = arith.divf %77, %78 : vector<2x128x1xf32>
    %cst_28 = arith.constant 9.99999974E-6 : f32
    %80 = vector.broadcast %cst_28 : f32 to vector<2x128x1xf32>
    %81 = arith.addf %79, %80 : vector<2x128x1xf32>
    %82 = math.rsqrt %81 : vector<2x128x1xf32>
    %83 = vector.broadcast %82 : vector<2x128x1xf32> to vector<2x128x128xf32>
    %84 = arith.mulf %74, %83 : vector<2x128x128xf32>
    %85 = vector.shape_cast %5 : vector<1x128xf32> to vector<1x1x128xf32>
    %86 = vector.broadcast %85 : vector<1x1x128xf32> to vector<2x128x128xf32>
    %87 = arith.mulf %84, %86 : vector<2x128x128xf32>
    %88 = vector.shape_cast %6 : vector<1x128xf32> to vector<1x1x128xf32>
    %89 = vector.broadcast %88 : vector<1x1x128xf32> to vector<2x128x128xf32>
    %90 = arith.addf %87, %89 : vector<2x128x128xf32>
    %91 = vector.shape_cast %90 : vector<2x128x128xf32> to vector<256x128xf32>
    %92 = arith.truncf %91 : vector<256x128xf32> to vector<256x128xbf16>
    %cst_29 = arith.constant dense<0.000000e+00> : vector<256x128xf32>
    %93 = tpu.matmul %92, %17, %cst_29 {dimension_numbers = #tpu.dot_dimension_numbers<[1], [0], [0], [1], [0, 0, 1, 1], [], []>} : vector<256x128xbf16>, vector<128x128xbf16>, vector<256x128xf32> -> vector<256x128xf32>
    %94 = vector.broadcast %7 : vector<1x128xf32> to vector<256x128xf32>
    %95 = arith.addf %93, %94 : vector<256x128xf32>
    %cst_30 = arith.constant 5.000000e-01 : f32
    %96 = vector.broadcast %cst_30 : f32 to vector<256x128xf32>
    %97 = arith.mulf %96, %95 : vector<256x128xf32>
    %cst_31 = arith.constant 0.707106769 : f32
    %98 = vector.broadcast %cst_31 : f32 to vector<256x128xf32>
    %99 = arith.mulf %95, %98 : vector<256x128xf32>
    %100 = math.erf %99 : vector<256x128xf32>
    %cst_32 = arith.constant 1.000000e+00 : f32
    %101 = vector.broadcast %cst_32 : f32 to vector<256x128xf32>
    %102 = arith.addf %101, %100 : vector<256x128xf32>
    %103 = arith.mulf %97, %102 : vector<256x128xf32>
    %104 = arith.truncf %103 : vector<256x128xf32> to vector<256x128xbf16>
    %cst_33 = arith.constant dense<0.000000e+00> : vector<256x128xf32>
    %105 = tpu.matmul %104, %19, %cst_33 {dimension_numbers = #tpu.dot_dimension_numbers<[1], [0], [0], [1], [0, 0, 1, 1], [], []>} : vector<256x128xbf16>, vector<128x128xbf16>, vector<256x128xf32> -> vector<256x128xf32>
    %106 = vector.broadcast %8 : vector<1x128xf32> to vector<256x128xf32>
    %107 = arith.addf %105, %106 : vector<256x128xf32>
    %108 = vector.shape_cast %107 : vector<256x128xf32> to vector<2x128x128xf32>
    %109 = arith.addf %68, %108 : vector<2x128x128xf32>
    %110 = arith.truncf %109 : vector<2x128x128xf32> to vector<2x128x128xbf16>
    %c0_34 = arith.constant 0 : index
    %c0_35 = arith.constant 0 : index
    %c0_36 = arith.constant 0 : index
    %111 = vector.load %arg5[%c0_34, %c0_35, %c0_36] : memref<2x128x128xbf16, #tpu.memory_space<vmem>>, vector<2x128x128xbf16>
    tpu.vector_store %arg5[%c0_34, %c0_35, %c0_36], %110 {strides = array<i32>} : memref<2x128x128xbf16, #tpu.memory_space<vmem>>, vector<2x128x128xbf16>,
    return
  }
  func.func @transform_0(%arg0: i32) -> (i32, i32, i32) {
    %c0_i32 = arith.constant 0 : i32
    %c0_i32_0 = arith.constant 0 : i32
    %c0_i32_1 = arith.constant 0 : i32
    return %arg0, %c0_i32, %c0_i32_0 : i32, i32, i32
  }
  func.func @transform_1(%arg0: i32) -> (i32, i32, i32) {
    %c0_i32 = arith.constant 0 : i32
    %c0_i32_0 = arith.constant 0 : i32
    %c0_i32_1 = arith.constant 0 : i32
    %c0_i32_2 = arith.constant 0 : i32
    return %c0_i32, %c0_i32_0, %c0_i32_1 : i32, i32, i32
  }
  func.func @transform_2(%arg0: i32) -> (i32, i32) {
    %c0_i32 = arith.constant 0 : i32
    %c0_i32_0 = arith.constant 0 : i32
    %c0_i32_1 = arith.constant 0 : i32
    return %c0_i32, %c0_i32_0 : i32, i32
  }
  func.func @transform_3(%arg0: i32) -> (i32, i32) {
    %c0_i32 = arith.constant 0 : i32
    %c0_i32_0 = arith.constant 0 : i32
    %c0_i32_1 = arith.constant 0 : i32
    return %c0_i32, %c0_i32_0 : i32, i32
  }
  func.func @transform_4(%arg0: i32) -> (i32, i32, i32) {
    %c0_i32 = arith.constant 0 : i32
    %c0_i32_0 = arith.constant 0 : i32
    %c0_i32_1 = arith.constant 0 : i32
    return %arg0, %c0_i32, %c0_i32_0 : i32, i32, i32
  }
}

</mosaic_0001>

<bundles_post_ra>
// kernel: tpu_custom_call.1
= control target key start
LH: loop header
LB: loop body
LE: loop exit
PB: predicated region body
PF: predicated region fallthrough
CT: control target
= control target key end

     0   :  { %9 = vsyncpa [#allocation3], 0  ;;  %s5339_s0 = inlined_call_operand.hbm [shape: bf16[8,128,128], index: 0, kind: input, shape index: {}]   ;;  %s5340_s1 = inlined_call_operand.hbm [shape: bf16[4,128,128], index: 1, kind: input, shape index: {}]   ;;  %s5341_s2 = inlined_call_operand.vmem [shape: f32[6,128], index: 2, kind: input, shape index: {}]   ;;  %s5342_s3 = inlined_call_operand.vmem [shape: f32[128,2], index: 3, kind: input, shape index: {}]   ;;  %s5343_s4 = inlined_call_operand.hbm [shape: bf16[8,128,128], index: 4, kind: output, shape index: {}]  }
   0x1   :  { %11 = vsyncpa [#allocation3 + $0x1], 0 }
   0x2   :  { %12 = vsyncpa [#allocation6], 0 }
   0x3   :  { %13 = vsyncpa [#allocation4], 0 }
   0x4   :  { %15 = vsyncpa [#allocation4 + $0x1], 0  ;;  %s3785_s15 = smov 0   ;;  %s3787_s16 = smov 0  }
   0x5   :  { %s3789_s17 = smov 0   ;;  %s3791_s18 = smov 0  }
   0x6 LB: > { %s3806_s19 = sadd.s32 4294967295, %s3749_s18   ;;  %s2830_s20 = sadd.s32 4294967294, %s3749_s18   ;;  %s3749_s18 = sphi %s3791_s18, %s5525_s18   ;;  %s3745_s17 = sphi %s3789_s17, %s5524_s17   ;;  %s3741_s16 = sphi %s3787_s16, %s5523_s16   ;;  %s3737_s15 = sphi %s3785_s15, %s5522_s15  }
   0x7   : > { %p41_p0 = scmp.ne.s32.totalorder %s3741_s16, %s3737_s15  ;;  %p5344_p1 = scmp.eq.s32.totalorder %s3806_s19, 0 }
   0x8   : > { %p134_p3 = scmp.eq.s32.totalorder %s2830_s20, 3  ;;  %p2831_p5 = scmp.ge.s32.totalorder %s3749_s18, 1 }
   0x9   : > { %p3815_p4 = por %p5344_p1, %p41_p0  ;;  %p141_p7 = scmp.lt.s32.totalorder %s3749_s18, 5 }
   0xa   : > { %p3820_p6 = por %p134_p3, %p41_p0  ;;  %s3751_s24 = smov [#allocation5]  }
   0xb   : > { %s5402_s21 = scalar_select %p3815_p4, 1, 0 }
   0xc   : > { %s5403_s22 = scalar_select %p3820_p6, 1, 0 }
   0xd   : > { %p3825_p8 = pnand %p2831_p5, %p141_p7  ;;  %s153_s25 = sshll.u32 %s3751_s24, 4  ;;  %s154_s25 = int_to_ptr.vmem [resolvable:$true] %s153_s25 }
   0xe   : > { %s3838_s27 = sadd.s32 1, %s3749_s18   ;;  %s28_s28 = sadd.s32 1, %s3745_s17 }
   0xf   : > { %s5404_s23 = scalar_select %p3825_p8, 1, 0 }
  0x10   : > { %p3274_p9 = pneg %p3825_p8  ;;  %s25_s29 = ssub.s32 %s3749_s18, %s3838_s27 }
  0x11   : > { %s3638_s30 = scalar_lea.vmem %s154_s25, 4096  ;;  %p3646_p3 = scmp.lt.s32.totalorder %s154_s25, %s154_s25 }
  0x12   : > { %p3833_p10 = pnand %p3274_p9, %p5344_p1  ;;  %p3639_p12 = scmp.ne.s32.totalorder %s154_s25, %s3638_s30 }
  0x13   : > { %p3647_p5 = scmp.lt.s32.totalorder %s3638_s30, %s3638_s30 }
  0x14   : > { %p3629_p11 = pneg %p3833_p10 }
  0x15   : > { %p3648_p7 = por %p3647_p5, %p3646_p3 }
  0x16   : > { %p3641_p13 = pnand %p3639_p12, %p3629_p11 }
  0x18   : > { %p3642_p0 = pneg %p3641_p13 }
  0x1a   : > { %p3649_p2 = pnand %p3648_p7, %p3642_p0 }
  0x1c   : > { %3652 = shalt.err (!%p3649_p2)
}
  0x1d   : > { %s3752_s5 = smov 64   ;;  %s3753_s6 = smov 4  }
  0x1e   : > { %3277 = dma.hbm_to_vmem [thread:$0]  (!%p3833_p10), %s5340_s1, 4096, %s154_s25, [#allocation6], %s3752_s5, %s3752_s5, %s3753_s6  }
  0x1f   : > { %p26_p2 = scmp.eq.s32.totalorder %s25_s29, 0  ;;  %p35_p9 = scmp.ne.s32.totalorder %s3745_s17, %s3741_s16 }
  0x20   : > { %p36_p11 = scmp.eq.s32.totalorder %s3749_s18, 0  ;;  %p3287_p12 = scmp.lt.s32.totalorder %s3749_s18, 4 }
  0x21   : > { %s3858_s9 = scalar_select %p26_p2, %s3745_s17, %s28_s28  }
  0x22   : > { %p37_p13 = por %p36_p11, %p35_p9  ;;  %p5406_p0 = scmp.eq.s32.totalorder %s3806_s19, 3 }
  0x23   : > { %s173_s11 = sand.u32 1, %s3745_s17   ;;  %s2913_s12 = sshll.u32 %s3749_s18, 11 }
  0x24   : > { %p3862_p3 = por %p5406_p0, %p35_p9  ;;  %s2834_s13 = sshll.u32 %s173_s11, 7 }
  0x25   : > { %s3871_s24 = scalar_lea.hbm %s5339_s0, %s2913_s12  ;;  %s177_s25 = scalar_lea.vmem [#allocation2], %s2834_s13 }
  0x26   : > { %s5407_s10 = scalar_select %p3862_p3, 1, 0 }
  0x27   : > { %s185_s26 = sshll.u32 %s177_s25, 4  ;;  %p3873_p10 = pnand %p3287_p12, %p37_p13  ;;  %s3877_s26 = int_to_ptr.vmem [resolvable:$true] %s185_s26 }
  0x28   : > { %s3879_s29 = scalar_lea.sflag [#allocation3], %s173_s11  ;;  %s3653_s30 = scalar_lea.hbm %s3871_s24, 2048 }
  0x29   : > { %p3654_p5 = scmp.ne.s32.totalorder %s3871_s24, %s3653_s30  ;;  %p3655_p7 = pneg %p3873_p10 }
  0x2a   : > { %s3658_s12 = scalar_lea.hbm %s5339_s0, 8192  ;;  %p3659_p11 = scmp.lt.s32.totalorder %s3871_s24, %s5339_s0 }
  0x2b   : > { %p3656_p2 = pnand %p3655_p7, %p3654_p5  ;;  %p3660_p12 = scmp.lt.s32.totalorder %s3658_s12, %s3653_s30 }
  0x2d   : > { %p3657_p9 = pneg %p3656_p2  ;;  %p3661_p13 = por %p3660_p12, %p3659_p11 }
  0x2f   : > { %p3662_p0 = pnand %p3661_p13, %p3657_p9 }
  0x31   : > { %3665 = shalt.err (!%p3662_p0)
}
  0x32   : > { %s3666_s11 = scalar_lea.vmem %s3877_s26, 2048  ;;  %s3754_s20 = smov [#allocation2]  }
  0x33   : > { %p3667_p1 = scmp.ne.s32.totalorder %s3877_s26, %s3666_s11  ;;  %s3671_s25 = sshll.u32 %s3754_s20, 4  ;;  %s3672_s25 = int_to_ptr.vmem [resolvable:$false] %s3671_s25 }
  0x34   : > { %s3673_s7 = scalar_lea.vmem %s3672_s25, 4096  ;;  %p3674_p2 = scmp.lt.s32.totalorder %s3877_s26, %s3672_s25 }
  0x35   : > { %p3669_p6 = pnand %p3667_p1, %p3655_p7  ;;  %p3675_p3 = scmp.lt.s32.totalorder %s3673_s7, %s3666_s11 }
  0x37   : > { %p3670_p5 = pneg %p3669_p6  ;;  %p3676_p4 = por %p3675_p3, %p3674_p2 }
  0x39   : > { %p3677_p8 = pnand %p3676_p4, %p3670_p5 }
  0x3b   : > { %3680 = shalt.err (!%p3677_p8)
}
  0x3c   : > { %3281 = dma.hbm_to_vmem [thread:$0]  (!%p3873_p10), %s3871_s24, 2048, %s3877_s26, %s3879_s29, %s3752_s5, %s3752_s5, %s3753_s6  }
  0x3d   : > { %p5409_p1 = scmp.ne.s32.totalorder %s5404_s23, 0 }
  0x3f   : > { %197 = sbr.rel (%p5409_p1) target bundleno = 1805 (0x70d), region = 36 }
  0x44   : > { %s3906_s30 = sand.u32 1, %s3741_s16   ;;  %p5410_p4 = scmp.ne.s32.totalorder %s5402_s21, 0 }
  0x45   : > { %s2839_s8 = sshll.u32 %s3906_s30, 7  ;;  %s200_s12 = scalar_lea.sflag [#allocation3], %s3906_s30 }
  0x46   : > { %s3912_s28 = scalar_lea.vmem [#allocation2], %s2839_s8 }
  0x47   : > { %3724 = dma.done.wait (%p5410_p4), %s200_s12, 2048  }
  0x48   : > { %3726 = vsyncadd (%p5410_p4), %s200_s12, 4294965248  ;;  %p5411_p6 = scmp.eq.s32.totalorder %s3806_s19, 0 }
  0x4a   : > { %3728 = dma.done.wait (%p5411_p6), [#allocation6], 4096   ;;  %p5412_p8 = pmov %p5411_p6 }
  0x4b   : > { %v3106_v0 = vld [vmem:[%s3912_s28 + $0x78] sm:$0xff]   ;;  %v3105_v6 = vld [vmem:[%s3912_s28 + $0x70] sm:$0xff]   ;;  %v3104_v10 = vld [vmem:[%s3912_s28 + $0x68] sm:$0xff]   ;;  %s5216_s23 = scalar_lea.vmem [#allocation7], %s2839_s8  ;;  %s2947_s8 = sshll.u32 %s3806_s19, 11 }
  0x4c   : > { %3730 = vsyncadd (%p5412_p8), [#allocation6], 4294963200  ;;  %v3098_v1 = vld [vmem:[%s3912_s28 + $0x38] sm:$0xff]   ;;  %v3924_v2 = vunpack.c.l.bf16 %v3106_v0  ;;  %v3929_v4 = vunpack.c.h.bf16 %v3106_v0  ;;  %v3097_v7 = vld [vmem:[%s3912_s28 + $0x30] sm:$0xff]   ;;  %v3937_v8 = vunpack.c.l.bf16 %v3105_v6  ;;  %v3940_v9 = vunpack.c.h.bf16 %v3105_v6  ;;  %s2747_s5 = sshll.u32 %s5216_s23, 4  ;;  %s5293_s26 = scalar_lea.hbm %s5343_s4, %s2947_s8  ;;  %s5295_s5 = int_to_ptr.vmem [resolvable:$true] %s2747_s5 }
  0x4d   : > { %v3926_v3 = vunpack.c.l.bf16 %v3098_v1  ;;  %v3932_v5 = vunpack.c.h.bf16 %v3098_v1  ;;  %v3945_v11 = vunpack.c.l.bf16 %v3097_v7  ;;  %v3947_v12 = vunpack.c.h.bf16 %v3097_v7  ;;  %v3096_v13 = vld [vmem:[%s3912_s28 + $0x28] sm:$0xff]   ;;  %v3103_v16 = vld [vmem:[%s3912_s28 + $0x60] sm:$0xff]   ;;  %v3102_v24 = vld [vmem:[%s3912_s28 + $0x58] sm:$0xff]   ;;  %s2733_s19 = scalar_lea.sflag [#allocation4], %s3906_s30  ;;  %s3681_s29 = scalar_lea.vmem %s5295_s5, 2048 }
  0x4e   : > { %5413 = vst [vmem:[#allocation11_spill] sm:$0xff] %v3924_v2  ;;  %443 = vadd.xlane.f32.xlu0 %v3924_v2  ;;  %5415 = vst [vmem:[#allocation13_spill] sm:$0xff] %v3929_v4  ;;  %v3952_v14 = vunpack.c.l.bf16 %v3104_v10  ;;  %v3954_v15 = vunpack.c.h.bf16 %v3104_v10  ;;  %v3959_v17 = vunpack.c.l.bf16 %v3096_v13  ;;  %v3961_v18 = vunpack.c.h.bf16 %v3096_v13  ;;  %v3095_v19 = vld [vmem:[%s3912_s28 + $0x20] sm:$0xff]   ;;  %v3094_v27 = vld [vmem:[%s3912_s28 + $0x18] sm:$0xff]   ;;  %p3682_p3 = scmp.ne.s32.totalorder %s5295_s5, %s3681_s29  ;;  %p5520_p10 = scmp.ne.s32.totalorder %s5407_s10, 0 }
  0x4f   : > { %5414 = vst [vmem:[#allocation12_spill] sm:$0xff] %v3926_v3  ;;  %411 = vadd.xlane.f32.xlu1 %v3926_v3  ;;  %5416 = vst [vmem:[#allocation14_spill] sm:$0xff] %v3932_v5  ;;  %v3966_v20 = vunpack.c.l.bf16 %v3103_v16  ;;  %v3968_v21 = vunpack.c.h.bf16 %v3103_v16  ;;  %v3972_v22 = vunpack.c.l.bf16 %v3095_v19  ;;  %v3974_v23 = vunpack.c.h.bf16 %v3095_v19  ;;  %v3101_v30 = vld [vmem:[%s3912_s28 + $0x50] sm:$0xff]   ;;  %v3100_v36 = vld [vmem:[%s3912_s28 + $0x48] sm:$0xff]   ;;  %s3757_s13 = smov [#allocation7]  }
  0x50   : > { %5417 = vst [vmem:[#allocation15_spill] sm:$0xff] %v3937_v8  ;;  %5418 = vst [vmem:[#allocation16_spill] sm:$0xff] %v3940_v9  ;;  %v3979_v25 = vunpack.c.l.bf16 %v3102_v24  ;;  %v3981_v26 = vunpack.c.h.bf16 %v3102_v24  ;;  %v3986_v28 = vunpack.c.l.bf16 %v3094_v27  ;;  %v3988_v29 = vunpack.c.h.bf16 %v3094_v27  ;;  %v3093_v33 = vld [vmem:[%s3912_s28 + $0x10] sm:$0xff]   ;;  %v3092_v39 = vld [vmem:[%s3912_s28 + $0x8] sm:$0xff]   ;;  %p3683_p7 = pnand %p3682_p3, %p5520_p10  ;;  %s3685_s14 = sshll.u32 %s3757_s13, 4  ;;  %s3686_s14 = int_to_ptr.vmem [resolvable:$false] %s3685_s14 }
  0x51   : > { %5419 = vst [vmem:[#allocation17_spill] sm:$0xff] %v3945_v11  ;;  %5420 = vst [vmem:[#allocation18_spill] sm:$0xff] %v3947_v12  ;;  %v3993_v31 = vunpack.c.l.bf16 %v3101_v30  ;;  %v3995_v32 = vunpack.c.h.bf16 %v3101_v30  ;;  %v4000_v34 = vunpack.c.l.bf16 %v3093_v33  ;;  %v4002_v35 = vunpack.c.h.bf16 %v3093_v33  ;;  %v3099_v42 = vld [vmem:[%s3912_s28 + $0x40] sm:$0xff]   ;;  %s3687_s11 = scalar_lea.vmem %s3686_s14, 4096  ;;  %p3688_p11 = scmp.lt.s32.totalorder %s5295_s5, %s3686_s14 }
  0x52   : > { %445 = vadd.xlane.f32.xlu0 %v3929_v4  ;;  %5421 = vst [vmem:[#allocation19_spill] sm:$0xff] %v3952_v14  ;;  %5422 = vst [vmem:[#allocation20_spill] sm:$0xff] %v3954_v15  ;;  %v4007_v37 = vunpack.c.l.bf16 %v3100_v36  ;;  %v4009_v38 = vunpack.c.h.bf16 %v3100_v36  ;;  %v4014_v40 = vunpack.c.l.bf16 %v3092_v39  ;;  %v4016_v41 = vunpack.c.h.bf16 %v3092_v39  ;;  %v2949_v45 = vld [vmem:[%s3912_s28] sm:$0xff]   ;;  %p3684_p9 = pneg %p3683_p7  ;;  %p3689_p12 = scmp.lt.s32.totalorder %s3687_s11, %s3681_s29 }
  0x53   : > { %413 = vadd.xlane.f32.xlu1 %v3932_v5  ;;  %5423 = vst [vmem:[#allocation21_spill] sm:$0xff] %v3959_v17  ;;  %5424 = vst [vmem:[#allocation22_spill] sm:$0xff] %v3961_v18  ;;  %v4021_v43 = vunpack.c.l.bf16 %v3099_v42  ;;  %v4023_v44 = vunpack.c.h.bf16 %v3099_v42  ;;  %v4028_v46 = vunpack.c.l.bf16 %v2949_v45  ;;  %v4030_v47 = vunpack.c.h.bf16 %v2949_v45 }
  0x54   : > { %5425 = vst [vmem:[#allocation23_spill] sm:$0xff] %v3966_v20  ;;  %5426 = vst [vmem:[#allocation24_spill] sm:$0xff] %v3968_v21  ;;  %p3690_p13 = por %p3689_p12, %p3688_p11 }
  0x55   : > { %5427 = vst [vmem:[#allocation25_spill] sm:$0xff] %v3972_v22  ;;  %5428 = vst [vmem:[#allocation26_spill] sm:$0xff] %v3974_v23 }
  0x56   : > { %439 = vadd.xlane.f32.xlu0 %v3937_v8  ;;  %5429 = vst [vmem:[#allocation27_spill] sm:$0xff] %v3979_v25  ;;  %5430 = vst [vmem:[#allocation28_spill] sm:$0xff] %v3981_v26  ;;  %p3691_p0 = pnand %p3690_p13, %p3684_p9 }
  0x57   : > { %441 = vadd.xlane.f32.xlu1 %v3940_v9  ;;  %5431 = vst [vmem:[#allocation29_spill] sm:$0xff] %v3986_v28  ;;  %5432 = vst [vmem:[#allocation30_spill] sm:$0xff] %v3988_v29 }
  0x58   : > { %5433 = vst [vmem:[#allocation31_spill] sm:$0xff] %v3993_v31  ;;  %5434 = vst [vmem:[#allocation32_spill] sm:$0xff] %v3995_v32 }
  0x59   : > { %5435 = vst [vmem:[#allocation33_spill] sm:$0xff] %v4000_v34  ;;  %5436 = vst [vmem:[#allocation34_spill] sm:$0xff] %v4002_v35 }
  0x5a   : > { %407 = vadd.xlane.f32.xlu0 %v3945_v11  ;;  %5437 = vst [vmem:[#allocation35_spill] sm:$0xff] %v4007_v37  ;;  %5438 = vst [vmem:[#allocation36_spill] sm:$0xff] %v4009_v38 }
  0x5b   : > { %409 = vadd.xlane.f32.xlu1 %v3947_v12  ;;  %5439 = vst [vmem:[#allocation37_spill] sm:$0xff] %v4014_v40  ;;  %5440 = vst [vmem:[#allocation38_spill] sm:$0xff] %v4016_v41 }
  0x5c   : > { %5441 = vst [vmem:[#allocation39_spill] sm:$0xff] %v4021_v43  ;;  %5442 = vst [vmem:[#allocation40_spill] sm:$0xff] %v4023_v44 }
  0x5d   : > { %5443 = vst [vmem:[#allocation41_spill] sm:$0xff] %v4030_v47 }
  0x5e   : > { %435 = vadd.xlane.f32.xlu0 %v3952_v14 }
  0x5f   : > { %437 = vadd.xlane.f32.xlu1 %v3954_v15 }
  0x62   : > { %403 = vadd.xlane.f32.xlu0 %v3959_v17 }
  0x63   : > { %405 = vadd.xlane.f32.xlu1 %v3961_v18 }
  0x66   : > { %431 = vadd.xlane.f32.xlu0 %v3966_v20 }
  0x67   : > { %433 = vadd.xlane.f32.xlu1 %v3968_v21 }
  0x6a   : > { %399 = vadd.xlane.f32.xlu0 %v3972_v22 }
  0x6b   : > { %401 = vadd.xlane.f32.xlu1 %v3974_v23 }
  0x6e   : > { %427 = vadd.xlane.f32.xlu0 %v3979_v25 }
  0x6f   : > { %429 = vadd.xlane.f32.xlu1 %v3981_v26 }
  0x72   : > { %395 = vadd.xlane.f32.xlu0 %v3986_v28 }
  0x73   : > { %397 = vadd.xlane.f32.xlu1 %v3988_v29 }
  0x76   : > { %423 = vadd.xlane.f32.xlu0 %v3993_v31 }
  0x77   : > { %425 = vadd.xlane.f32.xlu1 %v3995_v32 }
  0x7a   : > { %391 = vadd.xlane.f32.xlu0 %v4000_v34 }
  0x7b   : > { %393 = vadd.xlane.f32.xlu1 %v4002_v35 }
  0x7e   : > { %419 = vadd.xlane.f32.xlu0 %v4007_v37 }
  0x7f   : > { %421 = vadd.xlane.f32.xlu1 %v4009_v38 }
  0x82   : > { %387 = vadd.xlane.f32.xlu0 %v4014_v40 }
  0x83   : > { %389 = vadd.xlane.f32.xlu1 %v4016_v41 }
  0x86   : > { %415 = vadd.xlane.f32.xlu0 %v4021_v43 }
  0x87   : > { %417 = vadd.xlane.f32.xlu1 %v4023_v44 }
  0x8a   : > { %383 = vadd.xlane.f32.xlu0 %v4028_v46 }
  0x8b   : > { %385 = vadd.xlane.f32.xlu1 %v4030_v47 }
  0xd7   : > { %v444_v48 = vpop.xlane.xlu0 %443 }
  0xd8   : > { %v412_v49 = vpop.xlane.xlu1 %411  ;;  %v478_v50 = vmul.f32 0.0078125, %v444_v48 }
  0xd9   : > { %v462_v51 = vmul.f32 0.0078125, %v412_v49 }
  0xda   : > { %v4035_v52 = vsub.f32 %v3924_v2, %v478_v50 }
  0xdb   : > { %v4038_v53 = vsub.f32 %v3926_v3, %v462_v51  ;;  %v446_v54 = vpop.xlane.xlu0 %445 }
  0xdc   : > { %v414_v55 = vpop.xlane.xlu1 %413  ;;  %v479_v56 = vmul.f32 0.0078125, %v446_v54  ;;  %v542_v57 = vmul.f32 %v4035_v52, %v4035_v52 }
  0xdd   : > { %v463_v58 = vmul.f32 0.0078125, %v414_v55  ;;  %v526_v60 = vmul.f32 %v4038_v53, %v4038_v53 }
  0xde   : > { %604 = vadd.xlane.f32.xlu0 %v542_v57  ;;  %v4043_v59 = vsub.f32 %v3929_v4, %v479_v56 }
  0xdf   : > { %v4048_v61 = vsub.f32 %v3932_v5, %v463_v58  ;;  %v440_v62 = vpop.xlane.xlu0 %439 }
  0xe0   : > { %v442_v63 = vpop.xlane.xlu1 %441  ;;  %v476_v0 = vmul.f32 0.0078125, %v440_v62  ;;  %v543_v1 = vmul.f32 %v4043_v59, %v4043_v59 }
  0xe1   : > { %v477_v6 = vmul.f32 0.0078125, %v442_v63  ;;  %v527_v7 = vmul.f32 %v4048_v61, %v4048_v61 }
  0xe2   : > { %606 = vadd.xlane.f32.xlu1 %v543_v1  ;;  %572 = vadd.xlane.f32.xlu0 %v526_v60  ;;  %v4055_v10 = vsub.f32 %v3937_v8, %v476_v0 }
  0xe3   : > { %v4058_v13 = vsub.f32 %v3940_v9, %v477_v6  ;;  %v408_v16 = vpop.xlane.xlu0 %407 }
  0xe4   : > { %v410_v19 = vpop.xlane.xlu1 %409  ;;  %v460_v24 = vmul.f32 0.0078125, %v408_v16  ;;  %v540_v27 = vmul.f32 %v4055_v10, %v4055_v10 }
  0xe5   : > { %v461_v30 = vmul.f32 0.0078125, %v410_v19  ;;  %v541_v33 = vmul.f32 %v4058_v13, %v4058_v13 }
  0xe6   : > { %574 = vadd.xlane.f32.xlu1 %v527_v7  ;;  %600 = vadd.xlane.f32.xlu0 %v540_v27  ;;  %v4065_v36 = vsub.f32 %v3945_v11, %v460_v24 }
  0xe7   : > { %v4068_v39 = vsub.f32 %v3947_v12, %v461_v30  ;;  %v436_v42 = vpop.xlane.xlu0 %435 }
  0xe8   : > { %v438_v45 = vpop.xlane.xlu1 %437  ;;  %v474_v48 = vmul.f32 0.0078125, %v436_v42  ;;  %v524_v49 = vmul.f32 %v4065_v36, %v4065_v36 }
  0xe9   : > { %v475_v50 = vmul.f32 0.0078125, %v438_v45  ;;  %v525_v51 = vmul.f32 %v4068_v39, %v4068_v39 }
  0xea   : > { %602 = vadd.xlane.f32.xlu1 %v541_v33  ;;  %568 = vadd.xlane.f32.xlu0 %v524_v49  ;;  %v4075_v54 = vsub.f32 %v3952_v14, %v474_v48 }
  0xeb   : > { %v4078_v55 = vsub.f32 %v3954_v15, %v475_v50  ;;  %v404_v56 = vpop.xlane.xlu0 %403 }
  0xec   : > { %v406_v57 = vpop.xlane.xlu1 %405  ;;  %v458_v58 = vmul.f32 0.0078125, %v404_v56  ;;  %v538_v60 = vmul.f32 %v4075_v54, %v4075_v54 }
  0xed   : > { %v459_v62 = vmul.f32 0.0078125, %v406_v57  ;;  %v539_v63 = vmul.f32 %v4078_v55, %v4078_v55 }
  0xee   : > { %570 = vadd.xlane.f32.xlu1 %v525_v51  ;;  %596 = vadd.xlane.f32.xlu0 %v538_v60  ;;  %v4085_v0 = vsub.f32 %v3959_v17, %v458_v58 }
  0xef   : > { %v4088_v1 = vsub.f32 %v3961_v18, %v459_v62  ;;  %v432_v6 = vpop.xlane.xlu0 %431 }
  0xf0   : > { %v434_v7 = vpop.xlane.xlu1 %433  ;;  %v472_v16 = vmul.f32 0.0078125, %v432_v6  ;;  %v522_v19 = vmul.f32 %v4085_v0, %v4085_v0 }
  0xf1   : > { %v473_v24 = vmul.f32 0.0078125, %v434_v7  ;;  %v523_v27 = vmul.f32 %v4088_v1, %v4088_v1 }
  0xf2   : > { %598 = vadd.xlane.f32.xlu1 %v539_v63  ;;  %564 = vadd.xlane.f32.xlu0 %v522_v19  ;;  %v4095_v30 = vsub.f32 %v3966_v20, %v472_v16 }
  0xf3   : > { %v4098_v33 = vsub.f32 %v3968_v21, %v473_v24  ;;  %v400_v42 = vpop.xlane.xlu0 %399 }
  0xf4   : > { %v402_v45 = vpop.xlane.xlu1 %401  ;;  %v456_v48 = vmul.f32 0.0078125, %v400_v42  ;;  %v536_v49 = vmul.f32 %v4095_v30, %v4095_v30 }
  0xf5   : > { %v457_v50 = vmul.f32 0.0078125, %v402_v45  ;;  %v537_v51 = vmul.f32 %v4098_v33, %v4098_v33 }
  0xf6   : > { %566 = vadd.xlane.f32.xlu1 %v523_v27  ;;  %592 = vadd.xlane.f32.xlu0 %v536_v49  ;;  %v4105_v56 = vsub.f32 %v3972_v22, %v456_v48 }
  0xf7   : > { %v4108_v57 = vsub.f32 %v3974_v23, %v457_v50  ;;  %v428_v58 = vpop.xlane.xlu0 %427 }
  0xf8   : > { %v430_v60 = vpop.xlane.xlu1 %429  ;;  %v470_v62 = vmul.f32 0.0078125, %v428_v58  ;;  %v520_v63 = vmul.f32 %v4105_v56, %v4105_v56 }
  0xf9   : > { %v471_v6 = vmul.f32 0.0078125, %v430_v60  ;;  %v521_v7 = vmul.f32 %v4108_v57, %v4108_v57 }
  0xfa   : > { %594 = vadd.xlane.f32.xlu1 %v537_v51  ;;  %560 = vadd.xlane.f32.xlu0 %v520_v63  ;;  %v4115_v16 = vsub.f32 %v3979_v25, %v470_v62 }
  0xfb   : > { %v4118_v19 = vsub.f32 %v3981_v26, %v471_v6  ;;  %v396_v24 = vpop.xlane.xlu0 %395 }
  0xfc   : > { %v398_v27 = vpop.xlane.xlu1 %397  ;;  %v454_v42 = vmul.f32 0.0078125, %v396_v24  ;;  %v534_v45 = vmul.f32 %v4115_v16, %v4115_v16 }
  0xfd   : > { %v455_v48 = vmul.f32 0.0078125, %v398_v27  ;;  %v535_v49 = vmul.f32 %v4118_v19, %v4118_v19 }
  0xfe   : > { %562 = vadd.xlane.f32.xlu1 %v521_v7  ;;  %588 = vadd.xlane.f32.xlu0 %v534_v45  ;;  %v4125_v50 = vsub.f32 %v3986_v28, %v454_v42 }
  0xff   : > { %v4128_v51 = vsub.f32 %v3988_v29, %v455_v48  ;;  %v424_v58 = vpop.xlane.xlu0 %423 }
 0x100   : > { %v426_v60 = vpop.xlane.xlu1 %425  ;;  %v468_v62 = vmul.f32 0.0078125, %v424_v58  ;;  %v518_v63 = vmul.f32 %v4125_v50, %v4125_v50 }
 0x101   : > { %v469_v6 = vmul.f32 0.0078125, %v426_v60  ;;  %v519_v7 = vmul.f32 %v4128_v51, %v4128_v51 }
 0x102   : > { %590 = vadd.xlane.f32.xlu1 %v535_v49  ;;  %556 = vadd.xlane.f32.xlu0 %v518_v63  ;;  %v4135_v24 = vsub.f32 %v3993_v31, %v468_v62 }
 0x103   : > { %v4138_v27 = vsub.f32 %v3995_v32, %v469_v6  ;;  %v392_v42 = vpop.xlane.xlu0 %391  ;;  %v736_v32 = vlaneseq }
 0x104   : > { %v394_v45 = vpop.xlane.xlu1 %393  ;;  %v452_v48 = vmul.f32 0.0078125, %v392_v42  ;;  %v532_v58 = vmul.f32 %v4135_v24, %v4135_v24 }
 0x105   : > { %v453_v4 = vmul.f32 0.0078125, %v394_v45  ;;  %v533_v49 = vmul.f32 %v4138_v27, %v4138_v27 }
 0x106   : > { %558 = vadd.xlane.f32.xlu1 %v519_v7  ;;  %584 = vadd.xlane.f32.xlu0 %v532_v58  ;;  %v4145_v60 = vsub.f32 %v4000_v34, %v452_v48 }
 0x107   : > { %v4148_v62 = vsub.f32 %v4002_v35, %v453_v4  ;;  %v420_v63 = vpop.xlane.xlu0 %419 }
 0x108   : > { %v422_v6 = vpop.xlane.xlu1 %421  ;;  %v466_v2 = vmul.f32 0.0078125, %v420_v63  ;;  %v516_v42 = vmul.f32 %v4145_v60, %v4145_v60 }
 0x109   : > { %v467_v9 = vmul.f32 0.0078125, %v422_v6  ;;  %v517_v7 = vmul.f32 %v4148_v62, %v4148_v62 }
 0x10a   : > { %586 = vadd.xlane.f32.xlu1 %v533_v49  ;;  %552 = vadd.xlane.f32.xlu0 %v516_v42  ;;  %v4155_v45 = vsub.f32 %v4007_v37, %v466_v2 }
 0x10b   : > { %v4158_v48 = vsub.f32 %v4009_v38, %v467_v9  ;;  %v388_v4 = vpop.xlane.xlu0 %387 }
 0x10c   : > { %v390_v58 = vpop.xlane.xlu1 %389  ;;  %v450_v8 = vmul.f32 0.0078125, %v388_v4  ;;  %v530_v63 = vmul.f32 %v4155_v45, %v4155_v45 }
 0x10d   : > { %v451_v15 = vmul.f32 0.0078125, %v390_v58  ;;  %v531_v49 = vmul.f32 %v4158_v48, %v4158_v48 }
 0x10e   : > { %554 = vadd.xlane.f32.xlu1 %v517_v7  ;;  %580 = vadd.xlane.f32.xlu0 %v530_v63  ;;  %v4165_v6 = vsub.f32 %v4014_v40, %v450_v8 }
 0x10f   : > { %v4168_v2 = vsub.f32 %v4016_v41, %v451_v15  ;;  %v416_v9 = vpop.xlane.xlu0 %415 }
 0x110   : > { %v418_v42 = vpop.xlane.xlu1 %417  ;;  %v464_v14 = vmul.f32 0.0078125, %v416_v9  ;;  %v514_v4 = vmul.f32 %v4165_v6, %v4165_v6 }
 0x111   : > { %v465_v21 = vmul.f32 0.0078125, %v418_v42  ;;  %v515_v7 = vmul.f32 %v4168_v2, %v4168_v2 }
 0x112   : > { %582 = vadd.xlane.f32.xlu1 %v531_v49  ;;  %548 = vadd.xlane.f32.xlu0 %v514_v4  ;;  %v4175_v58 = vsub.f32 %v4021_v43, %v464_v14 }
 0x113   : > { %v4178_v8 = vsub.f32 %v4023_v44, %v465_v21  ;;  %v384_v15 = vpop.xlane.xlu0 %383 }
 0x114   : > { %v386_v63 = vpop.xlane.xlu1 %385  ;;  %v448_v20 = vmul.f32 0.0078125, %v384_v15  ;;  %v528_v9 = vmul.f32 %v4175_v58, %v4175_v58 }
 0x115   : > { %v449_v26 = vmul.f32 0.0078125, %v386_v63  ;;  %v529_v49 = vmul.f32 %v4178_v8, %v4178_v8  ;;  %v313_v63 = vld [vmem:[%s5342_s3 + $0x68] sm:$0xff] }
 0x116   : > { %550 = vadd.xlane.f32.xlu1 %v515_v7  ;;  %576 = vadd.xlane.f32.xlu0 %v528_v9  ;;  %v4185_v42 = vsub.f32 %v4028_v46, %v448_v20  ;;  %v5357_v7 = vmov 0   ;;  %v315_v20 = vld [vmem:[%s5342_s3 + $0x78] sm:$0xff] }
 0x117   : > { %v4188_v14 = vsub.f32 %v4030_v47, %v449_v26  ;;  %984 = vmatprep.mubr.bf16.mxu0 %v5357_v7  ;;  %3330 = vset.pattern.permute.xlu1 %v5357_v7  ;;  %v312_v26 = vld [vmem:[%s5342_s3 + $0x60] sm:$0xff] }
 0x118   : > { %v512_v21 = vmul.f32 %v4185_v42, %v4185_v42  ;;  %3329 = vset.pattern.permute.xlu0 %v5357_v7  ;;  %1385 = vmatprep.mubr.bf16.mxu1 %v5357_v7 }
 0x119   : > { %v513_v4 = vmul.f32 %v4188_v14, %v4188_v14 }
 0x11a   : > { %578 = vadd.xlane.f32.xlu1 %v529_v49  ;;  %544 = vadd.xlane.f32.xlu0 %v512_v21 }
 0x11e   : > { %546 = vadd.xlane.f32.xlu1 %v513_v4 }
 0x12f   : > { %901 = vperm.xlu1 %3330, %v315_v20   ;;  %v4210_v20 = vld [vmem:[%s5342_s3 + $0x50] sm:$0xff] }
 0x133   : > { %886 = vperm.xlu1 %3330, %v312_v26  }
 0x137   : > { %891 = vperm.xlu1 %3330, %v313_v63  }
 0x13b   : > { %876 = vperm.xlu1 %3330, %v4210_v20  }
 0x167   : > { %v605_v15 = vpop.xlane.xlu0 %604 }
 0x168   : > { %v638_v9 = vmul.f32 0.0078125, %v605_v15  ;;  %v311_v15 = vld [vmem:[%s5342_s3 + $0x58] sm:$0xff] }
 0x169   : > { %881 = vperm.xlu1 %3330, %v311_v15  }
 0x16a   : > { %v670_v49 = vadd.f32 1e-05, %v638_v9 }
 0x16b   : > { %v607_v21 = vpop.xlane.xlu1 %606  ;;  %v573_v4 = vpop.xlane.xlu0 %572 }
 0x16c   : > { %3365 = vrsqrt.f32 %v670_v49  ;;  %v639_v7 = vmul.f32 0.0078125, %v607_v21  ;;  %v622_v25 = vmul.f32 0.0078125, %v573_v4  ;;  %v4216_v49 = vshrl.u32 %v736_v32, 7  ;;  %v299_v32 = vld [vmem:[%s5341_s2] sm:$0x3f] }
 0x16e   : > { %v671_v26 = vadd.f32 1e-05, %v639_v7  ;;  %v654_v31 = vadd.f32 1e-05, %v622_v25  ;;  %5444 = vst [vmem:[#allocation42_spill] sm:$0xff] %v4216_v49  ;;  %v738_v43 = vsub.s32 0, %v4216_v49 }
 0x16f   : > { %v575_v38 = vpop.xlane.xlu1 %574  ;;  %v601_v37 = vpop.xlane.xlu0 %600 }
 0x170   : > { %3367 = vrsqrt.f32 %v671_v26  ;;  %v623_v63 = vmul.f32 0.0078125, %v575_v38  ;;  %v636_v9 = vmul.f32 0.0078125, %v601_v37  ;;  %v4222_v26 = vld [vmem:[%s5342_s3 + $0x40] sm:$0xff] }
 0x171   : > { %3369 = vrsqrt.f32 %v654_v31  ;;  %866 = vperm.xlu1 %3330, %v4222_v26  }
 0x172   : > { %v655_v21 = vadd.f32 1e-05, %v623_v63  ;;  %v668_v4 = vadd.f32 1e-05, %v636_v9 }
 0x173   : > { %v603_v44 = vpop.xlane.xlu1 %602  ;;  %v569_v7 = vpop.xlane.xlu0 %568 }
 0x174   : > { %3371 = vrsqrt.f32 %v655_v21  ;;  %v637_v25 = vmul.f32 0.0078125, %v603_v44  ;;  %v620_v5 = vmul.f32 0.0078125, %v569_v7  ;;  %v4231_v44 = vld [vmem:[%s5342_s3 + $0x48] sm:$0xff] }
 0x175   : > { %3373 = vrsqrt.f32 %v668_v4  ;;  %v4233_v4 = vrot.slane %v299_v32, %v738_v43  ;;  %871 = vperm.xlu1 %3330, %v4231_v44   ;;  %v4244_v43 = vld [vmem:[%s5342_s3 + $0x30] sm:$0xff] }
 0x176   : > { %v669_v37 = vadd.f32 1e-05, %v637_v25  ;;  %v652_v31 = vadd.f32 1e-05, %v620_v5  ;;  %v774_v5 = vsub.s32 1, %v4216_v49 }
 0x177   : > { %v571_v38 = vpop.xlane.xlu1 %570  ;;  %v597_v15 = vpop.xlane.xlu0 %596 }
 0x178   : > { %3375 = vrsqrt.f32 %v669_v37  ;;  %v621_v63 = vmul.f32 0.0078125, %v571_v38  ;;  %v634_v9 = vmul.f32 0.0078125, %v597_v15 }
 0x179   : > { %v3366_v21 = vpop.eup %3365  ;;  %3377 = vrsqrt.f32 %v652_v31  ;;  %v4239_v31 = vrot.slane %v299_v32, %v774_v5  ;;  %856 = vperm.xlu1 %3330, %v4244_v43  }
 0x17a   : > { %v653_v7 = vadd.f32 1e-05, %v621_v63  ;;  %v666_v25 = vadd.f32 1e-05, %v634_v9  ;;  %v734_v3 = vmul.f32 %v3366_v21, %v4035_v52  ;;  %v4249_v52 = vld [vmem:[%s5342_s3 + $0x70] sm:$0xff]  ;;  %v4258_v21 = vld [vmem:[%s5342_s3 + $0x20] sm:$0xff] }
 0x17b   : > { %v599_v12 = vpop.xlane.xlu1 %598  ;;  %v565_v11 = vpop.xlane.xlu0 %564  ;;  %896 = vperm.xlu0 %3329, %v4249_v52  }
 0x17c   : > { %3379 = vrsqrt.f32 %v653_v7  ;;  %v635_v18 = vmul.f32 0.0078125, %v599_v12  ;;  %v618_v17 = vmul.f32 0.0078125, %v565_v11  ;;  %v770_v38 = vmul.f32 %v4233_v4, %v734_v3 }
 0x17d   : > { %v3368_v37 = vpop.eup %3367  ;;  %3381 = vrsqrt.f32 %v666_v25  ;;  %846 = vperm.xlu1 %3330, %v4258_v21  }
 0x17e   : > { %v3370_v15 = vpop.eup %3369  ;;  %v667_v63 = vadd.f32 1e-05, %v635_v18  ;;  %v650_v12 = vadd.f32 1e-05, %v618_v17  ;;  %v735_v11 = vmul.f32 %v3368_v37, %v4043_v59  ;;  %v4263_v18 = vld [vmem:[%s5342_s3 + $0x38] sm:$0xff]  ;;  %v806_v25 = vadd.f32 %v4239_v31, %v770_v38  ;;  %v4276_v38 = vld [vmem:[%s5342_s3 + $0x10] sm:$0xff] }
 0x17f   : > { %v567_v3 = vpop.xlane.xlu1 %566  ;;  %v593_v32 = vpop.xlane.xlu0 %592  ;;  %v718_v9 = vmul.f32 %v3370_v15, %v4038_v53  ;;  %861 = vperm.xlu0 %3329, %v4263_v18  }
 0x180   : > { %3383 = vrsqrt.f32 %v667_v63  ;;  %v619_v17 = vmul.f32 0.0078125, %v567_v3  ;;  %v632_v59 = vmul.f32 0.0078125, %v593_v32  ;;  %v771_v5 = vmul.f32 %v4233_v4, %v735_v11 }
 0x181   : > { %v3372_v7 = vpop.eup %3371  ;;  %3385 = vrsqrt.f32 %v650_v12  ;;  %v754_v32 = vmul.f32 %v4233_v4, %v718_v9  ;;  %836 = vperm.xlu1 %3330, %v4276_v38  }
 0x182   : > { %v3374_v53 = vpop.eup %3373  ;;  %v651_v37 = vadd.f32 1e-05, %v619_v17  ;;  %v664_v15 = vadd.f32 1e-05, %v632_v59  ;;  %v807_v49 = vadd.f32 %v4239_v31, %v771_v5  ;;  %v719_v23 = vmul.f32 %v3372_v7, %v4048_v61  ;;  %v4281_v61 = vld [vmem:[%s5342_s3 + $0x28] sm:$0xff] }
 0x183   : > { %v595_v63 = vpop.xlane.xlu1 %594  ;;  %v561_v3 = vpop.xlane.xlu0 %560  ;;  %v732_v11 = vmul.f32 %v3374_v53, %v4055_v10  ;;  %851 = vperm.xlu0 %3329, %v4281_v61  }
 0x184   : > { %3387 = vrsqrt.f32 %v651_v37  ;;  %v633_v12 = vmul.f32 0.0078125, %v595_v63  ;;  %v616_v17 = vmul.f32 0.0078125, %v561_v3  ;;  %v823_v59 = vpack.c.bf16 %v807_v49, %v806_v25 }
 0x185   : > { %v3376_v5 = vpop.eup %3375  ;;  %3389 = vrsqrt.f32 %v664_v15  ;;  %v755_v9 = vmul.f32 %v4233_v4, %v719_v23  ;;  %v768_v10 = vmul.f32 %v4233_v4, %v732_v11  ;;  %v790_v63 = vadd.f32 %v4239_v31, %v754_v32  ;;  %v4294_v23 = vld [vmem:[%s5342_s3] sm:$0xff]  ;;  %v4300_v32 = vld [vmem:[%s5342_s3 + $0x18] sm:$0xff] }
 0x186   : > { %v3378_v7 = vpop.eup %3377  ;;  %v665_v53 = vadd.f32 1e-05, %v633_v12  ;;  %v648_v22 = vadd.f32 1e-05, %v616_v17  ;;  %952 = vmatprep.subr.bf16.mxu0 %v823_v59  ;;  %v733_v37 = vmul.f32 %v3376_v5, %v4058_v13  ;;  %826 = vperm.xlu1 %3330, %v4294_v23  }
 0x187   : > { %v563_v49 = vpop.xlane.xlu1 %562  ;;  %v589_v25 = vpop.xlane.xlu0 %588  ;;  %v791_v3 = vadd.f32 %v4239_v31, %v755_v9  ;;  %v716_v15 = vmul.f32 %v3378_v7, %v4065_v36  ;;  %v804_v59 = vadd.f32 %v4239_v31, %v768_v10  ;;  %841 = vperm.xlu0 %3329, %v4300_v32  }
 0x188   : > { %3391 = vrsqrt.f32 %v665_v53  ;;  %v617_v11 = vmul.f32 0.0078125, %v563_v49  ;;  %v630_v13 = vmul.f32 0.0078125, %v589_v25  ;;  %v769_v12 = vmul.f32 %v4233_v4, %v733_v37 }
 0x189   : > { %v3380_v17 = vpop.eup %3379  ;;  %3393 = vrsqrt.f32 %v648_v22  ;;  %v815_v36 = vpack.c.bf16 %v791_v3, %v790_v63  ;;  %v752_v25 = vmul.f32 %v4233_v4, %v716_v15  ;;  %v4312_v3 = vld [vmem:[%s5342_s3 + $0x8] sm:$0xff] }
 0x18a   : > { %v3382_v5 = vpop.eup %3381  ;;  %v649_v9 = vadd.f32 1e-05, %v617_v11  ;;  %v662_v7 = vadd.f32 1e-05, %v630_v13  ;;  %v805_v29 = vadd.f32 %v4239_v31, %v769_v12  ;;  %v717_v53 = vmul.f32 %v3380_v17, %v4068_v39 }
 0x18b   : > { %953 = vmatpush1.bf16.msra.mxu0 %v815_v36  ;;  %v591_v37 = vpop.xlane.xlu1 %590  ;;  %v557_v49 = vpop.xlane.xlu0 %556  ;;  %v730_v28 = vmul.f32 %v3382_v5, %v4075_v54  ;;  %831 = vperm.xlu0 %3329, %v4312_v3  }
 0x18c   : > { %3395 = vrsqrt.f32 %v649_v9  ;;  %v631_v22 = vmul.f32 0.0078125, %v591_v37  ;;  %v614_v10 = vmul.f32 0.0078125, %v557_v49  ;;  %v822_v63 = vpack.c.bf16 %v805_v29, %v804_v59 }
 0x18d   : > { %v3384_v39 = vpop.eup %3383  ;;  %3397 = vrsqrt.f32 %v662_v7  ;;  %v753_v11 = vmul.f32 %v4233_v4, %v717_v53  ;;  %v766_v13 = vmul.f32 %v4233_v4, %v730_v28  ;;  %v788_v29 = vadd.f32 %v4239_v31, %v752_v25 }
 0x18e   : > { %v3386_v15 = vpop.eup %3385  ;;  %v663_v12 = vadd.f32 1e-05, %v631_v22  ;;  %v646_v54 = vadd.f32 1e-05, %v614_v10  ;;  %954 = vmatprep.subr.bf16.mxu0 %v822_v63  ;;  %v731_v17 = vmul.f32 %v3384_v39, %v4078_v55 }
 0x18f   : > { %v559_v36 = vpop.xlane.xlu1 %558  ;;  %v585_v5 = vpop.xlane.xlu0 %584  ;;  %v789_v59 = vadd.f32 %v4239_v31, %v753_v11  ;;  %v714_v9 = vmul.f32 %v3386_v15, %v4085_v0  ;;  %v802_v55 = vadd.f32 %v4239_v31, %v766_v13 }
 0x190   : > { %3399 = vrsqrt.f32 %v663_v12  ;;  %v615_v7 = vmul.f32 0.0078125, %v559_v36  ;;  %v628_v53 = vmul.f32 0.0078125, %v585_v5  ;;  %v767_v28 = vmul.f32 %v4233_v4, %v731_v17 }
 0x191   : > { %v3388_v37 = vpop.eup %3387  ;;  %3401 = vrsqrt.f32 %v646_v54  ;;  %v814_v49 = vpack.c.bf16 %v789_v59, %v788_v29  ;;  %v750_v15 = vmul.f32 %v4233_v4, %v714_v9 }
 0x192   : > { %v3390_v22 = vpop.eup %3389  ;;  %v647_v10 = vadd.f32 1e-05, %v615_v7  ;;  %v660_v63 = vadd.f32 1e-05, %v628_v53  ;;  %v803_v25 = vadd.f32 %v4239_v31, %v767_v28  ;;  %v715_v39 = vmul.f32 %v3388_v37, %v4088_v1 }
 0x193   : > { %955 = vmatpush1.bf16.msra.mxu0 %v814_v49  ;;  %v587_v0 = vpop.xlane.xlu1 %586  ;;  %v553_v11 = vpop.xlane.xlu0 %552  ;;  %v728_v12 = vmul.f32 %v3390_v22, %v4095_v30  ;;  %v786_v30 = vadd.f32 %v4239_v31, %v750_v15 }
 0x194   : > { %3403 = vrsqrt.f32 %v647_v10  ;;  %v629_v17 = vmul.f32 0.0078125, %v587_v0  ;;  %v612_v54 = vmul.f32 0.0078125, %v553_v11  ;;  %v821_v36 = vpack.c.bf16 %v803_v25, %v802_v55 }
 0x195   : > { %v3392_v5 = vpop.eup %3391  ;;  %3405 = vrsqrt.f32 %v660_v63  ;;  %v751_v13 = vmul.f32 %v4233_v4, %v715_v39  ;;  %v764_v29 = vmul.f32 %v4233_v4, %v728_v12 }
 0x196   : > { %v3394_v59 = vpop.eup %3393  ;;  %v661_v7 = vadd.f32 1e-05, %v629_v17  ;;  %v644_v1 = vadd.f32 1e-05, %v612_v54  ;;  %956 = vmatprep.subr.bf16.mxu0 %v821_v36  ;;  %v729_v53 = vmul.f32 %v3392_v5, %v4098_v33 }
 0x197   : > { %v555_v28 = vpop.xlane.xlu1 %554  ;;  %v581_v9 = vpop.xlane.xlu0 %580  ;;  %v787_v37 = vadd.f32 %v4239_v31, %v751_v13  ;;  %v712_v49 = vmul.f32 %v3394_v59, %v4105_v56  ;;  %v800_v39 = vadd.f32 %v4239_v31, %v764_v29 }
 0x198   : > { %3407 = vrsqrt.f32 %v661_v7  ;;  %v613_v55 = vmul.f32 0.0078125, %v555_v28  ;;  %v626_v22 = vmul.f32 0.0078125, %v581_v9  ;;  %v765_v10 = vmul.f32 %v4233_v4, %v729_v53 }
 0x199   : > { %v3396_v63 = vpop.eup %3395  ;;  %3409 = vrsqrt.f32 %v644_v1  ;;  %v813_v25 = vpack.c.bf16 %v787_v37, %v786_v30  ;;  %v748_v54 = vmul.f32 %v4233_v4, %v712_v49 }
 0x19a   : > { %v3398_v0 = vpop.eup %3397  ;;  %v645_v33 = vadd.f32 1e-05, %v613_v55  ;;  %v658_v11 = vadd.f32 1e-05, %v626_v22  ;;  %v801_v12 = vadd.f32 %v4239_v31, %v765_v10  ;;  %v713_v15 = vmul.f32 %v3396_v63, %v4108_v57 }
 0x19b   : > { %957 = vmatpush1.bf16.msra.mxu0 %v813_v25  ;;  %v583_v17 = vpop.xlane.xlu1 %582  ;;  %v549_v56 = vpop.xlane.xlu0 %548  ;;  %v726_v36 = vmul.f32 %v3398_v0, %v4115_v16  ;;  %v784_v16 = vadd.f32 %v4239_v31, %v748_v54 }
 0x19c   : > { %3411 = vrsqrt.f32 %v645_v33  ;;  %v627_v5 = vmul.f32 0.0078125, %v583_v17  ;;  %v610_v13 = vmul.f32 0.0078125, %v549_v56  ;;  %v820_v59 = vpack.c.bf16 %v801_v12, %v800_v39 }
 0x19d   : > { %v3400_v7 = vpop.eup %3399  ;;  %3413 = vrsqrt.f32 %v658_v11  ;;  %v749_v29 = vmul.f32 %v4233_v4, %v713_v15  ;;  %v762_v1 = vmul.f32 %v4233_v4, %v726_v36 }
 0x19e   : > { %v3402_v53 = vpop.eup %3401  ;;  %v659_v28 = vadd.f32 1e-05, %v627_v5  ;;  %v642_v57 = vadd.f32 1e-05, %v610_v13  ;;  %958 = vmatprep.subr.bf16.mxu0 %v820_v59  ;;  %v727_v9 = vmul.f32 %v3400_v7, %v4118_v19 }
 0x19f   : > { %v551_v30 = vpop.xlane.xlu1 %550  ;;  %v577_v37 = vpop.xlane.xlu0 %576  ;;  %v785_v49 = vadd.f32 %v4239_v31, %v749_v29  ;;  %v710_v55 = vmul.f32 %v3402_v53, %v4125_v50  ;;  %v798_v0 = vadd.f32 %v4239_v31, %v762_v1 }
 0x1a0   : > { %3415 = vrsqrt.f32 %v659_v28  ;;  %v611_v22 = vmul.f32 0.0078125, %v551_v30  ;;  %v624_v10 = vmul.f32 0.0078125, %v577_v37  ;;  %v763_v63 = vmul.f32 %v4233_v4, %v727_v9 }
 0x1a1   : > { %v3404_v25 = vpop.eup %3403  ;;  %3417 = vrsqrt.f32 %v642_v57  ;;  %v812_v39 = vpack.c.bf16 %v785_v49, %v784_v16  ;;  %v746_v56 = vmul.f32 %v4233_v4, %v710_v55 }
 0x1a2   : > { %v3406_v33 = vpop.eup %3405  ;;  %v643_v19 = vadd.f32 1e-05, %v611_v22  ;;  %v656_v11 = vadd.f32 1e-05, %v624_v10  ;;  %v799_v12 = vadd.f32 %v4239_v31, %v763_v63  ;;  %v711_v15 = vmul.f32 %v3404_v25, %v4128_v51 }
 0x1a3   : > { %959 = vmatpush1.bf16.msra.mxu0 %v812_v39  ;;  %v579_v17 = vpop.xlane.xlu1 %578  ;;  %v545_v50 = vpop.xlane.xlu0 %544  ;;  %v724_v54 = vmul.f32 %v3406_v33, %v4135_v24  ;;  %v782_v9 = vadd.f32 %v4239_v31, %v746_v56 }
 0x1a4   : > { %3419 = vrsqrt.f32 %v643_v19  ;;  %v625_v36 = vmul.f32 0.0078125, %v579_v17  ;;  %v608_v5 = vmul.f32 0.0078125, %v545_v50  ;;  %v819_v13 = vpack.c.bf16 %v799_v12, %v798_v0 }
 0x1a5   : > { %v3408_v59 = vpop.eup %3407  ;;  %3421 = vrsqrt.f32 %v656_v11  ;;  %v747_v7 = vmul.f32 %v4233_v4, %v711_v15  ;;  %v760_v29 = vmul.f32 %v4233_v4, %v724_v54 }
 0x1a6   : > { %v3410_v1 = vpop.eup %3409  ;;  %v657_v53 = vadd.f32 1e-05, %v625_v36  ;;  %v640_v51 = vadd.f32 1e-05, %v608_v5  ;;  %960 = vmatprep.subr.bf16.mxu0 %v819_v13  ;;  %v725_v28 = vmul.f32 %v3408_v59, %v4138_v27 }
 0x1a7   : > { %v547_v57 = vpop.xlane.xlu1 %546  ;;  %v783_v24 = vadd.f32 %v4239_v31, %v747_v7  ;;  %v708_v30 = vmul.f32 %v3410_v1, %v4145_v60  ;;  %v796_v22 = vadd.f32 %v4239_v31, %v760_v29 }
 0x1a8   : > { %3423 = vrsqrt.f32 %v657_v53  ;;  %v609_v37 = vmul.f32 0.0078125, %v547_v57  ;;  %v761_v16 = vmul.f32 %v4233_v4, %v725_v28 }
 0x1a9   : > { %v3412_v49 = vpop.eup %3411  ;;  %3425 = vrsqrt.f32 %v640_v51  ;;  %v811_v55 = vpack.c.bf16 %v783_v24, %v782_v9  ;;  %v744_v39 = vmul.f32 %v4233_v4, %v708_v30 }
 0x1aa   : > { %v3414_v10 = vpop.eup %3413  ;;  %v641_v63 = vadd.f32 1e-05, %v609_v37  ;;  %v797_v27 = vadd.f32 %v4239_v31, %v761_v16  ;;  %v709_v25 = vmul.f32 %v3412_v49, %v4148_v62 }
 0x1ab   : > { %961 = vmatpush1.bf16.msra.mxu0 %v811_v55  ;;  %v722_v60 = vmul.f32 %v3414_v10, %v4155_v45  ;;  %v780_v12 = vadd.f32 %v4239_v31, %v744_v39  ;;  %v3334_v39 = vld [vmem:[#allocation5 + $0x8] sm:$0xff]  }
 0x1ac   : > { %3427 = vrsqrt.f32 %v641_v63  ;;  %v818_v0 = vpack.c.bf16 %v797_v27, %v796_v22  ;;  %v745_v33 = vmul.f32 %v4233_v4, %v709_v25  ;;  %v3333_v27 = vld [vmem:[#allocation5] sm:$0xff]   ;;  %v5445_v25 = vmov 0  }
 0x1ad   : > { %v3416_v19 = vpop.eup %3415  ;;  %v758_v62 = vmul.f32 %v4233_v4, %v722_v60  ;;  %v3337_v60 = vld [vmem:[#allocation5 + $0x20] sm:$0xff]  }
 0x1ae   : > { %v3418_v11 = vpop.eup %3417  ;;  %962 = vmatprep.subr.bf16.mxu0 %v818_v0  ;;  %v781_v15 = vadd.f32 %v4239_v31, %v745_v33  ;;  %v723_v17 = vmul.f32 %v3416_v19, %v4158_v48  ;;  %v3339_v0 = vld [vmem:[#allocation5 + $0x30] sm:$0xff]   ;;  %v3340_v33 = vld [vmem:[#allocation5 + $0x38] sm:$0xff]   ;;  %v4396_v19 = vpop.permute.xlu1 %901 }
 0x1af   : > { %v706_v50 = vmul.f32 %v3418_v11, %v4165_v6  ;;  %v794_v5 = vadd.f32 %v4239_v31, %v758_v62 }
 0x1b0   : > { %v810_v56 = vpack.c.bf16 %v781_v15, %v780_v12  ;;  %v759_v45 = vmul.f32 %v4233_v4, %v723_v17 }
 0x1b1   : > { %v3420_v54 = vpop.eup %3419  ;;  %v742_v7 = vmul.f32 %v4233_v4, %v706_v50 }
 0x1b2   : > { %v3422_v36 = vpop.eup %3421  ;;  %963 = vmatpush1.bf16.msra.mxu0 %v810_v56  ;;  %v795_v13 = vadd.f32 %v4239_v31, %v759_v45  ;;  %v707_v59 = vmul.f32 %v3420_v54, %v4168_v2  ;;  %v4398_v11 = vpop.permute.xlu1 %886 }
 0x1b3   : > { %v720_v48 = vmul.f32 %v3422_v36, %v4175_v58  ;;  %v778_v51 = vadd.f32 %v4239_v31, %v742_v7 }
 0x1b4   : > { %v817_v29 = vpack.c.bf16 %v795_v13, %v794_v5  ;;  %v743_v1 = vmul.f32 %v4233_v4, %v707_v59 }
 0x1b5   : > { %v3424_v6 = vpop.eup %3423  ;;  %v756_v9 = vmul.f32 %v4233_v4, %v720_v48 }
 0x1b6   : > { %v3426_v53 = vpop.eup %3425  ;;  %964 = vmatprep.subr.bf16.mxu0 %v817_v29  ;;  %v779_v28 = vadd.f32 %v4239_v31, %v743_v1  ;;  %v721_v57 = vmul.f32 %v3424_v6, %v4178_v8  ;;  %v4400_v12 = vpop.permute.xlu1 %891 }
 0x1b7   : > { %v704_v2 = vmul.f32 %v3426_v53, %v4185_v42  ;;  %v792_v37 = vadd.f32 %v4239_v31, %v756_v9 }
 0x1b8   : > { %v809_v24 = vpack.c.bf16 %v779_v28, %v778_v51  ;;  %v757_v30 = vmul.f32 %v4233_v4, %v721_v57 }
 0x1b9   : > { %v3428_v58 = vpop.eup %3427  ;;  %v740_v55 = vmul.f32 %v4233_v4, %v704_v2 }
 0x1ba   : > { %965 = vmatpush1.bf16.msra.mxu0 %v809_v24  ;;  %v793_v16 = vadd.f32 %v4239_v31, %v757_v30  ;;  %v705_v49 = vmul.f32 %v3428_v58, %v4188_v14  ;;  %v3335_v14 = vld [vmem:[#allocation5 + $0x10] sm:$0xff]   ;;  %v4402_v15 = vpop.permute.xlu1 %876 }
 0x1bb   : > { %v776_v10 = vadd.f32 %v4239_v31, %v740_v55 }
 0x1bc   : > { %v816_v22 = vpack.c.bf16 %v793_v16, %v792_v37  ;;  %v741_v8 = vmul.f32 %v4233_v4, %v705_v49  ;;  %v3336_v4 = vld [vmem:[#allocation5 + $0x18] sm:$0xff]  }
 0x1be   : > { %966 = vmatprep.subr.bf16.mxu0 %v816_v22  ;;  %v777_v42 = vadd.f32 %v4239_v31, %v741_v8  ;;  %v3338_v31 = vld [vmem:[#allocation5 + $0x28] sm:$0xff]  }
 0x1c0   : > { %v808_v63 = vpack.c.bf16 %v777_v42, %v776_v10 }
 0x1c2   : > { %967 = vmatpush1.bf16.msra.mxu0 %v808_v63 }
 0x1c5   : > { %985 = vmatmul.mubr.bf16.vlgmr.msra.gmra.mxu0 %v3333_v27 }
 0x1c6   : > { %994 = vmatprep.mubr.bf16.mxu0 %v5445_v25 }
 0x1cd   : > { %995 = vmatmul.mubr.bf16.gmra.mxu0 %v3334_v39 }
 0x1ce   : > { %1004 = vmatprep.mubr.bf16.mxu0 %v5445_v25 }
 0x1d5   : > { %1005 = vmatmul.mubr.bf16.gmra.mxu0 %v3335_v14 }
 0x1d6   : > { %1014 = vmatprep.mubr.bf16.mxu0 %v5445_v25 }
 0x1dd   : > { %1015 = vmatmul.mubr.bf16.gmra.mxu0 %v3336_v4 }
 0x1de   : > { %1024 = vmatprep.mubr.bf16.mxu0 %v5445_v25 }
 0x1e4   : > { %v4404_v17 = vpop.permute.xlu1 %881 }
 0x1e5   : > { %1025 = vmatmul.mubr.bf16.gmra.mxu0 %v3337_v60 }
 0x1e6   : > { %1034 = vmatprep.mubr.bf16.mxu0 %v5445_v25 }
 0x1ec   : > { %v4406_v62 = vpop.permute.xlu1 %866 }
 0x1ed   : > { %1035 = vmatmul.mubr.bf16.gmra.mxu0 %v3338_v31 }
 0x1ee   : > { %1044 = vmatprep.mubr.bf16.mxu0 %v5445_v25 }
 0x1f0   : > { %v4408_v50 = vpop.permute.xlu1 %871 }
 0x1f4   : > { %v4412_v45 = vpop.permute.xlu1 %856 }
 0x1f5   : > { %1045 = vmatmul.mubr.bf16.gmra.mxu0 %v3339_v0 }
 0x1f6   : > { %1054 = vmatprep.mubr.bf16.mxu0 %v5445_v25  ;;  %v4410_v56 = vpop.permute.xlu0 %896 }
 0x1f8   : > { %v4416_v36 = vpop.permute.xlu1 %846 }
 0x1fa   : > { %v4414_v54 = vpop.permute.xlu0 %861 }
 0x1fc   : > { %v837_v13 = vpop.permute.xlu1 %836 }
 0x1fd   : > { %1055 = vmatmul.mubr.bf16.gmra.mxu0 %v3340_v33 }
 0x1fe   : > { %v4418_v5 = vpop.permute.xlu0 %851 }
 0x201   : > { %v827_v7 = vpop.permute.xlu1 %826 }
 0x202   : > { %v842_v59 = vpop.permute.xlu0 %841 }
 0x206   : > { %v832_v6 = vpop.permute.xlu0 %831 }
 0x285   : > { %v986_v48 = vpop.f32.mrf.mxu0 }
 0x286   : > { %v987_v29 = vadd.f32 %v986_v48, %v827_v7 }
 0x287   : > { %v988_v1 = vpop.f32.mrf.mxu0 }
 0x288   : > { %v1097_v53 = vmul.f32 0.70710677, %v987_v29  ;;  %v989_v51 = vadd.f32 %v988_v1, %v827_v7 }
 0x289   : > { %v990_v28 = vpop.f32.mrf.mxu0 }
 0x28a   : > { %v1098_v57 = vmul.f32 0.70710677, %v989_v51  ;;  %v991_v9 = vadd.f32 %v990_v28, %v832_v6  ;;  %3429 = verf.f32 %v1097_v53  ;;  %v1065_v28 = vmul.f32 0.5, %v987_v29 }
 0x28b   : > { %v992_v2 = vpop.f32.mrf.mxu0 }
 0x28c   : > { %v1099_v24 = vmul.f32 0.70710677, %v991_v9  ;;  %v993_v30 = vadd.f32 %v992_v2, %v832_v6  ;;  %3431 = verf.f32 %v1098_v57  ;;  %v1067_v1 = vmul.f32 0.5, %v991_v9 }
 0x28d   : > { %v996_v58 = vpop.f32.mrf.mxu0 }
 0x28e   : > { %3433 = verf.f32 %v1099_v24  ;;  %v1100_v37 = vmul.f32 0.70710677, %v993_v30  ;;  %v997_v16 = vadd.f32 %v996_v58, %v837_v13  ;;  %v1068_v24 = vmul.f32 0.5, %v993_v30 }
 0x28f   : > { %v998_v49 = vpop.f32.mrf.mxu0 }
 0x290   : > { %3435 = verf.f32 %v1100_v37  ;;  %v1101_v55 = vmul.f32 0.70710677, %v997_v16  ;;  %v999_v22 = vadd.f32 %v998_v49, %v837_v13  ;;  %v1066_v49 = vmul.f32 0.5, %v989_v51 }
 0x291   : > { %v1000_v8 = vpop.f32.mrf.mxu0 }
 0x292   : > { %v1102_v10 = vmul.f32 0.70710677, %v999_v22  ;;  %v1001_v42 = vadd.f32 %v1000_v8, %v842_v59  ;;  %3437 = verf.f32 %v1101_v55 }
 0x293   : > { %v1002_v63 = vpop.f32.mrf.mxu0 }
 0x294   : > { %3439 = verf.f32 %v1102_v10  ;;  %v1103_v27 = vmul.f32 0.70710677, %v1001_v42  ;;  %v1003_v39 = vadd.f32 %v1002_v63, %v842_v59 }
 0x295   : > { %v4420_v14 = vpop.f32.mrf.mxu0 }
 0x296   : > { %3441 = verf.f32 %v1103_v27  ;;  %v1104_v4 = vmul.f32 0.70710677, %v1003_v39 }
 0x297   : > { %v1008_v60 = vpop.f32.mrf.mxu0  ;;  %v3430_v31 = vpop.eup %3429 }
 0x298   : > { %3443 = verf.f32 %v1104_v4  ;;  %v1161_v48 = vadd.f32 1.0, %v3430_v31 }
 0x299   : > { %v1010_v0 = vpop.f32.mrf.mxu0  ;;  %v3432_v33 = vpop.eup %3431 }
 0x29a   : > { %v1162_v57 = vadd.f32 1.0, %v3432_v33  ;;  %v4428_v37 = vmul.f32 %v1161_v48, %v1065_v28  ;;  %v1070_v28 = vmul.f32 0.5, %v999_v22 }
 0x29b   : > { %v3434_v7 = vpop.eup %3433  ;;  %v4422_v13 = vpop.f32.mrf.mxu0 }
 0x29c   : > { %v1163_v6 = vadd.f32 1.0, %v3434_v7  ;;  %v4434_v9 = vmul.f32 %v1162_v57, %v1066_v49  ;;  %v1071_v7 = vmul.f32 0.5, %v1001_v42 }
 0x29d   : > { %v3436_v53 = vpop.eup %3435  ;;  %v4424_v2 = vpop.f32.mrf.mxu0 }
 0x29e   : > { %v4426_v59 = vmul.f32 %v1163_v6, %v1067_v1  ;;  %v1164_v58 = vadd.f32 1.0, %v3436_v53  ;;  %v1069_v6 = vmul.f32 0.5, %v997_v16 }
 0x29f   : > { %v4430_v55 = vpop.f32.mrf.mxu0  ;;  %v3438_v8 = vpop.eup %3437 }
 0x2a0   : > { %v4432_v10 = vmul.f32 %v1164_v58, %v1068_v24  ;;  %v1165_v31 = vadd.f32 1.0, %v3438_v8  ;;  %v1072_v24 = vmul.f32 0.5, %v1003_v39 }
 0x2a1   : > { %v3440_v63 = vpop.eup %3439  ;;  %v4436_v27 = vpop.f32.mrf.mxu0 }
 0x2a2   : > { %v1166_v33 = vadd.f32 1.0, %v3440_v63  ;;  %v4448_v49 = vmul.f32 %v1165_v31, %v1069_v6  ;;  %v4466_v6 = vadd.f32 %v1010_v0, %v4418_v5 }
 0x2a3   : > { %v3442_v4 = vpop.eup %3441  ;;  %v4440_v30 = vpop.f32.mrf.mxu0 }
 0x2a4   : > { %v1167_v48 = vadd.f32 1.0, %v3442_v4  ;;  %v4450_v29 = vmul.f32 %v1166_v33, %v1070_v28 }
 0x2a5   : > { %v3444_v1 = vpop.eup %3443  ;;  %v4444_v53 = vpop.f32.mrf.mxu0 }
 0x2a6   : > { %v4446_v57 = vmul.f32 %v1167_v48, %v1071_v7  ;;  %v1168_v58 = vadd.f32 1.0, %v3444_v1  ;;  %v3756_v48 = vmov 1   ;;  %v4463_v1 = vadd.f32 %v1008_v60, %v4416_v36 }
 0x2a7   : > { %v1028_v8 = vpop.f32.mrf.mxu0  ;;  %3331 = vset.pattern.permute.xlu1 %v3756_v48  ;;  %3332 = vset.pattern.permute.xlu0 %v3756_v48  ;;  %v1107_v60 = vmul.f32 0.70710677, %v4466_v6 }
 0x2a8   : > { %v4452_v35 = vmul.f32 %v1168_v58, %v1072_v24  ;;  %1242 = vperm.xlu1 %3331, %v4294_v23   ;;  %1246 = vperm.xlu0 %3332, %v4312_v3   ;;  %v1106_v23 = vmul.f32 0.70710677, %v4463_v1 }
 0x2a9   : > { %v4454_v51 = vpop.f32.mrf.mxu0 }
 0x2aa   : > { %3445 = verf.f32 %v1106_v23 }
 0x2ab   : > { %v1032_v22 = vpop.f32.mrf.mxu0  ;;  %3447 = verf.f32 %v1107_v60  ;;  %v4570_v60 = vadd.f32 %v4424_v2, %v4412_v45 }
 0x2ac   : > { %1250 = vperm.xlu1 %3331, %v4276_v38   ;;  %1258 = vperm.xlu0 %3332, %v4258_v21  }
 0x2ad   : > { %v1036_v63 = vpop.f32.mrf.mxu0 }
 0x2ae   : > { %v4520_v23 = vadd.f32 %v1036_v63, %v4402_v15  ;;  %v4542_v63 = vadd.f32 %v4444_v53, %v4406_v62 }
 0x2af   : > { %v1038_v4 = vpop.f32.mrf.mxu0 }
 0x2b0   : > { %1254 = vperm.xlu1 %3331, %v4300_v32   ;;  %1266 = vperm.xlu0 %3332, %v4244_v43  }
 0x2b1   : > { %v1040_v39 = vpop.f32.mrf.mxu0 }
 0x2b3   : > { %v1042_v7 = vpop.f32.mrf.mxu0 }
 0x2b4   : > { %v4469_v24 = vadd.f32 %v1042_v7, %v4404_v17  ;;  %1262 = vperm.xlu1 %3331, %v4281_v61   ;;  %1274 = vperm.xlu0 %3332, %v4222_v26   ;;  %v4524_v61 = vadd.f32 %v1028_v8, %v4406_v62  ;;  %v4556_v62 = vadd.f32 %v4436_v27, %v4414_v54 }
 0x2b5   : > { %v1046_v31 = vpop.f32.mrf.mxu0 }
 0x2b6   : > { %v1120_v48 = vmul.f32 0.70710677, %v4469_v24  ;;  %v4496_v34 = vadd.f32 %v1046_v31, %v4398_v11  ;;  %v1088_v40 = vmul.f32 0.5, %v4469_v24 }
 0x2b7   : > { %v1048_v33 = vpop.f32.mrf.mxu0  ;;  %v4559_v53 = vpop.eup %3445 }
 0x2b8   : > { %v4472_v58 = vadd.f32 %v1048_v33, %v4398_v11  ;;  %3449 = verf.f32 %v1120_v48  ;;  %v4509_v11 = vadd.f32 %v1040_v39, %v4404_v17  ;;  %v1121_v26 = vmul.f32 0.70710677, %v4496_v34  ;;  %1270 = vperm.xlu1 %3331, %v4263_v18   ;;  %1282 = vperm.xlu0 %3332, %v4210_v20   ;;  %v4566_v39 = vpop.eup %3447 }
 0x2b9   : > { %v1050_v28 = vpop.f32.mrf.mxu0  ;;  %v1117_v20 = vmul.f32 0.70710677, %v4520_v23  ;;  %v4547_v18 = vadd.f32 %v4430_v55, %v4412_v45  ;;  %v4563_v55 = vadd.f32 %v4422_v13, %v4418_v5  ;;  %v3622_v5 = vld [vmem:[%s5342_s3 + $0x58] sm:$0xff]  ;;  %v1111_v45 = vmul.f32 0.70710677, %v4556_v62 }
 0x2ba   : > { %v1122_v7 = vmul.f32 0.70710677, %v4472_v58  ;;  %v4489_v21 = vadd.f32 %v1050_v28, %v4400_v12 }
 0x2bb   : > { %v1052_v42 = vpop.f32.mrf.mxu0  ;;  %v1110_v48 = vmul.f32 0.70710677, %v4547_v18 }
 0x2bc   : > { %v4478_v3 = vadd.f32 %v1052_v42, %v4400_v12  ;;  %v4504_v12 = vadd.f32 %v1038_v4, %v4402_v15  ;;  %3451 = verf.f32 %v1122_v7  ;;  %v1119_v15 = vmul.f32 0.70710677, %v4509_v11  ;;  %1278 = vperm.xlu1 %3331, %v4231_v44  }
 0x2bd   : > { %v1056_v0 = vpop.f32.mrf.mxu0  ;;  %v4580_v7 = vadd.f32 %v4420_v14, %v4416_v36 }
 0x2be   : > { %v4484_v33 = vadd.f32 %v1056_v0, %v4410_v56  ;;  %v1124_v38 = vmul.f32 0.70710677, %v4478_v3  ;;  %v1118_v17 = vmul.f32 0.70710677, %v4504_v12 }
 0x2bf   : > { %v1058_v16 = vpop.f32.mrf.mxu0  ;;  %v1105_v14 = vmul.f32 0.70710677, %v4580_v7 }
 0x2c0   : > { %v4493_v42 = vadd.f32 %v1058_v16, %v4410_v56  ;;  %v1125_v41 = vmul.f32 0.70710677, %v4484_v33  ;;  %v1123_v56 = vmul.f32 0.70710677, %v4489_v21  ;;  %3453 = verf.f32 %v1124_v38  ;;  %1286 = vperm.xlu1 %3331, %v3622_v5  }
 0x2c1   : > { %v1060_v0 = vpop.f32.mrf.mxu0  ;;  %v4513_v16 = vadd.f32 %v1032_v22, %v4408_v50  ;;  %v1108_v38 = vmul.f32 0.70710677, %v4563_v55 }
 0x2c2   : > { %v1126_v32 = vmul.f32 0.70710677, %v4493_v42  ;;  %v4501_v43 = vadd.f32 %v1060_v0, %v4396_v19 }
 0x2c3   : > { %v1062_v28 = vpop.f32.mrf.mxu0  ;;  %v1116_v8 = vmul.f32 0.70710677, %v4513_v16 }
 0x2c4   : > { %3455 = verf.f32 %v1126_v32  ;;  %v1127_v31 = vmul.f32 0.70710677, %v4501_v43  ;;  %v4517_v4 = vadd.f32 %v1062_v28, %v4396_v19  ;;  %v4532_v19 = vadd.f32 %v4454_v51, %v4408_v50 }
 0x2c5   : > { %3457 = verf.f32 %v1125_v41  ;;  %v4537_v41 = vadd.f32 %v4440_v30, %v4414_v54  ;;  %v1114_v50 = vmul.f32 0.70710677, %v4524_v61  ;;  %v3621_v30 = vld [vmem:[%s5342_s3 + $0x60] sm:$0xff]  ;;  %v1113_v54 = vmul.f32 0.70710677, %v4542_v63  ;;  %v3450_v27 = vpop.eup %3449 }
 0x2c6   : > { %3459 = verf.f32 %v1127_v31  ;;  %v1128_v22 = vmul.f32 0.70710677, %v4517_v4  ;;  %1290 = vperm.xlu0 %3332, %v3621_v30   ;;  %v1115_v51 = vmul.f32 0.70710677, %v4532_v19  ;;  %v1109_v32 = vmul.f32 0.70710677, %v4570_v60 }
 0x2c7   : > { %3461 = verf.f32 %v1123_v56  ;;  %v1112_v44 = vmul.f32 0.70710677, %v4537_v41 }
 0x2c8   : > { %3463 = verf.f32 %v1128_v22 }
 0x2c9   : > { %3465 = verf.f32 %v1121_v26  ;;  %v3452_v13 = vpop.eup %3451 }
 0x2ca   : > { %3467 = verf.f32 %v1118_v17  ;;  %1298 = vperm.xlu0 %3332, %v4249_v52   ;;  %v3623_v52 = vld [vmem:[%s5342_s3 + $0x68] sm:$0xff]  ;;  %v1186_v30 = vadd.f32 1.0, %v3452_v13 }
 0x2cb   : > { %3469 = verf.f32 %v1119_v15  ;;  %1294 = vperm.xlu1 %3331, %v3623_v52   ;;  %v1092_v15 = vmul.f32 0.5, %v4478_v3  ;;  %v1093_v3 = vmul.f32 0.5, %v4484_v33  ;;  %v1091_v52 = vmul.f32 0.5, %v4489_v21 }
 0x2cc   : > { %3471 = verf.f32 %v1116_v8  ;;  %v1095_v8 = vmul.f32 0.5, %v4501_v43 }
 0x2cd   : > { %3473 = verf.f32 %v1117_v20  ;;  %v3454_v2 = vpop.eup %3453 }
 0x2ce   : > { %3475 = verf.f32 %v1114_v50  ;;  %v1188_v31 = vadd.f32 1.0, %v3454_v2 }
 0x2cf   : > { %3477 = verf.f32 %v1115_v51  ;;  %v1094_v51 = vmul.f32 0.5, %v4493_v42 }
 0x2d0   : > { %3479 = verf.f32 %v1112_v44  ;;  %v1096_v44 = vmul.f32 0.5, %v4517_v4  ;;  %v1220_v13 = vmul.f32 %v1188_v31, %v1092_v15 }
 0x2d1   : > { %v3456_v0 = vpop.eup %3455  ;;  %3481 = verf.f32 %v1113_v54 }
 0x2d2   : > { %v3458_v28 = vpop.eup %3457  ;;  %3483 = verf.f32 %v1110_v48  ;;  %v1190_v26 = vadd.f32 1.0, %v3456_v0  ;;  %v3624_v48 = vld [vmem:[%s5342_s3 + $0x78] sm:$0xff]  ;;  %v1184_v0 = vadd.f32 1.0, %v3450_v27 }
 0x2d3   : > { %v3460_v36 = vpop.eup %3459  ;;  %3485 = verf.f32 %v1111_v45  ;;  %v1189_v20 = vadd.f32 1.0, %v3458_v28  ;;  %1302 = vperm.xlu1 %3331, %v3624_v48   ;;  %v1090_v45 = vmul.f32 0.5, %v4472_v58 }
 0x2d4   : > { %v3462_v56 = vpop.eup %3461  ;;  %3487 = verf.f32 %v1108_v38  ;;  %v1191_v17 = vadd.f32 1.0, %v3460_v36 }
 0x2d5   : > { %v3464_v22 = vpop.eup %3463  ;;  %3489 = verf.f32 %v1109_v32  ;;  %v1187_v2 = vadd.f32 1.0, %v3462_v56  ;;  %v1222_v32 = vmul.f32 %v1190_v26, %v1094_v51  ;;  %v1221_v36 = vmul.f32 %v1189_v20, %v1093_v3 }
 0x2d6   : > { %v3466_v50 = vpop.eup %3465  ;;  %v1192_v54 = vadd.f32 1.0, %v3464_v22  ;;  %v1223_v43 = vmul.f32 %v1191_v17, %v1095_v8  ;;  %3491 = verf.f32 %v1105_v14  ;;  %v1218_v58 = vmul.f32 %v1186_v30, %v1090_v45 }
 0x2d7   : > { %v3468_v5 = vpop.eup %3467  ;;  %v1185_v4 = vadd.f32 1.0, %v3466_v50  ;;  %v1089_v17 = vmul.f32 0.5, %v4496_v34  ;;  %v1219_v27 = vmul.f32 %v1187_v2, %v1091_v52  ;;  %v1086_v14 = vmul.f32 0.5, %v4504_v12 }
 0x2d8   : > { %v3470_v38 = vpop.eup %3469  ;;  %v1224_v42 = vmul.f32 %v1192_v54, %v1096_v44  ;;  %v1182_v48 = vadd.f32 1.0, %v3468_v5  ;;  %v1239_v31 = vpack.c.bf16 %v1223_v43, %v1221_v36  ;;  %v1216_v8 = vmul.f32 %v1184_v0, %v1088_v40 }
 0x2d9   : > { %v3472_v28 = vpop.eup %3471  ;;  %v1183_v33 = vadd.f32 1.0, %v3470_v38  ;;  %v1238_v21 = vpack.c.bf16 %v1220_v13, %v1218_v58  ;;  %v1087_v51 = vmul.f32 0.5, %v4509_v11  ;;  %v1217_v24 = vmul.f32 %v1185_v4, %v1089_v17 }
 0x2da   : > { %v3474_v22 = vpop.eup %3473  ;;  %v1240_v56 = vpack.c.bf16 %v1224_v42, %v1222_v32  ;;  %v1180_v15 = vadd.f32 1.0, %v3472_v28  ;;  %v1084_v54 = vmul.f32 0.5, %v4513_v16  ;;  %v1214_v34 = vmul.f32 %v1182_v48, %v1086_v14 }
 0x2db   : > { %v3476_v47 = vpop.eup %3475  ;;  %v1181_v50 = vadd.f32 1.0, %v3474_v22  ;;  %v1085_v2 = vmul.f32 0.5, %v4520_v23  ;;  %v1215_v12 = vmul.f32 %v1183_v33, %v1087_v51  ;;  %v1237_v40 = vpack.c.bf16 %v1219_v27, %v1217_v24 }
 0x2dc   : > { %v3478_v26 = vpop.eup %3477  ;;  %1353 = vmatprep.subr.bf16.mxu1 %v1240_v56  ;;  %v1178_v44 = vadd.f32 1.0, %v3476_v47  ;;  %v1082_v38 = vmul.f32 0.5, %v4524_v61  ;;  %v1212_v0 = vmul.f32 %v1180_v15, %v1084_v54  ;;  %v1236_v11 = vpack.c.bf16 %v1216_v8, %v1214_v34 }
 0x2dd   : > { %v3480_v20 = vpop.eup %3479  ;;  %1354 = vmatpush1.bf16.msra.mxu1 %v1239_v31  ;;  %v1179_v45 = vadd.f32 1.0, %v3478_v26  ;;  %v1083_v47 = vmul.f32 0.5, %v4532_v19  ;;  %v1213_v42 = vmul.f32 %v1181_v50, %v1085_v2  ;;  %v1080_v4 = vmul.f32 0.5, %v4537_v41 }
 0x2de   : > { %v3482_v30 = vpop.eup %3481  ;;  %1355 = vmatprep.subr.bf16.mxu1 %v1238_v21  ;;  %v1176_v43 = vadd.f32 1.0, %v3480_v20  ;;  %v1210_v52 = vmul.f32 %v1178_v44, %v1082_v38  ;;  %v1081_v36 = vmul.f32 0.5, %v4542_v63  ;;  %v1078_v58 = vmul.f32 0.5, %v4547_v18 }
 0x2df   : > { %v3484_v5 = vpop.eup %3483  ;;  %v1177_v32 = vadd.f32 1.0, %v3482_v30  ;;  %v1211_v22 = vmul.f32 %v1179_v45, %v1083_v47  ;;  %v1235_v48 = vpack.c.bf16 %v1215_v12, %v1213_v42  ;;  %v1079_v19 = vmul.f32 0.5, %v4556_v62  ;;  %v3342_v45 = vld [vmem:[#allocation5 + $0x48] sm:$0xff]  }
 0x2e0   : > { %v3486_v3 = vpop.eup %3485  ;;  %v1174_v28 = vadd.f32 1.0, %v3484_v5  ;;  %v1208_v56 = vmul.f32 %v1176_v43, %v1080_v4  ;;  %v1234_v33 = vpack.c.bf16 %v1212_v0, %v1210_v52  ;;  %v1170_v41 = vadd.f32 1.0, %v4559_v53 }
 0x2e1   : > { %v3488_v13 = vpop.eup %3487  ;;  %1356 = vmatpush1.bf16.msra.mxu1 %v1237_v40  ;;  %v1175_v23 = vadd.f32 1.0, %v3486_v3  ;;  %v1209_v27 = vmul.f32 %v1177_v32, %v1081_v36  ;;  %v1076_v26 = vmul.f32 0.5, %v4563_v55  ;;  %v1171_v63 = vadd.f32 1.0, %v4566_v39  ;;  %v5452_v36 = vld [vmem:[#allocation38_spill] sm:$0xff] }
 0x2e2   : > { %v3490_v16 = vpop.eup %3489  ;;  %1357 = vmatprep.subr.bf16.mxu1 %v1236_v11  ;;  %v1172_v61 = vadd.f32 1.0, %v3488_v13  ;;  %v1206_v15 = vmul.f32 %v1174_v28, %v1078_v58  ;;  %v1077_v14 = vmul.f32 0.5, %v4570_v60  ;;  %v1074_v21 = vmul.f32 0.5, %v4463_v1  ;;  %v5450_v11 = vld [vmem:[#allocation41_spill] sm:$0xff] }
 0x2e3   : > { %v1173_v17 = vadd.f32 1.0, %v3490_v16  ;;  %v3492_v31 = vpop.eup %3491  ;;  %v1207_v8 = vmul.f32 %v1175_v23, %v1079_v19  ;;  %v1233_v18 = vpack.c.bf16 %v1211_v22, %v1209_v27  ;;  %v1075_v51 = vmul.f32 0.5, %v4466_v6 }
 0x2e4   : > { %v1204_v20 = vmul.f32 %v1172_v61, %v1076_v26  ;;  %v1232_v50 = vpack.c.bf16 %v1208_v56, %v1206_v15  ;;  %v1169_v62 = vadd.f32 1.0, %v3492_v31  ;;  %v1202_v53 = vmul.f32 %v1170_v41, %v1074_v21  ;;  %v5454_v26 = vld [vmem:[#allocation34_spill] sm:$0xff]  ;;  %v5455_v21 = vld [vmem:[#allocation29_spill] sm:$0xff] }
 0x2e5   : > { %1358 = vmatpush1.bf16.msra.mxu1 %v1235_v48  ;;  %v1205_v24 = vmul.f32 %v1173_v17, %v1077_v14  ;;  %v1073_v55 = vmul.f32 0.5, %v4580_v7  ;;  %v1203_v30 = vmul.f32 %v1171_v63, %v1075_v51  ;;  %v5446_v1 = vpack.c.bf16 %v4452_v35, %v4450_v29  ;;  %v3341_v7 = vld [vmem:[#allocation5 + $0x40] sm:$0xff]   ;;  %v3343_v35 = vld [vmem:[#allocation5 + $0x50] sm:$0xff]   ;;  %v3344_v29 = vld [vmem:[#allocation5 + $0x58] sm:$0xff]  }
 0x2e6   : > { %1359 = vmatprep.subr.bf16.mxu1 %v1234_v33  ;;  %v1230_v39 = vpack.c.bf16 %v1204_v20, %v1202_v53  ;;  %v5447_v6 = vpack.c.bf16 %v4446_v57, %v4448_v49  ;;  %v5448_v34 = vpack.c.bf16 %v4432_v10, %v4434_v9  ;;  %v5449_v5 = vpack.c.bf16 %v4426_v59, %v4428_v37  ;;  %v3345_v10 = vld [vmem:[#allocation5 + $0x60] sm:$0xff]   ;;  %v3346_v59 = vld [vmem:[#allocation5 + $0x68] sm:$0xff]   ;;  %v3347_v37 = vld [vmem:[#allocation5 + $0x70] sm:$0xff]  }
 0x2e7   : > { %v1231_v44 = vpack.c.bf16 %v1207_v8, %v1205_v24  ;;  %v1201_v54 = vmul.f32 %v1169_v62, %v1073_v55  ;;  %v3348_v9 = vld [vmem:[#allocation5 + $0x78] sm:$0xff]   ;;  %v5453_v33 = vld [vmem:[#allocation33_spill] sm:$0xff] }
 0x2e8   : > { %v5456_v53 = vld [vmem:[#allocation30_spill] sm:$0xff] }
 0x2e9   : > { %1360 = vmatpush1.bf16.msra.mxu1 %v1233_v18  ;;  %v1229_v60 = vpack.c.bf16 %v1203_v30, %v1201_v54 }
 0x2ea   : > { %1361 = vmatprep.subr.bf16.mxu1 %v1232_v50 }
 0x2ed   : > { %1362 = vmatpush1.bf16.msra.mxu1 %v1231_v44 }
 0x2ee   : > { %1363 = vmatprep.subr.bf16.mxu1 %v1230_v39 }
 0x2f1   : > { %1364 = vmatpush1.bf16.msra.mxu1 %v1229_v60  ;;  %v5457_v60 = vld [vmem:[#allocation25_spill] sm:$0xff] }
 0x2f2   : > { %1365 = vmatprep.subr.bf16.mxu1 %v5446_v1 }
 0x2f5   : > { %1366 = vmatpush1.bf16.msra.mxu1 %v5447_v6 }
 0x2f6   : > { %1367 = vmatprep.subr.bf16.mxu1 %v5448_v34 }
 0x2f9   : > { %1368 = vmatpush1.bf16.msra.mxu1 %v5449_v5 }
 0x2fc   : > { %1386 = vmatmul.mubr.bf16.vlgmr.msra.gmra.mxu1 %v3341_v7 }
 0x2fd   : > { %1395 = vmatprep.mubr.bf16.mxu1 %v5445_v25 }
 0x304   : > { %1396 = vmatmul.mubr.bf16.gmra.mxu1 %v3342_v45  ;;  %v5458_v45 = vld [vmem:[#allocation26_spill] sm:$0xff] }
 0x305   : > { %1405 = vmatprep.mubr.bf16.mxu1 %v5445_v25 }
 0x30c   : > { %1406 = vmatmul.mubr.bf16.gmra.mxu1 %v3343_v35 }
 0x30d   : > { %1415 = vmatprep.mubr.bf16.mxu1 %v5445_v25 }
 0x314   : > { %1416 = vmatmul.mubr.bf16.gmra.mxu1 %v3344_v29 }
 0x315   : > { %1425 = vmatprep.mubr.bf16.mxu1 %v5445_v25 }
 0x31c   : > { %1426 = vmatmul.mubr.bf16.gmra.mxu1 %v3345_v10 }
 0x31d   : > { %1435 = vmatprep.mubr.bf16.mxu1 %v5445_v25 }
 0x323   : > { %v4637_v57 = vpop.permute.xlu1 %1242  ;;  %v4642_v40 = vpop.permute.xlu0 %1246 }
 0x324   : > { %1436 = vmatmul.mubr.bf16.gmra.mxu1 %v3346_v59 }
 0x325   : > { %1445 = vmatprep.mubr.bf16.mxu1 %v5445_v25 }
 0x327   : > { %v4672_v48 = vpop.permute.xlu0 %1258 }
 0x32b   : > { %v4690_v63 = vpop.permute.xlu0 %1266 }
 0x32c   : > { %1446 = vmatmul.mubr.bf16.gmra.mxu1 %v3347_v37 }
 0x32d   : > { %1455 = vmatprep.mubr.bf16.mxu1 %v5445_v25  ;;  %v4649_v25 = vpop.permute.xlu1 %1250 }
 0x32f   : > { %v4708_v30 = vpop.permute.xlu0 %1274 }
 0x331   : > { %v4663_v28 = vpop.permute.xlu1 %1254 }
 0x333   : > { %v1283_v29 = vpop.permute.xlu0 %1282 }
 0x334   : > { %1456 = vmatmul.mubr.bf16.gmra.mxu1 %v3348_v9  ;;  %v5459_v9 = vld [vmem:[#allocation21_spill] sm:$0xff] }
 0x335   : > { %v4681_v19 = vpop.permute.xlu1 %1262 }
 0x339   : > { %v4699_v50 = vpop.permute.xlu1 %1270 }
 0x33d   : > { %v4717_v6 = vpop.permute.xlu1 %1278 }
 0x3bc   : > { %v1387_v49 = vpop.f32.mrf.mxu1 }
 0x3bd   : > { %v1388_v2 = vadd.f32 %v1387_v49, %v4637_v57 }
 0x3be   : > { %v4640_v12 = vpop.f32.mrf.mxu1 }
 0x3bf   : > { %v4645_v3 = vadd.f32 %v4028_v46, %v1388_v2  ;;  %v5451_v46 = vld [vmem:[#allocation37_spill] sm:$0xff]  ;;  %v1287_v2 = vpop.permute.xlu1 %1286 }
 0x3c0   : > { %v1391_v43 = vpop.f32.mrf.mxu1 }
 0x3c1   : > { %v1392_v38 = vadd.f32 %v1391_v43, %v4642_v40  ;;  %1498 = vadd.xlane.f32.xlu0 %v4645_v3 }
 0x3c2   : > { %v4651_v0 = vpop.f32.mrf.mxu1 }
 0x3c3   : > { %v4654_v13 = vadd.f32 %v5450_v11, %v1392_v38 }
 0x3c4   : > { %v1397_v32 = vpop.f32.mrf.mxu1 }
 0x3c5   : > { %v1398_v47 = vadd.f32 %v1397_v32, %v4649_v25  ;;  %1500 = vadd.xlane.f32.xlu1 %v4654_v13  ;;  %v5460_v32 = vld [vmem:[#allocation22_spill] sm:$0xff] }
 0x3c6   : > { %v4658_v42 = vpop.f32.mrf.mxu1 }
 0x3c7   : > { %v4661_v16 = vadd.f32 %v5451_v46, %v1398_v47  ;;  %v1291_v46 = vpop.permute.xlu0 %1290 }
 0x3c8   : > { %v1401_v4 = vpop.f32.mrf.mxu1 }
 0x3c9   : > { %v1402_v52 = vadd.f32 %v1401_v4, %v4663_v28  ;;  %1502 = vadd.xlane.f32.xlu0 %v4661_v16 }
 0x3ca   : > { %v4667_v23 = vpop.f32.mrf.mxu1 }
 0x3cb   : > { %v4670_v22 = vadd.f32 %v5452_v36, %v1402_v52 }
 0x3cc   : > { %v1407_v61 = vpop.f32.mrf.mxu1 }
 0x3cd   : > { %v1408_v58 = vadd.f32 %v1407_v61, %v4672_v48  ;;  %1504 = vadd.xlane.f32.xlu0 %v4670_v22  ;;  %v5461_v61 = vld [vmem:[#allocation17_spill] sm:$0xff] }
 0x3ce   : > { %v4676_v56 = vpop.f32.mrf.mxu1 }
 0x3cf   : > { %v4679_v17 = vadd.f32 %v5453_v33, %v1408_v58  ;;  %v1295_v33 = vpop.permute.xlu1 %1294 }
 0x3d0   : > { %v1411_v27 = vpop.f32.mrf.mxu1 }
 0x3d1   : > { %v1412_v31 = vadd.f32 %v1411_v27, %v4681_v19  ;;  %1506 = vadd.xlane.f32.xlu1 %v4679_v17 }
 0x3d2   : > { %v4685_v41 = vpop.f32.mrf.mxu1 }
 0x3d3   : > { %v4688_v15 = vadd.f32 %v5454_v26, %v1412_v31 }
 0x3d4   : > { %v1417_v14 = vpop.f32.mrf.mxu1 }
 0x3d5   : > { %v1418_v8 = vadd.f32 %v1417_v14, %v4690_v63  ;;  %1508 = vadd.xlane.f32.xlu0 %v4688_v15  ;;  %v5463_v14 = vld [vmem:[#allocation18_spill] sm:$0xff] }
 0x3d6   : > { %v4694_v18 = vpop.f32.mrf.mxu1 }
 0x3d7   : > { %v4697_v20 = vadd.f32 %v5455_v21, %v1418_v8  ;;  %v1299_v21 = vpop.permute.xlu0 %1298 }
 0x3d8   : > { %v1421_v62 = vpop.f32.mrf.mxu1 }
 0x3d9   : > { %v1422_v51 = vadd.f32 %v1421_v62, %v4699_v50  ;;  %1510 = vadd.xlane.f32.xlu1 %v4697_v20 }
 0x3da   : > { %v4703_v24 = vpop.f32.mrf.mxu1 }
 0x3db   : > { %v4706_v55 = vadd.f32 %v5456_v53, %v1422_v51 }
 0x3dc   : > { %v1427_v44 = vpop.f32.mrf.mxu1 }
 0x3dd   : > { %v1428_v39 = vadd.f32 %v1427_v44, %v4708_v30  ;;  %1512 = vadd.xlane.f32.xlu0 %v4706_v55  ;;  %v1390_v44 = vadd.f32 %v4640_v12, %v4637_v57  ;;  %v5470_v57 = vld [vmem:[#allocation40_spill] sm:$0xff] }
 0x3de   : > { %v4712_v54 = vpop.f32.mrf.mxu1 }
 0x3df   : > { %v4715_v1 = vadd.f32 %v5457_v60, %v1428_v39  ;;  %v5465_v39 = vld [vmem:[#allocation12_spill] sm:$0xff] }
 0x3e0   : > { %v1431_v34 = vpop.f32.mrf.mxu1 }
 0x3e1   : > { %v1432_v7 = vadd.f32 %v1431_v34, %v4717_v6  ;;  %1514 = vadd.xlane.f32.xlu1 %v4715_v1  ;;  %v1303_v34 = vpop.permute.xlu1 %1302 }
 0x3e2   : > { %v4721_v5 = vpop.f32.mrf.mxu1 }
 0x3e3   : > { %v4724_v35 = vadd.f32 %v5458_v45, %v1432_v7 }
 0x3e4   : > { %v1437_v10 = vpop.f32.mrf.mxu1 }
 0x3e5   : > { %v1438_v59 = vadd.f32 %v1437_v10, %v1283_v29  ;;  %1516 = vadd.xlane.f32.xlu0 %v4724_v35  ;;  %v5466_v10 = vld [vmem:[#allocation39_spill] sm:$0xff] }
 0x3e6   : > { %v1439_v37 = vpop.f32.mrf.mxu1 }
 0x3e7   : > { %v4728_v49 = vadd.f32 %v5459_v9, %v1438_v59  ;;  %v4750_v59 = vadd.f32 %v5466_v10, %v1390_v44  ;;  %v1394_v9 = vadd.f32 %v4651_v0, %v4642_v40  ;;  %v1410_v40 = vadd.f32 %v4676_v56, %v4672_v48  ;;  %v5480_v48 = vld [vmem:[#allocation27_spill] sm:$0xff]  ;;  %v5490_v10 = vld [vmem:[#allocation20_spill] sm:$0xff] }
 0x3e8   : > { %v1441_v43 = vpop.f32.mrf.mxu1  ;;  %v1434_v44 = vadd.f32 %v4721_v5, %v4717_v6  ;;  %v5492_v6 = vld [vmem:[#allocation15_spill] sm:$0xff] }
 0x3e9   : > { %v1442_v38 = vadd.f32 %v1441_v43, %v1287_v2  ;;  %1518 = vadd.xlane.f32.xlu1 %v4728_v49  ;;  %5467 = vst [vmem:[#allocation38_spill] sm:$0xff] %v4750_v59  ;;  %v1400_v43 = vadd.f32 %v4658_v42, %v4649_v25  ;;  %v4762_v12 = vadd.f32 %v5470_v57, %v1394_v9  ;;  %v5474_v25 = vld [vmem:[#allocation36_spill] sm:$0xff]  ;;  %v5476_v42 = vld [vmem:[#allocation31_spill] sm:$0xff]  ;;  %v5498_v57 = vld [vmem:[#allocation13_spill] sm:$0xff] }
 0x3ea   : > { %v1443_v11 = vpop.f32.mrf.mxu1 }
 0x3eb   : > { %v4732_v47 = vadd.f32 %v5460_v32, %v1442_v38  ;;  %v5468_v38 = vld [vmem:[#allocation14_spill] sm:$0xff]  ;;  %5471 = vst [vmem:[#allocation34_spill] sm:$0xff] %v4762_v12 }
 0x3ec   : > { %v1447_v4 = vpop.f32.mrf.mxu1 }
 0x3ed   : > { %v1448_v52 = vadd.f32 %v1447_v4, %v1291_v46  ;;  %1520 = vadd.xlane.f32.xlu0 %v4732_v47  ;;  %v5472_v4 = vld [vmem:[#allocation35_spill] sm:$0xff] }
 0x3ee   : > { %v1449_v36 = vpop.f32.mrf.mxu1 }
 0x3ef   : > { %v4736_v58 = vadd.f32 %v5461_v61, %v1448_v52  ;;  %v4765_v52 = vadd.f32 %v5472_v4, %v1400_v43  ;;  %v1404_v61 = vadd.f32 %v4667_v23, %v4663_v28  ;;  %v5478_v28 = vld [vmem:[#allocation32_spill] sm:$0xff] }
 0x3f0   : > { %v1451_v27 = vpop.f32.mrf.mxu1 }
 0x3f1   : > { %5462 = vst [vmem:[#allocation41_spill] sm:$0xff] %v4736_v58  ;;  %v1452_v31 = vadd.f32 %v1451_v27, %v1295_v33  ;;  %1522 = vadd.xlane.f32.xlu1 %v4736_v58  ;;  %5473 = vst [vmem:[#allocation29_spill] sm:$0xff] %v4765_v52  ;;  %v4774_v0 = vadd.f32 %v5474_v25, %v1404_v61  ;;  %v4777_v27 = vadd.f32 %v5476_v42, %v1410_v40 }
 0x3f2   : > { %v1453_v26 = vpop.f32.mrf.mxu1 }
 0x3f3   : > { %v4740_v8 = vadd.f32 %v5463_v14, %v1452_v31  ;;  %5475 = vst [vmem:[#allocation30_spill] sm:$0xff] %v4774_v0  ;;  %5477 = vst [vmem:[#allocation25_spill] sm:$0xff] %v4777_v27  ;;  %v1414_v31 = vadd.f32 %v4685_v41, %v4681_v19  ;;  %v1420_v14 = vadd.f32 %v4694_v18, %v4690_v63  ;;  %v5482_v19 = vld [vmem:[#allocation28_spill] sm:$0xff]  ;;  %v5484_v63 = vld [vmem:[#allocation23_spill] sm:$0xff] }
 0x3f4   : > { %v1457_v62 = vpop.f32.mrf.mxu1 }
 0x3f5   : > { %5464 = vst [vmem:[#allocation37_spill] sm:$0xff] %v4740_v8  ;;  %v1458_v51 = vadd.f32 %v1457_v62, %v1299_v21  ;;  %1524 = vadd.xlane.f32.xlu0 %v4740_v8  ;;  %v4786_v23 = vadd.f32 %v5478_v28, %v1414_v31  ;;  %v4789_v56 = vadd.f32 %v5480_v48, %v1420_v14 }
 0x3f6   : > { %v1459_v53 = vpop.f32.mrf.mxu1  ;;  %v1424_v62 = vadd.f32 %v4703_v24, %v4699_v50  ;;  %v5486_v50 = vld [vmem:[#allocation24_spill] sm:$0xff] }
 0x3f7   : > { %v4746_v60 = vadd.f32 %v5465_v39, %v1458_v51  ;;  %5479 = vst [vmem:[#allocation26_spill] sm:$0xff] %v4786_v23  ;;  %5481 = vst [vmem:[#allocation21_spill] sm:$0xff] %v4789_v56  ;;  %v1430_v51 = vadd.f32 %v4712_v54, %v4708_v30  ;;  %v1440_v39 = vadd.f32 %v1439_v37, %v1283_v29  ;;  %v5488_v30 = vld [vmem:[#allocation19_spill] sm:$0xff] }
 0x3f8   : > { %v1461_v7 = vpop.f32.mrf.mxu1  ;;  %v4798_v41 = vadd.f32 %v5482_v19, %v1424_v62  ;;  %v4808_v24 = vadd.f32 %v5486_v50, %v1434_v44  ;;  %v1454_v29 = vadd.f32 %v1453_v26, %v1295_v33  ;;  %v1460_v37 = vadd.f32 %v1459_v53, %v1299_v21  ;;  %v3349_v33 = vld [vmem:[#allocation5 + $0xb8] sm:$0xff]  }
 0x3f9   : > { %v1462_v45 = vadd.f32 %v1461_v7, %v1303_v34  ;;  %1526 = vadd.xlane.f32.xlu1 %v4746_v60  ;;  %v4801_v18 = vadd.f32 %v5484_v63, %v1430_v51  ;;  %v4811_v54 = vadd.f32 %v5488_v30, %v1440_v39  ;;  %v1444_v7 = vadd.f32 %v1443_v11, %v1287_v2  ;;  %v5496_v11 = vld [vmem:[#allocation11_spill] sm:$0xff] }
 0x3fa   : > { %5483 = vst [vmem:[#allocation22_spill] sm:$0xff] %v4798_v41  ;;  %5487 = vst [vmem:[#allocation18_spill] sm:$0xff] %v4808_v24  ;;  %v1463_v43 = vpop.f32.mrf.mxu1  ;;  %3170 = vmatprep.subr.bf16.mxu0 %v3349_v33 }
 0x3fb   : > { %v4757_v32 = vadd.f32 %v5468_v38, %v1462_v45  ;;  %5485 = vst [vmem:[#allocation17_spill] sm:$0xff] %v4801_v18  ;;  %5489 = vst [vmem:[#allocation12_spill] sm:$0xff] %v4811_v54  ;;  %v1450_v45 = vadd.f32 %v1449_v36, %v1291_v46  ;;  %v4816_v9 = vadd.f32 %v5490_v10, %v1444_v7  ;;  %v5494_v38 = vld [vmem:[#allocation16_spill] sm:$0xff]  ;;  %3171 = vmatpush3.bf16.msra.mxu0 %v3349_v33 }
 0x3fc   : > { %v4824_v2 = vadd.f32 %v5494_v38, %v1454_v29  ;;  %v4827_v46 = vadd.f32 %v5496_v11, %v1460_v37  ;;  %v1464_v36 = vadd.f32 %v1463_v43, %v1303_v34  ;;  %v3350_v43 = vld [vmem:[#allocation5 + $0xb0] sm:$0xff]   ;;  %v3351_v33 = vld [vmem:[#allocation5 + $0xa8] sm:$0xff]  }
 0x3fd   : > { %5469 = vst [vmem:[#allocation33_spill] sm:$0xff] %v4757_v32  ;;  %1528 = vadd.xlane.f32.xlu0 %v4757_v32  ;;  %1530 = vadd.xlane.f32.xlu1 %v4750_v59  ;;  %5491 = vst [vmem:[#allocation39_spill] sm:$0xff] %v4816_v9  ;;  %v4819_v5 = vadd.f32 %v5492_v6, %v1450_v45 }
 0x3fe   : > { %5495 = vst [vmem:[#allocation40_spill] sm:$0xff] %v4824_v2  ;;  %5497 = vst [vmem:[#allocation35_spill] sm:$0xff] %v4827_v46  ;;  %v4832_v4 = vadd.f32 %v5498_v57, %v1464_v36  ;;  %3172 = vmatprep.subr.bf16.mxu0 %v3350_v43 }
 0x3ff   : > { %5493 = vst [vmem:[#allocation14_spill] sm:$0xff] %v4819_v5  ;;  %3173 = vmatpush3.bf16.msra.mxu0 %v3350_v43 }
 0x400   : > { %5499 = vst [vmem:[#allocation36_spill] sm:$0xff] %v4832_v4  ;;  %3174 = vmatprep.subr.bf16.mxu0 %v3351_v33 }
 0x401   : > { %1532 = vadd.xlane.f32.xlu0 %v4762_v12  ;;  %1534 = vadd.xlane.f32.xlu1 %v4765_v52 }
 0x403   : > { %3175 = vmatpush3.bf16.msra.mxu0 %v3351_v33  ;;  %v3356_v33 = vld [vmem:[#allocation5 + $0x80] sm:$0xff]  }
 0x405   : > { %1536 = vadd.xlane.f32.xlu0 %v4774_v0  ;;  %1538 = vadd.xlane.f32.xlu1 %v4777_v27 }
 0x409   : > { %1540 = vadd.xlane.f32.xlu0 %v4786_v23  ;;  %1542 = vadd.xlane.f32.xlu1 %v4789_v56 }
 0x40d   : > { %1544 = vadd.xlane.f32.xlu0 %v4798_v41  ;;  %1546 = vadd.xlane.f32.xlu1 %v4801_v18 }
 0x411   : > { %1548 = vadd.xlane.f32.xlu0 %v4808_v24  ;;  %1550 = vadd.xlane.f32.xlu1 %v4811_v54 }
 0x415   : > { %1552 = vadd.xlane.f32.xlu0 %v4816_v9  ;;  %1554 = vadd.xlane.f32.xlu1 %v4819_v5 }
 0x419   : > { %1556 = vadd.xlane.f32.xlu0 %v4824_v2  ;;  %1558 = vadd.xlane.f32.xlu1 %v4827_v46 }
 0x41d   : > { %1560 = vadd.xlane.f32.xlu0 %v4832_v4 }
 0x44a   : > { %v1499_v26 = vpop.xlane.xlu0 %1498 }
 0x44b   : > { %v1562_v21 = vmul.f32 0.0078125, %v1499_v26 }
 0x44d   : > { %v4836_v53 = vsub.f32 %v4645_v3, %v1562_v21 }
 0x44e   : > { %v1501_v61 = vpop.xlane.xlu1 %1500 }
 0x44f   : > { %v1563_v40 = vmul.f32 0.0078125, %v1501_v61  ;;  %v1626_v34 = vmul.f32 %v4836_v53, %v4836_v53 }
 0x451   : > { %v4841_v25 = vsub.f32 %v4654_v13, %v1563_v40  ;;  %1658 = vadd.xlane.f32.xlu1 %v1626_v34  ;;  %v3352_v34 = vld [vmem:[#allocation5 + $0xa0] sm:$0xff]  }
 0x452   : > { %v1503_v42 = vpop.xlane.xlu0 %1502  ;;  %3176 = vmatprep.subr.bf16.mxu0 %v3352_v34 }
 0x453   : > { %v1564_v31 = vmul.f32 0.0078125, %v1503_v42  ;;  %v1627_v14 = vmul.f32 %v4841_v25, %v4841_v25  ;;  %3177 = vmatpush3.bf16.msra.mxu0 %v3352_v34 }
 0x455   : > { %v4846_v28 = vsub.f32 %v4661_v16, %v1564_v31  ;;  %1660 = vadd.xlane.f32.xlu0 %v1627_v14 }
 0x456   : > { %v1505_v48 = vpop.xlane.xlu0 %1504 }
 0x457   : > { %v1565_v62 = vmul.f32 0.0078125, %v1505_v48  ;;  %v1628_v51 = vmul.f32 %v4846_v28, %v4846_v28 }
 0x459   : > { %v4851_v19 = vsub.f32 %v4670_v22, %v1565_v62  ;;  %1662 = vadd.xlane.f32.xlu1 %v1628_v51  ;;  %v3353_v62 = vld [vmem:[#allocation5 + $0x98] sm:$0xff]  }
 0x45a   : > { %v1507_v63 = vpop.xlane.xlu1 %1506  ;;  %3178 = vmatprep.subr.bf16.mxu0 %v3353_v62 }
 0x45b   : > { %v1566_v44 = vmul.f32 0.0078125, %v1507_v63  ;;  %v1629_v39 = vmul.f32 %v4851_v19, %v4851_v19  ;;  %3179 = vmatpush3.bf16.msra.mxu0 %v3353_v62 }
 0x45d   : > { %v4856_v50 = vsub.f32 %v4679_v17, %v1566_v44  ;;  %1664 = vadd.xlane.f32.xlu0 %v1629_v39 }
 0x45e   : > { %v1509_v30 = vpop.xlane.xlu0 %1508 }
 0x45f   : > { %v1567_v7 = vmul.f32 0.0078125, %v1509_v30  ;;  %v1630_v45 = vmul.f32 %v4856_v50, %v4856_v50  ;;  %v3354_v30 = vld [vmem:[#allocation5 + $0x90] sm:$0xff]  }
 0x460   : > { %3180 = vmatprep.subr.bf16.mxu0 %v3354_v30 }
 0x461   : > { %v4861_v10 = vsub.f32 %v4688_v15, %v1567_v7  ;;  %1666 = vadd.xlane.f32.xlu1 %v1630_v45  ;;  %3181 = vmatpush3.bf16.msra.mxu0 %v3354_v30 }
 0x462   : > { %v1511_v6 = vpop.xlane.xlu1 %1510 }
 0x463   : > { %v1568_v29 = vmul.f32 0.0078125, %v1511_v6  ;;  %v1631_v37 = vmul.f32 %v4861_v10, %v4861_v10 }
 0x465   : > { %v4866_v38 = vsub.f32 %v4697_v20, %v1568_v29  ;;  %1668 = vadd.xlane.f32.xlu0 %v1631_v37  ;;  %v3355_v37 = vld [vmem:[#allocation5 + $0x88] sm:$0xff]  }
 0x466   : > { %v1513_v11 = vpop.xlane.xlu0 %1512  ;;  %3182 = vmatprep.subr.bf16.mxu0 %v3355_v37 }
 0x467   : > { %v1569_v36 = vmul.f32 0.0078125, %v1513_v11  ;;  %v1632_v57 = vmul.f32 %v4866_v38, %v4866_v38  ;;  %3183 = vmatpush3.bf16.msra.mxu0 %v3355_v37 }
 0x468   : > { %3184 = vmatprep.subr.bf16.mxu0 %v3356_v33 }
 0x469   : > { %v4871_v26 = vsub.f32 %v4706_v55, %v1569_v36  ;;  %1670 = vadd.xlane.f32.xlu1 %v1632_v57 }
 0x46a   : > { %v1515_v21 = vpop.xlane.xlu1 %1514 }
 0x46b   : > { %v1570_v61 = vmul.f32 0.0078125, %v1515_v21  ;;  %v1633_v40 = vmul.f32 %v4871_v26, %v4871_v26  ;;  %3185 = vmatpush3.bf16.msra.mxu0 %v3356_v33 }
 0x46d   : > { %v4876_v42 = vsub.f32 %v4715_v1, %v1570_v61  ;;  %1672 = vadd.xlane.f32.xlu0 %v1633_v40 }
 0x46e   : > { %v1517_v31 = vpop.xlane.xlu0 %1516 }
 0x46f   : > { %v1571_v14 = vmul.f32 0.0078125, %v1517_v31  ;;  %v1634_v48 = vmul.f32 %v4876_v42, %v4876_v42 }
 0x471   : > { %v4881_v51 = vsub.f32 %v4724_v35, %v1571_v14  ;;  %1674 = vadd.xlane.f32.xlu1 %v1634_v48 }
 0x472   : > { %v1519_v63 = vpop.xlane.xlu1 %1518 }
 0x473   : > { %v1572_v44 = vmul.f32 0.0078125, %v1519_v63  ;;  %v1635_v39 = vmul.f32 %v4881_v51, %v4881_v51 }
 0x475   : > { %v4886_v7 = vsub.f32 %v4728_v49, %v1572_v44  ;;  %1676 = vadd.xlane.f32.xlu0 %v1635_v39 }
 0x476   : > { %v1521_v45 = vpop.xlane.xlu0 %1520 }
 0x477   : > { %v1573_v6 = vmul.f32 0.0078125, %v1521_v45  ;;  %v1636_v29 = vmul.f32 %v4886_v7, %v4886_v7 }
 0x479   : > { %v4891_v43 = vsub.f32 %v4732_v47, %v1573_v6  ;;  %1678 = vadd.xlane.f32.xlu1 %v1636_v29 }
 0x47a   : > { %v1523_v11 = vpop.xlane.xlu1 %1522 }
 0x47b   : > { %v1574_v36 = vmul.f32 0.0078125, %v1523_v11  ;;  %v1637_v57 = vmul.f32 %v4891_v43, %v4891_v43 }
 0x47d   : > { %v4896_v21 = vsub.f32 %v4736_v58, %v1574_v36  ;;  %1680 = vadd.xlane.f32.xlu0 %v1637_v57 }
 0x47e   : > { %v1525_v61 = vpop.xlane.xlu0 %1524 }
 0x47f   : > { %v1575_v40 = vmul.f32 0.0078125, %v1525_v61  ;;  %v1638_v34 = vmul.f32 %v4896_v21, %v4896_v21 }
 0x481   : > { %v4901_v31 = vsub.f32 %v4740_v8, %v1575_v40  ;;  %1682 = vadd.xlane.f32.xlu1 %v1638_v34 }
 0x482   : > { %v1527_v14 = vpop.xlane.xlu1 %1526 }
 0x483   : > { %v1576_v48 = vmul.f32 0.0078125, %v1527_v14  ;;  %v1639_v62 = vmul.f32 %v4901_v31, %v4901_v31 }
 0x485   : > { %v4906_v63 = vsub.f32 %v4746_v60, %v1576_v48  ;;  %1684 = vadd.xlane.f32.xlu0 %v1639_v62 }
 0x486   : > { %v1531_v44 = vpop.xlane.xlu1 %1530  ;;  %v1529_v39 = vpop.xlane.xlu0 %1528 }
 0x487   : > { %v1578_v30 = vmul.f32 0.0078125, %v1531_v44  ;;  %v1577_v45 = vmul.f32 0.0078125, %v1529_v39  ;;  %v1640_v6 = vmul.f32 %v4906_v63, %v4906_v63 }
 0x489   : > { %v4911_v29 = vsub.f32 %v4750_v59, %v1578_v30  ;;  %v4914_v37 = vsub.f32 %v4757_v32, %v1577_v45  ;;  %1686 = vadd.xlane.f32.xlu1 %v1640_v6 }
 0x48a   : > { %v1535_v11 = vpop.xlane.xlu1 %1534  ;;  %v1533_v36 = vpop.xlane.xlu0 %1532 }
 0x48b   : > { %v1580_v57 = vmul.f32 0.0078125, %v1535_v11  ;;  %v1579_v33 = vmul.f32 0.0078125, %v1533_v36  ;;  %v1642_v61 = vmul.f32 %v4911_v29, %v4911_v29  ;;  %v1641_v40 = vmul.f32 %v4914_v37, %v4914_v37 }
 0x48d   : > { %v4921_v34 = vsub.f32 %v4765_v52, %v1580_v57  ;;  %v4924_v14 = vsub.f32 %v4762_v12, %v1579_v33  ;;  %1690 = vadd.xlane.f32.xlu1 %v1642_v61  ;;  %1688 = vadd.xlane.f32.xlu0 %v1641_v40 }
 0x48e   : > { %v1539_v48 = vpop.xlane.xlu1 %1538  ;;  %v1537_v62 = vpop.xlane.xlu0 %1536 }
 0x48f   : > { %v1582_v44 = vmul.f32 0.0078125, %v1539_v48  ;;  %v1581_v39 = vmul.f32 0.0078125, %v1537_v62  ;;  %v1644_v30 = vmul.f32 %v4921_v34, %v4921_v34  ;;  %v1643_v45 = vmul.f32 %v4924_v14, %v4924_v14 }
 0x491   : > { %v4931_v6 = vsub.f32 %v4777_v27, %v1582_v44  ;;  %v4934_v11 = vsub.f32 %v4774_v0, %v1581_v39  ;;  %1694 = vadd.xlane.f32.xlu1 %v1644_v30  ;;  %1692 = vadd.xlane.f32.xlu0 %v1643_v45  ;;  %v5500_v0 = vld [vmem:[#allocation42_spill] sm:$0xff] }
 0x492   : > { %v1543_v36 = vpop.xlane.xlu1 %1542  ;;  %v1541_v57 = vpop.xlane.xlu0 %1540  ;;  %v1852_v52 = vsub.s32 2, %v5500_v0 }
 0x493   : > { %v1584_v33 = vmul.f32 0.0078125, %v1543_v36  ;;  %v1583_v61 = vmul.f32 0.0078125, %v1541_v57  ;;  %v1646_v40 = vmul.f32 %v4931_v6, %v4931_v6  ;;  %v1645_v48 = vmul.f32 %v4934_v11, %v4934_v11 }
 0x495   : > { %v4941_v62 = vsub.f32 %v4789_v56, %v1584_v33  ;;  %v4944_v44 = vsub.f32 %v4786_v23, %v1583_v61  ;;  %1698 = vadd.xlane.f32.xlu1 %v1646_v40  ;;  %1696 = vadd.xlane.f32.xlu0 %v1645_v48 }
 0x496   : > { %v1547_v39 = vpop.xlane.xlu1 %1546  ;;  %v1545_v30 = vpop.xlane.xlu0 %1544 }
 0x497   : > { %v1586_v45 = vmul.f32 0.0078125, %v1547_v39  ;;  %v1585_v27 = vmul.f32 0.0078125, %v1545_v30  ;;  %v1648_v36 = vmul.f32 %v4941_v62, %v4941_v62  ;;  %v1647_v57 = vmul.f32 %v4944_v44, %v4944_v44 }
 0x499   : > { %v4951_v12 = vsub.f32 %v4801_v18, %v1586_v45  ;;  %v4954_v33 = vsub.f32 %v4798_v41, %v1585_v27  ;;  %1702 = vadd.xlane.f32.xlu1 %v1648_v36  ;;  %1700 = vadd.xlane.f32.xlu0 %v1647_v57 }
 0x49a   : > { %v1551_v61 = vpop.xlane.xlu1 %1550  ;;  %v1549_v40 = vpop.xlane.xlu0 %1548 }
 0x49b   : > { %v1588_v48 = vmul.f32 0.0078125, %v1551_v61  ;;  %v1587_v23 = vmul.f32 0.0078125, %v1549_v40  ;;  %v1650_v39 = vmul.f32 %v4951_v12, %v4951_v12  ;;  %v1649_v30 = vmul.f32 %v4954_v33, %v4954_v33 }
 0x49d   : > { %v4961_v56 = vsub.f32 %v4811_v54, %v1588_v48  ;;  %v4964_v45 = vsub.f32 %v4808_v24, %v1587_v23  ;;  %1706 = vadd.xlane.f32.xlu1 %v1650_v39  ;;  %1704 = vadd.xlane.f32.xlu0 %v1649_v30 }
 0x49e   : > { %v1555_v27 = vpop.xlane.xlu1 %1554  ;;  %v1553_v36 = vpop.xlane.xlu0 %1552 }
 0x49f   : > { %v1590_v57 = vmul.f32 0.0078125, %v1555_v27  ;;  %v1589_v18 = vmul.f32 0.0078125, %v1553_v36  ;;  %v1652_v61 = vmul.f32 %v4961_v56, %v4961_v56  ;;  %v1651_v40 = vmul.f32 %v4964_v45, %v4964_v45 }
 0x4a1   : > { %v4971_v41 = vsub.f32 %v4819_v5, %v1590_v57  ;;  %v4974_v48 = vsub.f32 %v4816_v9, %v1589_v18  ;;  %1710 = vadd.xlane.f32.xlu1 %v1652_v61  ;;  %1708 = vadd.xlane.f32.xlu0 %v1651_v40 }
 0x4a2   : > { %v1559_v23 = vpop.xlane.xlu1 %1558  ;;  %v1557_v39 = vpop.xlane.xlu0 %1556 }
 0x4a3   : > { %v1592_v30 = vmul.f32 0.0078125, %v1559_v23  ;;  %v1591_v24 = vmul.f32 0.0078125, %v1557_v39  ;;  %v1654_v27 = vmul.f32 %v4971_v41, %v4971_v41  ;;  %v1653_v36 = vmul.f32 %v4974_v48, %v4974_v48 }
 0x4a5   : > { %v4981_v54 = vsub.f32 %v4827_v46, %v1592_v30  ;;  %v4984_v57 = vsub.f32 %v4824_v2, %v1591_v24  ;;  %1714 = vadd.xlane.f32.xlu1 %v1654_v27  ;;  %1712 = vadd.xlane.f32.xlu0 %v1653_v36  ;;  %v3357_v24 = vld [vmem:[#allocation5 + $0xf8] sm:$0xff]   ;;  %v3358_v27 = vld [vmem:[#allocation5 + $0xf0] sm:$0xff]  }
 0x4a6   : > { %v1561_v18 = vpop.xlane.xlu0 %1560  ;;  %3218 = vmatprep.subr.bf16.mxu1 %v3357_v24 }
 0x4a7   : > { %v1593_v61 = vmul.f32 0.0078125, %v1561_v18  ;;  %v1656_v40 = vmul.f32 %v4981_v54, %v4981_v54  ;;  %v1655_v23 = vmul.f32 %v4984_v57, %v4984_v57  ;;  %3219 = vmatpush3.bf16.msra.mxu1 %v3357_v24 }
 0x4a8   : > { %3220 = vmatprep.subr.bf16.mxu1 %v3358_v27 }
 0x4a9   : > { %v4991_v39 = vsub.f32 %v4832_v4, %v1593_v61  ;;  %1718 = vadd.xlane.f32.xlu1 %v1656_v40  ;;  %1716 = vadd.xlane.f32.xlu0 %v1655_v23 }
 0x4ab   : > { %v1657_v30 = vmul.f32 %v4991_v39, %v4991_v39  ;;  %3221 = vmatpush3.bf16.msra.mxu1 %v3358_v27 }
 0x4ad   : > { %1720 = vadd.xlane.f32.xlu0 %v1657_v30 }
 0x4da   : > { %v1659_v36 = vpop.xlane.xlu1 %1658 }
 0x4db   : > { %v1722_v18 = vmul.f32 0.0078125, %v1659_v36 }
 0x4dd   : > { %v1754_v2 = vadd.f32 1e-05, %v1722_v18 }
 0x4de   : > { %v1661_v5 = vpop.xlane.xlu0 %1660 }
 0x4df   : > { %3493 = vrsqrt.f32 %v1754_v2  ;;  %v1723_v46 = vmul.f32 0.0078125, %v1661_v5  ;;  %v5000_v5 = vld [vmem:[%s5341_s2] sm:$0x3f] }
 0x4e0   : > { %v5003_v2 = vrot.slane %v5000_v5, %v1852_v52 }
 0x4e1   : > { %v1755_v61 = vadd.f32 1e-05, %v1723_v46 }
 0x4e2   : > { %v1663_v4 = vpop.xlane.xlu1 %1662 }
 0x4e3   : > { %3495 = vrsqrt.f32 %v1755_v61  ;;  %v1724_v40 = vmul.f32 0.0078125, %v1663_v4 }
 0x4e5   : > { %v1756_v23 = vadd.f32 1e-05, %v1724_v40 }
 0x4e6   : > { %v1665_v9 = vpop.xlane.xlu0 %1664 }
 0x4e7   : > { %3497 = vrsqrt.f32 %v1756_v23  ;;  %v1725_v30 = vmul.f32 0.0078125, %v1665_v9  ;;  %v1888_v9 = vsub.s32 3, %v5500_v0 }
 0x4e9   : > { %v1757_v59 = vadd.f32 1e-05, %v1725_v30 }
 0x4ea   : > { %v1667_v24 = vpop.xlane.xlu1 %1666 }
 0x4eb   : > { %3499 = vrsqrt.f32 %v1757_v59  ;;  %v1726_v27 = vmul.f32 0.0078125, %v1667_v24 }
 0x4ec   : > { %v3494_v8 = vpop.eup %3493 }
 0x4ed   : > { %v1758_v36 = vadd.f32 1e-05, %v1726_v27  ;;  %v1818_v18 = vmul.f32 %v3494_v8, %v4836_v53  ;;  %v5009_v8 = vrot.slane %v5000_v5, %v1888_v9 }
 0x4ee   : > { %v1669_v46 = vpop.xlane.xlu0 %1668 }
 0x4ef   : > { %3501 = vrsqrt.f32 %v1758_v36  ;;  %v1727_v4 = vmul.f32 0.0078125, %v1669_v46  ;;  %v1854_v23 = vmul.f32 %v5003_v2, %v1818_v18 }
 0x4f0   : > { %v3496_v61 = vpop.eup %3495 }
 0x4f1   : > { %v1759_v59 = vadd.f32 1e-05, %v1727_v4  ;;  %v1819_v40 = vmul.f32 %v3496_v61, %v4841_v25  ;;  %v1890_v36 = vadd.f32 %v5009_v8, %v1854_v23 }
 0x4f2   : > { %v1671_v53 = vpop.xlane.xlu1 %1670 }
 0x4f3   : > { %3503 = vrsqrt.f32 %v1759_v59  ;;  %v1728_v30 = vmul.f32 0.0078125, %v1671_v53  ;;  %v1855_v52 = vmul.f32 %v5003_v2, %v1819_v40 }
 0x4f4   : > { %v3498_v24 = vpop.eup %3497 }
 0x4f5   : > { %v1820_v27 = vmul.f32 %v3498_v24, %v4846_v28  ;;  %v1760_v58 = vadd.f32 1e-05, %v1728_v30  ;;  %v1891_v46 = vadd.f32 %v5009_v8, %v1855_v52 }
 0x4f6   : > { %v1673_v4 = vpop.xlane.xlu0 %1672 }
 0x4f7   : > { %3505 = vrsqrt.f32 %v1760_v58  ;;  %v1729_v25 = vmul.f32 0.0078125, %v1673_v4  ;;  %v1922_v18 = vpack.c.bf16 %v1891_v46, %v1890_v36  ;;  %v1856_v59 = vmul.f32 %v5003_v2, %v1820_v27 }
 0x4f8   : > { %v3500_v61 = vpop.eup %3499 }
 0x4f9   : > { %v1821_v9 = vmul.f32 %v3500_v61, %v4851_v19  ;;  %v1761_v32 = vadd.f32 1e-05, %v1729_v25  ;;  %3186 = vmatprep.mubr.bf16.mxu0 %v1922_v18  ;;  %v1892_v52 = vadd.f32 %v5009_v8, %v1856_v59 }
 0x4fa   : > { %v1675_v40 = vpop.xlane.xlu1 %1674 }
 0x4fb   : > { %3507 = vrsqrt.f32 %v1761_v32  ;;  %v1730_v53 = vmul.f32 0.0078125, %v1675_v40  ;;  %v1857_v28 = vmul.f32 %v5003_v2, %v1821_v9 }
 0x4fc   : > { %v3502_v30 = vpop.eup %3501 }
 0x4fd   : > { %v1762_v23 = vadd.f32 1e-05, %v1730_v53  ;;  %v1893_v58 = vadd.f32 %v5009_v8, %v1857_v28  ;;  %v1822_v24 = vmul.f32 %v3502_v30, %v4856_v50 }
 0x4fe   : > { %v1677_v36 = vpop.xlane.xlu0 %1676 }
 0x4ff   : > { %3509 = vrsqrt.f32 %v1762_v23  ;;  %v1731_v19 = vmul.f32 0.0078125, %v1677_v36  ;;  %v1923_v46 = vpack.c.bf16 %v1893_v58, %v1892_v52  ;;  %v1858_v27 = vmul.f32 %v5003_v2, %v1822_v24 }
 0x500   : > { %v3504_v4 = vpop.eup %3503 }
 0x501   : > { %v1763_v25 = vadd.f32 1e-05, %v1731_v19  ;;  %3187 = vmatmul.mubr.bf16.vlgmr.msra.gmra.mxu0 %v1923_v46  ;;  %v1823_v32 = vmul.f32 %v3504_v4, %v4861_v10  ;;  %v1894_v50 = vadd.f32 %v5009_v8, %v1858_v27 }
 0x502   : > { %v1679_v18 = vpop.xlane.xlu1 %1678 }
 0x503   : > { %3511 = vrsqrt.f32 %v1763_v25  ;;  %v1732_v61 = vmul.f32 0.0078125, %v1679_v18  ;;  %v1859_v9 = vmul.f32 %v5003_v2, %v1823_v32 }
 0x504   : > { %v3506_v59 = vpop.eup %3505 }
 0x505   : > { %v1764_v40 = vadd.f32 1e-05, %v1732_v61  ;;  %v1895_v53 = vadd.f32 %v5009_v8, %v1859_v9  ;;  %v1824_v28 = vmul.f32 %v3506_v59, %v4866_v38 }
 0x506   : > { %v1681_v30 = vpop.xlane.xlu0 %1680 }
 0x507   : > { %3513 = vrsqrt.f32 %v1764_v40  ;;  %v1733_v23 = vmul.f32 0.0078125, %v1681_v30  ;;  %v1924_v52 = vpack.c.bf16 %v1895_v53, %v1894_v50  ;;  %v1860_v36 = vmul.f32 %v5003_v2, %v1824_v28 }
 0x508   : > { %v3508_v10 = vpop.eup %3507 }
 0x509   : > { %v1765_v58 = vadd.f32 1e-05, %v1733_v23  ;;  %3190 = vmatprep.mubr.bf16.mxu0 %v1924_v52  ;;  %v1825_v24 = vmul.f32 %v3508_v10, %v4871_v26  ;;  %v1896_v38 = vadd.f32 %v5009_v8, %v1860_v36 }
 0x50a   : > { %v1683_v19 = vpop.xlane.xlu1 %1682 }
 0x50b   : > { %3515 = vrsqrt.f32 %v1765_v58  ;;  %v1734_v46 = vmul.f32 0.0078125, %v1683_v19  ;;  %v1861_v4 = vmul.f32 %v5003_v2, %v1825_v24 }
 0x50c   : > { %v3510_v25 = vpop.eup %3509 }
 0x50d   : > { %v1766_v32 = vadd.f32 1e-05, %v1734_v46  ;;  %v1897_v27 = vadd.f32 %v5009_v8, %v1861_v4  ;;  %v1826_v18 = vmul.f32 %v3510_v25, %v4876_v42 }
 0x50e   : > { %v1685_v61 = vpop.xlane.xlu0 %1684 }
 0x50f   : > { %3517 = vrsqrt.f32 %v1766_v32  ;;  %v1735_v9 = vmul.f32 0.0078125, %v1685_v61  ;;  %v1925_v59 = vpack.c.bf16 %v1897_v27, %v1896_v38  ;;  %v1862_v53 = vmul.f32 %v5003_v2, %v1826_v18 }
 0x510   : > { %v3512_v26 = vpop.eup %3511 }
 0x511   : > { %v1767_v40 = vadd.f32 1e-05, %v1735_v9  ;;  %3191 = vmatmul.mubr.bf16.gmra.mxu0 %v1925_v59  ;;  %v1827_v50 = vmul.f32 %v3512_v26, %v4881_v51  ;;  %v1898_v42 = vadd.f32 %v5009_v8, %v1862_v53 }
 0x512   : > { %v1687_v28 = vpop.xlane.xlu1 %1686 }
 0x513   : > { %3519 = vrsqrt.f32 %v1767_v40  ;;  %v1736_v30 = vmul.f32 0.0078125, %v1687_v28  ;;  %v1863_v23 = vmul.f32 %v5003_v2, %v1827_v50 }
 0x514   : > { %v3514_v52 = vpop.eup %3513 }
 0x515   : > { %v1768_v10 = vadd.f32 1e-05, %v1736_v30  ;;  %v1899_v58 = vadd.f32 %v5009_v8, %v1863_v23  ;;  %v1828_v24 = vmul.f32 %v3514_v52, %v4886_v7 }
 0x516   : > { %v1691_v36 = vpop.xlane.xlu1 %1690  ;;  %v1689_v19 = vpop.xlane.xlu0 %1688 }
 0x517   : > { %3521 = vrsqrt.f32 %v1768_v10  ;;  %v1738_v46 = vmul.f32 0.0078125, %v1691_v36  ;;  %v1737_v51 = vmul.f32 0.0078125, %v1689_v19  ;;  %v1926_v4 = vpack.c.bf16 %v1899_v58, %v1898_v42 }
 0x518   : > { %v3516_v25 = vpop.eup %3515  ;;  %v1864_v32 = vmul.f32 %v5003_v2, %v1828_v24 }
 0x519   : > { %v1770_v38 = vadd.f32 1e-05, %v1738_v46  ;;  %v1769_v27 = vadd.f32 1e-05, %v1737_v51  ;;  %3194 = vmatprep.mubr.bf16.mxu0 %v1926_v4  ;;  %v1829_v18 = vmul.f32 %v3516_v25, %v4891_v43 }
 0x51a   : > { %v1695_v61 = vpop.xlane.xlu1 %1694  ;;  %v1693_v9 = vpop.xlane.xlu0 %1692  ;;  %v1900_v50 = vadd.f32 %v5009_v8, %v1864_v32 }
 0x51b   : > { %3523 = vrsqrt.f32 %v1770_v38  ;;  %v1740_v59 = vmul.f32 0.0078125, %v1695_v61  ;;  %v1739_v26 = vmul.f32 0.0078125, %v1693_v9  ;;  %v1865_v7 = vmul.f32 %v5003_v2, %v1829_v18 }
 0x51c   : > { %v3518_v40 = vpop.eup %3517  ;;  %3525 = vrsqrt.f32 %v1769_v27 }
 0x51d   : > { %v1772_v53 = vadd.f32 1e-05, %v1740_v59  ;;  %v1771_v28 = vadd.f32 1e-05, %v1739_v26  ;;  %v1901_v30 = vadd.f32 %v5009_v8, %v1865_v7  ;;  %v1830_v23 = vmul.f32 %v3518_v40, %v4896_v21 }
 0x51e   : > { %v1699_v52 = vpop.xlane.xlu1 %1698  ;;  %v1697_v10 = vpop.xlane.xlu0 %1696 }
 0x51f   : > { %3527 = vrsqrt.f32 %v1772_v53  ;;  %v1742_v43 = vmul.f32 0.0078125, %v1699_v52  ;;  %v1741_v42 = vmul.f32 0.0078125, %v1697_v10  ;;  %v1927_v58 = vpack.c.bf16 %v1901_v30, %v1900_v50 }
 0x520   : > { %v3520_v24 = vpop.eup %3519  ;;  %3529 = vrsqrt.f32 %v1771_v28  ;;  %v1866_v51 = vmul.f32 %v5003_v2, %v1830_v23 }
 0x521   : > { %v1774_v36 = vadd.f32 1e-05, %v1742_v43  ;;  %v1773_v19 = vadd.f32 1e-05, %v1741_v42  ;;  %3195 = vmatmul.mubr.bf16.gmra.mxu0 %v1927_v58  ;;  %v1831_v46 = vmul.f32 %v3520_v24, %v4901_v31 }
 0x522   : > { %v1703_v4 = vpop.xlane.xlu1 %1702  ;;  %v1701_v25 = vpop.xlane.xlu0 %1700  ;;  %v1902_v9 = vadd.f32 %v5009_v8, %v1866_v51 }
 0x523   : > { %3531 = vrsqrt.f32 %v1774_v36  ;;  %v1744_v32 = vmul.f32 0.0078125, %v1703_v4  ;;  %v1743_v21 = vmul.f32 0.0078125, %v1701_v25  ;;  %v1867_v38 = vmul.f32 %v5003_v2, %v1831_v46 }
 0x524   : > { %v3522_v27 = vpop.eup %3521  ;;  %3533 = vrsqrt.f32 %v1773_v19 }
 0x525   : > { %v1776_v18 = vadd.f32 1e-05, %v1744_v32  ;;  %v1775_v61 = vadd.f32 1e-05, %v1743_v21  ;;  %v1903_v59 = vadd.f32 %v5009_v8, %v1867_v38  ;;  %v1832_v31 = vmul.f32 %v3522_v27, %v4906_v63 }
 0x526   : > { %v1707_v26 = vpop.xlane.xlu1 %1706  ;;  %v1705_v7 = vpop.xlane.xlu0 %1704 }
 0x527   : > { %3535 = vrsqrt.f32 %v1776_v18  ;;  %v1746_v40 = vmul.f32 0.0078125, %v1707_v26  ;;  %v1745_v50 = vmul.f32 0.0078125, %v1705_v7  ;;  %v1928_v53 = vpack.c.bf16 %v1903_v59, %v1902_v9 }
 0x528   : > { %v3524_v28 = vpop.eup %3523  ;;  %3537 = vrsqrt.f32 %v1775_v61  ;;  %v1868_v58 = vmul.f32 %v5003_v2, %v1832_v31 }
 0x529   : > { %v3526_v30 = vpop.eup %3525  ;;  %v1778_v23 = vadd.f32 1e-05, %v1746_v40  ;;  %v1777_v52 = vadd.f32 1e-05, %v1745_v50  ;;  %3198 = vmatprep.mubr.bf16.mxu0 %v1928_v53  ;;  %v1834_v24 = vmul.f32 %v3524_v28, %v4911_v29 }
 0x52a   : > { %v1711_v10 = vpop.xlane.xlu1 %1710  ;;  %v1709_v43 = vpop.xlane.xlu0 %1708  ;;  %v1833_v42 = vmul.f32 %v3526_v30, %v4914_v37  ;;  %v1904_v37 = vadd.f32 %v5009_v8, %v1868_v58 }
 0x52b   : > { %3539 = vrsqrt.f32 %v1778_v23  ;;  %v1748_v63 = vmul.f32 0.0078125, %v1711_v10  ;;  %v1747_v36 = vmul.f32 0.0078125, %v1709_v43  ;;  %v1870_v18 = vmul.f32 %v5003_v2, %v1834_v24 }
 0x52c   : > { %v3528_v19 = vpop.eup %3527  ;;  %3541 = vrsqrt.f32 %v1777_v52  ;;  %v1869_v46 = vmul.f32 %v5003_v2, %v1833_v42 }
 0x52d   : > { %v3530_v51 = vpop.eup %3529  ;;  %v1780_v4 = vadd.f32 1e-05, %v1748_v63  ;;  %v1779_v25 = vadd.f32 1e-05, %v1747_v36  ;;  %v1836_v32 = vmul.f32 %v3528_v19, %v4921_v34 }
 0x52e   : > { %v1715_v21 = vpop.xlane.xlu1 %1714  ;;  %v1713_v38 = vpop.xlane.xlu0 %1712  ;;  %v1905_v27 = vadd.f32 %v5009_v8, %v1869_v46  ;;  %v1835_v29 = vmul.f32 %v3530_v51, %v4924_v14  ;;  %v1906_v14 = vadd.f32 %v5009_v8, %v1870_v18 }
 0x52f   : > { %3543 = vrsqrt.f32 %v1780_v4  ;;  %v1750_v61 = vmul.f32 0.0078125, %v1715_v21  ;;  %v1749_v9 = vmul.f32 0.0078125, %v1713_v38  ;;  %v1872_v50 = vmul.f32 %v5003_v2, %v1836_v32 }
 0x530   : > { %v3532_v59 = vpop.eup %3531  ;;  %3545 = vrsqrt.f32 %v1779_v25  ;;  %v1929_v26 = vpack.c.bf16 %v1905_v27, %v1904_v37  ;;  %v1871_v7 = vmul.f32 %v5003_v2, %v1835_v29 }
 0x531   : > { %v3534_v31 = vpop.eup %3533  ;;  %v1782_v34 = vadd.f32 1e-05, %v1750_v61  ;;  %v1781_v40 = vadd.f32 1e-05, %v1749_v9  ;;  %v1838_v52 = vmul.f32 %v3532_v59, %v4931_v6  ;;  %v1908_v46 = vadd.f32 %v5009_v8, %v1872_v50 }
 0x532   : > { %3199 = vmatmul.mubr.bf16.gmra.mxu0 %v1929_v26  ;;  %v1719_v53 = vpop.xlane.xlu1 %1718  ;;  %v1717_v28 = vpop.xlane.xlu0 %1716  ;;  %v1907_v30 = vadd.f32 %v5009_v8, %v1871_v7  ;;  %v1837_v23 = vmul.f32 %v3534_v31, %v4934_v11 }
 0x533   : > { %3547 = vrsqrt.f32 %v1782_v34  ;;  %v1752_v10 = vmul.f32 0.0078125, %v1719_v53  ;;  %v1751_v43 = vmul.f32 0.0078125, %v1717_v28  ;;  %v1874_v6 = vmul.f32 %v5003_v2, %v1838_v52 }
 0x534   : > { %v3536_v42 = vpop.eup %3535  ;;  %3549 = vrsqrt.f32 %v1781_v40  ;;  %v1930_v58 = vpack.c.bf16 %v1907_v30, %v1906_v14  ;;  %v1873_v24 = vmul.f32 %v5003_v2, %v1837_v23 }
 0x535   : > { %v3538_v63 = vpop.eup %3537  ;;  %v1784_v36 = vadd.f32 1e-05, %v1752_v10  ;;  %v1783_v19 = vadd.f32 1e-05, %v1751_v43  ;;  %v1840_v25 = vmul.f32 %v3536_v42, %v4941_v62  ;;  %v1910_v61 = vadd.f32 %v5009_v8, %v1874_v6 }
 0x536   : > { %3202 = vmatprep.mubr.bf16.mxu0 %v1930_v58  ;;  %v1721_v51 = vpop.xlane.xlu0 %1720  ;;  %v1909_v4 = vadd.f32 %v5009_v8, %v1873_v24  ;;  %v1839_v11 = vmul.f32 %v3538_v63, %v4944_v44 }
 0x537   : > { %3551 = vrsqrt.f32 %v1784_v36  ;;  %v1753_v32 = vmul.f32 0.0078125, %v1721_v51  ;;  %v1876_v62 = vmul.f32 %v5003_v2, %v1840_v25 }
 0x538   : > { %v3540_v21 = vpop.eup %3539  ;;  %3553 = vrsqrt.f32 %v1783_v19  ;;  %v1931_v38 = vpack.c.bf16 %v1909_v4, %v1908_v46  ;;  %v1875_v37 = vmul.f32 %v5003_v2, %v1839_v11  ;;  %v3359_v11 = vld [vmem:[#allocation5 + $0xe8] sm:$0xff]  }
 0x539   : > { %v3542_v27 = vpop.eup %3541  ;;  %v1785_v29 = vadd.f32 1e-05, %v1753_v32  ;;  %v1842_v18 = vmul.f32 %v3540_v21, %v4951_v12  ;;  %v1912_v12 = vadd.f32 %v5009_v8, %v1876_v62  ;;  %3222 = vmatprep.subr.bf16.mxu1 %v3359_v11 }
 0x53a   : > { %3203 = vmatmul.mubr.bf16.gmra.mxu0 %v1931_v38  ;;  %v1911_v44 = vadd.f32 %v5009_v8, %v1875_v37  ;;  %v1841_v9 = vmul.f32 %v3542_v27, %v4954_v33  ;;  %3223 = vmatpush3.bf16.msra.mxu1 %v3359_v11  ;;  %v3360_v38 = vld [vmem:[#allocation5 + $0xe0] sm:$0xff]  }
 0x53b   : > { %3555 = vrsqrt.f32 %v1785_v29  ;;  %v1878_v34 = vmul.f32 %v5003_v2, %v1842_v18  ;;  %3224 = vmatprep.subr.bf16.mxu1 %v3360_v38  ;;  %v3361_v29 = vld [vmem:[#allocation5 + $0xd8] sm:$0xff]   ;;  %v3362_v18 = vld [vmem:[#allocation5 + $0xd0] sm:$0xff]  }
 0x53c   : > { %v3544_v59 = vpop.eup %3543  ;;  %v1932_v26 = vpack.c.bf16 %v1911_v44, %v1910_v61  ;;  %v1877_v7 = vmul.f32 %v5003_v2, %v1841_v9  ;;  %v3363_v61 = vld [vmem:[#allocation5 + $0xc8] sm:$0xff]   ;;  %v1940_v44 = vsub.s32 4, %v5500_v0 }
 0x53d   : > { %v3546_v31 = vpop.eup %3545  ;;  %v1844_v53 = vmul.f32 %v3544_v59, %v4961_v56  ;;  %v1914_v23 = vadd.f32 %v5009_v8, %v1878_v34 }
 0x53e   : > { %3206 = vmatprep.mubr.bf16.mxu0 %v1932_v26  ;;  %v1913_v40 = vadd.f32 %v5009_v8, %v1877_v7  ;;  %v1843_v50 = vmul.f32 %v3546_v31, %v4964_v45  ;;  %3225 = vmatpush3.bf16.msra.mxu1 %v3360_v38 }
 0x53f   : > { %v1880_v43 = vmul.f32 %v5003_v2, %v1844_v53  ;;  %3226 = vmatprep.subr.bf16.mxu1 %v3361_v29 }
 0x540   : > { %v3548_v33 = vpop.eup %3547  ;;  %v1933_v28 = vpack.c.bf16 %v1913_v40, %v1912_v12  ;;  %v1879_v14 = vmul.f32 %v5003_v2, %v1843_v50 }
 0x541   : > { %v3550_v30 = vpop.eup %3549  ;;  %v1846_v42 = vmul.f32 %v3548_v33, %v4971_v41  ;;  %v1916_v36 = vadd.f32 %v5009_v8, %v1880_v43 }
 0x542   : > { %3207 = vmatmul.mubr.bf16.gmra.mxu0 %v1933_v28  ;;  %v1915_v52 = vadd.f32 %v5009_v8, %v1879_v14  ;;  %v1845_v10 = vmul.f32 %v3550_v30, %v4974_v48  ;;  %3227 = vmatpush3.bf16.msra.mxu1 %v3361_v29 }
 0x543   : > { %v1882_v48 = vmul.f32 %v5003_v2, %v1846_v42  ;;  %3228 = vmatprep.subr.bf16.mxu1 %v3362_v18 }
 0x544   : > { %v3552_v58 = vpop.eup %3551  ;;  %v1934_v45 = vpack.c.bf16 %v1915_v52, %v1914_v23  ;;  %v1881_v56 = vmul.f32 %v5003_v2, %v1845_v10 }
 0x545   : > { %v3554_v24 = vpop.eup %3553  ;;  %v1848_v63 = vmul.f32 %v3552_v58, %v4981_v54  ;;  %v1918_v54 = vadd.f32 %v5009_v8, %v1882_v48 }
 0x546   : > { %3210 = vmatprep.mubr.bf16.mxu0 %v1934_v45  ;;  %v1917_v19 = vadd.f32 %v5009_v8, %v1881_v56  ;;  %v1847_v46 = vmul.f32 %v3554_v24, %v4984_v57  ;;  %3229 = vmatpush3.bf16.msra.mxu1 %v3362_v18 }
 0x547   : > { %v1884_v25 = vmul.f32 %v5003_v2, %v1848_v63  ;;  %3230 = vmatprep.subr.bf16.mxu1 %v3363_v61 }
 0x548   : > { %v3556_v51 = vpop.eup %3555  ;;  %v1935_v4 = vpack.c.bf16 %v1917_v19, %v1916_v36  ;;  %v1883_v41 = vmul.f32 %v5003_v2, %v1847_v46 }
 0x549   : > { %v1849_v6 = vmul.f32 %v3556_v51, %v4991_v39  ;;  %v1920_v37 = vadd.f32 %v5009_v8, %v1884_v25 }
 0x54a   : > { %3211 = vmatmul.mubr.bf16.gmra.mxu0 %v1935_v4  ;;  %v1919_v32 = vadd.f32 %v5009_v8, %v1883_v41  ;;  %3231 = vmatpush3.bf16.msra.mxu1 %v3363_v61 }
 0x54b   : > { %v1885_v21 = vmul.f32 %v5003_v2, %v1849_v6  ;;  %v3364_v2 = vld [vmem:[#allocation5 + $0xc0] sm:$0xff]  }
 0x54c   : > { %v1936_v57 = vpack.c.bf16 %v1919_v32, %v1918_v54  ;;  %3232 = vmatprep.subr.bf16.mxu1 %v3364_v2 }
 0x54d   : > { %v1921_v27 = vadd.f32 %v5009_v8, %v1885_v21  ;;  %v5106_v8 = vrot.slane %v5000_v5, %v1940_v44 }
 0x54e   : > { %3214 = vmatprep.mubr.bf16.mxu0 %v1936_v57  ;;  %3233 = vmatpush3.bf16.msra.mxu1 %v3364_v2 }
 0x54f   : > { %v1937_v39 = vpack.c.bf16 %v1921_v27, %v1920_v37 }
 0x552   : > { %3215 = vmatmul.mubr.bf16.gmra.mxu0 %v1937_v39 }
 0x5c1   : > { %v3188_v9 = vpop.f32.mrf.mxu0 }
 0x5c2   : > { %v2033_v62 = vadd.f32 %v3188_v9, %v5106_v8 }
 0x5c3   : > { %v2024_v59 = vpop.f32.mrf.mxu0 }
 0x5c4   : > { %v2025_v26 = vadd.f32 %v2024_v59, %v5106_v8  ;;  %v2185_v7 = vmul.f32 0.70710677, %v2033_v62  ;;  %v2153_v25 = vmul.f32 0.5, %v2033_v62 }
 0x5c5   : > { %v3189_v31 = vpop.f32.mrf.mxu0 }
 0x5c6   : > { %v2183_v34 = vmul.f32 0.70710677, %v2025_v26  ;;  %v2036_v12 = vadd.f32 %v3189_v31, %v5106_v8  ;;  %v2151_v4 = vmul.f32 0.5, %v2025_v26 }
 0x5c7   : > { %v2027_v40 = vpop.f32.mrf.mxu0 }
 0x5c8   : > { %3557 = verf.f32 %v2183_v34  ;;  %v2186_v50 = vmul.f32 0.70710677, %v2036_v12  ;;  %v2028_v53 = vadd.f32 %v2027_v40, %v5106_v8  ;;  %v2154_v48 = vmul.f32 0.5, %v2036_v12 }
 0x5c9   : > { %3559 = verf.f32 %v2185_v7 }
 0x5ca   : > { %3561 = verf.f32 %v2186_v50  ;;  %v2184_v5 = vmul.f32 0.70710677, %v2028_v53  ;;  %v2152_v41 = vmul.f32 0.5, %v2028_v53 }
 0x5cc   : > { %3563 = verf.f32 %v2184_v5 }
 0x5d1   : > { %v3192_v33 = vpop.f32.mrf.mxu0 }
 0x5d2   : > { %v2049_v28 = vadd.f32 %v3192_v33, %v5106_v8 }
 0x5d3   : > { %v2040_v14 = vpop.f32.mrf.mxu0 }
 0x5d4   : > { %v2189_v30 = vmul.f32 0.70710677, %v2049_v28  ;;  %v2041_v23 = vadd.f32 %v2040_v14, %v5106_v8 }
 0x5d5   : > { %v3558_v52 = vpop.eup %3557  ;;  %v3193_v10 = vpop.f32.mrf.mxu0 }
 0x5d6   : > { %v3560_v43 = vpop.eup %3559  ;;  %v2187_v58 = vmul.f32 0.70710677, %v2041_v23  ;;  %v2052_v45 = vadd.f32 %v3193_v10, %v5106_v8  ;;  %v2247_v24 = vadd.f32 1.0, %v3558_v52  ;;  %3565 = verf.f32 %v2189_v30 }
 0x5d7   : > { %v3562_v42 = vpop.eup %3561  ;;  %v2043_v56 = vpop.f32.mrf.mxu0  ;;  %v2249_v46 = vadd.f32 1.0, %v3560_v43  ;;  %v2155_v33 = vmul.f32 0.5, %v2041_v23  ;;  %v2157_v10 = vmul.f32 0.5, %v2049_v28 }
 0x5d8   : > { %v2250_v63 = vadd.f32 1.0, %v3562_v42  ;;  %v2044_v36 = vadd.f32 %v2043_v56, %v5106_v8  ;;  %3567 = verf.f32 %v2187_v58  ;;  %v2190_v51 = vmul.f32 0.70710677, %v2052_v45 }
 0x5d9   : > { %v3564_v19 = vpop.eup %3563  ;;  %v2279_v32 = vmul.f32 %v2247_v24, %v2151_v4  ;;  %v2281_v57 = vmul.f32 %v2249_v46, %v2153_v25  ;;  %v2158_v34 = vmul.f32 0.5, %v2052_v45 }
 0x5da   : > { %v2248_v11 = vadd.f32 1.0, %v3564_v19  ;;  %v2188_v6 = vmul.f32 0.70710677, %v2044_v36  ;;  %v2282_v54 = vmul.f32 %v2250_v63, %v2154_v48  ;;  %3569 = verf.f32 %v2190_v51 }
 0x5db   : > { %v2156_v14 = vmul.f32 0.5, %v2044_v36 }
 0x5dc   : > { %v2280_v21 = vmul.f32 %v2248_v11, %v2152_v41  ;;  %3571 = verf.f32 %v2188_v6  ;;  %v2312_v37 = vpack.c.bf16 %v2282_v54, %v2281_v57 }
 0x5de   : > { %v2311_v38 = vpack.c.bf16 %v2280_v21, %v2279_v32 }
 0x5e0   : > { %3234 = vmatprep.mubr.bf16.mxu1 %v2311_v38 }
 0x5e1   : > { %v3196_v27 = vpop.f32.mrf.mxu0  ;;  %3235 = vmatmul.mubr.bf16.vlgmr.msra.gmra.mxu1 %v2312_v37 }
 0x5e2   : > { %v2065_v39 = vadd.f32 %v3196_v27, %v5106_v8 }
 0x5e3   : > { %v2056_v29 = vpop.f32.mrf.mxu0  ;;  %v3566_v61 = vpop.eup %3565 }
 0x5e4   : > { %v2057_v18 = vadd.f32 %v2056_v29, %v5106_v8  ;;  %v2193_v2 = vmul.f32 0.70710677, %v2065_v39  ;;  %v2253_v50 = vadd.f32 1.0, %v3566_v61 }
 0x5e5   : > { %v3197_v44 = vpop.f32.mrf.mxu0  ;;  %v3568_v9 = vpop.eup %3567 }
 0x5e6   : > { %v2191_v62 = vmul.f32 0.70710677, %v2057_v18  ;;  %v2068_v59 = vadd.f32 %v3197_v44, %v5106_v8  ;;  %v2251_v31 = vadd.f32 1.0, %v3568_v9  ;;  %v2285_v56 = vmul.f32 %v2253_v50, %v2157_v10 }
 0x5e7   : > { %v2059_v26 = vpop.f32.mrf.mxu0  ;;  %v3570_v7 = vpop.eup %3569  ;;  %v2159_v6 = vmul.f32 0.5, %v2057_v18  ;;  %v2161_v44 = vmul.f32 0.5, %v2065_v39 }
 0x5e8   : > { %3573 = verf.f32 %v2191_v62  ;;  %v2060_v12 = vadd.f32 %v2059_v26, %v5106_v8  ;;  %v2254_v53 = vadd.f32 1.0, %v3570_v7  ;;  %v2194_v5 = vmul.f32 0.70710677, %v2068_v59 }
 0x5e9   : > { %v3572_v40 = vpop.eup %3571  ;;  %3575 = verf.f32 %v2193_v2  ;;  %v2283_v42 = vmul.f32 %v2251_v31, %v2155_v33  ;;  %v2162_v54 = vmul.f32 0.5, %v2068_v59 }
 0x5ea   : > { %v2252_v30 = vadd.f32 1.0, %v3572_v40  ;;  %v2192_v52 = vmul.f32 0.70710677, %v2060_v12  ;;  %v2286_v43 = vmul.f32 %v2254_v53, %v2158_v34  ;;  %3577 = verf.f32 %v2194_v5 }
 0x5eb   : > { %v2160_v27 = vmul.f32 0.5, %v2060_v12 }
 0x5ec   : > { %v2284_v58 = vmul.f32 %v2252_v30, %v2156_v14  ;;  %3579 = verf.f32 %v2192_v52  ;;  %v2314_v24 = vpack.c.bf16 %v2286_v43, %v2285_v56 }
 0x5ee   : > { %v2313_v45 = vpack.c.bf16 %v2284_v58, %v2283_v42 }
 0x5f0   : > { %3238 = vmatprep.mubr.bf16.mxu1 %v2313_v45 }
 0x5f1   : > { %3239 = vmatmul.mubr.bf16.gmra.mxu1 %v2314_v24 }
 0x5f2   : > { %v3200_v63 = vpop.f32.mrf.mxu0 }
 0x5f3   : > { %v5121_v19 = vadd.f32 %v3200_v63, %v5106_v8 }
 0x5f4   : > { %v2072_v46 = vpop.f32.mrf.mxu0 }
 0x5f5   : > { %v3574_v23 = vpop.eup %3573  ;;  %v2197_v36 = vmul.f32 0.70710677, %v5121_v19  ;;  %v5125_v28 = vadd.f32 %v2072_v46, %v5106_v8 }
 0x5f6   : > { %v3576_v48 = vpop.eup %3575  ;;  %v3201_v51 = vpop.f32.mrf.mxu0  ;;  %v2255_v25 = vadd.f32 1.0, %v3574_v23 }
 0x5f7   : > { %v2195_v4 = vmul.f32 0.70710677, %v5125_v28  ;;  %v5129_v41 = vadd.f32 %v3201_v51, %v5106_v8  ;;  %v3578_v11 = vpop.eup %3577  ;;  %v2257_v57 = vadd.f32 1.0, %v3576_v48  ;;  %3581 = verf.f32 %v2197_v36 }
 0x5f8   : > { %v2075_v32 = vpop.f32.mrf.mxu0  ;;  %v2258_v38 = vadd.f32 1.0, %v3578_v11  ;;  %v2287_v62 = vmul.f32 %v2255_v25, %v2159_v6 }
 0x5f9   : > { %v3580_v21 = vpop.eup %3579  ;;  %v2198_v37 = vmul.f32 0.70710677, %v5129_v41  ;;  %3583 = verf.f32 %v2195_v4  ;;  %v2076_v61 = vadd.f32 %v2075_v32, %v5106_v8  ;;  %v2289_v31 = vmul.f32 %v2257_v57, %v2161_v44 }
 0x5fa   : > { %v2256_v29 = vadd.f32 1.0, %v3580_v21  ;;  %v3204_v2 = vpop.f32.mrf.mxu0  ;;  %v2290_v9 = vmul.f32 %v2258_v38, %v2162_v54  ;;  %v2166_v21 = vmul.f32 0.5, %v5129_v41  ;;  %v2163_v38 = vmul.f32 0.5, %v5125_v28 }
 0x5fb   : > { %3585 = verf.f32 %v2198_v37  ;;  %v5134_v18 = vadd.f32 %v3204_v2, %v5106_v8  ;;  %v2196_v26 = vmul.f32 0.70710677, %v2076_v61  ;;  %v2164_v37 = vmul.f32 0.5, %v2076_v61 }
 0x5fc   : > { %v2288_v59 = vmul.f32 %v2256_v29, %v2160_v27  ;;  %v2088_v7 = vpop.f32.mrf.mxu0  ;;  %v2316_v5 = vpack.c.bf16 %v2290_v9, %v2289_v31  ;;  %v2165_v44 = vmul.f32 0.5, %v5121_v19 }
 0x5fd   : > { %v2201_v34 = vmul.f32 0.70710677, %v5134_v18  ;;  %v5138_v12 = vadd.f32 %v2088_v7, %v5106_v8  ;;  %3587 = verf.f32 %v2196_v26 }
 0x5fe   : > { %v3205_v40 = vpop.f32.mrf.mxu0  ;;  %v2315_v50 = vpack.c.bf16 %v2288_v59, %v2287_v62 }
 0x5ff   : > { %v2199_v39 = vmul.f32 0.70710677, %v5138_v12  ;;  %v2100_v53 = vadd.f32 %v3205_v40, %v5106_v8  ;;  %3589 = verf.f32 %v2201_v34 }
 0x600   : > { %v2091_v33 = vpop.f32.mrf.mxu0  ;;  %3242 = vmatprep.mubr.bf16.mxu1 %v2315_v50 }
 0x601   : > { %v2202_v14 = vmul.f32 0.70710677, %v2100_v53  ;;  %v2092_v30 = vadd.f32 %v2091_v33, %v5106_v8  ;;  %3243 = vmatmul.mubr.bf16.gmra.mxu1 %v2316_v5  ;;  %3591 = verf.f32 %v2199_v39  ;;  %v2170_v5 = vmul.f32 0.5, %v2100_v53 }
 0x602   : > { %v3208_v52 = vpop.f32.mrf.mxu0  ;;  %v2169_v53 = vmul.f32 0.5, %v5134_v18 }
 0x603   : > { %3593 = verf.f32 %v2202_v14  ;;  %v2200_v10 = vmul.f32 0.70710677, %v2092_v30  ;;  %v5144_v43 = vadd.f32 %v3208_v52, %v5106_v8 }
 0x604   : > { %v2104_v42 = vpop.f32.mrf.mxu0  ;;  %v3582_v56 = vpop.eup %3581 }
 0x605   : > { %3595 = verf.f32 %v2200_v10  ;;  %v2205_v58 = vmul.f32 0.70710677, %v5144_v43  ;;  %v5148_v45 = vadd.f32 %v2104_v42, %v5106_v8  ;;  %v2261_v32 = vadd.f32 1.0, %v3582_v56 }
 0x606   : > { %v3209_v24 = vpop.f32.mrf.mxu0  ;;  %v3584_v63 = vpop.eup %3583 }
 0x607   : > { %v5151_v46 = vadd.f32 %v3209_v24, %v5106_v8  ;;  %v2203_v36 = vmul.f32 0.70710677, %v5148_v45  ;;  %3597 = verf.f32 %v2205_v58  ;;  %v2259_v11 = vadd.f32 1.0, %v3584_v63 }
 0x608   : > { %v3586_v23 = vpop.eup %3585  ;;  %v2107_v48 = vpop.f32.mrf.mxu0  ;;  %v2293_v34 = vmul.f32 %v2261_v32, %v2165_v44  ;;  %v2168_v58 = vmul.f32 0.5, %v2092_v30 }
 0x609   : > { %v2262_v51 = vadd.f32 1.0, %v3586_v23  ;;  %v2206_v4 = vmul.f32 0.70710677, %v5151_v46  ;;  %3599 = verf.f32 %v2203_v36  ;;  %v5156_v6 = vadd.f32 %v2107_v48, %v5106_v8 }
 0x60a   : > { %v3212_v25 = vpop.f32.mrf.mxu0  ;;  %v3588_v54 = vpop.eup %3587  ;;  %v2291_v26 = vmul.f32 %v2259_v11, %v2163_v38  ;;  %v2167_v48 = vmul.f32 0.5, %v5138_v12 }
 0x60b   : > { %3601 = verf.f32 %v2206_v4  ;;  %v5160_v57 = vadd.f32 %v3212_v25, %v5106_v8  ;;  %v2260_v27 = vadd.f32 1.0, %v3588_v54  ;;  %v2204_v29 = vmul.f32 0.70710677, %v5156_v6 }
 0x60c   : > { %v2120_v2 = vpop.f32.mrf.mxu0  ;;  %v2294_v9 = vmul.f32 %v2262_v51, %v2166_v21  ;;  %v3590_v59 = vpop.eup %3589 }
 0x60d   : > { %v5166_v62 = vadd.f32 %v2120_v2, %v5106_v8  ;;  %v2292_v41 = vmul.f32 %v2260_v27, %v2164_v37  ;;  %3603 = verf.f32 %v2204_v29  ;;  %v2209_v28 = vmul.f32 0.70710677, %v5160_v57 }
 0x60e   : > { %v3213_v7 = vpop.f32.mrf.mxu0  ;;  %v3592_v31 = vpop.eup %3591  ;;  %v2318_v52 = vpack.c.bf16 %v2294_v9, %v2293_v34  ;;  %v2265_v63 = vadd.f32 1.0, %v3590_v59 }
 0x60f   : > { %v2207_v40 = vmul.f32 0.70710677, %v5166_v62  ;;  %v5171_v50 = vadd.f32 %v3213_v7, %v5106_v8  ;;  %v2317_v39 = vpack.c.bf16 %v2292_v41, %v2291_v26  ;;  %v2263_v42 = vadd.f32 1.0, %v3592_v31 }
 0x610   : > { %v3594_v61 = vpop.eup %3593  ;;  %v2123_v19 = vpop.f32.mrf.mxu0  ;;  %v2297_v18 = vmul.f32 %v2265_v63, %v2169_v53 }
 0x611   : > { %v2266_v33 = vadd.f32 1.0, %v3594_v61  ;;  %v5174_v14 = vadd.f32 %v2123_v19, %v5106_v8  ;;  %3605 = verf.f32 %v2207_v40  ;;  %v2210_v56 = vmul.f32 0.70710677, %v5171_v50  ;;  %3246 = vmatprep.mubr.bf16.mxu1 %v2317_v39 }
 0x612   : > { %v3596_v10 = vpop.eup %3595  ;;  %v3216_v24 = vpop.f32.mrf.mxu0  ;;  %3607 = verf.f32 %v2209_v28  ;;  %3247 = vmatmul.mubr.bf16.gmra.mxu1 %v2318_v52  ;;  %v2295_v32 = vmul.f32 %v2263_v42, %v2167_v48  ;;  %v2174_v28 = vmul.f32 0.5, %v5151_v46  ;;  %v2171_v61 = vmul.f32 0.5, %v5148_v45 }
 0x613   : > { %v2264_v23 = vadd.f32 1.0, %v3596_v10  ;;  %v2208_v36 = vmul.f32 0.70710677, %v5174_v14  ;;  %3609 = verf.f32 %v2210_v56  ;;  %v5181_v51 = vadd.f32 %v3216_v24, %v5106_v8 }
 0x614   : > { %v2136_v30 = vpop.f32.mrf.mxu0  ;;  %v2298_v4 = vmul.f32 %v2266_v33, %v2170_v5  ;;  %v3598_v54 = vpop.eup %3597  ;;  %v2172_v40 = vmul.f32 0.5, %v5156_v6  ;;  %v2173_v5 = vmul.f32 0.5, %v5144_v43  ;;  %v2175_v45 = vmul.f32 0.5, %v5166_v62 }
 0x615   : > { %v2296_v11 = vmul.f32 %v2264_v23, %v2168_v58  ;;  %3611 = verf.f32 %v2208_v36  ;;  %v5184_v25 = vadd.f32 %v2136_v30, %v5106_v8  ;;  %v2213_v21 = vmul.f32 0.70710677, %v5181_v51 }
 0x616   : > { %v3217_v38 = vpop.f32.mrf.mxu0  ;;  %v3600_v37 = vpop.eup %3599  ;;  %v2320_v26 = vpack.c.bf16 %v2298_v4, %v2297_v18  ;;  %v2269_v34 = vadd.f32 1.0, %v3598_v54  ;;  %v2178_v53 = vmul.f32 0.5, %v5171_v50  ;;  %v2176_v43 = vmul.f32 0.5, %v5174_v14 }
 0x617   : > { %v2211_v12 = vmul.f32 0.70710677, %v5184_v25  ;;  %v2148_v27 = vadd.f32 %v3217_v38, %v5106_v8  ;;  %v2319_v44 = vpack.c.bf16 %v2296_v11, %v2295_v32  ;;  %3613 = verf.f32 %v2213_v21 }
 0x618   : > { %v3602_v29 = vpop.eup %3601  ;;  %v2139_v2 = vpop.f32.mrf.mxu0  ;;  %v2267_v41 = vadd.f32 1.0, %v3600_v37  ;;  %v2301_v42 = vmul.f32 %v2269_v34, %v2173_v5  ;;  %v2177_v30 = vmul.f32 0.5, %v5160_v57  ;;  %v2179_v14 = vmul.f32 0.5, %v5184_v25 }
 0x619   : > { %v2270_v9 = vadd.f32 1.0, %v3602_v29  ;;  %v2214_v59 = vmul.f32 0.70710677, %v2148_v27  ;;  %3615 = verf.f32 %v2211_v12  ;;  %v2140_v7 = vadd.f32 %v2139_v2, %v5106_v8  ;;  %3250 = vmatprep.mubr.bf16.mxu1 %v2319_v44 }
 0x61a   : > { %v3604_v31 = vpop.eup %3603  ;;  %3251 = vmatmul.mubr.bf16.gmra.mxu1 %v2320_v26  ;;  %v2299_v52 = vmul.f32 %v2267_v41, %v2171_v61  ;;  %v2182_v44 = vmul.f32 0.5, %v2148_v27  ;;  %v3626_v27 = vld [vmem:[%s5341_s2] sm:$0x3f] }
 0x61b   : > { %3617 = verf.f32 %v2214_v59  ;;  %v2268_v19 = vadd.f32 1.0, %v3604_v31  ;;  %v2212_v39 = vmul.f32 0.70710677, %v2140_v7  ;;  %v2302_v33 = vmul.f32 %v2270_v9, %v2174_v28 }
 0x61c   : > { %v2180_v9 = vmul.f32 0.5, %v2140_v7  ;;  %v2181_v59 = vmul.f32 0.5, %v5181_v51 }
 0x61d   : > { %v2300_v10 = vmul.f32 %v2268_v19, %v2172_v40  ;;  %3619 = verf.f32 %v2212_v39  ;;  %v2322_v63 = vpack.c.bf16 %v2302_v33, %v2301_v42  ;;  %v2329_v40 = vsub.s32 5, %v5500_v0 }
 0x61e   : > { %v3606_v8 = vpop.eup %3605 }
 0x61f   : > { %v3608_v58 = vpop.eup %3607  ;;  %v2321_v56 = vpack.c.bf16 %v2300_v10, %v2299_v52  ;;  %v2271_v46 = vadd.f32 1.0, %v3606_v8  ;;  %v5204_v25 = vrot.slane %v3626_v27, %v2329_v40 }
 0x620   : > { %v3610_v24 = vpop.eup %3609  ;;  %v2273_v6 = vadd.f32 1.0, %v3608_v58 }
 0x621   : > { %v2274_v36 = vadd.f32 1.0, %v3610_v24  ;;  %3254 = vmatprep.mubr.bf16.mxu1 %v2321_v56  ;;  %v2303_v4 = vmul.f32 %v2271_v46, %v2175_v45 }
 0x622   : > { %v3612_v23 = vpop.eup %3611  ;;  %3255 = vmatmul.mubr.bf16.gmra.mxu1 %v2322_v63  ;;  %v2305_v38 = vmul.f32 %v2273_v6, %v2177_v30 }
 0x623   : > { %v2272_v48 = vadd.f32 1.0, %v3612_v23  ;;  %v2306_v11 = vmul.f32 %v2274_v36, %v2178_v53 }
 0x624   : > { %v3614_v32 = vpop.eup %3613 }
 0x625   : > { %v2304_v54 = vmul.f32 %v2272_v48, %v2176_v43  ;;  %v2324_v12 = vpack.c.bf16 %v2306_v11, %v2305_v38  ;;  %v2277_v50 = vadd.f32 1.0, %v3614_v32 }
 0x626   : > { %v3616_v21 = vpop.eup %3615 }
 0x627   : > { %v2323_v37 = vpack.c.bf16 %v2304_v54, %v2303_v4  ;;  %v2275_v29 = vadd.f32 1.0, %v3616_v21  ;;  %v2309_v34 = vmul.f32 %v2277_v50, %v2181_v59 }
 0x628   : > { %v3618_v18 = vpop.eup %3617 }
 0x629   : > { %v2278_v62 = vadd.f32 1.0, %v3618_v18  ;;  %3258 = vmatprep.mubr.bf16.mxu1 %v2323_v37  ;;  %v2307_v41 = vmul.f32 %v2275_v29, %v2179_v14 }
 0x62a   : > { %v3620_v2 = vpop.eup %3619  ;;  %3259 = vmatmul.mubr.bf16.gmra.mxu1 %v2324_v12 }
 0x62b   : > { %v2276_v57 = vadd.f32 1.0, %v3620_v2  ;;  %v2310_v26 = vmul.f32 %v2278_v62, %v2182_v44 }
 0x62d   : > { %v2308_v31 = vmul.f32 %v2276_v57, %v2180_v9  ;;  %v2326_v61 = vpack.c.bf16 %v2310_v26, %v2309_v34  ;;  %v5501_v9 = vld [vmem:[#allocation33_spill] sm:$0xff] }
 0x62e   : > { %v5502_v26 = vld [vmem:[#allocation41_spill] sm:$0xff] }
 0x62f   : > { %v2325_v28 = vpack.c.bf16 %v2308_v31, %v2307_v41  ;;  %v5503_v34 = vld [vmem:[#allocation37_spill] sm:$0xff] }
 0x631   : > { %3262 = vmatprep.mubr.bf16.mxu1 %v2325_v28 }
 0x632   : > { %3263 = vmatmul.mubr.bf16.gmra.mxu1 %v2326_v61 }
 0x6a1   : > { %v3236_v7 = vpop.f32.mrf.mxu1 }
 0x6a2   : > { %v2422_v51 = vadd.f32 %v3236_v7, %v5204_v25 }
 0x6a3   : > { %v2413_v19 = vpop.f32.mrf.mxu1 }
 0x6a4   : > { %v2414_v5 = vadd.f32 %v2413_v19, %v5204_v25  ;;  %v2542_v10 = vadd.f32 %v2422_v51, %v4661_v16 }
 0x6a5   : > { %v3237_v39 = vpop.f32.mrf.mxu1 }
 0x6a6   : > { %v2425_v33 = vadd.f32 %v3237_v39, %v5204_v25  ;;  %v2540_v42 = vadd.f32 %v2414_v5, %v4645_v3  ;;  %v5504_v39 = vld [vmem:[#allocation29_spill] sm:$0xff] }
 0x6a7   : > { %v2416_v52 = vpop.f32.mrf.mxu1 }
 0x6a8   : > { %v2543_v0 = vadd.f32 %v2425_v33, %v4670_v22  ;;  %v2417_v8 = vadd.f32 %v2416_v52, %v5204_v25  ;;  %v5505_v33 = vld [vmem:[#allocation30_spill] sm:$0xff] }
 0x6aa   : > { %v3020_v58 = vpack.c.bf16 %v2543_v0, %v2542_v10  ;;  %v2541_v56 = vadd.f32 %v2417_v8, %v4654_v13  ;;  %v5506_v8 = vld [vmem:[#allocation38_spill] sm:$0xff] }
 0x6ac   : > { %3107 = vst [vmem:[%s5216_s23 + $0x8] sm:$0xff] %v3020_v58   ;;  %v3015_v24 = vpack.c.bf16 %v2541_v56, %v2540_v42  ;;  %v5507_v56 = vld [vmem:[#allocation34_spill] sm:$0xff] }
 0x6ae   : > { %3016 = vst [vmem:[%s5216_s23] sm:$0xff] %v3015_v24  }
 0x6b1   : > { %v3240_v16 = vpop.f32.mrf.mxu1 }
 0x6b2   : > { %v2438_v22 = vadd.f32 %v3240_v16, %v5204_v25 }
 0x6b3   : > { %v2429_v46 = vpop.f32.mrf.mxu1 }
 0x6b4   : > { %v2430_v3 = vadd.f32 %v2429_v46, %v5204_v25  ;;  %v2546_v45 = vadd.f32 %v2438_v22, %v4697_v20 }
 0x6b5   : > { %v3241_v63 = vpop.f32.mrf.mxu1 }
 0x6b6   : > { %v2441_v23 = vadd.f32 %v3241_v63, %v5204_v25  ;;  %v2544_v53 = vadd.f32 %v2430_v3, %v4679_v17 }
 0x6b7   : > { %v2432_v13 = vpop.f32.mrf.mxu1 }
 0x6b8   : > { %v2547_v36 = vadd.f32 %v2441_v23, %v4706_v55  ;;  %v2433_v6 = vadd.f32 %v2432_v13, %v5204_v25 }
 0x6ba   : > { %v3030_v43 = vpack.c.bf16 %v2547_v36, %v2546_v45  ;;  %v2545_v48 = vadd.f32 %v2433_v6, %v4688_v15  ;;  %v5508_v45 = vld [vmem:[#allocation21_spill] sm:$0xff]  ;;  %v5509_v6 = vld [vmem:[#allocation22_spill] sm:$0xff] }
 0x6bc   : > { %3109 = vst [vmem:[%s5216_s23 + $0x18] sm:$0xff] %v3030_v43   ;;  %v3025_v30 = vpack.c.bf16 %v2545_v48, %v2544_v53 }
 0x6be   : > { %3108 = vst [vmem:[%s5216_s23 + $0x10] sm:$0xff] %v3025_v30   ;;  %v5510_v30 = vld [vmem:[#allocation25_spill] sm:$0xff] }
 0x6c1   : > { %v3244_v4 = vpop.f32.mrf.mxu1 }
 0x6c2   : > { %v2454_v54 = vadd.f32 %v3244_v4, %v5204_v25 }
 0x6c3   : > { %v2445_v11 = vpop.f32.mrf.mxu1 }
 0x6c4   : > { %v2446_v20 = vadd.f32 %v2445_v11, %v5204_v25  ;;  %v2550_v17 = vadd.f32 %v2454_v54, %v4728_v49  ;;  %v5511_v54 = vld [vmem:[#allocation26_spill] sm:$0xff] }
 0x6c5   : > { %v3245_v32 = vpop.f32.mrf.mxu1 }
 0x6c6   : > { %v2457_v55 = vadd.f32 %v3245_v32, %v5204_v25  ;;  %v2548_v37 = vadd.f32 %v2446_v20, %v4715_v1 }
 0x6c7   : > { %v2448_v21 = vpop.f32.mrf.mxu1 }
 0x6c8   : > { %v2551_v38 = vadd.f32 %v2457_v55, %v4732_v47  ;;  %v2449_v15 = vadd.f32 %v2448_v21, %v5204_v25 }
 0x6ca   : > { %v3040_v18 = vpack.c.bf16 %v2551_v38, %v2550_v17  ;;  %v2549_v62 = vadd.f32 %v2449_v15, %v4724_v35 }
 0x6cc   : > { %3111 = vst [vmem:[%s5216_s23 + $0x28] sm:$0xff] %v3040_v18   ;;  %v3035_v12 = vpack.c.bf16 %v2549_v62, %v2548_v37  ;;  %v5512_v18 = vld [vmem:[#allocation12_spill] sm:$0xff] }
 0x6ce   : > { %3110 = vst [vmem:[%s5216_s23 + $0x20] sm:$0xff] %v3035_v12   ;;  %v5513_v12 = vld [vmem:[#allocation39_spill] sm:$0xff] }
 0x6d2   : > { %v3248_v29 = vpop.f32.mrf.mxu1 }
 0x6d3   : > { %v2470_v50 = vadd.f32 %v3248_v29, %v5204_v25 }
 0x6d4   : > { %v2461_v2 = vpop.f32.mrf.mxu1 }
 0x6d5   : > { %v2462_v49 = vadd.f32 %v2461_v2, %v5204_v25  ;;  %v2554_v1 = vadd.f32 %v2470_v50, %v4746_v60 }
 0x6d6   : > { %v3249_v44 = vpop.f32.mrf.mxu1 }
 0x6d7   : > { %v2473_v47 = vadd.f32 %v3249_v44, %v5204_v25  ;;  %v2552_v41 = vadd.f32 %v2462_v49, %v5502_v26  ;;  %v5514_v44 = vld [vmem:[#allocation17_spill] sm:$0xff] }
 0x6d8   : > { %v2464_v14 = vpop.f32.mrf.mxu1 }
 0x6d9   : > { %v2555_v57 = vadd.f32 %v2473_v47, %v5501_v9  ;;  %v2465_v35 = vadd.f32 %v2464_v14, %v5204_v25  ;;  %v5515_v14 = vld [vmem:[#allocation18_spill] sm:$0xff] }
 0x6da   : > { %v3252_v59 = vpop.f32.mrf.mxu1 }
 0x6db   : > { %v3050_v31 = vpack.c.bf16 %v2555_v57, %v2554_v1  ;;  %v2553_v28 = vadd.f32 %v2465_v35, %v5503_v34  ;;  %v2486_v27 = vadd.f32 %v3252_v59, %v5204_v25  ;;  %v5516_v34 = vld [vmem:[#allocation35_spill] sm:$0xff] }
 0x6dc   : > { %v2477_v61 = vpop.f32.mrf.mxu1 }
 0x6dd   : > { %3113 = vst [vmem:[%s5216_s23 + $0x38] sm:$0xff] %v3050_v31   ;;  %v3045_v40 = vpack.c.bf16 %v2553_v28, %v2552_v41  ;;  %v2478_v60 = vadd.f32 %v2477_v61, %v5204_v25  ;;  %v2558_v5 = vadd.f32 %v2486_v27, %v5504_v39  ;;  %v5517_v61 = vld [vmem:[#allocation36_spill] sm:$0xff] }
 0x6de   : > { %v3253_v7 = vpop.f32.mrf.mxu1 }
 0x6df   : > { %3112 = vst [vmem:[%s5216_s23 + $0x30] sm:$0xff] %v3045_v40   ;;  %v2489_v19 = vadd.f32 %v3253_v7, %v5204_v25  ;;  %v2556_v42 = vadd.f32 %v2478_v60, %v5506_v8  ;;  %v5518_v7 = vld [vmem:[#allocation14_spill] sm:$0xff] }
 0x6e0   : > { %v2480_v51 = vpop.f32.mrf.mxu1 }
 0x6e1   : > { %v2559_v52 = vadd.f32 %v2489_v19, %v5505_v33  ;;  %v2481_v10 = vadd.f32 %v2480_v51, %v5204_v25  ;;  %v5519_v51 = vld [vmem:[#allocation40_spill] sm:$0xff] }
 0x6e2   : > { %v3256_v0 = vpop.f32.mrf.mxu1 }
 0x6e3   : > { %v3060_v58 = vpack.c.bf16 %v2559_v52, %v2558_v5  ;;  %v2557_v24 = vadd.f32 %v2481_v10, %v5507_v56  ;;  %v2502_v22 = vadd.f32 %v3256_v0, %v5204_v25 }
 0x6e4   : > { %v2493_v16 = vpop.f32.mrf.mxu1 }
 0x6e5   : > { %3115 = vst [vmem:[%s5216_s23 + $0x48] sm:$0xff] %v3060_v58   ;;  %v3055_v46 = vpack.c.bf16 %v2557_v24, %v2556_v42  ;;  %v2494_v3 = vadd.f32 %v2493_v16, %v5204_v25  ;;  %v2562_v36 = vadd.f32 %v2502_v22, %v5508_v45 }
 0x6e6   : > { %v3257_v63 = vpop.f32.mrf.mxu1 }
 0x6e7   : > { %3114 = vst [vmem:[%s5216_s23 + $0x40] sm:$0xff] %v3055_v46   ;;  %v2505_v23 = vadd.f32 %v3257_v63, %v5204_v25  ;;  %v2560_v4 = vadd.f32 %v2494_v3, %v5510_v30 }
 0x6e8   : > { %v2496_v13 = vpop.f32.mrf.mxu1 }
 0x6e9   : > { %v2563_v53 = vadd.f32 %v2505_v23, %v5509_v6  ;;  %v2497_v43 = vadd.f32 %v2496_v13, %v5204_v25 }
 0x6ea   : > { %v3260_v48 = vpop.f32.mrf.mxu1 }
 0x6eb   : > { %v3070_v11 = vpack.c.bf16 %v2563_v53, %v2562_v36  ;;  %v2561_v32 = vadd.f32 %v2497_v43, %v5511_v54  ;;  %v2518_v21 = vadd.f32 %v3260_v48, %v5204_v25 }
 0x6ec   : > { %v2509_v20 = vpop.f32.mrf.mxu1 }
 0x6ed   : > { %3117 = vst [vmem:[%s5216_s23 + $0x58] sm:$0xff] %v3070_v11   ;;  %v3065_v55 = vpack.c.bf16 %v2561_v32, %v2560_v4  ;;  %v2510_v38 = vadd.f32 %v2509_v20, %v5204_v25  ;;  %v2566_v62 = vadd.f32 %v2518_v21, %v5512_v18 }
 0x6ee   : > { %v3261_v17 = vpop.f32.mrf.mxu1 }
 0x6ef   : > { %3116 = vst [vmem:[%s5216_s23 + $0x50] sm:$0xff] %v3065_v55   ;;  %v2521_v15 = vadd.f32 %v3261_v17, %v5204_v25  ;;  %v2564_v49 = vadd.f32 %v2510_v38, %v5514_v44 }
 0x6f0   : > { %v2512_v37 = vpop.f32.mrf.mxu1 }
 0x6f1   : > { %v2567_v29 = vadd.f32 %v2521_v15, %v5513_v12  ;;  %v2513_v2 = vadd.f32 %v2512_v37, %v5204_v25 }
 0x6f2   : > { %v3264_v50 = vpop.f32.mrf.mxu1 }
 0x6f3   : > { %v3080_v47 = vpack.c.bf16 %v2567_v29, %v2566_v62  ;;  %v2565_v1 = vadd.f32 %v2513_v2, %v5515_v14  ;;  %v2534_v35 = vadd.f32 %v3264_v50, %v5204_v25 }
 0x6f4   : > { %v2525_v9 = vpop.f32.mrf.mxu1 }
 0x6f5   : > { %3119 = vst [vmem:[%s5216_s23 + $0x68] sm:$0xff] %v3080_v47   ;;  %v3075_v57 = vpack.c.bf16 %v2565_v1, %v2564_v49  ;;  %v2526_v26 = vadd.f32 %v2525_v9, %v5204_v25  ;;  %v2570_v28 = vadd.f32 %v2534_v35, %v5516_v34 }
 0x6f6   : > { %v3265_v59 = vpop.f32.mrf.mxu1 }
 0x6f7   : > { %3118 = vst [vmem:[%s5216_s23 + $0x60] sm:$0xff] %v3075_v57   ;;  %v2537_v41 = vadd.f32 %v3265_v59, %v5204_v25  ;;  %v2568_v60 = vadd.f32 %v2526_v26, %v5518_v7 }
 0x6f8   : > { %v2528_v31 = vpop.f32.mrf.mxu1 }
 0x6f9   : > { %v2571_v40 = vadd.f32 %v2537_v41, %v5517_v61  ;;  %v2529_v27 = vadd.f32 %v2528_v31, %v5204_v25 }
 0x6fb   : > { %v3090_v19 = vpack.c.bf16 %v2571_v40, %v2570_v28  ;;  %v2569_v39 = vadd.f32 %v2529_v27, %v5519_v51 }
 0x6fd   : > { %3121 = vst [vmem:[%s5216_s23 + $0x78] sm:$0xff] %v3090_v19   ;;  %v3085_v5 = vpack.c.bf16 %v2569_v39, %v2568_v60 }
 0x6ff   : > { %3120 = vst [vmem:[%s5216_s23 + $0x70] sm:$0xff] %v3085_v5  }
 0x700   : > { %3694 = shalt.err (!%p3691_p0)
}
 0x701   : > { %s3695_s20 = scalar_lea.hbm %s5293_s26, 2048  ;;  %s3699_s12 = scalar_lea.hbm %s5343_s4, 8192 }
 0x702   : > { %p3696_p5 = scmp.ne.s32.totalorder %s5293_s26, %s3695_s20  ;;  %p3700_p4 = scmp.lt.s32.totalorder %s5293_s26, %s5343_s4 }
 0x703   : > { %p3701_p6 = scmp.lt.s32.totalorder %s3699_s12, %s3695_s20 }
 0x704   : > { %p3697_p2 = pnand %p3696_p5, %p5520_p10 }
 0x705   : > { %p3702_p8 = por %p3701_p6, %p3700_p4 }
 0x706   : > { %p3698_p1 = pneg %p3697_p2 }
 0x708   : > { %p3703_p3 = pnand %p3702_p8, %p3698_p1 }
 0x70a   : > { %3706 = shalt.err (!%p3703_p3)
}
 0x70b   : > { %s3758_s23 = smov 64   ;;  %s3759_s8 = smov 4  }
 0x70c   : > { %3272 = dma.vmem_to_hbm [thread:$0]  (%p5520_p10), %s5295_s5, 2048, %s5293_s26, %s2733_s19, %s3758_s23, %s3758_s23, %s3759_s8  }
 0x70d PF: > { %p3289_p7 = scmp.ge.s32.totalorder %s3749_s18, 2  ;;  %s2762_s6 = sand.u32 1, %s3737_s15  }
 0x70e   : > { %p5521_p9 = scmp.ne.s32.totalorder %s5403_s22, 0  ;;  %s2763_s24 = scalar_lea.sflag [#allocation4], %s2762_s6 }
 0x710   : > { %p3283_p11 = pnand %p3289_p7, %p5521_p9 }
 0x712   : > { %p3284_p12 = pneg %p3283_p11 }
 0x714   : > { %3732 = dma.done.wait (%p3284_p12), %s2763_s24, 2048  }
 0x715   : > { %3734 = vsyncadd (%p3284_p12), %s2763_s24, 4294965248  ;;  %p18_p13 = scmp.ge.s32.totalorder %s3838_s27, 6   ;;  %s5522_s15 = smov %s3741_s16 }
 0x716   : > { %s5523_s16 = smov %s3745_s17  ;;  %s5524_s17 = smov %s3858_s9 }
 0x717   : > { %s5525_s18 = smov %s3838_s27  ;;  %20 = sbr.rel (!%p18_p13) target bundleno = 6 (0x6), region = 88 }
 0x71c   :  { %2768 = vsyncpa [#allocation3], 1 }
 0x71d   :  { %2770 = vsyncpa [#allocation3 + $0x1], 1 }
 0x71e   :  { %2771 = vsyncpa [#allocation6], 1 }
 0x71f   :  { %2772 = vsyncpa [#allocation4], 1 }
 0x720   :  { %2774 = vsyncpa [#allocation4 + $0x1], 1 }

// kernel: tpu_custom_call.1
= control target key start
LH: loop header
LB: loop body
LE: loop exit
PB: predicated region body
PF: predicated region fallthrough
CT: control target
= control target key end

     0   :  { %9 = vsyncpa [#allocation3], 0  ;;  %s5339_s0 = inlined_call_operand.hbm [shape: bf16[8,128,128], index: 0, kind: input, shape index: {}]   ;;  %s5340_s1 = inlined_call_operand.hbm [shape: bf16[4,128,128], index: 1, kind: input, shape index: {}]   ;;  %s5341_s2 = inlined_call_operand.vmem [shape: f32[6,128], index: 2, kind: input, shape index: {}]   ;;  %s5342_s3 = inlined_call_operand.vmem [shape: f32[128,2], index: 3, kind: input, shape index: {}]   ;;  %s5343_s4 = inlined_call_operand.hbm [shape: bf16[8,128,128], index: 4, kind: output, shape index: {}]  }
   0x1   :  { %11 = vsyncpa [#allocation3 + $0x1], 0 }
   0x2   :  { %12 = vsyncpa [#allocation6], 0 }
   0x3   :  { %13 = vsyncpa [#allocation4], 0 }
   0x4   :  { %15 = vsyncpa [#allocation4 + $0x1], 0  ;;  %s3785_s15 = smov 0   ;;  %s3787_s16 = smov 0  }
   0x5   :  { %s3789_s17 = smov 0   ;;  %s3791_s18 = smov 0  }
   0x6 LB: > { %s3806_s19 = sadd.s32 4294967295, %s3749_s18   ;;  %s2830_s20 = sadd.s32 4294967294, %s3749_s18   ;;  %s3749_s18 = sphi %s3791_s18, %s5525_s18   ;;  %s3745_s17 = sphi %s3789_s17, %s5524_s17   ;;  %s3741_s16 = sphi %s3787_s16, %s5523_s16   ;;  %s3737_s15 = sphi %s3785_s15, %s5522_s15  }
   0x7   : > { %p41_p0 = scmp.ne.s32.totalorder %s3741_s16, %s3737_s15  ;;  %p5344_p1 = scmp.eq.s32.totalorder %s3806_s19, 0 }
   0x8   : > { %p134_p3 = scmp.eq.s32.totalorder %s2830_s20, 3  ;;  %p2831_p5 = scmp.ge.s32.totalorder %s3749_s18, 1 }
   0x9   : > { %p3815_p4 = por %p5344_p1, %p41_p0  ;;  %p141_p7 = scmp.lt.s32.totalorder %s3749_s18, 5 }
   0xa   : > { %p3820_p6 = por %p134_p3, %p41_p0  ;;  %s3751_s24 = smov [#allocation5]  }
   0xb   : > { %s5402_s21 = scalar_select %p3815_p4, 1, 0 }
   0xc   : > { %s5403_s22 = scalar_select %p3820_p6, 1, 0 }
   0xd   : > { %p3825_p8 = pnand %p2831_p5, %p141_p7  ;;  %s153_s25 = sshll.u32 %s3751_s24, 4  ;;  %s154_s25 = int_to_ptr.vmem [resolvable:$true] %s153_s25 }
   0xe   : > { %s3838_s27 = sadd.s32 1, %s3749_s18   ;;  %s28_s28 = sadd.s32 1, %s3745_s17 }
   0xf   : > { %s5404_s23 = scalar_select %p3825_p8, 1, 0 }
  0x10   : > { %p3274_p9 = pneg %p3825_p8  ;;  %s25_s29 = ssub.s32 %s3749_s18, %s3838_s27 }
  0x11   : > { %s3638_s30 = scalar_lea.vmem %s154_s25, 4096  ;;  %p3646_p3 = scmp.lt.s32.totalorder %s154_s25, %s154_s25 }
  0x12   : > { %p3833_p10 = pnand %p3274_p9, %p5344_p1  ;;  %p3639_p12 = scmp.ne.s32.totalorder %s154_s25, %s3638_s30 }
  0x13   : > { %p3647_p5 = scmp.lt.s32.totalorder %s3638_s30, %s3638_s30 }
  0x14   : > { %p3629_p11 = pneg %p3833_p10 }
  0x15   : > { %p3648_p7 = por %p3647_p5, %p3646_p3 }
  0x16   : > { %p3641_p13 = pnand %p3639_p12, %p3629_p11 }
  0x18   : > { %p3642_p0 = pneg %p3641_p13 }
  0x1a   : > { %p3649_p2 = pnand %p3648_p7, %p3642_p0 }
  0x1c   : > { %3652 = shalt.err (!%p3649_p2)
}
  0x1d   : > { %s3752_s5 = smov 64   ;;  %s3753_s6 = smov 4  }
  0x1e   : > { %3277 = dma.hbm_to_vmem [thread:$0]  (!%p3833_p10), %s5340_s1, 4096, %s154_s25, [#allocation6], %s3752_s5, %s3752_s5, %s3753_s6  }
  0x1f   : > { %p26_p2 = scmp.eq.s32.totalorder %s25_s29, 0  ;;  %p35_p9 = scmp.ne.s32.totalorder %s3745_s17, %s3741_s16 }
  0x20   : > { %p36_p11 = scmp.eq.s32.totalorder %s3749_s18, 0  ;;  %p3287_p12 = scmp.lt.s32.totalorder %s3749_s18, 4 }
  0x21   : > { %s3858_s9 = scalar_select %p26_p2, %s3745_s17, %s28_s28  }
  0x22   : > { %p37_p13 = por %p36_p11, %p35_p9  ;;  %p5406_p0 = scmp.eq.s32.totalorder %s3806_s19, 3 }
  0x23   : > { %s173_s11 = sand.u32 1, %s3745_s17   ;;  %s2913_s12 = sshll.u32 %s3749_s18, 11 }
  0x24   : > { %p3862_p3 = por %p5406_p0, %p35_p9  ;;  %s2834_s13 = sshll.u32 %s173_s11, 7 }
  0x25   : > { %s3871_s24 = scalar_lea.hbm %s5339_s0, %s2913_s12  ;;  %s177_s25 = scalar_lea.vmem [#allocation2], %s2834_s13 }
  0x26   : > { %s5407_s10 = scalar_select %p3862_p3, 1, 0 }
  0x27   : > { %s185_s26 = sshll.u32 %s177_s25, 4  ;;  %p3873_p10 = pnand %p3287_p12, %p37_p13  ;;  %s3877_s26 = int_to_ptr.vmem [resolvable:$true] %s185_s26 }
  0x28   : > { %s3879_s29 = scalar_lea.sflag [#allocation3], %s173_s11  ;;  %s3653_s30 = scalar_lea.hbm %s3871_s24, 2048 }
  0x29   : > { %p3654_p5 = scmp.ne.s32.totalorder %s3871_s24, %s3653_s30  ;;  %p3655_p7 = pneg %p3873_p10 }
  0x2a   : > { %s3658_s12 = scalar_lea.hbm %s5339_s0, 8192  ;;  %p3659_p11 = scmp.lt.s32.totalorder %s3871_s24, %s5339_s0 }
  0x2b   : > { %p3656_p2 = pnand %p3655_p7, %p3654_p5  ;;  %p3660_p12 = scmp.lt.s32.totalorder %s3658_s12, %s3653_s30 }
  0x2d   : > { %p3657_p9 = pneg %p3656_p2  ;;  %p3661_p13 = por %p3660_p12, %p3659_p11 }
  0x2f   : > { %p3662_p0 = pnand %p3661_p13, %p3657_p9 }
  0x31   : > { %3665 = shalt.err (!%p3662_p0)
}
  0x32   : > { %s3666_s11 = scalar_lea.vmem %s3877_s26, 2048  ;;  %s3754_s20 = smov [#allocation2]  }
  0x33   : > { %p3667_p1 = scmp.ne.s32.totalorder %s3877_s26, %s3666_s11  ;;  %s3671_s25 = sshll.u32 %s3754_s20, 4  ;;  %s3672_s25 = int_to_ptr.vmem [resolvable:$false] %s3671_s25 }
  0x34   : > { %s3673_s7 = scalar_lea.vmem %s3672_s25, 4096  ;;  %p3674_p2 = scmp.lt.s32.totalorder %s3877_s26, %s3672_s25 }
  0x35   : > { %p3669_p6 = pnand %p3667_p1, %p3655_p7  ;;  %p3675_p3 = scmp.lt.s32.totalorder %s3673_s7, %s3666_s11 }
  0x37   : > { %p3670_p5 = pneg %p3669_p6  ;;  %p3676_p4 = por %p3675_p3, %p3674_p2 }
  0x39   : > { %p3677_p8 = pnand %p3676_p4, %p3670_p5 }
  0x3b   : > { %3680 = shalt.err (!%p3677_p8)
}
  0x3c   : > { %3281 = dma.hbm_to_vmem [thread:$0]  (!%p3873_p10), %s3871_s24, 2048, %s3877_s26, %s3879_s29, %s3752_s5, %s3752_s5, %s3753_s6  }
  0x3d   : > { %p5409_p1 = scmp.ne.s32.totalorder %s5404_s23, 0 }
  0x3f   : > { %197 = sbr.rel (%p5409_p1) target bundleno = 1805 (0x70d), region = 36 }
  0x44   : > { %s3906_s30 = sand.u32 1, %s3741_s16   ;;  %p5410_p4 = scmp.ne.s32.totalorder %s5402_s21, 0 }
  0x45   : > { %s2839_s8 = sshll.u32 %s3906_s30, 7  ;;  %s200_s12 = scalar_lea.sflag [#allocation3], %s3906_s30 }
  0x46   : > { %s3912_s28 = scalar_lea.vmem [#allocation2], %s2839_s8 }
  0x47   : > { %3724 = dma.done.wait (%p5410_p4), %s200_s12, 2048  }
  0x48   : > { %3726 = vsyncadd (%p5410_p4), %s200_s12, 4294965248  ;;  %p5411_p6 = scmp.eq.s32.totalorder %s3806_s19, 0 }
  0x4a   : > { %3728 = dma.done.wait (%p5411_p6), [#allocation6], 4096   ;;  %p5412_p8 = pmov %p5411_p6 }
  0x4b   : > { %v3106_v0 = vld [vmem:[%s3912_s28 + $0x78] sm:$0xff]   ;;  %v3105_v6 = vld [vmem:[%s3912_s28 + $0x70] sm:$0xff]   ;;  %v3104_v10 = vld [vmem:[%s3912_s28 + $0x68] sm:$0xff]   ;;  %s5216_s23 = scalar_lea.vmem [#allocation7], %s2839_s8  ;;  %s2947_s8 = sshll.u32 %s3806_s19, 11 }
  0x4c   : > { %3730 = vsyncadd (%p5412_p8), [#allocation6], 4294963200  ;;  %v3098_v1 = vld [vmem:[%s3912_s28 + $0x38] sm:$0xff]   ;;  %v3924_v2 = vunpack.c.l.bf16 %v3106_v0  ;;  %v3929_v4 = vunpack.c.h.bf16 %v3106_v0  ;;  %v3097_v7 = vld [vmem:[%s3912_s28 + $0x30] sm:$0xff]   ;;  %v3937_v8 = vunpack.c.l.bf16 %v3105_v6  ;;  %v3940_v9 = vunpack.c.h.bf16 %v3105_v6  ;;  %s2747_s5 = sshll.u32 %s5216_s23, 4  ;;  %s5293_s26 = scalar_lea.hbm %s5343_s4, %s2947_s8  ;;  %s5295_s5 = int_to_ptr.vmem [resolvable:$true] %s2747_s5 }
  0x4d   : > { %v3926_v3 = vunpack.c.l.bf16 %v3098_v1  ;;  %v3932_v5 = vunpack.c.h.bf16 %v3098_v1  ;;  %v3945_v11 = vunpack.c.l.bf16 %v3097_v7  ;;  %v3947_v12 = vunpack.c.h.bf16 %v3097_v7  ;;  %v3096_v13 = vld [vmem:[%s3912_s28 + $0x28] sm:$0xff]   ;;  %v3103_v16 = vld [vmem:[%s3912_s28 + $0x60] sm:$0xff]   ;;  %v3102_v24 = vld [vmem:[%s3912_s28 + $0x58] sm:$0xff]   ;;  %s2733_s19 = scalar_lea.sflag [#allocation4], %s3906_s30  ;;  %s3681_s29 = scalar_lea.vmem %s5295_s5, 2048 }
  0x4e   : > { %5413 = vst [vmem:[#allocation11_spill] sm:$0xff] %v3924_v2  ;;  %443 = vadd.xlane.f32.xlu0 %v3924_v2  ;;  %5415 = vst [vmem:[#allocation13_spill] sm:$0xff] %v3929_v4  ;;  %v3952_v14 = vunpack.c.l.bf16 %v3104_v10  ;;  %v3954_v15 = vunpack.c.h.bf16 %v3104_v10  ;;  %v3959_v17 = vunpack.c.l.bf16 %v3096_v13  ;;  %v3961_v18 = vunpack.c.h.bf16 %v3096_v13  ;;  %v3095_v19 = vld [vmem:[%s3912_s28 + $0x20] sm:$0xff]   ;;  %v3094_v27 = vld [vmem:[%s3912_s28 + $0x18] sm:$0xff]   ;;  %p3682_p3 = scmp.ne.s32.totalorder %s5295_s5, %s3681_s29  ;;  %p5520_p10 = scmp.ne.s32.totalorder %s5407_s10, 0 }
  0x4f   : > { %5414 = vst [vmem:[#allocation12_spill] sm:$0xff] %v3926_v3  ;;  %411 = vadd.xlane.f32.xlu1 %v3926_v3  ;;  %5416 = vst [vmem:[#allocation14_spill] sm:$0xff] %v3932_v5  ;;  %v3966_v20 = vunpack.c.l.bf16 %v3103_v16  ;;  %v3968_v21 = vunpack.c.h.bf16 %v3103_v16  ;;  %v3972_v22 = vunpack.c.l.bf16 %v3095_v19  ;;  %v3974_v23 = vunpack.c.h.bf16 %v3095_v19  ;;  %v3101_v30 = vld [vmem:[%s3912_s28 + $0x50] sm:$0xff]   ;;  %v3100_v36 = vld [vmem:[%s3912_s28 + $0x48] sm:$0xff]   ;;  %s3757_s13 = smov [#allocation7]  }
  0x50   : > { %5417 = vst [vmem:[#allocation15_spill] sm:$0xff] %v3937_v8  ;;  %5418 = vst [vmem:[#allocation16_spill] sm:$0xff] %v3940_v9  ;;  %v3979_v25 = vunpack.c.l.bf16 %v3102_v24  ;;  %v3981_v26 = vunpack.c.h.bf16 %v3102_v24  ;;  %v3986_v28 = vunpack.c.l.bf16 %v3094_v27  ;;  %v3988_v29 = vunpack.c.h.bf16 %v3094_v27  ;;  %v3093_v33 = vld [vmem:[%s3912_s28 + $0x10] sm:$0xff]   ;;  %v3092_v39 = vld [vmem:[%s3912_s28 + $0x8] sm:$0xff]   ;;  %p3683_p7 = pnand %p3682_p3, %p5520_p10  ;;  %s3685_s14 = sshll.u32 %s3757_s13, 4  ;;  %s3686_s14 = int_to_ptr.vmem [resolvable:$false] %s3685_s14 }
  0x51   : > { %5419 = vst [vmem:[#allocation17_spill] sm:$0xff] %v3945_v11  ;;  %5420 = vst [vmem:[#allocation18_spill] sm:$0xff] %v3947_v12  ;;  %v3993_v31 = vunpack.c.l.bf16 %v3101_v30  ;;  %v3995_v32 = vunpack.c.h.bf16 %v3101_v30  ;;  %v4000_v34 = vunpack.c.l.bf16 %v3093_v33  ;;  %v4002_v35 = vunpack.c.h.bf16 %v3093_v33  ;;  %v3099_v42 = vld [vmem:[%s3912_s28 + $0x40] sm:$0xff]   ;;  %s3687_s11 = scalar_lea.vmem %s3686_s14, 4096  ;;  %p3688_p11 = scmp.lt.s32.totalorder %s5295_s5, %s3686_s14 }
  0x52   : > { %445 = vadd.xlane.f32.xlu0 %v3929_v4  ;;  %5421 = vst [vmem:[#allocation19_spill] sm:$0xff] %v3952_v14  ;;  %5422 = vst [vmem:[#allocation20_spill] sm:$0xff] %v3954_v15  ;;  %v4007_v37 = vunpack.c.l.bf16 %v3100_v36  ;;  %v4009_v38 = vunpack.c.h.bf16 %v3100_v36  ;;  %v4014_v40 = vunpack.c.l.bf16 %v3092_v39  ;;  %v4016_v41 = vunpack.c.h.bf16 %v3092_v39  ;;  %v2949_v45 = vld [vmem:[%s3912_s28] sm:$0xff]   ;;  %p3684_p9 = pneg %p3683_p7  ;;  %p3689_p12 = scmp.lt.s32.totalorder %s3687_s11, %s3681_s29 }
  0x53   : > { %413 = vadd.xlane.f32.xlu1 %v3932_v5  ;;  %5423 = vst [vmem:[#allocation21_spill] sm:$0xff] %v3959_v17  ;;  %5424 = vst [vmem:[#allocation22_spill] sm:$0xff] %v3961_v18  ;;  %v4021_v43 = vunpack.c.l.bf16 %v3099_v42  ;;  %v4023_v44 = vunpack.c.h.bf16 %v3099_v42  ;;  %v4028_v46 = vunpack.c.l.bf16 %v2949_v45  ;;  %v4030_v47 = vunpack.c.h.bf16 %v2949_v45 }
  0x54   : > { %5425 = vst [vmem:[#allocation23_spill] sm:$0xff] %v3966_v20  ;;  %5426 = vst [vmem:[#allocation24_spill] sm:$0xff] %v3968_v21  ;;  %p3690_p13 = por %p3689_p12, %p3688_p11 }
  0x55   : > { %5427 = vst [vmem:[#allocation25_spill] sm:$0xff] %v3972_v22  ;;  %5428 = vst [vmem:[#allocation26_spill] sm:$0xff] %v3974_v23 }
  0x56   : > { %439 = vadd.xlane.f32.xlu0 %v3937_v8  ;;  %5429 = vst [vmem:[#allocation27_spill] sm:$0xff] %v3979_v25  ;;  %5430 = vst [vmem:[#allocation28_spill] sm:$0xff] %v3981_v26  ;;  %p3691_p0 = pnand %p3690_p13, %p3684_p9 }
  0x57   : > { %441 = vadd.xlane.f32.xlu1 %v3940_v9  ;;  %5431 = vst [vmem:[#allocation29_spill] sm:$0xff] %v3986_v28  ;;  %5432 = vst [vmem:[#allocation30_spill] sm:$0xff] %v3988_v29 }
  0x58   : > { %5433 = vst [vmem:[#allocation31_spill] sm:$0xff] %v3993_v31  ;;  %5434 = vst [vmem:[#allocation32_spill] sm:$0xff] %v3995_v32 }
  0x59   : > { %5435 = vst [vmem:[#allocation33_spill] sm:$0xff] %v4000_v34  ;;  %5436 = vst [vmem:[#allocation34_spill] sm:$0xff] %v4002_v35 }
  0x5a   : > { %407 = vadd.xlane.f32.xlu0 %v3945_v11  ;;  %5437 = vst [vmem:[#allocation35_spill] sm:$0xff] %v4007_v37  ;;  %5438 = vst [vmem:[#allocation36_spill] sm:$0xff] %v4009_v38 }
  0x5b   : > { %409 = vadd.xlane.f32.xlu1 %v3947_v12  ;;  %5439 = vst [vmem:[#allocation37_spill] sm:$0xff] %v4014_v40  ;;  %5440 = vst [vmem:[#allocation38_spill] sm:$0xff] %v4016_v41 }
  0x5c   : > { %5441 = vst [vmem:[#allocation39_spill] sm:$0xff] %v4021_v43  ;;  %5442 = vst [vmem:[#allocation40_spill] sm:$0xff] %v4023_v44 }
  0x5d   : > { %5443 = vst [vmem:[#allocation41_spill] sm:$0xff] %v4030_v47 }
  0x5e   : > { %435 = vadd.xlane.f32.xlu0 %v3952_v14 }
  0x5f   : > { %437 = vadd.xlane.f32.xlu1 %v3954_v15 }
  0x62   : > { %403 = vadd.xlane.f32.xlu0 %v3959_v17 }
  0x63   : > { %405 = vadd.xlane.f32.xlu1 %v3961_v18 }
  0x66   : > { %431 = vadd.xlane.f32.xlu0 %v3966_v20 }
  0x67   : > { %433 = vadd.xlane.f32.xlu1 %v3968_v21 }
  0x6a   : > { %399 = vadd.xlane.f32.xlu0 %v3972_v22 }
  0x6b   : > { %401 = vadd.xlane.f32.xlu1 %v3974_v23 }
  0x6e   : > { %427 = vadd.xlane.f32.xlu0 %v3979_v25 }
  0x6f   : > { %429 = vadd.xlane.f32.xlu1 %v3981_v26 }
  0x72   : > { %395 = vadd.xlane.f32.xlu0 %v3986_v28 }
  0x73   : > { %397 = vadd.xlane.f32.xlu1 %v3988_v29 }
  0x76   : > { %423 = vadd.xlane.f32.xlu0 %v3993_v31 }
  0x77   : > { %425 = vadd.xlane.f32.xlu1 %v3995_v32 }
  0x7a   : > { %391 = vadd.xlane.f32.xlu0 %v4000_v34 }
  0x7b   : > { %393 = vadd.xlane.f32.xlu1 %v4002_v35 }
  0x7e   : > { %419 = vadd.xlane.f32.xlu0 %v4007_v37 }
  0x7f   : > { %421 = vadd.xlane.f32.xlu1 %v4009_v38 }
  0x82   : > { %387 = vadd.xlane.f32.xlu0 %v4014_v40 }
  0x83   : > { %389 = vadd.xlane.f32.xlu1 %v4016_v41 }
  0x86   : > { %415 = vadd.xlane.f32.xlu0 %v4021_v43 }
  0x87   : > { %417 = vadd.xlane.f32.xlu1 %v4023_v44 }
  0x8a   : > { %383 = vadd.xlane.f32.xlu0 %v4028_v46 }
  0x8b   : > { %385 = vadd.xlane.f32.xlu1 %v4030_v47 }
  0xd7   : > { %v444_v48 = vpop.xlane.xlu0 %443 }
  0xd8   : > { %v412_v49 = vpop.xlane.xlu1 %411  ;;  %v478_v50 = vmul.f32 0.0078125, %v444_v48 }
  0xd9   : > { %v462_v51 = vmul.f32 0.0078125, %v412_v49 }
  0xda   : > { %v4035_v52 = vsub.f32 %v3924_v2, %v478_v50 }
  0xdb   : > { %v4038_v53 = vsub.f32 %v3926_v3, %v462_v51  ;;  %v446_v54 = vpop.xlane.xlu0 %445 }
  0xdc   : > { %v414_v55 = vpop.xlane.xlu1 %413  ;;  %v479_v56 = vmul.f32 0.0078125, %v446_v54  ;;  %v542_v57 = vmul.f32 %v4035_v52, %v4035_v52 }
  0xdd   : > { %v463_v58 = vmul.f32 0.0078125, %v414_v55  ;;  %v526_v60 = vmul.f32 %v4038_v53, %v4038_v53 }
  0xde   : > { %604 = vadd.xlane.f32.xlu0 %v542_v57  ;;  %v4043_v59 = vsub.f32 %v3929_v4, %v479_v56 }
  0xdf   : > { %v4048_v61 = vsub.f32 %v3932_v5, %v463_v58  ;;  %v440_v62 = vpop.xlane.xlu0 %439 }
  0xe0   : > { %v442_v63 = vpop.xlane.xlu1 %441  ;;  %v476_v0 = vmul.f32 0.0078125, %v440_v62  ;;  %v543_v1 = vmul.f32 %v4043_v59, %v4043_v59 }
  0xe1   : > { %v477_v6 = vmul.f32 0.0078125, %v442_v63  ;;  %v527_v7 = vmul.f32 %v4048_v61, %v4048_v61 }
  0xe2   : > { %606 = vadd.xlane.f32.xlu1 %v543_v1  ;;  %572 = vadd.xlane.f32.xlu0 %v526_v60  ;;  %v4055_v10 = vsub.f32 %v3937_v8, %v476_v0 }
  0xe3   : > { %v4058_v13 = vsub.f32 %v3940_v9, %v477_v6  ;;  %v408_v16 = vpop.xlane.xlu0 %407 }
  0xe4   : > { %v410_v19 = vpop.xlane.xlu1 %409  ;;  %v460_v24 = vmul.f32 0.0078125, %v408_v16  ;;  %v540_v27 = vmul.f32 %v4055_v10, %v4055_v10 }
  0xe5   : > { %v461_v30 = vmul.f32 0.0078125, %v410_v19  ;;  %v541_v33 = vmul.f32 %v4058_v13, %v4058_v13 }
  0xe6   : > { %574 = vadd.xlane.f32.xlu1 %v527_v7  ;;  %600 = vadd.xlane.f32.xlu0 %v540_v27  ;;  %v4065_v36 = vsub.f32 %v3945_v11, %v460_v24 }
  0xe7   : > { %v4068_v39 = vsub.f32 %v3947_v12, %v461_v30  ;;  %v436_v42 = vpop.xlane.xlu0 %435 }
  0xe8   : > { %v438_v45 = vpop.xlane.xlu1 %437  ;;  %v474_v48 = vmul.f32 0.0078125, %v436_v42  ;;  %v524_v49 = vmul.f32 %v4065_v36, %v4065_v36 }
  0xe9   : > { %v475_v50 = vmul.f32 0.0078125, %v438_v45  ;;  %v525_v51 = vmul.f32 %v4068_v39, %v4068_v39 }
  0xea   : > { %602 = vadd.xlane.f32.xlu1 %v541_v33  ;;  %568 = vadd.xlane.f32.xlu0 %v524_v49  ;;  %v4075_v54 = vsub.f32 %v3952_v14, %v474_v48 }
  0xeb   : > { %v4078_v55 = vsub.f32 %v3954_v15, %v475_v50  ;;  %v404_v56 = vpop.xlane.xlu0 %403 }
  0xec   : > { %v406_v57 = vpop.xlane.xlu1 %405  ;;  %v458_v58 = vmul.f32 0.0078125, %v404_v56  ;;  %v538_v60 = vmul.f32 %v4075_v54, %v4075_v54 }
  0xed   : > { %v459_v62 = vmul.f32 0.0078125, %v406_v57  ;;  %v539_v63 = vmul.f32 %v4078_v55, %v4078_v55 }
  0xee   : > { %570 = vadd.xlane.f32.xlu1 %v525_v51  ;;  %596 = vadd.xlane.f32.xlu0 %v538_v60  ;;  %v4085_v0 = vsub.f32 %v3959_v17, %v458_v58 }
  0xef   : > { %v4088_v1 = vsub.f32 %v3961_v18, %v459_v62  ;;  %v432_v6 = vpop.xlane.xlu0 %431 }
  0xf0   : > { %v434_v7 = vpop.xlane.xlu1 %433  ;;  %v472_v16 = vmul.f32 0.0078125, %v432_v6  ;;  %v522_v19 = vmul.f32 %v4085_v0, %v4085_v0 }
  0xf1   : > { %v473_v24 = vmul.f32 0.0078125, %v434_v7  ;;  %v523_v27 = vmul.f32 %v4088_v1, %v4088_v1 }
  0xf2   : > { %598 = vadd.xlane.f32.xlu1 %v539_v63  ;;  %564 = vadd.xlane.f32.xlu0 %v522_v19  ;;  %v4095_v30 = vsub.f32 %v3966_v20, %v472_v16 }
  0xf3   : > { %v4098_v33 = vsub.f32 %v3968_v21, %v473_v24  ;;  %v400_v42 = vpop.xlane.xlu0 %399 }
  0xf4   : > { %v402_v45 = vpop.xlane.xlu1 %401  ;;  %v456_v48 = vmul.f32 0.0078125, %v400_v42  ;;  %v536_v49 = vmul.f32 %v4095_v30, %v4095_v30 }
  0xf5   : > { %v457_v50 = vmul.f32 0.0078125, %v402_v45  ;;  %v537_v51 = vmul.f32 %v4098_v33, %v4098_v33 }
  0xf6   : > { %566 = vadd.xlane.f32.xlu1 %v523_v27  ;;  %592 = vadd.xlane.f32.xlu0 %v536_v49  ;;  %v4105_v56 = vsub.f32 %v3972_v22, %v456_v48 }
  0xf7   : > { %v4108_v57 = vsub.f32 %v3974_v23, %v457_v50  ;;  %v428_v58 = vpop.xlane.xlu0 %427 }
  0xf8   : > { %v430_v60 = vpop.xlane.xlu1 %429  ;;  %v470_v62 = vmul.f32 0.0078125, %v428_v58  ;;  %v520_v63 = vmul.f32 %v4105_v56, %v4105_v56 }
  0xf9   : > { %v471_v6 = vmul.f32 0.0078125, %v430_v60  ;;  %v521_v7 = vmul.f32 %v4108_v57, %v4108_v57 }
  0xfa   : > { %594 = vadd.xlane.f32.xlu1 %v537_v51  ;;  %560 = vadd.xlane.f32.xlu0 %v520_v63  ;;  %v4115_v16 = vsub.f32 %v3979_v25, %v470_v62 }
  0xfb   : > { %v4118_v19 = vsub.f32 %v3981_v26, %v471_v6  ;;  %v396_v24 = vpop.xlane.xlu0 %395 }
  0xfc   : > { %v398_v27 = vpop.xlane.xlu1 %397  ;;  %v454_v42 = vmul.f32 0.0078125, %v396_v24  ;;  %v534_v45 = vmul.f32 %v4115_v16, %v4115_v16 }
  0xfd   : > { %v455_v48 = vmul.f32 0.0078125, %v398_v27  ;;  %v535_v49 = vmul.f32 %v4118_v19, %v4118_v19 }
  0xfe   : > { %562 = vadd.xlane.f32.xlu1 %v521_v7  ;;  %588 = vadd.xlane.f32.xlu0 %v534_v45  ;;  %v4125_v50 = vsub.f32 %v3986_v28, %v454_v42 }
  0xff   : > { %v4128_v51 = vsub.f32 %v3988_v29, %v455_v48  ;;  %v424_v58 = vpop.xlane.xlu0 %423 }
 0x100   : > { %v426_v60 = vpop.xlane.xlu1 %425  ;;  %v468_v62 = vmul.f32 0.0078125, %v424_v58  ;;  %v518_v63 = vmul.f32 %v4125_v50, %v4125_v50 }
 0x101   : > { %v469_v6 = vmul.f32 0.0078125, %v426_v60  ;;  %v519_v7 = vmul.f32 %v4128_v51, %v4128_v51 }
 0x102   : > { %590 = vadd.xlane.f32.xlu1 %v535_v49  ;;  %556 = vadd.xlane.f32.xlu0 %v518_v63  ;;  %v4135_v24 = vsub.f32 %v3993_v31, %v468_v62 }
 0x103   : > { %v4138_v27 = vsub.f32 %v3995_v32, %v469_v6  ;;  %v392_v42 = vpop.xlane.xlu0 %391  ;;  %v736_v32 = vlaneseq }
 0x104   : > { %v394_v45 = vpop.xlane.xlu1 %393  ;;  %v452_v48 = vmul.f32 0.0078125, %v392_v42  ;;  %v532_v58 = vmul.f32 %v4135_v24, %v4135_v24 }
 0x105   : > { %v453_v4 = vmul.f32 0.0078125, %v394_v45  ;;  %v533_v49 = vmul.f32 %v4138_v27, %v4138_v27 }
 0x106   : > { %558 = vadd.xlane.f32.xlu1 %v519_v7  ;;  %584 = vadd.xlane.f32.xlu0 %v532_v58  ;;  %v4145_v60 = vsub.f32 %v4000_v34, %v452_v48 }
 0x107   : > { %v4148_v62 = vsub.f32 %v4002_v35, %v453_v4  ;;  %v420_v63 = vpop.xlane.xlu0 %419 }
 0x108   : > { %v422_v6 = vpop.xlane.xlu1 %421  ;;  %v466_v2 = vmul.f32 0.0078125, %v420_v63  ;;  %v516_v42 = vmul.f32 %v4145_v60, %v4145_v60 }
 0x109   : > { %v467_v9 = vmul.f32 0.0078125, %v422_v6  ;;  %v517_v7 = vmul.f32 %v4148_v62, %v4148_v62 }
 0x10a   : > { %586 = vadd.xlane.f32.xlu1 %v533_v49  ;;  %552 = vadd.xlane.f32.xlu0 %v516_v42  ;;  %v4155_v45 = vsub.f32 %v4007_v37, %v466_v2 }
 0x10b   : > { %v4158_v48 = vsub.f32 %v4009_v38, %v467_v9  ;;  %v388_v4 = vpop.xlane.xlu0 %387 }
 0x10c   : > { %v390_v58 = vpop.xlane.xlu1 %389  ;;  %v450_v8 = vmul.f32 0.0078125, %v388_v4  ;;  %v530_v63 = vmul.f32 %v4155_v45, %v4155_v45 }
 0x10d   : > { %v451_v15 = vmul.f32 0.0078125, %v390_v58  ;;  %v531_v49 = vmul.f32 %v4158_v48, %v4158_v48 }
 0x10e   : > { %554 = vadd.xlane.f32.xlu1 %v517_v7  ;;  %580 = vadd.xlane.f32.xlu0 %v530_v63  ;;  %v4165_v6 = vsub.f32 %v4014_v40, %v450_v8 }
 0x10f   : > { %v4168_v2 = vsub.f32 %v4016_v41, %v451_v15  ;;  %v416_v9 = vpop.xlane.xlu0 %415 }
 0x110   : > { %v418_v42 = vpop.xlane.xlu1 %417  ;;  %v464_v14 = vmul.f32 0.0078125, %v416_v9  ;;  %v514_v4 = vmul.f32 %v4165_v6, %v4165_v6 }
 0x111   : > { %v465_v21 = vmul.f32 0.0078125, %v418_v42  ;;  %v515_v7 = vmul.f32 %v4168_v2, %v4168_v2 }
 0x112   : > { %582 = vadd.xlane.f32.xlu1 %v531_v49  ;;  %548 = vadd.xlane.f32.xlu0 %v514_v4  ;;  %v4175_v58 = vsub.f32 %v4021_v43, %v464_v14 }
 0x113   : > { %v4178_v8 = vsub.f32 %v4023_v44, %v465_v21  ;;  %v384_v15 = vpop.xlane.xlu0 %383 }
 0x114   : > { %v386_v63 = vpop.xlane.xlu1 %385  ;;  %v448_v20 = vmul.f32 0.0078125, %v384_v15  ;;  %v528_v9 = vmul.f32 %v4175_v58, %v4175_v58 }
 0x115   : > { %v449_v26 = vmul.f32 0.0078125, %v386_v63  ;;  %v529_v49 = vmul.f32 %v4178_v8, %v4178_v8  ;;  %v313_v63 = vld [vmem:[%s5342_s3 + $0x68] sm:$0xff] }
 0x116   : > { %550 = vadd.xlane.f32.xlu1 %v515_v7  ;;  %576 = vadd.xlane.f32.xlu0 %v528_v9  ;;  %v4185_v42 = vsub.f32 %v4028_v46, %v448_v20  ;;  %v5357_v7 = vmov 0   ;;  %v315_v20 = vld [vmem:[%s5342_s3 + $0x78] sm:$0xff] }
 0x117   : > { %v4188_v14 = vsub.f32 %v4030_v47, %v449_v26  ;;  %984 = vmatprep.mubr.bf16.mxu0 %v5357_v7  ;;  %3330 = vset.pattern.permute.xlu1 %v5357_v7  ;;  %v312_v26 = vld [vmem:[%s5342_s3 + $0x60] sm:$0xff] }
 0x118   : > { %v512_v21 = vmul.f32 %v4185_v42, %v4185_v42  ;;  %3329 = vset.pattern.permute.xlu0 %v5357_v7  ;;  %1385 = vmatprep.mubr.bf16.mxu1 %v5357_v7 }
 0x119   : > { %v513_v4 = vmul.f32 %v4188_v14, %v4188_v14 }
 0x11a   : > { %578 = vadd.xlane.f32.xlu1 %v529_v49  ;;  %544 = vadd.xlane.f32.xlu0 %v512_v21 }
 0x11e   : > { %546 = vadd.xlane.f32.xlu1 %v513_v4 }
 0x12f   : > { %901 = vperm.xlu1 %3330, %v315_v20   ;;  %v4210_v20 = vld [vmem:[%s5342_s3 + $0x50] sm:$0xff] }
 0x133   : > { %886 = vperm.xlu1 %3330, %v312_v26  }
 0x137   : > { %891 = vperm.xlu1 %3330, %v313_v63  }
 0x13b   : > { %876 = vperm.xlu1 %3330, %v4210_v20  }
 0x167   : > { %v605_v15 = vpop.xlane.xlu0 %604 }
 0x168   : > { %v638_v9 = vmul.f32 0.0078125, %v605_v15  ;;  %v311_v15 = vld [vmem:[%s5342_s3 + $0x58] sm:$0xff] }
 0x169   : > { %881 = vperm.xlu1 %3330, %v311_v15  }
 0x16a   : > { %v670_v49 = vadd.f32 1e-05, %v638_v9 }
 0x16b   : > { %v607_v21 = vpop.xlane.xlu1 %606  ;;  %v573_v4 = vpop.xlane.xlu0 %572 }
 0x16c   : > { %3365 = vrsqrt.f32 %v670_v49  ;;  %v639_v7 = vmul.f32 0.0078125, %v607_v21  ;;  %v622_v25 = vmul.f32 0.0078125, %v573_v4  ;;  %v4216_v49 = vshrl.u32 %v736_v32, 7  ;;  %v299_v32 = vld [vmem:[%s5341_s2] sm:$0x3f] }
 0x16e   : > { %v671_v26 = vadd.f32 1e-05, %v639_v7  ;;  %v654_v31 = vadd.f32 1e-05, %v622_v25  ;;  %5444 = vst [vmem:[#allocation42_spill] sm:$0xff] %v4216_v49  ;;  %v738_v43 = vsub.s32 0, %v4216_v49 }
 0x16f   : > { %v575_v38 = vpop.xlane.xlu1 %574  ;;  %v601_v37 = vpop.xlane.xlu0 %600 }
 0x170   : > { %3367 = vrsqrt.f32 %v671_v26  ;;  %v623_v63 = vmul.f32 0.0078125, %v575_v38  ;;  %v636_v9 = vmul.f32 0.0078125, %v601_v37  ;;  %v4222_v26 = vld [vmem:[%s5342_s3 + $0x40] sm:$0xff] }
 0x171   : > { %3369 = vrsqrt.f32 %v654_v31  ;;  %866 = vperm.xlu1 %3330, %v4222_v26  }
 0x172   : > { %v655_v21 = vadd.f32 1e-05, %v623_v63  ;;  %v668_v4 = vadd.f32 1e-05, %v636_v9 }
 0x173   : > { %v603_v44 = vpop.xlane.xlu1 %602  ;;  %v569_v7 = vpop.xlane.xlu0 %568 }
 0x174   : > { %3371 = vrsqrt.f32 %v655_v21  ;;  %v637_v25 = vmul.f32 0.0078125, %v603_v44  ;;  %v620_v5 = vmul.f32 0.0078125, %v569_v7  ;;  %v4231_v44 = vld [vmem:[%s5342_s3 + $0x48] sm:$0xff] }
 0x175   : > { %3373 = vrsqrt.f32 %v668_v4  ;;  %v4233_v4 = vrot.slane %v299_v32, %v738_v43  ;;  %871 = vperm.xlu1 %3330, %v4231_v44   ;;  %v4244_v43 = vld [vmem:[%s5342_s3 + $0x30] sm:$0xff] }
 0x176   : > { %v669_v37 = vadd.f32 1e-05, %v637_v25  ;;  %v652_v31 = vadd.f32 1e-05, %v620_v5  ;;  %v774_v5 = vsub.s32 1, %v4216_v49 }
 0x177   : > { %v571_v38 = vpop.xlane.xlu1 %570  ;;  %v597_v15 = vpop.xlane.xlu0 %596 }
 0x178   : > { %3375 = vrsqrt.f32 %v669_v37  ;;  %v621_v63 = vmul.f32 0.0078125, %v571_v38  ;;  %v634_v9 = vmul.f32 0.0078125, %v597_v15 }
 0x179   : > { %v3366_v21 = vpop.eup %3365  ;;  %3377 = vrsqrt.f32 %v652_v31  ;;  %v4239_v31 = vrot.slane %v299_v32, %v774_v5  ;;  %856 = vperm.xlu1 %3330, %v4244_v43  }
 0x17a   : > { %v653_v7 = vadd.f32 1e-05, %v621_v63  ;;  %v666_v25 = vadd.f32 1e-05, %v634_v9  ;;  %v734_v3 = vmul.f32 %v3366_v21, %v4035_v52  ;;  %v4249_v52 = vld [vmem:[%s5342_s3 + $0x70] sm:$0xff]  ;;  %v4258_v21 = vld [vmem:[%s5342_s3 + $0x20] sm:$0xff] }
 0x17b   : > { %v599_v12 = vpop.xlane.xlu1 %598  ;;  %v565_v11 = vpop.xlane.xlu0 %564  ;;  %896 = vperm.xlu0 %3329, %v4249_v52  }
 0x17c   : > { %3379 = vrsqrt.f32 %v653_v7  ;;  %v635_v18 = vmul.f32 0.0078125, %v599_v12  ;;  %v618_v17 = vmul.f32 0.0078125, %v565_v11  ;;  %v770_v38 = vmul.f32 %v4233_v4, %v734_v3 }
 0x17d   : > { %v3368_v37 = vpop.eup %3367  ;;  %3381 = vrsqrt.f32 %v666_v25  ;;  %846 = vperm.xlu1 %3330, %v4258_v21  }
 0x17e   : > { %v3370_v15 = vpop.eup %3369  ;;  %v667_v63 = vadd.f32 1e-05, %v635_v18  ;;  %v650_v12 = vadd.f32 1e-05, %v618_v17  ;;  %v735_v11 = vmul.f32 %v3368_v37, %v4043_v59  ;;  %v4263_v18 = vld [vmem:[%s5342_s3 + $0x38] sm:$0xff]  ;;  %v806_v25 = vadd.f32 %v4239_v31, %v770_v38  ;;  %v4276_v38 = vld [vmem:[%s5342_s3 + $0x10] sm:$0xff] }
 0x17f   : > { %v567_v3 = vpop.xlane.xlu1 %566  ;;  %v593_v32 = vpop.xlane.xlu0 %592  ;;  %v718_v9 = vmul.f32 %v3370_v15, %v4038_v53  ;;  %861 = vperm.xlu0 %3329, %v4263_v18  }
 0x180   : > { %3383 = vrsqrt.f32 %v667_v63  ;;  %v619_v17 = vmul.f32 0.0078125, %v567_v3  ;;  %v632_v59 = vmul.f32 0.0078125, %v593_v32  ;;  %v771_v5 = vmul.f32 %v4233_v4, %v735_v11 }
 0x181   : > { %v3372_v7 = vpop.eup %3371  ;;  %3385 = vrsqrt.f32 %v650_v12  ;;  %v754_v32 = vmul.f32 %v4233_v4, %v718_v9  ;;  %836 = vperm.xlu1 %3330, %v4276_v38  }
 0x182   : > { %v3374_v53 = vpop.eup %3373  ;;  %v651_v37 = vadd.f32 1e-05, %v619_v17  ;;  %v664_v15 = vadd.f32 1e-05, %v632_v59  ;;  %v807_v49 = vadd.f32 %v4239_v31, %v771_v5  ;;  %v719_v23 = vmul.f32 %v3372_v7, %v4048_v61  ;;  %v4281_v61 = vld [vmem:[%s5342_s3 + $0x28] sm:$0xff] }
 0x183   : > { %v595_v63 = vpop.xlane.xlu1 %594  ;;  %v561_v3 = vpop.xlane.xlu0 %560  ;;  %v732_v11 = vmul.f32 %v3374_v53, %v4055_v10  ;;  %851 = vperm.xlu0 %3329, %v4281_v61  }
 0x184   : > { %3387 = vrsqrt.f32 %v651_v37  ;;  %v633_v12 = vmul.f32 0.0078125, %v595_v63  ;;  %v616_v17 = vmul.f32 0.0078125, %v561_v3  ;;  %v823_v59 = vpack.c.bf16 %v807_v49, %v806_v25 }
 0x185   : > { %v3376_v5 = vpop.eup %3375  ;;  %3389 = vrsqrt.f32 %v664_v15  ;;  %v755_v9 = vmul.f32 %v4233_v4, %v719_v23  ;;  %v768_v10 = vmul.f32 %v4233_v4, %v732_v11  ;;  %v790_v63 = vadd.f32 %v4239_v31, %v754_v32  ;;  %v4294_v23 = vld [vmem:[%s5342_s3] sm:$0xff]  ;;  %v4300_v32 = vld [vmem:[%s5342_s3 + $0x18] sm:$0xff] }
 0x186   : > { %v3378_v7 = vpop.eup %3377  ;;  %v665_v53 = vadd.f32 1e-05, %v633_v12  ;;  %v648_v22 = vadd.f32 1e-05, %v616_v17  ;;  %952 = vmatprep.subr.bf16.mxu0 %v823_v59  ;;  %v733_v37 = vmul.f32 %v3376_v5, %v4058_v13  ;;  %826 = vperm.xlu1 %3330, %v4294_v23  }
 0x187   : > { %v563_v49 = vpop.xlane.xlu1 %562  ;;  %v589_v25 = vpop.xlane.xlu0 %588  ;;  %v791_v3 = vadd.f32 %v4239_v31, %v755_v9  ;;  %v716_v15 = vmul.f32 %v3378_v7, %v4065_v36  ;;  %v804_v59 = vadd.f32 %v4239_v31, %v768_v10  ;;  %841 = vperm.xlu0 %3329, %v4300_v32  }
 0x188   : > { %3391 = vrsqrt.f32 %v665_v53  ;;  %v617_v11 = vmul.f32 0.0078125, %v563_v49  ;;  %v630_v13 = vmul.f32 0.0078125, %v589_v25  ;;  %v769_v12 = vmul.f32 %v4233_v4, %v733_v37 }
 0x189   : > { %v3380_v17 = vpop.eup %3379  ;;  %3393 = vrsqrt.f32 %v648_v22  ;;  %v815_v36 = vpack.c.bf16 %v791_v3, %v790_v63  ;;  %v752_v25 = vmul.f32 %v4233_v4, %v716_v15  ;;  %v4312_v3 = vld [vmem:[%s5342_s3 + $0x8] sm:$0xff] }
 0x18a   : > { %v3382_v5 = vpop.eup %3381  ;;  %v649_v9 = vadd.f32 1e-05, %v617_v11  ;;  %v662_v7 = vadd.f32 1e-05, %v630_v13  ;;  %v805_v29 = vadd.f32 %v4239_v31, %v769_v12  ;;  %v717_v53 = vmul.f32 %v3380_v17, %v4068_v39 }
 0x18b   : > { %953 = vmatpush1.bf16.msra.mxu0 %v815_v36  ;;  %v591_v37 = vpop.xlane.xlu1 %590  ;;  %v557_v49 = vpop.xlane.xlu0 %556  ;;  %v730_v28 = vmul.f32 %v3382_v5, %v4075_v54  ;;  %831 = vperm.xlu0 %3329, %v4312_v3  }
 0x18c   : > { %3395 = vrsqrt.f32 %v649_v9  ;;  %v631_v22 = vmul.f32 0.0078125, %v591_v37  ;;  %v614_v10 = vmul.f32 0.0078125, %v557_v49  ;;  %v822_v63 = vpack.c.bf16 %v805_v29, %v804_v59 }
 0x18d   : > { %v3384_v39 = vpop.eup %3383  ;;  %3397 = vrsqrt.f32 %v662_v7  ;;  %v753_v11 = vmul.f32 %v4233_v4, %v717_v53  ;;  %v766_v13 = vmul.f32 %v4233_v4, %v730_v28  ;;  %v788_v29 = vadd.f32 %v4239_v31, %v752_v25 }
 0x18e   : > { %v3386_v15 = vpop.eup %3385  ;;  %v663_v12 = vadd.f32 1e-05, %v631_v22  ;;  %v646_v54 = vadd.f32 1e-05, %v614_v10  ;;  %954 = vmatprep.subr.bf16.mxu0 %v822_v63  ;;  %v731_v17 = vmul.f32 %v3384_v39, %v4078_v55 }
 0x18f   : > { %v559_v36 = vpop.xlane.xlu1 %558  ;;  %v585_v5 = vpop.xlane.xlu0 %584  ;;  %v789_v59 = vadd.f32 %v4239_v31, %v753_v11  ;;  %v714_v9 = vmul.f32 %v3386_v15, %v4085_v0  ;;  %v802_v55 = vadd.f32 %v4239_v31, %v766_v13 }
 0x190   : > { %3399 = vrsqrt.f32 %v663_v12  ;;  %v615_v7 = vmul.f32 0.0078125, %v559_v36  ;;  %v628_v53 = vmul.f32 0.0078125, %v585_v5  ;;  %v767_v28 = vmul.f32 %v4233_v4, %v731_v17 }
 0x191   : > { %v3388_v37 = vpop.eup %3387  ;;  %3401 = vrsqrt.f32 %v646_v54  ;;  %v814_v49 = vpack.c.bf16 %v789_v59, %v788_v29  ;;  %v750_v15 = vmul.f32 %v4233_v4, %v714_v9 }
 0x192   : > { %v3390_v22 = vpop.eup %3389  ;;  %v647_v10 = vadd.f32 1e-05, %v615_v7  ;;  %v660_v63 = vadd.f32 1e-05, %v628_v53  ;;  %v803_v25 = vadd.f32 %v4239_v31, %v767_v28  ;;  %v715_v39 = vmul.f32 %v3388_v37, %v4088_v1 }
 0x193   : > { %955 = vmatpush1.bf16.msra.mxu0 %v814_v49  ;;  %v587_v0 = vpop.xlane.xlu1 %586  ;;  %v553_v11 = vpop.xlane.xlu0 %552  ;;  %v728_v12 = vmul.f32 %v3390_v22, %v4095_v30  ;;  %v786_v30 = vadd.f32 %v4239_v31, %v750_v15 }
 0x194   : > { %3403 = vrsqrt.f32 %v647_v10  ;;  %v629_v17 = vmul.f32 0.0078125, %v587_v0  ;;  %v612_v54 = vmul.f32 0.0078125, %v553_v11  ;;  %v821_v36 = vpack.c.bf16 %v803_v25, %v802_v55 }
 0x195   : > { %v3392_v5 = vpop.eup %3391  ;;  %3405 = vrsqrt.f32 %v660_v63  ;;  %v751_v13 = vmul.f32 %v4233_v4, %v715_v39  ;;  %v764_v29 = vmul.f32 %v4233_v4, %v728_v12 }
 0x196   : > { %v3394_v59 = vpop.eup %3393  ;;  %v661_v7 = vadd.f32 1e-05, %v629_v17  ;;  %v644_v1 = vadd.f32 1e-05, %v612_v54  ;;  %956 = vmatprep.subr.bf16.mxu0 %v821_v36  ;;  %v729_v53 = vmul.f32 %v3392_v5, %v4098_v33 }
 0x197   : > { %v555_v28 = vpop.xlane.xlu1 %554  ;;  %v581_v9 = vpop.xlane.xlu0 %580  ;;  %v787_v37 = vadd.f32 %v4239_v31, %v751_v13  ;;  %v712_v49 = vmul.f32 %v3394_v59, %v4105_v56  ;;  %v800_v39 = vadd.f32 %v4239_v31, %v764_v29 }
 0x198   : > { %3407 = vrsqrt.f32 %v661_v7  ;;  %v613_v55 = vmul.f32 0.0078125, %v555_v28  ;;  %v626_v22 = vmul.f32 0.0078125, %v581_v9  ;;  %v765_v10 = vmul.f32 %v4233_v4, %v729_v53 }
 0x199   : > { %v3396_v63 = vpop.eup %3395  ;;  %3409 = vrsqrt.f32 %v644_v1  ;;  %v813_v25 = vpack.c.bf16 %v787_v37, %v786_v30  ;;  %v748_v54 = vmul.f32 %v4233_v4, %v712_v49 }
 0x19a   : > { %v3398_v0 = vpop.eup %3397  ;;  %v645_v33 = vadd.f32 1e-05, %v613_v55  ;;  %v658_v11 = vadd.f32 1e-05, %v626_v22  ;;  %v801_v12 = vadd.f32 %v4239_v31, %v765_v10  ;;  %v713_v15 = vmul.f32 %v3396_v63, %v4108_v57 }
 0x19b   : > { %957 = vmatpush1.bf16.msra.mxu0 %v813_v25  ;;  %v583_v17 = vpop.xlane.xlu1 %582  ;;  %v549_v56 = vpop.xlane.xlu0 %548  ;;  %v726_v36 = vmul.f32 %v3398_v0, %v4115_v16  ;;  %v784_v16 = vadd.f32 %v4239_v31, %v748_v54 }
 0x19c   : > { %3411 = vrsqrt.f32 %v645_v33  ;;  %v627_v5 = vmul.f32 0.0078125, %v583_v17  ;;  %v610_v13 = vmul.f32 0.0078125, %v549_v56  ;;  %v820_v59 = vpack.c.bf16 %v801_v12, %v800_v39 }
 0x19d   : > { %v3400_v7 = vpop.eup %3399  ;;  %3413 = vrsqrt.f32 %v658_v11  ;;  %v749_v29 = vmul.f32 %v4233_v4, %v713_v15  ;;  %v762_v1 = vmul.f32 %v4233_v4, %v726_v36 }
 0x19e   : > { %v3402_v53 = vpop.eup %3401  ;;  %v659_v28 = vadd.f32 1e-05, %v627_v5  ;;  %v642_v57 = vadd.f32 1e-05, %v610_v13  ;;  %958 = vmatprep.subr.bf16.mxu0 %v820_v59  ;;  %v727_v9 = vmul.f32 %v3400_v7, %v4118_v19 }
 0x19f   : > { %v551_v30 = vpop.xlane.xlu1 %550  ;;  %v577_v37 = vpop.xlane.xlu0 %576  ;;  %v785_v49 = vadd.f32 %v4239_v31, %v749_v29  ;;  %v710_v55 = vmul.f32 %v3402_v53, %v4125_v50  ;;  %v798_v0 = vadd.f32 %v4239_v31, %v762_v1 }
 0x1a0   : > { %3415 = vrsqrt.f32 %v659_v28  ;;  %v611_v22 = vmul.f32 0.0078125, %v551_v30  ;;  %v624_v10 = vmul.f32 0.0078125, %v577_v37  ;;  %v763_v63 = vmul.f32 %v4233_v4, %v727_v9 }
 0x1a1   : > { %v3404_v25 = vpop.eup %3403  ;;  %3417 = vrsqrt.f32 %v642_v57  ;;  %v812_v39 = vpack.c.bf16 %v785_v49, %v784_v16  ;;  %v746_v56 = vmul.f32 %v4233_v4, %v710_v55 }
 0x1a2   : > { %v3406_v33 = vpop.eup %3405  ;;  %v643_v19 = vadd.f32 1e-05, %v611_v22  ;;  %v656_v11 = vadd.f32 1e-05, %v624_v10  ;;  %v799_v12 = vadd.f32 %v4239_v31, %v763_v63  ;;  %v711_v15 = vmul.f32 %v3404_v25, %v4128_v51 }
 0x1a3   : > { %959 = vmatpush1.bf16.msra.mxu0 %v812_v39  ;;  %v579_v17 = vpop.xlane.xlu1 %578  ;;  %v545_v50 = vpop.xlane.xlu0 %544  ;;  %v724_v54 = vmul.f32 %v3406_v33, %v4135_v24  ;;  %v782_v9 = vadd.f32 %v4239_v31, %v746_v56 }
 0x1a4   : > { %3419 = vrsqrt.f32 %v643_v19  ;;  %v625_v36 = vmul.f32 0.0078125, %v579_v17  ;;  %v608_v5 = vmul.f32 0.0078125, %v545_v50  ;;  %v819_v13 = vpack.c.bf16 %v799_v12, %v798_v0 }
 0x1a5   : > { %v3408_v59 = vpop.eup %3407  ;;  %3421 = vrsqrt.f32 %v656_v11  ;;  %v747_v7 = vmul.f32 %v4233_v4, %v711_v15  ;;  %v760_v29 = vmul.f32 %v4233_v4, %v724_v54 }
 0x1a6   : > { %v3410_v1 = vpop.eup %3409  ;;  %v657_v53 = vadd.f32 1e-05, %v625_v36  ;;  %v640_v51 = vadd.f32 1e-05, %v608_v5  ;;  %960 = vmatprep.subr.bf16.mxu0 %v819_v13  ;;  %v725_v28 = vmul.f32 %v3408_v59, %v4138_v27 }
 0x1a7   : > { %v547_v57 = vpop.xlane.xlu1 %546  ;;  %v783_v24 = vadd.f32 %v4239_v31, %v747_v7  ;;  %v708_v30 = vmul.f32 %v3410_v1, %v4145_v60  ;;  %v796_v22 = vadd.f32 %v4239_v31, %v760_v29 }
 0x1a8   : > { %3423 = vrsqrt.f32 %v657_v53  ;;  %v609_v37 = vmul.f32 0.0078125, %v547_v57  ;;  %v761_v16 = vmul.f32 %v4233_v4, %v725_v28 }
 0x1a9   : > { %v3412_v49 = vpop.eup %3411  ;;  %3425 = vrsqrt.f32 %v640_v51  ;;  %v811_v55 = vpack.c.bf16 %v783_v24, %v782_v9  ;;  %v744_v39 = vmul.f32 %v4233_v4, %v708_v30 }
 0x1aa   : > { %v3414_v10 = vpop.eup %3413  ;;  %v641_v63 = vadd.f32 1e-05, %v609_v37  ;;  %v797_v27 = vadd.f32 %v4239_v31, %v761_v16  ;;  %v709_v25 = vmul.f32 %v3412_v49, %v4148_v62 }
 0x1ab   : > { %961 = vmatpush1.bf16.msra.mxu0 %v811_v55  ;;  %v722_v60 = vmul.f32 %v3414_v10, %v4155_v45  ;;  %v780_v12 = vadd.f32 %v4239_v31, %v744_v39  ;;  %v3334_v39 = vld [vmem:[#allocation5 + $0x8] sm:$0xff]  }
 0x1ac   : > { %3427 = vrsqrt.f32 %v641_v63  ;;  %v818_v0 = vpack.c.bf16 %v797_v27, %v796_v22  ;;  %v745_v33 = vmul.f32 %v4233_v4, %v709_v25  ;;  %v3333_v27 = vld [vmem:[#allocation5] sm:$0xff]   ;;  %v5445_v25 = vmov 0  }
 0x1ad   : > { %v3416_v19 = vpop.eup %3415  ;;  %v758_v62 = vmul.f32 %v4233_v4, %v722_v60  ;;  %v3337_v60 = vld [vmem:[#allocation5 + $0x20] sm:$0xff]  }
 0x1ae   : > { %v3418_v11 = vpop.eup %3417  ;;  %962 = vmatprep.subr.bf16.mxu0 %v818_v0  ;;  %v781_v15 = vadd.f32 %v4239_v31, %v745_v33  ;;  %v723_v17 = vmul.f32 %v3416_v19, %v4158_v48  ;;  %v3339_v0 = vld [vmem:[#allocation5 + $0x30] sm:$0xff]   ;;  %v3340_v33 = vld [vmem:[#allocation5 + $0x38] sm:$0xff]   ;;  %v4396_v19 = vpop.permute.xlu1 %901 }
 0x1af   : > { %v706_v50 = vmul.f32 %v3418_v11, %v4165_v6  ;;  %v794_v5 = vadd.f32 %v4239_v31, %v758_v62 }
 0x1b0   : > { %v810_v56 = vpack.c.bf16 %v781_v15, %v780_v12  ;;  %v759_v45 = vmul.f32 %v4233_v4, %v723_v17 }
 0x1b1   : > { %v3420_v54 = vpop.eup %3419  ;;  %v742_v7 = vmul.f32 %v4233_v4, %v706_v50 }
 0x1b2   : > { %v3422_v36 = vpop.eup %3421  ;;  %963 = vmatpush1.bf16.msra.mxu0 %v810_v56  ;;  %v795_v13 = vadd.f32 %v4239_v31, %v759_v45  ;;  %v707_v59 = vmul.f32 %v3420_v54, %v4168_v2  ;;  %v4398_v11 = vpop.permute.xlu1 %886 }
 0x1b3   : > { %v720_v48 = vmul.f32 %v3422_v36, %v4175_v58  ;;  %v778_v51 = vadd.f32 %v4239_v31, %v742_v7 }
 0x1b4   : > { %v817_v29 = vpack.c.bf16 %v795_v13, %v794_v5  ;;  %v743_v1 = vmul.f32 %v4233_v4, %v707_v59 }
 0x1b5   : > { %v3424_v6 = vpop.eup %3423  ;;  %v756_v9 = vmul.f32 %v4233_v4, %v720_v48 }
 0x1b6   : > { %v3426_v53 = vpop.eup %3425  ;;  %964 = vmatprep.subr.bf16.mxu0 %v817_v29  ;;  %v779_v28 = vadd.f32 %v4239_v31, %v743_v1  ;;  %v721_v57 = vmul.f32 %v3424_v6, %v4178_v8  ;;  %v4400_v12 = vpop.permute.xlu1 %891 }
 0x1b7   : > { %v704_v2 = vmul.f32 %v3426_v53, %v4185_v42  ;;  %v792_v37 = vadd.f32 %v4239_v31, %v756_v9 }
 0x1b8   : > { %v809_v24 = vpack.c.bf16 %v779_v28, %v778_v51  ;;  %v757_v30 = vmul.f32 %v4233_v4, %v721_v57 }
 0x1b9   : > { %v3428_v58 = vpop.eup %3427  ;;  %v740_v55 = vmul.f32 %v4233_v4, %v704_v2 }
 0x1ba   : > { %965 = vmatpush1.bf16.msra.mxu0 %v809_v24  ;;  %v793_v16 = vadd.f32 %v4239_v31, %v757_v30  ;;  %v705_v49 = vmul.f32 %v3428_v58, %v4188_v14  ;;  %v3335_v14 = vld [vmem:[#allocation5 + $0x10] sm:$0xff]   ;;  %v4402_v15 = vpop.permute.xlu1 %876 }
 0x1bb   : > { %v776_v10 = vadd.f32 %v4239_v31, %v740_v55 }
 0x1bc   : > { %v816_v22 = vpack.c.bf16 %v793_v16, %v792_v37  ;;  %v741_v8 = vmul.f32 %v4233_v4, %v705_v49  ;;  %v3336_v4 = vld [vmem:[#allocation5 + $0x18] sm:$0xff]  }
 0x1be   : > { %966 = vmatprep.subr.bf16.mxu0 %v816_v22  ;;  %v777_v42 = vadd.f32 %v4239_v31, %v741_v8  ;;  %v3338_v31 = vld [vmem:[#allocation5 + $0x28] sm:$0xff]  }
 0x1c0   : > { %v808_v63 = vpack.c.bf16 %v777_v42, %v776_v10 }
 0x1c2   : > { %967 = vmatpush1.bf16.msra.mxu0 %v808_v63 }
 0x1c5   : > { %985 = vmatmul.mubr.bf16.vlgmr.msra.gmra.mxu0 %v3333_v27 }
 0x1c6   : > { %994 = vmatprep.mubr.bf16.mxu0 %v5445_v25 }
 0x1cd   : > { %995 = vmatmul.mubr.bf16.gmra.mxu0 %v3334_v39 }
 0x1ce   : > { %1004 = vmatprep.mubr.bf16.mxu0 %v5445_v25 }
 0x1d5   : > { %1005 = vmatmul.mubr.bf16.gmra.mxu0 %v3335_v14 }
 0x1d6   : > { %1014 = vmatprep.mubr.bf16.mxu0 %v5445_v25 }
 0x1dd   : > { %1015 = vmatmul.mubr.bf16.gmra.mxu0 %v3336_v4 }
 0x1de   : > { %1024 = vmatprep.mubr.bf16.mxu0 %v5445_v25 }
 0x1e4   : > { %v4404_v17 = vpop.permute.xlu1 %881 }
 0x1e5   : > { %1025 = vmatmul.mubr.bf16.gmra.mxu0 %v3337_v60 }
 0x1e6   : > { %1034 = vmatprep.mubr.bf16.mxu0 %v5445_v25 }
 0x1ec   : > { %v4406_v62 = vpop.permute.xlu1 %866 }
 0x1ed   : > { %1035 = vmatmul.mubr.bf16.gmra.mxu0 %v3338_v31 }
 0x1ee   : > { %1044 = vmatprep.mubr.bf16.mxu0 %v5445_v25 }
 0x1f0   : > { %v4408_v50 = vpop.permute.xlu1 %871 }
 0x1f4   : > { %v4412_v45 = vpop.permute.xlu1 %856 }
 0x1f5   : > { %1045 = vmatmul.mubr.bf16.gmra.mxu0 %v3339_v0 }
 0x1f6   : > { %1054 = vmatprep.mubr.bf16.mxu0 %v5445_v25  ;;  %v4410_v56 = vpop.permute.xlu0 %896 }
 0x1f8   : > { %v4416_v36 = vpop.permute.xlu1 %846 }
 0x1fa   : > { %v4414_v54 = vpop.permute.xlu0 %861 }
 0x1fc   : > { %v837_v13 = vpop.permute.xlu1 %836 }
 0x1fd   : > { %1055 = vmatmul.mubr.bf16.gmra.mxu0 %v3340_v33 }
 0x1fe   : > { %v4418_v5 = vpop.permute.xlu0 %851 }
 0x201   : > { %v827_v7 = vpop.permute.xlu1 %826 }
 0x202   : > { %v842_v59 = vpop.permute.xlu0 %841 }
 0x206   : > { %v832_v6 = vpop.permute.xlu0 %831 }
 0x285   : > { %v986_v48 = vpop.f32.mrf.mxu0 }
 0x286   : > { %v987_v29 = vadd.f32 %v986_v48, %v827_v7 }
 0x287   : > { %v988_v1 = vpop.f32.mrf.mxu0 }
 0x288   : > { %v1097_v53 = vmul.f32 0.70710677, %v987_v29  ;;  %v989_v51 = vadd.f32 %v988_v1, %v827_v7 }
 0x289   : > { %v990_v28 = vpop.f32.mrf.mxu0 }
 0x28a   : > { %v1098_v57 = vmul.f32 0.70710677, %v989_v51  ;;  %v991_v9 = vadd.f32 %v990_v28, %v832_v6  ;;  %3429 = verf.f32 %v1097_v53  ;;  %v1065_v28 = vmul.f32 0.5, %v987_v29 }
 0x28b   : > { %v992_v2 = vpop.f32.mrf.mxu0 }
 0x28c   : > { %v1099_v24 = vmul.f32 0.70710677, %v991_v9  ;;  %v993_v30 = vadd.f32 %v992_v2, %v832_v6  ;;  %3431 = verf.f32 %v1098_v57  ;;  %v1067_v1 = vmul.f32 0.5, %v991_v9 }
 0x28d   : > { %v996_v58 = vpop.f32.mrf.mxu0 }
 0x28e   : > { %3433 = verf.f32 %v1099_v24  ;;  %v1100_v37 = vmul.f32 0.70710677, %v993_v30  ;;  %v997_v16 = vadd.f32 %v996_v58, %v837_v13  ;;  %v1068_v24 = vmul.f32 0.5, %v993_v30 }
 0x28f   : > { %v998_v49 = vpop.f32.mrf.mxu0 }
 0x290   : > { %3435 = verf.f32 %v1100_v37  ;;  %v1101_v55 = vmul.f32 0.70710677, %v997_v16  ;;  %v999_v22 = vadd.f32 %v998_v49, %v837_v13  ;;  %v1066_v49 = vmul.f32 0.5, %v989_v51 }
 0x291   : > { %v1000_v8 = vpop.f32.mrf.mxu0 }
 0x292   : > { %v1102_v10 = vmul.f32 0.70710677, %v999_v22  ;;  %v1001_v42 = vadd.f32 %v1000_v8, %v842_v59  ;;  %3437 = verf.f32 %v1101_v55 }
 0x293   : > { %v1002_v63 = vpop.f32.mrf.mxu0 }
 0x294   : > { %3439 = verf.f32 %v1102_v10  ;;  %v1103_v27 = vmul.f32 0.70710677, %v1001_v42  ;;  %v1003_v39 = vadd.f32 %v1002_v63, %v842_v59 }
 0x295   : > { %v4420_v14 = vpop.f32.mrf.mxu0 }
 0x296   : > { %3441 = verf.f32 %v1103_v27  ;;  %v1104_v4 = vmul.f32 0.70710677, %v1003_v39 }
 0x297   : > { %v1008_v60 = vpop.f32.mrf.mxu0  ;;  %v3430_v31 = vpop.eup %3429 }
 0x298   : > { %3443 = verf.f32 %v1104_v4  ;;  %v1161_v48 = vadd.f32 1.0, %v3430_v31 }
 0x299   : > { %v1010_v0 = vpop.f32.mrf.mxu0  ;;  %v3432_v33 = vpop.eup %3431 }
 0x29a   : > { %v1162_v57 = vadd.f32 1.0, %v3432_v33  ;;  %v4428_v37 = vmul.f32 %v1161_v48, %v1065_v28  ;;  %v1070_v28 = vmul.f32 0.5, %v999_v22 }
 0x29b   : > { %v3434_v7 = vpop.eup %3433  ;;  %v4422_v13 = vpop.f32.mrf.mxu0 }
 0x29c   : > { %v1163_v6 = vadd.f32 1.0, %v3434_v7  ;;  %v4434_v9 = vmul.f32 %v1162_v57, %v1066_v49  ;;  %v1071_v7 = vmul.f32 0.5, %v1001_v42 }
 0x29d   : > { %v3436_v53 = vpop.eup %3435  ;;  %v4424_v2 = vpop.f32.mrf.mxu0 }
 0x29e   : > { %v4426_v59 = vmul.f32 %v1163_v6, %v1067_v1  ;;  %v1164_v58 = vadd.f32 1.0, %v3436_v53  ;;  %v1069_v6 = vmul.f32 0.5, %v997_v16 }
 0x29f   : > { %v4430_v55 = vpop.f32.mrf.mxu0  ;;  %v3438_v8 = vpop.eup %3437 }
 0x2a0   : > { %v4432_v10 = vmul.f32 %v1164_v58, %v1068_v24  ;;  %v1165_v31 = vadd.f32 1.0, %v3438_v8  ;;  %v1072_v24 = vmul.f32 0.5, %v1003_v39 }
 0x2a1   : > { %v3440_v63 = vpop.eup %3439  ;;  %v4436_v27 = vpop.f32.mrf.mxu0 }
 0x2a2   : > { %v1166_v33 = vadd.f32 1.0, %v3440_v63  ;;  %v4448_v49 = vmul.f32 %v1165_v31, %v1069_v6  ;;  %v4466_v6 = vadd.f32 %v1010_v0, %v4418_v5 }
 0x2a3   : > { %v3442_v4 = vpop.eup %3441  ;;  %v4440_v30 = vpop.f32.mrf.mxu0 }
 0x2a4   : > { %v1167_v48 = vadd.f32 1.0, %v3442_v4  ;;  %v4450_v29 = vmul.f32 %v1166_v33, %v1070_v28 }
 0x2a5   : > { %v3444_v1 = vpop.eup %3443  ;;  %v4444_v53 = vpop.f32.mrf.mxu0 }
 0x2a6   : > { %v4446_v57 = vmul.f32 %v1167_v48, %v1071_v7  ;;  %v1168_v58 = vadd.f32 1.0, %v3444_v1  ;;  %v3756_v48 = vmov 1   ;;  %v4463_v1 = vadd.f32 %v1008_v60, %v4416_v36 }
 0x2a7   : > { %v1028_v8 = vpop.f32.mrf.mxu0  ;;  %3331 = vset.pattern.permute.xlu1 %v3756_v48  ;;  %3332 = vset.pattern.permute.xlu0 %v3756_v48  ;;  %v1107_v60 = vmul.f32 0.70710677, %v4466_v6 }
 0x2a8   : > { %v4452_v35 = vmul.f32 %v1168_v58, %v1072_v24  ;;  %1242 = vperm.xlu1 %3331, %v4294_v23   ;;  %1246 = vperm.xlu0 %3332, %v4312_v3   ;;  %v1106_v23 = vmul.f32 0.70710677, %v4463_v1 }
 0x2a9   : > { %v4454_v51 = vpop.f32.mrf.mxu0 }
 0x2aa   : > { %3445 = verf.f32 %v1106_v23 }
 0x2ab   : > { %v1032_v22 = vpop.f32.mrf.mxu0  ;;  %3447 = verf.f32 %v1107_v60  ;;  %v4570_v60 = vadd.f32 %v4424_v2, %v4412_v45 }
 0x2ac   : > { %1250 = vperm.xlu1 %3331, %v4276_v38   ;;  %1258 = vperm.xlu0 %3332, %v4258_v21  }
 0x2ad   : > { %v1036_v63 = vpop.f32.mrf.mxu0 }
 0x2ae   : > { %v4520_v23 = vadd.f32 %v1036_v63, %v4402_v15  ;;  %v4542_v63 = vadd.f32 %v4444_v53, %v4406_v62 }
 0x2af   : > { %v1038_v4 = vpop.f32.mrf.mxu0 }
 0x2b0   : > { %1254 = vperm.xlu1 %3331, %v4300_v32   ;;  %1266 = vperm.xlu0 %3332, %v4244_v43  }
 0x2b1   : > { %v1040_v39 = vpop.f32.mrf.mxu0 }
 0x2b3   : > { %v1042_v7 = vpop.f32.mrf.mxu0 }
 0x2b4   : > { %v4469_v24 = vadd.f32 %v1042_v7, %v4404_v17  ;;  %1262 = vperm.xlu1 %3331, %v4281_v61   ;;  %1274 = vperm.xlu0 %3332, %v4222_v26   ;;  %v4524_v61 = vadd.f32 %v1028_v8, %v4406_v62  ;;  %v4556_v62 = vadd.f32 %v4436_v27, %v4414_v54 }
 0x2b5   : > { %v1046_v31 = vpop.f32.mrf.mxu0 }
 0x2b6   : > { %v1120_v48 = vmul.f32 0.70710677, %v4469_v24  ;;  %v4496_v34 = vadd.f32 %v1046_v31, %v4398_v11  ;;  %v1088_v40 = vmul.f32 0.5, %v4469_v24 }
 0x2b7   : > { %v1048_v33 = vpop.f32.mrf.mxu0  ;;  %v4559_v53 = vpop.eup %3445 }
 0x2b8   : > { %v4472_v58 = vadd.f32 %v1048_v33, %v4398_v11  ;;  %3449 = verf.f32 %v1120_v48  ;;  %v4509_v11 = vadd.f32 %v1040_v39, %v4404_v17  ;;  %v1121_v26 = vmul.f32 0.70710677, %v4496_v34  ;;  %1270 = vperm.xlu1 %3331, %v4263_v18   ;;  %1282 = vperm.xlu0 %3332, %v4210_v20   ;;  %v4566_v39 = vpop.eup %3447 }
 0x2b9   : > { %v1050_v28 = vpop.f32.mrf.mxu0  ;;  %v1117_v20 = vmul.f32 0.70710677, %v4520_v23  ;;  %v4547_v18 = vadd.f32 %v4430_v55, %v4412_v45  ;;  %v4563_v55 = vadd.f32 %v4422_v13, %v4418_v5  ;;  %v3622_v5 = vld [vmem:[%s5342_s3 + $0x58] sm:$0xff]  ;;  %v1111_v45 = vmul.f32 0.70710677, %v4556_v62 }
 0x2ba   : > { %v1122_v7 = vmul.f32 0.70710677, %v4472_v58  ;;  %v4489_v21 = vadd.f32 %v1050_v28, %v4400_v12 }
 0x2bb   : > { %v1052_v42 = vpop.f32.mrf.mxu0  ;;  %v1110_v48 = vmul.f32 0.70710677, %v4547_v18 }
 0x2bc   : > { %v4478_v3 = vadd.f32 %v1052_v42, %v4400_v12  ;;  %v4504_v12 = vadd.f32 %v1038_v4, %v4402_v15  ;;  %3451 = verf.f32 %v1122_v7  ;;  %v1119_v15 = vmul.f32 0.70710677, %v4509_v11  ;;  %1278 = vperm.xlu1 %3331, %v4231_v44  }
 0x2bd   : > { %v1056_v0 = vpop.f32.mrf.mxu0  ;;  %v4580_v7 = vadd.f32 %v4420_v14, %v4416_v36 }
 0x2be   : > { %v4484_v33 = vadd.f32 %v1056_v0, %v4410_v56  ;;  %v1124_v38 = vmul.f32 0.70710677, %v4478_v3  ;;  %v1118_v17 = vmul.f32 0.70710677, %v4504_v12 }
 0x2bf   : > { %v1058_v16 = vpop.f32.mrf.mxu0  ;;  %v1105_v14 = vmul.f32 0.70710677, %v4580_v7 }
 0x2c0   : > { %v4493_v42 = vadd.f32 %v1058_v16, %v4410_v56  ;;  %v1125_v41 = vmul.f32 0.70710677, %v4484_v33  ;;  %v1123_v56 = vmul.f32 0.70710677, %v4489_v21  ;;  %3453 = verf.f32 %v1124_v38  ;;  %1286 = vperm.xlu1 %3331, %v3622_v5  }
 0x2c1   : > { %v1060_v0 = vpop.f32.mrf.mxu0  ;;  %v4513_v16 = vadd.f32 %v1032_v22, %v4408_v50  ;;  %v1108_v38 = vmul.f32 0.70710677, %v4563_v55 }
 0x2c2   : > { %v1126_v32 = vmul.f32 0.70710677, %v4493_v42  ;;  %v4501_v43 = vadd.f32 %v1060_v0, %v4396_v19 }
 0x2c3   : > { %v1062_v28 = vpop.f32.mrf.mxu0  ;;  %v1116_v8 = vmul.f32 0.70710677, %v4513_v16 }
 0x2c4   : > { %3455 = verf.f32 %v1126_v32  ;;  %v1127_v31 = vmul.f32 0.70710677, %v4501_v43  ;;  %v4517_v4 = vadd.f32 %v1062_v28, %v4396_v19  ;;  %v4532_v19 = vadd.f32 %v4454_v51, %v4408_v50 }
 0x2c5   : > { %3457 = verf.f32 %v1125_v41  ;;  %v4537_v41 = vadd.f32 %v4440_v30, %v4414_v54  ;;  %v1114_v50 = vmul.f32 0.70710677, %v4524_v61  ;;  %v3621_v30 = vld [vmem:[%s5342_s3 + $0x60] sm:$0xff]  ;;  %v1113_v54 = vmul.f32 0.70710677, %v4542_v63  ;;  %v3450_v27 = vpop.eup %3449 }
 0x2c6   : > { %3459 = verf.f32 %v1127_v31  ;;  %v1128_v22 = vmul.f32 0.70710677, %v4517_v4  ;;  %1290 = vperm.xlu0 %3332, %v3621_v30   ;;  %v1115_v51 = vmul.f32 0.70710677, %v4532_v19  ;;  %v1109_v32 = vmul.f32 0.70710677, %v4570_v60 }
 0x2c7   : > { %3461 = verf.f32 %v1123_v56  ;;  %v1112_v44 = vmul.f32 0.70710677, %v4537_v41 }
 0x2c8   : > { %3463 = verf.f32 %v1128_v22 }
 0x2c9   : > { %3465 = verf.f32 %v1121_v26  ;;  %v3452_v13 = vpop.eup %3451 }
 0x2ca   : > { %3467 = verf.f32 %v1118_v17  ;;  %1298 = vperm.xlu0 %3332, %v4249_v52   ;;  %v3623_v52 = vld [vmem:[%s5342_s3 + $0x68] sm:$0xff]  ;;  %v1186_v30 = vadd.f32 1.0, %v3452_v13 }
 0x2cb   : > { %3469 = verf.f32 %v1119_v15  ;;  %1294 = vperm.xlu1 %3331, %v3623_v52   ;;  %v1092_v15 = vmul.f32 0.5, %v4478_v3  ;;  %v1093_v3 = vmul.f32 0.5, %v4484_v33  ;;  %v1091_v52 = vmul.f32 0.5, %v4489_v21 }
 0x2cc   : > { %3471 = verf.f32 %v1116_v8  ;;  %v1095_v8 = vmul.f32 0.5, %v4501_v43 }
 0x2cd   : > { %3473 = verf.f32 %v1117_v20  ;;  %v3454_v2 = vpop.eup %3453 }
 0x2ce   : > { %3475 = verf.f32 %v1114_v50  ;;  %v1188_v31 = vadd.f32 1.0, %v3454_v2 }
 0x2cf   : > { %3477 = verf.f32 %v1115_v51  ;;  %v1094_v51 = vmul.f32 0.5, %v4493_v42 }
 0x2d0   : > { %3479 = verf.f32 %v1112_v44  ;;  %v1096_v44 = vmul.f32 0.5, %v4517_v4  ;;  %v1220_v13 = vmul.f32 %v1188_v31, %v1092_v15 }
 0x2d1   : > { %v3456_v0 = vpop.eup %3455  ;;  %3481 = verf.f32 %v1113_v54 }
 0x2d2   : > { %v3458_v28 = vpop.eup %3457  ;;  %3483 = verf.f32 %v1110_v48  ;;  %v1190_v26 = vadd.f32 1.0, %v3456_v0  ;;  %v3624_v48 = vld [vmem:[%s5342_s3 + $0x78] sm:$0xff]  ;;  %v1184_v0 = vadd.f32 1.0, %v3450_v27 }
 0x2d3   : > { %v3460_v36 = vpop.eup %3459  ;;  %3485 = verf.f32 %v1111_v45  ;;  %v1189_v20 = vadd.f32 1.0, %v3458_v28  ;;  %1302 = vperm.xlu1 %3331, %v3624_v48   ;;  %v1090_v45 = vmul.f32 0.5, %v4472_v58 }
 0x2d4   : > { %v3462_v56 = vpop.eup %3461  ;;  %3487 = verf.f32 %v1108_v38  ;;  %v1191_v17 = vadd.f32 1.0, %v3460_v36 }
 0x2d5   : > { %v3464_v22 = vpop.eup %3463  ;;  %3489 = verf.f32 %v1109_v32  ;;  %v1187_v2 = vadd.f32 1.0, %v3462_v56  ;;  %v1222_v32 = vmul.f32 %v1190_v26, %v1094_v51  ;;  %v1221_v36 = vmul.f32 %v1189_v20, %v1093_v3 }
 0x2d6   : > { %v3466_v50 = vpop.eup %3465  ;;  %v1192_v54 = vadd.f32 1.0, %v3464_v22  ;;  %v1223_v43 = vmul.f32 %v1191_v17, %v1095_v8  ;;  %3491 = verf.f32 %v1105_v14  ;;  %v1218_v58 = vmul.f32 %v1186_v30, %v1090_v45 }
 0x2d7   : > { %v3468_v5 = vpop.eup %3467  ;;  %v1185_v4 = vadd.f32 1.0, %v3466_v50  ;;  %v1089_v17 = vmul.f32 0.5, %v4496_v34  ;;  %v1219_v27 = vmul.f32 %v1187_v2, %v1091_v52  ;;  %v1086_v14 = vmul.f32 0.5, %v4504_v12 }
 0x2d8   : > { %v3470_v38 = vpop.eup %3469  ;;  %v1224_v42 = vmul.f32 %v1192_v54, %v1096_v44  ;;  %v1182_v48 = vadd.f32 1.0, %v3468_v5  ;;  %v1239_v31 = vpack.c.bf16 %v1223_v43, %v1221_v36  ;;  %v1216_v8 = vmul.f32 %v1184_v0, %v1088_v40 }
 0x2d9   : > { %v3472_v28 = vpop.eup %3471  ;;  %v1183_v33 = vadd.f32 1.0, %v3470_v38  ;;  %v1238_v21 = vpack.c.bf16 %v1220_v13, %v1218_v58  ;;  %v1087_v51 = vmul.f32 0.5, %v4509_v11  ;;  %v1217_v24 = vmul.f32 %v1185_v4, %v1089_v17 }
 0x2da   : > { %v3474_v22 = vpop.eup %3473  ;;  %v1240_v56 = vpack.c.bf16 %v1224_v42, %v1222_v32  ;;  %v1180_v15 = vadd.f32 1.0, %v3472_v28  ;;  %v1084_v54 = vmul.f32 0.5, %v4513_v16  ;;  %v1214_v34 = vmul.f32 %v1182_v48, %v1086_v14 }
 0x2db   : > { %v3476_v47 = vpop.eup %3475  ;;  %v1181_v50 = vadd.f32 1.0, %v3474_v22  ;;  %v1085_v2 = vmul.f32 0.5, %v4520_v23  ;;  %v1215_v12 = vmul.f32 %v1183_v33, %v1087_v51  ;;  %v1237_v40 = vpack.c.bf16 %v1219_v27, %v1217_v24 }
 0x2dc   : > { %v3478_v26 = vpop.eup %3477  ;;  %1353 = vmatprep.subr.bf16.mxu1 %v1240_v56  ;;  %v1178_v44 = vadd.f32 1.0, %v3476_v47  ;;  %v1082_v38 = vmul.f32 0.5, %v4524_v61  ;;  %v1212_v0 = vmul.f32 %v1180_v15, %v1084_v54  ;;  %v1236_v11 = vpack.c.bf16 %v1216_v8, %v1214_v34 }
 0x2dd   : > { %v3480_v20 = vpop.eup %3479  ;;  %1354 = vmatpush1.bf16.msra.mxu1 %v1239_v31  ;;  %v1179_v45 = vadd.f32 1.0, %v3478_v26  ;;  %v1083_v47 = vmul.f32 0.5, %v4532_v19  ;;  %v1213_v42 = vmul.f32 %v1181_v50, %v1085_v2  ;;  %v1080_v4 = vmul.f32 0.5, %v4537_v41 }
 0x2de   : > { %v3482_v30 = vpop.eup %3481  ;;  %1355 = vmatprep.subr.bf16.mxu1 %v1238_v21  ;;  %v1176_v43 = vadd.f32 1.0, %v3480_v20  ;;  %v1210_v52 = vmul.f32 %v1178_v44, %v1082_v38  ;;  %v1081_v36 = vmul.f32 0.5, %v4542_v63  ;;  %v1078_v58 = vmul.f32 0.5, %v4547_v18 }
 0x2df   : > { %v3484_v5 = vpop.eup %3483  ;;  %v1177_v32 = vadd.f32 1.0, %v3482_v30  ;;  %v1211_v22 = vmul.f32 %v1179_v45, %v1083_v47  ;;  %v1235_v48 = vpack.c.bf16 %v1215_v12, %v1213_v42  ;;  %v1079_v19 = vmul.f32 0.5, %v4556_v62  ;;  %v3342_v45 = vld [vmem:[#allocation5 + $0x48] sm:$0xff]  }
 0x2e0   : > { %v3486_v3 = vpop.eup %3485  ;;  %v1174_v28 = vadd.f32 1.0, %v3484_v5  ;;  %v1208_v56 = vmul.f32 %v1176_v43, %v1080_v4  ;;  %v1234_v33 = vpack.c.bf16 %v1212_v0, %v1210_v52  ;;  %v1170_v41 = vadd.f32 1.0, %v4559_v53 }
 0x2e1   : > { %v3488_v13 = vpop.eup %3487  ;;  %1356 = vmatpush1.bf16.msra.mxu1 %v1237_v40  ;;  %v1175_v23 = vadd.f32 1.0, %v3486_v3  ;;  %v1209_v27 = vmul.f32 %v1177_v32, %v1081_v36  ;;  %v1076_v26 = vmul.f32 0.5, %v4563_v55  ;;  %v1171_v63 = vadd.f32 1.0, %v4566_v39  ;;  %v5452_v36 = vld [vmem:[#allocation38_spill] sm:$0xff] }
 0x2e2   : > { %v3490_v16 = vpop.eup %3489  ;;  %1357 = vmatprep.subr.bf16.mxu1 %v1236_v11  ;;  %v1172_v61 = vadd.f32 1.0, %v3488_v13  ;;  %v1206_v15 = vmul.f32 %v1174_v28, %v1078_v58  ;;  %v1077_v14 = vmul.f32 0.5, %v4570_v60  ;;  %v1074_v21 = vmul.f32 0.5, %v4463_v1  ;;  %v5450_v11 = vld [vmem:[#allocation41_spill] sm:$0xff] }
 0x2e3   : > { %v1173_v17 = vadd.f32 1.0, %v3490_v16  ;;  %v3492_v31 = vpop.eup %3491  ;;  %v1207_v8 = vmul.f32 %v1175_v23, %v1079_v19  ;;  %v1233_v18 = vpack.c.bf16 %v1211_v22, %v1209_v27  ;;  %v1075_v51 = vmul.f32 0.5, %v4466_v6 }
 0x2e4   : > { %v1204_v20 = vmul.f32 %v1172_v61, %v1076_v26  ;;  %v1232_v50 = vpack.c.bf16 %v1208_v56, %v1206_v15  ;;  %v1169_v62 = vadd.f32 1.0, %v3492_v31  ;;  %v1202_v53 = vmul.f32 %v1170_v41, %v1074_v21  ;;  %v5454_v26 = vld [vmem:[#allocation34_spill] sm:$0xff]  ;;  %v5455_v21 = vld [vmem:[#allocation29_spill] sm:$0xff] }
 0x2e5   : > { %1358 = vmatpush1.bf16.msra.mxu1 %v1235_v48  ;;  %v1205_v24 = vmul.f32 %v1173_v17, %v1077_v14  ;;  %v1073_v55 = vmul.f32 0.5, %v4580_v7  ;;  %v1203_v30 = vmul.f32 %v1171_v63, %v1075_v51  ;;  %v5446_v1 = vpack.c.bf16 %v4452_v35, %v4450_v29  ;;  %v3341_v7 = vld [vmem:[#allocation5 + $0x40] sm:$0xff]   ;;  %v3343_v35 = vld [vmem:[#allocation5 + $0x50] sm:$0xff]   ;;  %v3344_v29 = vld [vmem:[#allocation5 + $0x58] sm:$0xff]  }
 0x2e6   : > { %1359 = vmatprep.subr.bf16.mxu1 %v1234_v33  ;;  %v1230_v39 = vpack.c.bf16 %v1204_v20, %v1202_v53  ;;  %v5447_v6 = vpack.c.bf16 %v4446_v57, %v4448_v49  ;;  %v5448_v34 = vpack.c.bf16 %v4432_v10, %v4434_v9  ;;  %v5449_v5 = vpack.c.bf16 %v4426_v59, %v4428_v37  ;;  %v3345_v10 = vld [vmem:[#allocation5 + $0x60] sm:$0xff]   ;;  %v3346_v59 = vld [vmem:[#allocation5 + $0x68] sm:$0xff]   ;;  %v3347_v37 = vld [vmem:[#allocation5 + $0x70] sm:$0xff]  }
 0x2e7   : > { %v1231_v44 = vpack.c.bf16 %v1207_v8, %v1205_v24  ;;  %v1201_v54 = vmul.f32 %v1169_v62, %v1073_v55  ;;  %v3348_v9 = vld [vmem:[#allocation5 + $0x78] sm:$0xff]   ;;  %v5453_v33 = vld [vmem:[#allocation33_spill] sm:$0xff] }
 0x2e8   : > { %v5456_v53 = vld [vmem:[#allocation30_spill] sm:$0xff] }
 0x2e9   : > { %1360 = vmatpush1.bf16.msra.mxu1 %v1233_v18  ;;  %v1229_v60 = vpack.c.bf16 %v1203_v30, %v1201_v54 }
 0x2ea   : > { %1361 = vmatprep.subr.bf16.mxu1 %v1232_v50 }
 0x2ed   : > { %1362 = vmatpush1.bf16.msra.mxu1 %v1231_v44 }
 0x2ee   : > { %1363 = vmatprep.subr.bf16.mxu1 %v1230_v39 }
 0x2f1   : > { %1364 = vmatpush1.bf16.msra.mxu1 %v1229_v60  ;;  %v5457_v60 = vld [vmem:[#allocation25_spill] sm:$0xff] }
 0x2f2   : > { %1365 = vmatprep.subr.bf16.mxu1 %v5446_v1 }
 0x2f5   : > { %1366 = vmatpush1.bf16.msra.mxu1 %v5447_v6 }
 0x2f6   : > { %1367 = vmatprep.subr.bf16.mxu1 %v5448_v34 }
 0x2f9   : > { %1368 = vmatpush1.bf16.msra.mxu1 %v5449_v5 }
 0x2fc   : > { %1386 = vmatmul.mubr.bf16.vlgmr.msra.gmra.mxu1 %v3341_v7 }
 0x2fd   : > { %1395 = vmatprep.mubr.bf16.mxu1 %v5445_v25 }
 0x304   : > { %1396 = vmatmul.mubr.bf16.gmra.mxu1 %v3342_v45  ;;  %v5458_v45 = vld [vmem:[#allocation26_spill] sm:$0xff] }
 0x305   : > { %1405 = vmatprep.mubr.bf16.mxu1 %v5445_v25 }
 0x30c   : > { %1406 = vmatmul.mubr.bf16.gmra.mxu1 %v3343_v35 }
 0x30d   : > { %1415 = vmatprep.mubr.bf16.mxu1 %v5445_v25 }
 0x314   : > { %1416 = vmatmul.mubr.bf16.gmra.mxu1 %v3344_v29 }
 0x315   : > { %1425 = vmatprep.mubr.bf16.mxu1 %v5445_v25 }
 0x31c   : > { %1426 = vmatmul.mubr.bf16.gmra.mxu1 %v3345_v10 }
 0x31d   : > { %1435 = vmatprep.mubr.bf16.mxu1 %v5445_v25 }
 0x323   : > { %v4637_v57 = vpop.permute.xlu1 %1242  ;;  %v4642_v40 = vpop.permute.xlu0 %1246 }
 0x324   : > { %1436 = vmatmul.mubr.bf16.gmra.mxu1 %v3346_v59 }
 0x325   : > { %1445 = vmatprep.mubr.bf16.mxu1 %v5445_v25 }
 0x327   : > { %v4672_v48 = vpop.permute.xlu0 %1258 }
 0x32b   : > { %v4690_v63 = vpop.permute.xlu0 %1266 }
 0x32c   : > { %1446 = vmatmul.mubr.bf16.gmra.mxu1 %v3347_v37 }
 0x32d   : > { %1455 = vmatprep.mubr.bf16.mxu1 %v5445_v25  ;;  %v4649_v25 = vpop.permute.xlu1 %1250 }
 0x32f   : > { %v4708_v30 = vpop.permute.xlu0 %1274 }
 0x331   : > { %v4663_v28 = vpop.permute.xlu1 %1254 }
 0x333   : > { %v1283_v29 = vpop.permute.xlu0 %1282 }
 0x334   : > { %1456 = vmatmul.mubr.bf16.gmra.mxu1 %v3348_v9  ;;  %v5459_v9 = vld [vmem:[#allocation21_spill] sm:$0xff] }
 0x335   : > { %v4681_v19 = vpop.permute.xlu1 %1262 }
 0x339   : > { %v4699_v50 = vpop.permute.xlu1 %1270 }
 0x33d   : > { %v4717_v6 = vpop.permute.xlu1 %1278 }
 0x3bc   : > { %v1387_v49 = vpop.f32.mrf.mxu1 }
 0x3bd   : > { %v1388_v2 = vadd.f32 %v1387_v49, %v4637_v57 }
 0x3be   : > { %v4640_v12 = vpop.f32.mrf.mxu1 }
 0x3bf   : > { %v4645_v3 = vadd.f32 %v4028_v46, %v1388_v2  ;;  %v5451_v46 = vld [vmem:[#allocation37_spill] sm:$0xff]  ;;  %v1287_v2 = vpop.permute.xlu1 %1286 }
 0x3c0   : > { %v1391_v43 = vpop.f32.mrf.mxu1 }
 0x3c1   : > { %v1392_v38 = vadd.f32 %v1391_v43, %v4642_v40  ;;  %1498 = vadd.xlane.f32.xlu0 %v4645_v3 }
 0x3c2   : > { %v4651_v0 = vpop.f32.mrf.mxu1 }
 0x3c3   : > { %v4654_v13 = vadd.f32 %v5450_v11, %v1392_v38 }
 0x3c4   : > { %v1397_v32 = vpop.f32.mrf.mxu1 }
 0x3c5   : > { %v1398_v47 = vadd.f32 %v1397_v32, %v4649_v25  ;;  %1500 = vadd.xlane.f32.xlu1 %v4654_v13  ;;  %v5460_v32 = vld [vmem:[#allocation22_spill] sm:$0xff] }
 0x3c6   : > { %v4658_v42 = vpop.f32.mrf.mxu1 }
 0x3c7   : > { %v4661_v16 = vadd.f32 %v5451_v46, %v1398_v47  ;;  %v1291_v46 = vpop.permute.xlu0 %1290 }
 0x3c8   : > { %v1401_v4 = vpop.f32.mrf.mxu1 }
 0x3c9   : > { %v1402_v52 = vadd.f32 %v1401_v4, %v4663_v28  ;;  %1502 = vadd.xlane.f32.xlu0 %v4661_v16 }
 0x3ca   : > { %v4667_v23 = vpop.f32.mrf.mxu1 }
 0x3cb   : > { %v4670_v22 = vadd.f32 %v5452_v36, %v1402_v52 }
 0x3cc   : > { %v1407_v61 = vpop.f32.mrf.mxu1 }
 0x3cd   : > { %v1408_v58 = vadd.f32 %v1407_v61, %v4672_v48  ;;  %1504 = vadd.xlane.f32.xlu0 %v4670_v22  ;;  %v5461_v61 = vld [vmem:[#allocation17_spill] sm:$0xff] }
 0x3ce   : > { %v4676_v56 = vpop.f32.mrf.mxu1 }
 0x3cf   : > { %v4679_v17 = vadd.f32 %v5453_v33, %v1408_v58  ;;  %v1295_v33 = vpop.permute.xlu1 %1294 }
 0x3d0   : > { %v1411_v27 = vpop.f32.mrf.mxu1 }
 0x3d1   : > { %v1412_v31 = vadd.f32 %v1411_v27, %v4681_v19  ;;  %1506 = vadd.xlane.f32.xlu1 %v4679_v17 }
 0x3d2   : > { %v4685_v41 = vpop.f32.mrf.mxu1 }
 0x3d3   : > { %v4688_v15 = vadd.f32 %v5454_v26, %v1412_v31 }
 0x3d4   : > { %v1417_v14 = vpop.f32.mrf.mxu1 }
 0x3d5   : > { %v1418_v8 = vadd.f32 %v1417_v14, %v4690_v63  ;;  %1508 = vadd.xlane.f32.xlu0 %v4688_v15  ;;  %v5463_v14 = vld [vmem:[#allocation18_spill] sm:$0xff] }
 0x3d6   : > { %v4694_v18 = vpop.f32.mrf.mxu1 }
 0x3d7   : > { %v4697_v20 = vadd.f32 %v5455_v21, %v1418_v8  ;;  %v1299_v21 = vpop.permute.xlu0 %1298 }
 0x3d8   : > { %v1421_v62 = vpop.f32.mrf.mxu1 }
 0x3d9   : > { %v1422_v51 = vadd.f32 %v1421_v62, %v4699_v50  ;;  %1510 = vadd.xlane.f32.xlu1 %v4697_v20 }
 0x3da   : > { %v4703_v24 = vpop.f32.mrf.mxu1 }
 0x3db   : > { %v4706_v55 = vadd.f32 %v5456_v53, %v1422_v51 }
 0x3dc   : > { %v1427_v44 = vpop.f32.mrf.mxu1 }
 0x3dd   : > { %v1428_v39 = vadd.f32 %v1427_v44, %v4708_v30  ;;  %1512 = vadd.xlane.f32.xlu0 %v4706_v55  ;;  %v1390_v44 = vadd.f32 %v4640_v12, %v4637_v57  ;;  %v5470_v57 = vld [vmem:[#allocation40_spill] sm:$0xff] }
 0x3de   : > { %v4712_v54 = vpop.f32.mrf.mxu1 }
 0x3df   : > { %v4715_v1 = vadd.f32 %v5457_v60, %v1428_v39  ;;  %v5465_v39 = vld [vmem:[#allocation12_spill] sm:$0xff] }
 0x3e0   : > { %v1431_v34 = vpop.f32.mrf.mxu1 }
 0x3e1   : > { %v1432_v7 = vadd.f32 %v1431_v34, %v4717_v6  ;;  %1514 = vadd.xlane.f32.xlu1 %v4715_v1  ;;  %v1303_v34 = vpop.permute.xlu1 %1302 }
 0x3e2   : > { %v4721_v5 = vpop.f32.mrf.mxu1 }
 0x3e3   : > { %v4724_v35 = vadd.f32 %v5458_v45, %v1432_v7 }
 0x3e4   : > { %v1437_v10 = vpop.f32.mrf.mxu1 }
 0x3e5   : > { %v1438_v59 = vadd.f32 %v1437_v10, %v1283_v29  ;;  %1516 = vadd.xlane.f32.xlu0 %v4724_v35  ;;  %v5466_v10 = vld [vmem:[#allocation39_spill] sm:$0xff] }
 0x3e6   : > { %v1439_v37 = vpop.f32.mrf.mxu1 }
 0x3e7   : > { %v4728_v49 = vadd.f32 %v5459_v9, %v1438_v59  ;;  %v4750_v59 = vadd.f32 %v5466_v10, %v1390_v44  ;;  %v1394_v9 = vadd.f32 %v4651_v0, %v4642_v40  ;;  %v1410_v40 = vadd.f32 %v4676_v56, %v4672_v48  ;;  %v5480_v48 = vld [vmem:[#allocation27_spill] sm:$0xff]  ;;  %v5490_v10 = vld [vmem:[#allocation20_spill] sm:$0xff] }
 0x3e8   : > { %v1441_v43 = vpop.f32.mrf.mxu1  ;;  %v1434_v44 = vadd.f32 %v4721_v5, %v4717_v6  ;;  %v5492_v6 = vld [vmem:[#allocation15_spill] sm:$0xff] }
 0x3e9   : > { %v1442_v38 = vadd.f32 %v1441_v43, %v1287_v2  ;;  %1518 = vadd.xlane.f32.xlu1 %v4728_v49  ;;  %5467 = vst [vmem:[#allocation38_spill] sm:$0xff] %v4750_v59  ;;  %v1400_v43 = vadd.f32 %v4658_v42, %v4649_v25  ;;  %v4762_v12 = vadd.f32 %v5470_v57, %v1394_v9  ;;  %v5474_v25 = vld [vmem:[#allocation36_spill] sm:$0xff]  ;;  %v5476_v42 = vld [vmem:[#allocation31_spill] sm:$0xff]  ;;  %v5498_v57 = vld [vmem:[#allocation13_spill] sm:$0xff] }
 0x3ea   : > { %v1443_v11 = vpop.f32.mrf.mxu1 }
 0x3eb   : > { %v4732_v47 = vadd.f32 %v5460_v32, %v1442_v38  ;;  %v5468_v38 = vld [vmem:[#allocation14_spill] sm:$0xff]  ;;  %5471 = vst [vmem:[#allocation34_spill] sm:$0xff] %v4762_v12 }
 0x3ec   : > { %v1447_v4 = vpop.f32.mrf.mxu1 }
 0x3ed   : > { %v1448_v52 = vadd.f32 %v1447_v4, %v1291_v46  ;;  %1520 = vadd.xlane.f32.xlu0 %v4732_v47  ;;  %v5472_v4 = vld [vmem:[#allocation35_spill] sm:$0xff] }
 0x3ee   : > { %v1449_v36 = vpop.f32.mrf.mxu1 }
 0x3ef   : > { %v4736_v58 = vadd.f32 %v5461_v61, %v1448_v52  ;;  %v4765_v52 = vadd.f32 %v5472_v4, %v1400_v43  ;;  %v1404_v61 = vadd.f32 %v4667_v23, %v4663_v28  ;;  %v5478_v28 = vld [vmem:[#allocation32_spill] sm:$0xff] }
 0x3f0   : > { %v1451_v27 = vpop.f32.mrf.mxu1 }
 0x3f1   : > { %5462 = vst [vmem:[#allocation41_spill] sm:$0xff] %v4736_v58  ;;  %v1452_v31 = vadd.f32 %v1451_v27, %v1295_v33  ;;  %1522 = vadd.xlane.f32.xlu1 %v4736_v58  ;;  %5473 = vst [vmem:[#allocation29_spill] sm:$0xff] %v4765_v52  ;;  %v4774_v0 = vadd.f32 %v5474_v25, %v1404_v61  ;;  %v4777_v27 = vadd.f32 %v5476_v42, %v1410_v40 }
 0x3f2   : > { %v1453_v26 = vpop.f32.mrf.mxu1 }
 0x3f3   : > { %v4740_v8 = vadd.f32 %v5463_v14, %v1452_v31  ;;  %5475 = vst [vmem:[#allocation30_spill] sm:$0xff] %v4774_v0  ;;  %5477 = vst [vmem:[#allocation25_spill] sm:$0xff] %v4777_v27  ;;  %v1414_v31 = vadd.f32 %v4685_v41, %v4681_v19  ;;  %v1420_v14 = vadd.f32 %v4694_v18, %v4690_v63  ;;  %v5482_v19 = vld [vmem:[#allocation28_spill] sm:$0xff]  ;;  %v5484_v63 = vld [vmem:[#allocation23_spill] sm:$0xff] }
 0x3f4   : > { %v1457_v62 = vpop.f32.mrf.mxu1 }
 0x3f5   : > { %5464 = vst [vmem:[#allocation37_spill] sm:$0xff] %v4740_v8  ;;  %v1458_v51 = vadd.f32 %v1457_v62, %v1299_v21  ;;  %1524 = vadd.xlane.f32.xlu0 %v4740_v8  ;;  %v4786_v23 = vadd.f32 %v5478_v28, %v1414_v31  ;;  %v4789_v56 = vadd.f32 %v5480_v48, %v1420_v14 }
 0x3f6   : > { %v1459_v53 = vpop.f32.mrf.mxu1  ;;  %v1424_v62 = vadd.f32 %v4703_v24, %v4699_v50  ;;  %v5486_v50 = vld [vmem:[#allocation24_spill] sm:$0xff] }
 0x3f7   : > { %v4746_v60 = vadd.f32 %v5465_v39, %v1458_v51  ;;  %5479 = vst [vmem:[#allocation26_spill] sm:$0xff] %v4786_v23  ;;  %5481 = vst [vmem:[#allocation21_spill] sm:$0xff] %v4789_v56  ;;  %v1430_v51 = vadd.f32 %v4712_v54, %v4708_v30  ;;  %v1440_v39 = vadd.f32 %v1439_v37, %v1283_v29  ;;  %v5488_v30 = vld [vmem:[#allocation19_spill] sm:$0xff] }
 0x3f8   : > { %v1461_v7 = vpop.f32.mrf.mxu1  ;;  %v4798_v41 = vadd.f32 %v5482_v19, %v1424_v62  ;;  %v4808_v24 = vadd.f32 %v5486_v50, %v1434_v44  ;;  %v1454_v29 = vadd.f32 %v1453_v26, %v1295_v33  ;;  %v1460_v37 = vadd.f32 %v1459_v53, %v1299_v21  ;;  %v3349_v33 = vld [vmem:[#allocation5 + $0xb8] sm:$0xff]  }
 0x3f9   : > { %v1462_v45 = vadd.f32 %v1461_v7, %v1303_v34  ;;  %1526 = vadd.xlane.f32.xlu1 %v4746_v60  ;;  %v4801_v18 = vadd.f32 %v5484_v63, %v1430_v51  ;;  %v4811_v54 = vadd.f32 %v5488_v30, %v1440_v39  ;;  %v1444_v7 = vadd.f32 %v1443_v11, %v1287_v2  ;;  %v5496_v11 = vld [vmem:[#allocation11_spill] sm:$0xff] }
 0x3fa   : > { %5483 = vst [vmem:[#allocation22_spill] sm:$0xff] %v4798_v41  ;;  %5487 = vst [vmem:[#allocation18_spill] sm:$0xff] %v4808_v24  ;;  %v1463_v43 = vpop.f32.mrf.mxu1  ;;  %3170 = vmatprep.subr.bf16.mxu0 %v3349_v33 }
 0x3fb   : > { %v4757_v32 = vadd.f32 %v5468_v38, %v1462_v45  ;;  %5485 = vst [vmem:[#allocation17_spill] sm:$0xff] %v4801_v18  ;;  %5489 = vst [vmem:[#allocation12_spill] sm:$0xff] %v4811_v54  ;;  %v1450_v45 = vadd.f32 %v1449_v36, %v1291_v46  ;;  %v4816_v9 = vadd.f32 %v5490_v10, %v1444_v7  ;;  %v5494_v38 = vld [vmem:[#allocation16_spill] sm:$0xff]  ;;  %3171 = vmatpush3.bf16.msra.mxu0 %v3349_v33 }
 0x3fc   : > { %v4824_v2 = vadd.f32 %v5494_v38, %v1454_v29  ;;  %v4827_v46 = vadd.f32 %v5496_v11, %v1460_v37  ;;  %v1464_v36 = vadd.f32 %v1463_v43, %v1303_v34  ;;  %v3350_v43 = vld [vmem:[#allocation5 + $0xb0] sm:$0xff]   ;;  %v3351_v33 = vld [vmem:[#allocation5 + $0xa8] sm:$0xff]  }
 0x3fd   : > { %5469 = vst [vmem:[#allocation33_spill] sm:$0xff] %v4757_v32  ;;  %1528 = vadd.xlane.f32.xlu0 %v4757_v32  ;;  %1530 = vadd.xlane.f32.xlu1 %v4750_v59  ;;  %5491 = vst [vmem:[#allocation39_spill] sm:$0xff] %v4816_v9  ;;  %v4819_v5 = vadd.f32 %v5492_v6, %v1450_v45 }
 0x3fe   : > { %5495 = vst [vmem:[#allocation40_spill] sm:$0xff] %v4824_v2  ;;  %5497 = vst [vmem:[#allocation35_spill] sm:$0xff] %v4827_v46  ;;  %v4832_v4 = vadd.f32 %v5498_v57, %v1464_v36  ;;  %3172 = vmatprep.subr.bf16.mxu0 %v3350_v43 }
 0x3ff   : > { %5493 = vst [vmem:[#allocation14_spill] sm:$0xff] %v4819_v5  ;;  %3173 = vmatpush3.bf16.msra.mxu0 %v3350_v43 }
 0x400   : > { %5499 = vst [vmem:[#allocation36_spill] sm:$0xff] %v4832_v4  ;;  %3174 = vmatprep.subr.bf16.mxu0 %v3351_v33 }
 0x401   : > { %1532 = vadd.xlane.f32.xlu0 %v4762_v12  ;;  %1534 = vadd.xlane.f32.xlu1 %v4765_v52 }
 0x403   : > { %3175 = vmatpush3.bf16.msra.mxu0 %v3351_v33  ;;  %v3356_v33 = vld [vmem:[#allocation5 + $0x80] sm:$0xff]  }
 0x405   : > { %1536 = vadd.xlane.f32.xlu0 %v4774_v0  ;;  %1538 = vadd.xlane.f32.xlu1 %v4777_v27 }
 0x409   : > { %1540 = vadd.xlane.f32.xlu0 %v4786_v23  ;;  %1542 = vadd.xlane.f32.xlu1 %v4789_v56 }
 0x40d   : > { %1544 = vadd.xlane.f32.xlu0 %v4798_v41  ;;  %1546 = vadd.xlane.f32.xlu1 %v4801_v18 }
 0x411   : > { %1548 = vadd.xlane.f32.xlu0 %v4808_v24  ;;  %1550 = vadd.xlane.f32.xlu1 %v4811_v54 }
 0x415   : > { %1552 = vadd.xlane.f32.xlu0 %v4816_v9  ;;  %1554 = vadd.xlane.f32.xlu1 %v4819_v5 }
 0x419   : > { %1556 = vadd.xlane.f32.xlu0 %v4824_v2  ;;  %1558 = vadd.xlane.f32.xlu1 %v4827_v46 }
 0x41d   : > { %1560 = vadd.xlane.f32.xlu0 %v4832_v4 }
 0x44a   : > { %v1499_v26 = vpop.xlane.xlu0 %1498 }
 0x44b   : > { %v1562_v21 = vmul.f32 0.0078125, %v1499_v26 }
 0x44d   : > { %v4836_v53 = vsub.f32 %v4645_v3, %v1562_v21 }
 0x44e   : > { %v1501_v61 = vpop.xlane.xlu1 %1500 }
 0x44f   : > { %v1563_v40 = vmul.f32 0.0078125, %v1501_v61  ;;  %v1626_v34 = vmul.f32 %v4836_v53, %v4836_v53 }
 0x451   : > { %v4841_v25 = vsub.f32 %v4654_v13, %v1563_v40  ;;  %1658 = vadd.xlane.f32.xlu1 %v1626_v34  ;;  %v3352_v34 = vld [vmem:[#allocation5 + $0xa0] sm:$0xff]  }
 0x452   : > { %v1503_v42 = vpop.xlane.xlu0 %1502  ;;  %3176 = vmatprep.subr.bf16.mxu0 %v3352_v34 }
 0x453   : > { %v1564_v31 = vmul.f32 0.0078125, %v1503_v42  ;;  %v1627_v14 = vmul.f32 %v4841_v25, %v4841_v25  ;;  %3177 = vmatpush3.bf16.msra.mxu0 %v3352_v34 }
 0x455   : > { %v4846_v28 = vsub.f32 %v4661_v16, %v1564_v31  ;;  %1660 = vadd.xlane.f32.xlu0 %v1627_v14 }
 0x456   : > { %v1505_v48 = vpop.xlane.xlu0 %1504 }
 0x457   : > { %v1565_v62 = vmul.f32 0.0078125, %v1505_v48  ;;  %v1628_v51 = vmul.f32 %v4846_v28, %v4846_v28 }
 0x459   : > { %v4851_v19 = vsub.f32 %v4670_v22, %v1565_v62  ;;  %1662 = vadd.xlane.f32.xlu1 %v1628_v51  ;;  %v3353_v62 = vld [vmem:[#allocation5 + $0x98] sm:$0xff]  }
 0x45a   : > { %v1507_v63 = vpop.xlane.xlu1 %1506  ;;  %3178 = vmatprep.subr.bf16.mxu0 %v3353_v62 }
 0x45b   : > { %v1566_v44 = vmul.f32 0.0078125, %v1507_v63  ;;  %v1629_v39 = vmul.f32 %v4851_v19, %v4851_v19  ;;  %3179 = vmatpush3.bf16.msra.mxu0 %v3353_v62 }
 0x45d   : > { %v4856_v50 = vsub.f32 %v4679_v17, %v1566_v44  ;;  %1664 = vadd.xlane.f32.xlu0 %v1629_v39 }
 0x45e   : > { %v1509_v30 = vpop.xlane.xlu0 %1508 }
 0x45f   : > { %v1567_v7 = vmul.f32 0.0078125, %v1509_v30  ;;  %v1630_v45 = vmul.f32 %v4856_v50, %v4856_v50  ;;  %v3354_v30 = vld [vmem:[#allocation5 + $0x90] sm:$0xff]  }
 0x460   : > { %3180 = vmatprep.subr.bf16.mxu0 %v3354_v30 }
 0x461   : > { %v4861_v10 = vsub.f32 %v4688_v15, %v1567_v7  ;;  %1666 = vadd.xlane.f32.xlu1 %v1630_v45  ;;  %3181 = vmatpush3.bf16.msra.mxu0 %v3354_v30 }
 0x462   : > { %v1511_v6 = vpop.xlane.xlu1 %1510 }
 0x463   : > { %v1568_v29 = vmul.f32 0.0078125, %v1511_v6  ;;  %v1631_v37 = vmul.f32 %v4861_v10, %v4861_v10 }
 0x465   : > { %v4866_v38 = vsub.f32 %v4697_v20, %v1568_v29  ;;  %1668 = vadd.xlane.f32.xlu0 %v1631_v37  ;;  %v3355_v37 = vld [vmem:[#allocation5 + $0x88] sm:$0xff]  }
 0x466   : > { %v1513_v11 = vpop.xlane.xlu0 %1512  ;;  %3182 = vmatprep.subr.bf16.mxu0 %v3355_v37 }
 0x467   : > { %v1569_v36 = vmul.f32 0.0078125, %v1513_v11  ;;  %v1632_v57 = vmul.f32 %v4866_v38, %v4866_v38  ;;  %3183 = vmatpush3.bf16.msra.mxu0 %v3355_v37 }
 0x468   : > { %3184 = vmatprep.subr.bf16.mxu0 %v3356_v33 }
 0x469   : > { %v4871_v26 = vsub.f32 %v4706_v55, %v1569_v36  ;;  %1670 = vadd.xlane.f32.xlu1 %v1632_v57 }
 0x46a   : > { %v1515_v21 = vpop.xlane.xlu1 %1514 }
 0x46b   : > { %v1570_v61 = vmul.f32 0.0078125, %v1515_v21  ;;  %v1633_v40 = vmul.f32 %v4871_v26, %v4871_v26  ;;  %3185 = vmatpush3.bf16.msra.mxu0 %v3356_v33 }
 0x46d   : > { %v4876_v42 = vsub.f32 %v4715_v1, %v1570_v61  ;;  %1672 = vadd.xlane.f32.xlu0 %v1633_v40 }
 0x46e   : > { %v1517_v31 = vpop.xlane.xlu0 %1516 }
 0x46f   : > { %v1571_v14 = vmul.f32 0.0078125, %v1517_v31  ;;  %v1634_v48 = vmul.f32 %v4876_v42, %v4876_v42 }
 0x471   : > { %v4881_v51 = vsub.f32 %v4724_v35, %v1571_v14  ;;  %1674 = vadd.xlane.f32.xlu1 %v1634_v48 }
 0x472   : > { %v1519_v63 = vpop.xlane.xlu1 %1518 }
 0x473   : > { %v1572_v44 = vmul.f32 0.0078125, %v1519_v63  ;;  %v1635_v39 = vmul.f32 %v4881_v51, %v4881_v51 }
 0x475   : > { %v4886_v7 = vsub.f32 %v4728_v49, %v1572_v44  ;;  %1676 = vadd.xlane.f32.xlu0 %v1635_v39 }
 0x476   : > { %v1521_v45 = vpop.xlane.xlu0 %1520 }
 0x477   : > { %v1573_v6 = vmul.f32 0.0078125, %v1521_v45  ;;  %v1636_v29 = vmul.f32 %v4886_v7, %v4886_v7 }
 0x479   : > { %v4891_v43 = vsub.f32 %v4732_v47, %v1573_v6  ;;  %1678 = vadd.xlane.f32.xlu1 %v1636_v29 }
 0x47a   : > { %v1523_v11 = vpop.xlane.xlu1 %1522 }
 0x47b   : > { %v1574_v36 = vmul.f32 0.0078125, %v1523_v11  ;;  %v1637_v57 = vmul.f32 %v4891_v43, %v4891_v43 }
 0x47d   : > { %v4896_v21 = vsub.f32 %v4736_v58, %v1574_v36  ;;  %1680 = vadd.xlane.f32.xlu0 %v1637_v57 }
 0x47e   : > { %v1525_v61 = vpop.xlane.xlu0 %1524 }
 0x47f   : > { %v1575_v40 = vmul.f32 0.0078125, %v1525_v61  ;;  %v1638_v34 = vmul.f32 %v4896_v21, %v4896_v21 }
 0x481   : > { %v4901_v31 = vsub.f32 %v4740_v8, %v1575_v40  ;;  %1682 = vadd.xlane.f32.xlu1 %v1638_v34 }
 0x482   : > { %v1527_v14 = vpop.xlane.xlu1 %1526 }
 0x483   : > { %v1576_v48 = vmul.f32 0.0078125, %v1527_v14  ;;  %v1639_v62 = vmul.f32 %v4901_v31, %v4901_v31 }
 0x485   : > { %v4906_v63 = vsub.f32 %v4746_v60, %v1576_v48  ;;  %1684 = vadd.xlane.f32.xlu0 %v1639_v62 }
 0x486   : > { %v1531_v44 = vpop.xlane.xlu1 %1530  ;;  %v1529_v39 = vpop.xlane.xlu0 %1528 }
 0x487   : > { %v1578_v30 = vmul.f32 0.0078125, %v1531_v44  ;;  %v1577_v45 = vmul.f32 0.0078125, %v1529_v39  ;;  %v1640_v6 = vmul.f32 %v4906_v63, %v4906_v63 }
 0x489   : > { %v4911_v29 = vsub.f32 %v4750_v59, %v1578_v30  ;;  %v4914_v37 = vsub.f32 %v4757_v32, %v1577_v45  ;;  %1686 = vadd.xlane.f32.xlu1 %v1640_v6 }
 0x48a   : > { %v1535_v11 = vpop.xlane.xlu1 %1534  ;;  %v1533_v36 = vpop.xlane.xlu0 %1532 }
 0x48b   : > { %v1580_v57 = vmul.f32 0.0078125, %v1535_v11  ;;  %v1579_v33 = vmul.f32 0.0078125, %v1533_v36  ;;  %v1642_v61 = vmul.f32 %v4911_v29, %v4911_v29  ;;  %v1641_v40 = vmul.f32 %v4914_v37, %v4914_v37 }
 0x48d   : > { %v4921_v34 = vsub.f32 %v4765_v52, %v1580_v57  ;;  %v4924_v14 = vsub.f32 %v4762_v12, %v1579_v33  ;;  %1690 = vadd.xlane.f32.xlu1 %v1642_v61  ;;  %1688 = vadd.xlane.f32.xlu0 %v1641_v40 }
 0x48e   : > { %v1539_v48 = vpop.xlane.xlu1 %1538  ;;  %v1537_v62 = vpop.xlane.xlu0 %1536 }
 0x48f   : > { %v1582_v44 = vmul.f32 0.0078125, %v1539_v48  ;;  %v1581_v39 = vmul.f32 0.0078125, %v1537_v62  ;;  %v1644_v30 = vmul.f32 %v4921_v34, %v4921_v34  ;;  %v1643_v45 = vmul.f32 %v4924_v14, %v4924_v14 }
 0x491   : > { %v4931_v6 = vsub.f32 %v4777_v27, %v1582_v44  ;;  %v4934_v11 = vsub.f32 %v4774_v0, %v1581_v39  ;;  %1694 = vadd.xlane.f32.xlu1 %v1644_v30  ;;  %1692 = vadd.xlane.f32.xlu0 %v1643_v45  ;;  %v5500_v0 = vld [vmem:[#allocation42_spill] sm:$0xff] }
 0x492   : > { %v1543_v36 = vpop.xlane.xlu1 %1542  ;;  %v1541_v57 = vpop.xlane.xlu0 %1540  ;;  %v1852_v52 = vsub.s32 2, %v5500_v0 }
 0x493   : > { %v1584_v33 = vmul.f32 0.0078125, %v1543_v36  ;;  %v1583_v61 = vmul.f32 0.0078125, %v1541_v57  ;;  %v1646_v40 = vmul.f32 %v4931_v6, %v4931_v6  ;;  %v1645_v48 = vmul.f32 %v4934_v11, %v4934_v11 }
 0x495   : > { %v4941_v62 = vsub.f32 %v4789_v56, %v1584_v33  ;;  %v4944_v44 = vsub.f32 %v4786_v23, %v1583_v61  ;;  %1698 = vadd.xlane.f32.xlu1 %v1646_v40  ;;  %1696 = vadd.xlane.f32.xlu0 %v1645_v48 }
 0x496   : > { %v1547_v39 = vpop.xlane.xlu1 %1546  ;;  %v1545_v30 = vpop.xlane.xlu0 %1544 }
 0x497   : > { %v1586_v45 = vmul.f32 0.0078125, %v1547_v39  ;;  %v1585_v27 = vmul.f32 0.0078125, %v1545_v30  ;;  %v1648_v36 = vmul.f32 %v4941_v62, %v4941_v62  ;;  %v1647_v57 = vmul.f32 %v4944_v44, %v4944_v44 }
 0x499   : > { %v4951_v12 = vsub.f32 %v4801_v18, %v1586_v45  ;;  %v4954_v33 = vsub.f32 %v4798_v41, %v1585_v27  ;;  %1702 = vadd.xlane.f32.xlu1 %v1648_v36  ;;  %1700 = vadd.xlane.f32.xlu0 %v1647_v57 }
 0x49a   : > { %v1551_v61 = vpop.xlane.xlu1 %1550  ;;  %v1549_v40 = vpop.xlane.xlu0 %1548 }
 0x49b   : > { %v1588_v48 = vmul.f32 0.0078125, %v1551_v61  ;;  %v1587_v23 = vmul.f32 0.0078125, %v1549_v40  ;;  %v1650_v39 = vmul.f32 %v4951_v12, %v4951_v12  ;;  %v1649_v30 = vmul.f32 %v4954_v33, %v4954_v33 }
 0x49d   : > { %v4961_v56 = vsub.f32 %v4811_v54, %v1588_v48  ;;  %v4964_v45 = vsub.f32 %v4808_v24, %v1587_v23  ;;  %1706 = vadd.xlane.f32.xlu1 %v1650_v39  ;;  %1704 = vadd.xlane.f32.xlu0 %v1649_v30 }
 0x49e   : > { %v1555_v27 = vpop.xlane.xlu1 %1554  ;;  %v1553_v36 = vpop.xlane.xlu0 %1552 }
 0x49f   : > { %v1590_v57 = vmul.f32 0.0078125, %v1555_v27  ;;  %v1589_v18 = vmul.f32 0.0078125, %v1553_v36  ;;  %v1652_v61 = vmul.f32 %v4961_v56, %v4961_v56  ;;  %v1651_v40 = vmul.f32 %v4964_v45, %v4964_v45 }
 0x4a1   : > { %v4971_v41 = vsub.f32 %v4819_v5, %v1590_v57  ;;  %v4974_v48 = vsub.f32 %v4816_v9, %v1589_v18  ;;  %1710 = vadd.xlane.f32.xlu1 %v1652_v61  ;;  %1708 = vadd.xlane.f32.xlu0 %v1651_v40 }
 0x4a2   : > { %v1559_v23 = vpop.xlane.xlu1 %1558  ;;  %v1557_v39 = vpop.xlane.xlu0 %1556 }
 0x4a3   : > { %v1592_v30 = vmul.f32 0.0078125, %v1559_v23  ;;  %v1591_v24 = vmul.f32 0.0078125, %v1557_v39  ;;  %v1654_v27 = vmul.f32 %v4971_v41, %v4971_v41  ;;  %v1653_v36 = vmul.f32 %v4974_v48, %v4974_v48 }
 0x4a5   : > { %v4981_v54 = vsub.f32 %v4827_v46, %v1592_v30  ;;  %v4984_v57 = vsub.f32 %v4824_v2, %v1591_v24  ;;  %1714 = vadd.xlane.f32.xlu1 %v1654_v27  ;;  %1712 = vadd.xlane.f32.xlu0 %v1653_v36  ;;  %v3357_v24 = vld [vmem:[#allocation5 + $0xf8] sm:$0xff]   ;;  %v3358_v27 = vld [vmem:[#allocation5 + $0xf0] sm:$0xff]  }
 0x4a6   : > { %v1561_v18 = vpop.xlane.xlu0 %1560  ;;  %3218 = vmatprep.subr.bf16.mxu1 %v3357_v24 }
 0x4a7   : > { %v1593_v61 = vmul.f32 0.0078125, %v1561_v18  ;;  %v1656_v40 = vmul.f32 %v4981_v54, %v4981_v54  ;;  %v1655_v23 = vmul.f32 %v4984_v57, %v4984_v57  ;;  %3219 = vmatpush3.bf16.msra.mxu1 %v3357_v24 }
 0x4a8   : > { %3220 = vmatprep.subr.bf16.mxu1 %v3358_v27 }
 0x4a9   : > { %v4991_v39 = vsub.f32 %v4832_v4, %v1593_v61  ;;  %1718 = vadd.xlane.f32.xlu1 %v1656_v40  ;;  %1716 = vadd.xlane.f32.xlu0 %v1655_v23 }
 0x4ab   : > { %v1657_v30 = vmul.f32 %v4991_v39, %v4991_v39  ;;  %3221 = vmatpush3.bf16.msra.mxu1 %v3358_v27 }
 0x4ad   : > { %1720 = vadd.xlane.f32.xlu0 %v1657_v30 }
 0x4da   : > { %v1659_v36 = vpop.xlane.xlu1 %1658 }
 0x4db   : > { %v1722_v18 = vmul.f32 0.0078125, %v1659_v36 }
 0x4dd   : > { %v1754_v2 = vadd.f32 1e-05, %v1722_v18 }
 0x4de   : > { %v1661_v5 = vpop.xlane.xlu0 %1660 }
 0x4df   : > { %3493 = vrsqrt.f32 %v1754_v2  ;;  %v1723_v46 = vmul.f32 0.0078125, %v1661_v5  ;;  %v5000_v5 = vld [vmem:[%s5341_s2] sm:$0x3f] }
 0x4e0   : > { %v5003_v2 = vrot.slane %v5000_v5, %v1852_v52 }
 0x4e1   : > { %v1755_v61 = vadd.f32 1e-05, %v1723_v46 }
 0x4e2   : > { %v1663_v4 = vpop.xlane.xlu1 %1662 }
 0x4e3   : > { %3495 = vrsqrt.f32 %v1755_v61  ;;  %v1724_v40 = vmul.f32 0.0078125, %v1663_v4 }
 0x4e5   : > { %v1756_v23 = vadd.f32 1e-05, %v1724_v40 }
 0x4e6   : > { %v1665_v9 = vpop.xlane.xlu0 %1664 }
 0x4e7   : > { %3497 = vrsqrt.f32 %v1756_v23  ;;  %v1725_v30 = vmul.f32 0.0078125, %v1665_v9  ;;  %v1888_v9 = vsub.s32 3, %v5500_v0 }
 0x4e9   : > { %v1757_v59 = vadd.f32 1e-05, %v1725_v30 }
 0x4ea   : > { %v1667_v24 = vpop.xlane.xlu1 %1666 }
 0x4eb   : > { %3499 = vrsqrt.f32 %v1757_v59  ;;  %v1726_v27 = vmul.f32 0.0078125, %v1667_v24 }
 0x4ec   : > { %v3494_v8 = vpop.eup %3493 }
 0x4ed   : > { %v1758_v36 = vadd.f32 1e-05, %v1726_v27  ;;  %v1818_v18 = vmul.f32 %v3494_v8, %v4836_v53  ;;  %v5009_v8 = vrot.slane %v5000_v5, %v1888_v9 }
 0x4ee   : > { %v1669_v46 = vpop.xlane.xlu0 %1668 }
 0x4ef   : > { %3501 = vrsqrt.f32 %v1758_v36  ;;  %v1727_v4 = vmul.f32 0.0078125, %v1669_v46  ;;  %v1854_v23 = vmul.f32 %v5003_v2, %v1818_v18 }
 0x4f0   : > { %v3496_v61 = vpop.eup %3495 }
 0x4f1   : > { %v1759_v59 = vadd.f32 1e-05, %v1727_v4  ;;  %v1819_v40 = vmul.f32 %v3496_v61, %v4841_v25  ;;  %v1890_v36 = vadd.f32 %v5009_v8, %v1854_v23 }
 0x4f2   : > { %v1671_v53 = vpop.xlane.xlu1 %1670 }
 0x4f3   : > { %3503 = vrsqrt.f32 %v1759_v59  ;;  %v1728_v30 = vmul.f32 0.0078125, %v1671_v53  ;;  %v1855_v52 = vmul.f32 %v5003_v2, %v1819_v40 }
 0x4f4   : > { %v3498_v24 = vpop.eup %3497 }
 0x4f5   : > { %v1820_v27 = vmul.f32 %v3498_v24, %v4846_v28  ;;  %v1760_v58 = vadd.f32 1e-05, %v1728_v30  ;;  %v1891_v46 = vadd.f32 %v5009_v8, %v1855_v52 }
 0x4f6   : > { %v1673_v4 = vpop.xlane.xlu0 %1672 }
 0x4f7   : > { %3505 = vrsqrt.f32 %v1760_v58  ;;  %v1729_v25 = vmul.f32 0.0078125, %v1673_v4  ;;  %v1922_v18 = vpack.c.bf16 %v1891_v46, %v1890_v36  ;;  %v1856_v59 = vmul.f32 %v5003_v2, %v1820_v27 }
 0x4f8   : > { %v3500_v61 = vpop.eup %3499 }
 0x4f9   : > { %v1821_v9 = vmul.f32 %v3500_v61, %v4851_v19  ;;  %v1761_v32 = vadd.f32 1e-05, %v1729_v25  ;;  %3186 = vmatprep.mubr.bf16.mxu0 %v1922_v18  ;;  %v1892_v52 = vadd.f32 %v5009_v8, %v1856_v59 }
 0x4fa   : > { %v1675_v40 = vpop.xlane.xlu1 %1674 }
 0x4fb   : > { %3507 = vrsqrt.f32 %v1761_v32  ;;  %v1730_v53 = vmul.f32 0.0078125, %v1675_v40  ;;  %v1857_v28 = vmul.f32 %v5003_v2, %v1821_v9 }
 0x4fc   : > { %v3502_v30 = vpop.eup %3501 }
 0x4fd   : > { %v1762_v23 = vadd.f32 1e-05, %v1730_v53  ;;  %v1893_v58 = vadd.f32 %v5009_v8, %v1857_v28  ;;  %v1822_v24 = vmul.f32 %v3502_v30, %v4856_v50 }
 0x4fe   : > { %v1677_v36 = vpop.xlane.xlu0 %1676 }
 0x4ff   : > { %3509 = vrsqrt.f32 %v1762_v23  ;;  %v1731_v19 = vmul.f32 0.0078125, %v1677_v36  ;;  %v1923_v46 = vpack.c.bf16 %v1893_v58, %v1892_v52  ;;  %v1858_v27 = vmul.f32 %v5003_v2, %v1822_v24 }
 0x500   : > { %v3504_v4 = vpop.eup %3503 }
 0x501   : > { %v1763_v25 = vadd.f32 1e-05, %v1731_v19  ;;  %3187 = vmatmul.mubr.bf16.vlgmr.msra.gmra.mxu0 %v1923_v46  ;;  %v1823_v32 = vmul.f32 %v3504_v4, %v4861_v10  ;;  %v1894_v50 = vadd.f32 %v5009_v8, %v1858_v27 }
 0x502   : > { %v1679_v18 = vpop.xlane.xlu1 %1678 }
 0x503   : > { %3511 = vrsqrt.f32 %v1763_v25  ;;  %v1732_v61 = vmul.f32 0.0078125, %v1679_v18  ;;  %v1859_v9 = vmul.f32 %v5003_v2, %v1823_v32 }
 0x504   : > { %v3506_v59 = vpop.eup %3505 }
 0x505   : > { %v1764_v40 = vadd.f32 1e-05, %v1732_v61  ;;  %v1895_v53 = vadd.f32 %v5009_v8, %v1859_v9  ;;  %v1824_v28 = vmul.f32 %v3506_v59, %v4866_v38 }
 0x506   : > { %v1681_v30 = vpop.xlane.xlu0 %1680 }
 0x507   : > { %3513 = vrsqrt.f32 %v1764_v40  ;;  %v1733_v23 = vmul.f32 0.0078125, %v1681_v30  ;;  %v1924_v52 = vpack.c.bf16 %v1895_v53, %v1894_v50  ;;  %v1860_v36 = vmul.f32 %v5003_v2, %v1824_v28 }
 0x508   : > { %v3508_v10 = vpop.eup %3507 }
 0x509   : > { %v1765_v58 = vadd.f32 1e-05, %v1733_v23  ;;  %3190 = vmatprep.mubr.bf16.mxu0 %v1924_v52  ;;  %v1825_v24 = vmul.f32 %v3508_v10, %v4871_v26  ;;  %v1896_v38 = vadd.f32 %v5009_v8, %v1860_v36 }
 0x50a   : > { %v1683_v19 = vpop.xlane.xlu1 %1682 }
 0x50b   : > { %3515 = vrsqrt.f32 %v1765_v58  ;;  %v1734_v46 = vmul.f32 0.0078125, %v1683_v19  ;;  %v1861_v4 = vmul.f32 %v5003_v2, %v1825_v24 }
 0x50c   : > { %v3510_v25 = vpop.eup %3509 }
 0x50d   : > { %v1766_v32 = vadd.f32 1e-05, %v1734_v46  ;;  %v1897_v27 = vadd.f32 %v5009_v8, %v1861_v4  ;;  %v1826_v18 = vmul.f32 %v3510_v25, %v4876_v42 }
 0x50e   : > { %v1685_v61 = vpop.xlane.xlu0 %1684 }
 0x50f   : > { %3517 = vrsqrt.f32 %v1766_v32  ;;  %v1735_v9 = vmul.f32 0.0078125, %v1685_v61  ;;  %v1925_v59 = vpack.c.bf16 %v1897_v27, %v1896_v38  ;;  %v1862_v53 = vmul.f32 %v5003_v2, %v1826_v18 }
 0x510   : > { %v3512_v26 = vpop.eup %3511 }
 0x511   : > { %v1767_v40 = vadd.f32 1e-05, %v1735_v9  ;;  %3191 = vmatmul.mubr.bf16.gmra.mxu0 %v1925_v59  ;;  %v1827_v50 = vmul.f32 %v3512_v26, %v4881_v51  ;;  %v1898_v42 = vadd.f32 %v5009_v8, %v1862_v53 }
 0x512   : > { %v1687_v28 = vpop.xlane.xlu1 %1686 }
 0x513   : > { %3519 = vrsqrt.f32 %v1767_v40  ;;  %v1736_v30 = vmul.f32 0.0078125, %v1687_v28  ;;  %v1863_v23 = vmul.f32 %v5003_v2, %v1827_v50 }
 0x514   : > { %v3514_v52 = vpop.eup %3513 }
 0x515   : > { %v1768_v10 = vadd.f32 1e-05, %v1736_v30  ;;  %v1899_v58 = vadd.f32 %v5009_v8, %v1863_v23  ;;  %v1828_v24 = vmul.f32 %v3514_v52, %v4886_v7 }
 0x516   : > { %v1691_v36 = vpop.xlane.xlu1 %1690  ;;  %v1689_v19 = vpop.xlane.xlu0 %1688 }
 0x517   : > { %3521 = vrsqrt.f32 %v1768_v10  ;;  %v1738_v46 = vmul.f32 0.0078125, %v1691_v36  ;;  %v1737_v51 = vmul.f32 0.0078125, %v1689_v19  ;;  %v1926_v4 = vpack.c.bf16 %v1899_v58, %v1898_v42 }
 0x518   : > { %v3516_v25 = vpop.eup %3515  ;;  %v1864_v32 = vmul.f32 %v5003_v2, %v1828_v24 }
 0x519   : > { %v1770_v38 = vadd.f32 1e-05, %v1738_v46  ;;  %v1769_v27 = vadd.f32 1e-05, %v1737_v51  ;;  %3194 = vmatprep.mubr.bf16.mxu0 %v1926_v4  ;;  %v1829_v18 = vmul.f32 %v3516_v25, %v4891_v43 }
 0x51a   : > { %v1695_v61 = vpop.xlane.xlu1 %1694  ;;  %v1693_v9 = vpop.xlane.xlu0 %1692  ;;  %v1900_v50 = vadd.f32 %v5009_v8, %v1864_v32 }
 0x51b   : > { %3523 = vrsqrt.f32 %v1770_v38  ;;  %v1740_v59 = vmul.f32 0.0078125, %v1695_v61  ;;  %v1739_v26 = vmul.f32 0.0078125, %v1693_v9  ;;  %v1865_v7 = vmul.f32 %v5003_v2, %v1829_v18 }
 0x51c   : > { %v3518_v40 = vpop.eup %3517  ;;  %3525 = vrsqrt.f32 %v1769_v27 }
 0x51d   : > { %v1772_v53 = vadd.f32 1e-05, %v1740_v59  ;;  %v1771_v28 = vadd.f32 1e-05, %v1739_v26  ;;  %v1901_v30 = vadd.f32 %v5009_v8, %v1865_v7  ;;  %v1830_v23 = vmul.f32 %v3518_v40, %v4896_v21 }
 0x51e   : > { %v1699_v52 = vpop.xlane.xlu1 %1698  ;;  %v1697_v10 = vpop.xlane.xlu0 %1696 }
 0x51f   : > { %3527 = vrsqrt.f32 %v1772_v53  ;;  %v1742_v43 = vmul.f32 0.0078125, %v1699_v52  ;;  %v1741_v42 = vmul.f32 0.0078125, %v1697_v10  ;;  %v1927_v58 = vpack.c.bf16 %v1901_v30, %v1900_v50 }
 0x520   : > { %v3520_v24 = vpop.eup %3519  ;;  %3529 = vrsqrt.f32 %v1771_v28  ;;  %v1866_v51 = vmul.f32 %v5003_v2, %v1830_v23 }
 0x521   : > { %v1774_v36 = vadd.f32 1e-05, %v1742_v43  ;;  %v1773_v19 = vadd.f32 1e-05, %v1741_v42  ;;  %3195 = vmatmul.mubr.bf16.gmra.mxu0 %v1927_v58  ;;  %v1831_v46 = vmul.f32 %v3520_v24, %v4901_v31 }
 0x522   : > { %v1703_v4 = vpop.xlane.xlu1 %1702  ;;  %v1701_v25 = vpop.xlane.xlu0 %1700  ;;  %v1902_v9 = vadd.f32 %v5009_v8, %v1866_v51 }
 0x523   : > { %3531 = vrsqrt.f32 %v1774_v36  ;;  %v1744_v32 = vmul.f32 0.0078125, %v1703_v4  ;;  %v1743_v21 = vmul.f32 0.0078125, %v1701_v25  ;;  %v1867_v38 = vmul.f32 %v5003_v2, %v1831_v46 }
 0x524   : > { %v3522_v27 = vpop.eup %3521  ;;  %3533 = vrsqrt.f32 %v1773_v19 }
 0x525   : > { %v1776_v18 = vadd.f32 1e-05, %v1744_v32  ;;  %v1775_v61 = vadd.f32 1e-05, %v1743_v21  ;;  %v1903_v59 = vadd.f32 %v5009_v8, %v1867_v38  ;;  %v1832_v31 = vmul.f32 %v3522_v27, %v4906_v63 }
 0x526   : > { %v1707_v26 = vpop.xlane.xlu1 %1706  ;;  %v1705_v7 = vpop.xlane.xlu0 %1704 }
 0x527   : > { %3535 = vrsqrt.f32 %v1776_v18  ;;  %v1746_v40 = vmul.f32 0.0078125, %v1707_v26  ;;  %v1745_v50 = vmul.f32 0.0078125, %v1705_v7  ;;  %v1928_v53 = vpack.c.bf16 %v1903_v59, %v1902_v9 }
 0x528   : > { %v3524_v28 = vpop.eup %3523  ;;  %3537 = vrsqrt.f32 %v1775_v61  ;;  %v1868_v58 = vmul.f32 %v5003_v2, %v1832_v31 }
 0x529   : > { %v3526_v30 = vpop.eup %3525  ;;  %v1778_v23 = vadd.f32 1e-05, %v1746_v40  ;;  %v1777_v52 = vadd.f32 1e-05, %v1745_v50  ;;  %3198 = vmatprep.mubr.bf16.mxu0 %v1928_v53  ;;  %v1834_v24 = vmul.f32 %v3524_v28, %v4911_v29 }
 0x52a   : > { %v1711_v10 = vpop.xlane.xlu1 %1710  ;;  %v1709_v43 = vpop.xlane.xlu0 %1708  ;;  %v1833_v42 = vmul.f32 %v3526_v30, %v4914_v37  ;;  %v1904_v37 = vadd.f32 %v5009_v8, %v1868_v58 }
 0x52b   : > { %3539 = vrsqrt.f32 %v1778_v23  ;;  %v1748_v63 = vmul.f32 0.0078125, %v1711_v10  ;;  %v1747_v36 = vmul.f32 0.0078125, %v1709_v43  ;;  %v1870_v18 = vmul.f32 %v5003_v2, %v1834_v24 }
 0x52c   : > { %v3528_v19 = vpop.eup %3527  ;;  %3541 = vrsqrt.f32 %v1777_v52  ;;  %v1869_v46 = vmul.f32 %v5003_v2, %v1833_v42 }
 0x52d   : > { %v3530_v51 = vpop.eup %3529  ;;  %v1780_v4 = vadd.f32 1e-05, %v1748_v63  ;;  %v1779_v25 = vadd.f32 1e-05, %v1747_v36  ;;  %v1836_v32 = vmul.f32 %v3528_v19, %v4921_v34 }
 0x52e   : > { %v1715_v21 = vpop.xlane.xlu1 %1714  ;;  %v1713_v38 = vpop.xlane.xlu0 %1712  ;;  %v1905_v27 = vadd.f32 %v5009_v8, %v1869_v46  ;;  %v1835_v29 = vmul.f32 %v3530_v51, %v4924_v14  ;;  %v1906_v14 = vadd.f32 %v5009_v8, %v1870_v18 }
 0x52f   : > { %3543 = vrsqrt.f32 %v1780_v4  ;;  %v1750_v61 = vmul.f32 0.0078125, %v1715_v21  ;;  %v1749_v9 = vmul.f32 0.0078125, %v1713_v38  ;;  %v1872_v50 = vmul.f32 %v5003_v2, %v1836_v32 }
 0x530   : > { %v3532_v59 = vpop.eup %3531  ;;  %3545 = vrsqrt.f32 %v1779_v25  ;;  %v1929_v26 = vpack.c.bf16 %v1905_v27, %v1904_v37  ;;  %v1871_v7 = vmul.f32 %v5003_v2, %v1835_v29 }
 0x531   : > { %v3534_v31 = vpop.eup %3533  ;;  %v1782_v34 = vadd.f32 1e-05, %v1750_v61  ;;  %v1781_v40 = vadd.f32 1e-05, %v1749_v9  ;;  %v1838_v52 = vmul.f32 %v3532_v59, %v4931_v6  ;;  %v1908_v46 = vadd.f32 %v5009_v8, %v1872_v50 }
 0x532   : > { %3199 = vmatmul.mubr.bf16.gmra.mxu0 %v1929_v26  ;;  %v1719_v53 = vpop.xlane.xlu1 %1718  ;;  %v1717_v28 = vpop.xlane.xlu0 %1716  ;;  %v1907_v30 = vadd.f32 %v5009_v8, %v1871_v7  ;;  %v1837_v23 = vmul.f32 %v3534_v31, %v4934_v11 }
 0x533   : > { %3547 = vrsqrt.f32 %v1782_v34  ;;  %v1752_v10 = vmul.f32 0.0078125, %v1719_v53  ;;  %v1751_v43 = vmul.f32 0.0078125, %v1717_v28  ;;  %v1874_v6 = vmul.f32 %v5003_v2, %v1838_v52 }
 0x534   : > { %v3536_v42 = vpop.eup %3535  ;;  %3549 = vrsqrt.f32 %v1781_v40  ;;  %v1930_v58 = vpack.c.bf16 %v1907_v30, %v1906_v14  ;;  %v1873_v24 = vmul.f32 %v5003_v2, %v1837_v23 }
 0x535   : > { %v3538_v63 = vpop.eup %3537  ;;  %v1784_v36 = vadd.f32 1e-05, %v1752_v10  ;;  %v1783_v19 = vadd.f32 1e-05, %v1751_v43  ;;  %v1840_v25 = vmul.f32 %v3536_v42, %v4941_v62  ;;  %v1910_v61 = vadd.f32 %v5009_v8, %v1874_v6 }
 0x536   : > { %3202 = vmatprep.mubr.bf16.mxu0 %v1930_v58  ;;  %v1721_v51 = vpop.xlane.xlu0 %1720  ;;  %v1909_v4 = vadd.f32 %v5009_v8, %v1873_v24  ;;  %v1839_v11 = vmul.f32 %v3538_v63, %v4944_v44 }
 0x537   : > { %3551 = vrsqrt.f32 %v1784_v36  ;;  %v1753_v32 = vmul.f32 0.0078125, %v1721_v51  ;;  %v1876_v62 = vmul.f32 %v5003_v2, %v1840_v25 }
 0x538   : > { %v3540_v21 = vpop.eup %3539  ;;  %3553 = vrsqrt.f32 %v1783_v19  ;;  %v1931_v38 = vpack.c.bf16 %v1909_v4, %v1908_v46  ;;  %v1875_v37 = vmul.f32 %v5003_v2, %v1839_v11  ;;  %v3359_v11 = vld [vmem:[#allocation5 + $0xe8] sm:$0xff]  }
 0x539   : > { %v3542_v27 = vpop.eup %3541  ;;  %v1785_v29 = vadd.f32 1e-05, %v1753_v32  ;;  %v1842_v18 = vmul.f32 %v3540_v21, %v4951_v12  ;;  %v1912_v12 = vadd.f32 %v5009_v8, %v1876_v62  ;;  %3222 = vmatprep.subr.bf16.mxu1 %v3359_v11 }
 0x53a   : > { %3203 = vmatmul.mubr.bf16.gmra.mxu0 %v1931_v38  ;;  %v1911_v44 = vadd.f32 %v5009_v8, %v1875_v37  ;;  %v1841_v9 = vmul.f32 %v3542_v27, %v4954_v33  ;;  %3223 = vmatpush3.bf16.msra.mxu1 %v3359_v11  ;;  %v3360_v38 = vld [vmem:[#allocation5 + $0xe0] sm:$0xff]  }
 0x53b   : > { %3555 = vrsqrt.f32 %v1785_v29  ;;  %v1878_v34 = vmul.f32 %v5003_v2, %v1842_v18  ;;  %3224 = vmatprep.subr.bf16.mxu1 %v3360_v38  ;;  %v3361_v29 = vld [vmem:[#allocation5 + $0xd8] sm:$0xff]   ;;  %v3362_v18 = vld [vmem:[#allocation5 + $0xd0] sm:$0xff]  }
 0x53c   : > { %v3544_v59 = vpop.eup %3543  ;;  %v1932_v26 = vpack.c.bf16 %v1911_v44, %v1910_v61  ;;  %v1877_v7 = vmul.f32 %v5003_v2, %v1841_v9  ;;  %v3363_v61 = vld [vmem:[#allocation5 + $0xc8] sm:$0xff]   ;;  %v1940_v44 = vsub.s32 4, %v5500_v0 }
 0x53d   : > { %v3546_v31 = vpop.eup %3545  ;;  %v1844_v53 = vmul.f32 %v3544_v59, %v4961_v56  ;;  %v1914_v23 = vadd.f32 %v5009_v8, %v1878_v34 }
 0x53e   : > { %3206 = vmatprep.mubr.bf16.mxu0 %v1932_v26  ;;  %v1913_v40 = vadd.f32 %v5009_v8, %v1877_v7  ;;  %v1843_v50 = vmul.f32 %v3546_v31, %v4964_v45  ;;  %3225 = vmatpush3.bf16.msra.mxu1 %v3360_v38 }
 0x53f   : > { %v1880_v43 = vmul.f32 %v5003_v2, %v1844_v53  ;;  %3226 = vmatprep.subr.bf16.mxu1 %v3361_v29 }
 0x540   : > { %v3548_v33 = vpop.eup %3547  ;;  %v1933_v28 = vpack.c.bf16 %v1913_v40, %v1912_v12  ;;  %v1879_v14 = vmul.f32 %v5003_v2, %v1843_v50 }
 0x541   : > { %v3550_v30 = vpop.eup %3549  ;;  %v1846_v42 = vmul.f32 %v3548_v33, %v4971_v41  ;;  %v1916_v36 = vadd.f32 %v5009_v8, %v1880_v43 }
 0x542   : > { %3207 = vmatmul.mubr.bf16.gmra.mxu0 %v1933_v28  ;;  %v1915_v52 = vadd.f32 %v5009_v8, %v1879_v14  ;;  %v1845_v10 = vmul.f32 %v3550_v30, %v4974_v48  ;;  %3227 = vmatpush3.bf16.msra.mxu1 %v3361_v29 }
 0x543   : > { %v1882_v48 = vmul.f32 %v5003_v2, %v1846_v42  ;;  %3228 = vmatprep.subr.bf16.mxu1 %v3362_v18 }
 0x544   : > { %v3552_v58 = vpop.eup %3551  ;;  %v1934_v45 = vpack.c.bf16 %v1915_v52, %v1914_v23  ;;  %v1881_v56 = vmul.f32 %v5003_v2, %v1845_v10 }
 0x545   : > { %v3554_v24 = vpop.eup %3553  ;;  %v1848_v63 = vmul.f32 %v3552_v58, %v4981_v54  ;;  %v1918_v54 = vadd.f32 %v5009_v8, %v1882_v48 }
 0x546   : > { %3210 = vmatprep.mubr.bf16.mxu0 %v1934_v45  ;;  %v1917_v19 = vadd.f32 %v5009_v8, %v1881_v56  ;;  %v1847_v46 = vmul.f32 %v3554_v24, %v4984_v57  ;;  %3229 = vmatpush3.bf16.msra.mxu1 %v3362_v18 }
 0x547   : > { %v1884_v25 = vmul.f32 %v5003_v2, %v1848_v63  ;;  %3230 = vmatprep.subr.bf16.mxu1 %v3363_v61 }
 0x548   : > { %v3556_v51 = vpop.eup %3555  ;;  %v1935_v4 = vpack.c.bf16 %v1917_v19, %v1916_v36  ;;  %v1883_v41 = vmul.f32 %v5003_v2, %v1847_v46 }
 0x549   : > { %v1849_v6 = vmul.f32 %v3556_v51, %v4991_v39  ;;  %v1920_v37 = vadd.f32 %v5009_v8, %v1884_v25 }
 0x54a   : > { %3211 = vmatmul.mubr.bf16.gmra.mxu0 %v1935_v4  ;;  %v1919_v32 = vadd.f32 %v5009_v8, %v1883_v41  ;;  %3231 = vmatpush3.bf16.msra.mxu1 %v3363_v61 }
 0x54b   : > { %v1885_v21 = vmul.f32 %v5003_v2, %v1849_v6  ;;  %v3364_v2 = vld [vmem:[#allocation5 + $0xc0] sm:$0xff]  }
 0x54c   : > { %v1936_v57 = vpack.c.bf16 %v1919_v32, %v1918_v54  ;;  %3232 = vmatprep.subr.bf16.mxu1 %v3364_v2 }
 0x54d   : > { %v1921_v27 = vadd.f32 %v5009_v8, %v1885_v21  ;;  %v5106_v8 = vrot.slane %v5000_v5, %v1940_v44 }
 0x54e   : > { %3214 = vmatprep.mubr.bf16.mxu0 %v1936_v57  ;;  %3233 = vmatpush3.bf16.msra.mxu1 %v3364_v2 }
 0x54f   : > { %v1937_v39 = vpack.c.bf16 %v1921_v27, %v1920_v37 }
 0x552   : > { %3215 = vmatmul.mubr.bf16.gmra.mxu0 %v1937_v39 }
 0x5c1   : > { %v3188_v9 = vpop.f32.mrf.mxu0 }
 0x5c2   : > { %v2033_v62 = vadd.f32 %v3188_v9, %v5106_v8 }
 0x5c3   : > { %v2024_v59 = vpop.f32.mrf.mxu0 }
 0x5c4   : > { %v2025_v26 = vadd.f32 %v2024_v59, %v5106_v8  ;;  %v2185_v7 = vmul.f32 0.70710677, %v2033_v62  ;;  %v2153_v25 = vmul.f32 0.5, %v2033_v62 }
 0x5c5   : > { %v3189_v31 = vpop.f32.mrf.mxu0 }
 0x5c6   : > { %v2183_v34 = vmul.f32 0.70710677, %v2025_v26  ;;  %v2036_v12 = vadd.f32 %v3189_v31, %v5106_v8  ;;  %v2151_v4 = vmul.f32 0.5, %v2025_v26 }
 0x5c7   : > { %v2027_v40 = vpop.f32.mrf.mxu0 }
 0x5c8   : > { %3557 = verf.f32 %v2183_v34  ;;  %v2186_v50 = vmul.f32 0.70710677, %v2036_v12  ;;  %v2028_v53 = vadd.f32 %v2027_v40, %v5106_v8  ;;  %v2154_v48 = vmul.f32 0.5, %v2036_v12 }
 0x5c9   : > { %3559 = verf.f32 %v2185_v7 }
 0x5ca   : > { %3561 = verf.f32 %v2186_v50  ;;  %v2184_v5 = vmul.f32 0.70710677, %v2028_v53  ;;  %v2152_v41 = vmul.f32 0.5, %v2028_v53 }
 0x5cc   : > { %3563 = verf.f32 %v2184_v5 }
 0x5d1   : > { %v3192_v33 = vpop.f32.mrf.mxu0 }
 0x5d2   : > { %v2049_v28 = vadd.f32 %v3192_v33, %v5106_v8 }
 0x5d3   : > { %v2040_v14 = vpop.f32.mrf.mxu0 }
 0x5d4   : > { %v2189_v30 = vmul.f32 0.70710677, %v2049_v28  ;;  %v2041_v23 = vadd.f32 %v2040_v14, %v5106_v8 }
 0x5d5   : > { %v3558_v52 = vpop.eup %3557  ;;  %v3193_v10 = vpop.f32.mrf.mxu0 }
 0x5d6   : > { %v3560_v43 = vpop.eup %3559  ;;  %v2187_v58 = vmul.f32 0.70710677, %v2041_v23  ;;  %v2052_v45 = vadd.f32 %v3193_v10, %v5106_v8  ;;  %v2247_v24 = vadd.f32 1.0, %v3558_v52  ;;  %3565 = verf.f32 %v2189_v30 }
 0x5d7   : > { %v3562_v42 = vpop.eup %3561  ;;  %v2043_v56 = vpop.f32.mrf.mxu0  ;;  %v2249_v46 = vadd.f32 1.0, %v3560_v43  ;;  %v2155_v33 = vmul.f32 0.5, %v2041_v23  ;;  %v2157_v10 = vmul.f32 0.5, %v2049_v28 }
 0x5d8   : > { %v2250_v63 = vadd.f32 1.0, %v3562_v42  ;;  %v2044_v36 = vadd.f32 %v2043_v56, %v5106_v8  ;;  %3567 = verf.f32 %v2187_v58  ;;  %v2190_v51 = vmul.f32 0.70710677, %v2052_v45 }
 0x5d9   : > { %v3564_v19 = vpop.eup %3563  ;;  %v2279_v32 = vmul.f32 %v2247_v24, %v2151_v4  ;;  %v2281_v57 = vmul.f32 %v2249_v46, %v2153_v25  ;;  %v2158_v34 = vmul.f32 0.5, %v2052_v45 }
 0x5da   : > { %v2248_v11 = vadd.f32 1.0, %v3564_v19  ;;  %v2188_v6 = vmul.f32 0.70710677, %v2044_v36  ;;  %v2282_v54 = vmul.f32 %v2250_v63, %v2154_v48  ;;  %3569 = verf.f32 %v2190_v51 }
 0x5db   : > { %v2156_v14 = vmul.f32 0.5, %v2044_v36 }
 0x5dc   : > { %v2280_v21 = vmul.f32 %v2248_v11, %v2152_v41  ;;  %3571 = verf.f32 %v2188_v6  ;;  %v2312_v37 = vpack.c.bf16 %v2282_v54, %v2281_v57 }
 0x5de   : > { %v2311_v38 = vpack.c.bf16 %v2280_v21, %v2279_v32 }
 0x5e0   : > { %3234 = vmatprep.mubr.bf16.mxu1 %v2311_v38 }
 0x5e1   : > { %v3196_v27 = vpop.f32.mrf.mxu0  ;;  %3235 = vmatmul.mubr.bf16.vlgmr.msra.gmra.mxu1 %v2312_v37 }
 0x5e2   : > { %v2065_v39 = vadd.f32 %v3196_v27, %v5106_v8 }
 0x5e3   : > { %v2056_v29 = vpop.f32.mrf.mxu0  ;;  %v3566_v61 = vpop.eup %3565 }
 0x5e4   : > { %v2057_v18 = vadd.f32 %v2056_v29, %v5106_v8  ;;  %v2193_v2 = vmul.f32 0.70710677, %v2065_v39  ;;  %v2253_v50 = vadd.f32 1.0, %v3566_v61 }
 0x5e5   : > { %v3197_v44 = vpop.f32.mrf.mxu0  ;;  %v3568_v9 = vpop.eup %3567 }
 0x5e6   : > { %v2191_v62 = vmul.f32 0.70710677, %v2057_v18  ;;  %v2068_v59 = vadd.f32 %v3197_v44, %v5106_v8  ;;  %v2251_v31 = vadd.f32 1.0, %v3568_v9  ;;  %v2285_v56 = vmul.f32 %v2253_v50, %v2157_v10 }
 0x5e7   : > { %v2059_v26 = vpop.f32.mrf.mxu0  ;;  %v3570_v7 = vpop.eup %3569  ;;  %v2159_v6 = vmul.f32 0.5, %v2057_v18  ;;  %v2161_v44 = vmul.f32 0.5, %v2065_v39 }
 0x5e8   : > { %3573 = verf.f32 %v2191_v62  ;;  %v2060_v12 = vadd.f32 %v2059_v26, %v5106_v8  ;;  %v2254_v53 = vadd.f32 1.0, %v3570_v7  ;;  %v2194_v5 = vmul.f32 0.70710677, %v2068_v59 }
 0x5e9   : > { %v3572_v40 = vpop.eup %3571  ;;  %3575 = verf.f32 %v2193_v2  ;;  %v2283_v42 = vmul.f32 %v2251_v31, %v2155_v33  ;;  %v2162_v54 = vmul.f32 0.5, %v2068_v59 }
 0x5ea   : > { %v2252_v30 = vadd.f32 1.0, %v3572_v40  ;;  %v2192_v52 = vmul.f32 0.70710677, %v2060_v12  ;;  %v2286_v43 = vmul.f32 %v2254_v53, %v2158_v34  ;;  %3577 = verf.f32 %v2194_v5 }
 0x5eb   : > { %v2160_v27 = vmul.f32 0.5, %v2060_v12 }
 0x5ec   : > { %v2284_v58 = vmul.f32 %v2252_v30, %v2156_v14  ;;  %3579 = verf.f32 %v2192_v52  ;;  %v2314_v24 = vpack.c.bf16 %v2286_v43, %v2285_v56 }
 0x5ee   : > { %v2313_v45 = vpack.c.bf16 %v2284_v58, %v2283_v42 }
 0x5f0   : > { %3238 = vmatprep.mubr.bf16.mxu1 %v2313_v45 }
 0x5f1   : > { %3239 = vmatmul.mubr.bf16.gmra.mxu1 %v2314_v24 }
 0x5f2   : > { %v3200_v63 = vpop.f32.mrf.mxu0 }
 0x5f3   : > { %v5121_v19 = vadd.f32 %v3200_v63, %v5106_v8 }
 0x5f4   : > { %v2072_v46 = vpop.f32.mrf.mxu0 }
 0x5f5   : > { %v3574_v23 = vpop.eup %3573  ;;  %v2197_v36 = vmul.f32 0.70710677, %v5121_v19  ;;  %v5125_v28 = vadd.f32 %v2072_v46, %v5106_v8 }
 0x5f6   : > { %v3576_v48 = vpop.eup %3575  ;;  %v3201_v51 = vpop.f32.mrf.mxu0  ;;  %v2255_v25 = vadd.f32 1.0, %v3574_v23 }
 0x5f7   : > { %v2195_v4 = vmul.f32 0.70710677, %v5125_v28  ;;  %v5129_v41 = vadd.f32 %v3201_v51, %v5106_v8  ;;  %v3578_v11 = vpop.eup %3577  ;;  %v2257_v57 = vadd.f32 1.0, %v3576_v48  ;;  %3581 = verf.f32 %v2197_v36 }
 0x5f8   : > { %v2075_v32 = vpop.f32.mrf.mxu0  ;;  %v2258_v38 = vadd.f32 1.0, %v3578_v11  ;;  %v2287_v62 = vmul.f32 %v2255_v25, %v2159_v6 }
 0x5f9   : > { %v3580_v21 = vpop.eup %3579  ;;  %v2198_v37 = vmul.f32 0.70710677, %v5129_v41  ;;  %3583 = verf.f32 %v2195_v4  ;;  %v2076_v61 = vadd.f32 %v2075_v32, %v5106_v8  ;;  %v2289_v31 = vmul.f32 %v2257_v57, %v2161_v44 }
 0x5fa   : > { %v2256_v29 = vadd.f32 1.0, %v3580_v21  ;;  %v3204_v2 = vpop.f32.mrf.mxu0  ;;  %v2290_v9 = vmul.f32 %v2258_v38, %v2162_v54  ;;  %v2166_v21 = vmul.f32 0.5, %v5129_v41  ;;  %v2163_v38 = vmul.f32 0.5, %v5125_v28 }
 0x5fb   : > { %3585 = verf.f32 %v2198_v37  ;;  %v5134_v18 = vadd.f32 %v3204_v2, %v5106_v8  ;;  %v2196_v26 = vmul.f32 0.70710677, %v2076_v61  ;;  %v2164_v37 = vmul.f32 0.5, %v2076_v61 }
 0x5fc   : > { %v2288_v59 = vmul.f32 %v2256_v29, %v2160_v27  ;;  %v2088_v7 = vpop.f32.mrf.mxu0  ;;  %v2316_v5 = vpack.c.bf16 %v2290_v9, %v2289_v31  ;;  %v2165_v44 = vmul.f32 0.5, %v5121_v19 }
 0x5fd   : > { %v2201_v34 = vmul.f32 0.70710677, %v5134_v18  ;;  %v5138_v12 = vadd.f32 %v2088_v7, %v5106_v8  ;;  %3587 = verf.f32 %v2196_v26 }
 0x5fe   : > { %v3205_v40 = vpop.f32.mrf.mxu0  ;;  %v2315_v50 = vpack.c.bf16 %v2288_v59, %v2287_v62 }
 0x5ff   : > { %v2199_v39 = vmul.f32 0.70710677, %v5138_v12  ;;  %v2100_v53 = vadd.f32 %v3205_v40, %v5106_v8  ;;  %3589 = verf.f32 %v2201_v34 }
 0x600   : > { %v2091_v33 = vpop.f32.mrf.mxu0  ;;  %3242 = vmatprep.mubr.bf16.mxu1 %v2315_v50 }
 0x601   : > { %v2202_v14 = vmul.f32 0.70710677, %v2100_v53  ;;  %v2092_v30 = vadd.f32 %v2091_v33, %v5106_v8  ;;  %3243 = vmatmul.mubr.bf16.gmra.mxu1 %v2316_v5  ;;  %3591 = verf.f32 %v2199_v39  ;;  %v2170_v5 = vmul.f32 0.5, %v2100_v53 }
 0x602   : > { %v3208_v52 = vpop.f32.mrf.mxu0  ;;  %v2169_v53 = vmul.f32 0.5, %v5134_v18 }
 0x603   : > { %3593 = verf.f32 %v2202_v14  ;;  %v2200_v10 = vmul.f32 0.70710677, %v2092_v30  ;;  %v5144_v43 = vadd.f32 %v3208_v52, %v5106_v8 }
 0x604   : > { %v2104_v42 = vpop.f32.mrf.mxu0  ;;  %v3582_v56 = vpop.eup %3581 }
 0x605   : > { %3595 = verf.f32 %v2200_v10  ;;  %v2205_v58 = vmul.f32 0.70710677, %v5144_v43  ;;  %v5148_v45 = vadd.f32 %v2104_v42, %v5106_v8  ;;  %v2261_v32 = vadd.f32 1.0, %v3582_v56 }
 0x606   : > { %v3209_v24 = vpop.f32.mrf.mxu0  ;;  %v3584_v63 = vpop.eup %3583 }
 0x607   : > { %v5151_v46 = vadd.f32 %v3209_v24, %v5106_v8  ;;  %v2203_v36 = vmul.f32 0.70710677, %v5148_v45  ;;  %3597 = verf.f32 %v2205_v58  ;;  %v2259_v11 = vadd.f32 1.0, %v3584_v63 }
 0x608   : > { %v3586_v23 = vpop.eup %3585  ;;  %v2107_v48 = vpop.f32.mrf.mxu0  ;;  %v2293_v34 = vmul.f32 %v2261_v32, %v2165_v44  ;;  %v2168_v58 = vmul.f32 0.5, %v2092_v30 }
 0x609   : > { %v2262_v51 = vadd.f32 1.0, %v3586_v23  ;;  %v2206_v4 = vmul.f32 0.70710677, %v5151_v46  ;;  %3599 = verf.f32 %v2203_v36  ;;  %v5156_v6 = vadd.f32 %v2107_v48, %v5106_v8 }
 0x60a   : > { %v3212_v25 = vpop.f32.mrf.mxu0  ;;  %v3588_v54 = vpop.eup %3587  ;;  %v2291_v26 = vmul.f32 %v2259_v11, %v2163_v38  ;;  %v2167_v48 = vmul.f32 0.5, %v5138_v12 }
 0x60b   : > { %3601 = verf.f32 %v2206_v4  ;;  %v5160_v57 = vadd.f32 %v3212_v25, %v5106_v8  ;;  %v2260_v27 = vadd.f32 1.0, %v3588_v54  ;;  %v2204_v29 = vmul.f32 0.70710677, %v5156_v6 }
 0x60c   : > { %v2120_v2 = vpop.f32.mrf.mxu0  ;;  %v2294_v9 = vmul.f32 %v2262_v51, %v2166_v21  ;;  %v3590_v59 = vpop.eup %3589 }
 0x60d   : > { %v5166_v62 = vadd.f32 %v2120_v2, %v5106_v8  ;;  %v2292_v41 = vmul.f32 %v2260_v27, %v2164_v37  ;;  %3603 = verf.f32 %v2204_v29  ;;  %v2209_v28 = vmul.f32 0.70710677, %v5160_v57 }
 0x60e   : > { %v3213_v7 = vpop.f32.mrf.mxu0  ;;  %v3592_v31 = vpop.eup %3591  ;;  %v2318_v52 = vpack.c.bf16 %v2294_v9, %v2293_v34  ;;  %v2265_v63 = vadd.f32 1.0, %v3590_v59 }
 0x60f   : > { %v2207_v40 = vmul.f32 0.70710677, %v5166_v62  ;;  %v5171_v50 = vadd.f32 %v3213_v7, %v5106_v8  ;;  %v2317_v39 = vpack.c.bf16 %v2292_v41, %v2291_v26  ;;  %v2263_v42 = vadd.f32 1.0, %v3592_v31 }
 0x610   : > { %v3594_v61 = vpop.eup %3593  ;;  %v2123_v19 = vpop.f32.mrf.mxu0  ;;  %v2297_v18 = vmul.f32 %v2265_v63, %v2169_v53 }
 0x611   : > { %v2266_v33 = vadd.f32 1.0, %v3594_v61  ;;  %v5174_v14 = vadd.f32 %v2123_v19, %v5106_v8  ;;  %3605 = verf.f32 %v2207_v40  ;;  %v2210_v56 = vmul.f32 0.70710677, %v5171_v50  ;;  %3246 = vmatprep.mubr.bf16.mxu1 %v2317_v39 }
 0x612   : > { %v3596_v10 = vpop.eup %3595  ;;  %v3216_v24 = vpop.f32.mrf.mxu0  ;;  %3607 = verf.f32 %v2209_v28  ;;  %3247 = vmatmul.mubr.bf16.gmra.mxu1 %v2318_v52  ;;  %v2295_v32 = vmul.f32 %v2263_v42, %v2167_v48  ;;  %v2174_v28 = vmul.f32 0.5, %v5151_v46  ;;  %v2171_v61 = vmul.f32 0.5, %v5148_v45 }
 0x613   : > { %v2264_v23 = vadd.f32 1.0, %v3596_v10  ;;  %v2208_v36 = vmul.f32 0.70710677, %v5174_v14  ;;  %3609 = verf.f32 %v2210_v56  ;;  %v5181_v51 = vadd.f32 %v3216_v24, %v5106_v8 }
 0x614   : > { %v2136_v30 = vpop.f32.mrf.mxu0  ;;  %v2298_v4 = vmul.f32 %v2266_v33, %v2170_v5  ;;  %v3598_v54 = vpop.eup %3597  ;;  %v2172_v40 = vmul.f32 0.5, %v5156_v6  ;;  %v2173_v5 = vmul.f32 0.5, %v5144_v43  ;;  %v2175_v45 = vmul.f32 0.5, %v5166_v62 }
 0x615   : > { %v2296_v11 = vmul.f32 %v2264_v23, %v2168_v58  ;;  %3611 = verf.f32 %v2208_v36  ;;  %v5184_v25 = vadd.f32 %v2136_v30, %v5106_v8  ;;  %v2213_v21 = vmul.f32 0.70710677, %v5181_v51 }
 0x616   : > { %v3217_v38 = vpop.f32.mrf.mxu0  ;;  %v3600_v37 = vpop.eup %3599  ;;  %v2320_v26 = vpack.c.bf16 %v2298_v4, %v2297_v18  ;;  %v2269_v34 = vadd.f32 1.0, %v3598_v54  ;;  %v2178_v53 = vmul.f32 0.5, %v5171_v50  ;;  %v2176_v43 = vmul.f32 0.5, %v5174_v14 }
 0x617   : > { %v2211_v12 = vmul.f32 0.70710677, %v5184_v25  ;;  %v2148_v27 = vadd.f32 %v3217_v38, %v5106_v8  ;;  %v2319_v44 = vpack.c.bf16 %v2296_v11, %v2295_v32  ;;  %3613 = verf.f32 %v2213_v21 }
 0x618   : > { %v3602_v29 = vpop.eup %3601  ;;  %v2139_v2 = vpop.f32.mrf.mxu0  ;;  %v2267_v41 = vadd.f32 1.0, %v3600_v37  ;;  %v2301_v42 = vmul.f32 %v2269_v34, %v2173_v5  ;;  %v2177_v30 = vmul.f32 0.5, %v5160_v57  ;;  %v2179_v14 = vmul.f32 0.5, %v5184_v25 }
 0x619   : > { %v2270_v9 = vadd.f32 1.0, %v3602_v29  ;;  %v2214_v59 = vmul.f32 0.70710677, %v2148_v27  ;;  %3615 = verf.f32 %v2211_v12  ;;  %v2140_v7 = vadd.f32 %v2139_v2, %v5106_v8  ;;  %3250 = vmatprep.mubr.bf16.mxu1 %v2319_v44 }
 0x61a   : > { %v3604_v31 = vpop.eup %3603  ;;  %3251 = vmatmul.mubr.bf16.gmra.mxu1 %v2320_v26  ;;  %v2299_v52 = vmul.f32 %v2267_v41, %v2171_v61  ;;  %v2182_v44 = vmul.f32 0.5, %v2148_v27  ;;  %v3626_v27 = vld [vmem:[%s5341_s2] sm:$0x3f] }
 0x61b   : > { %3617 = verf.f32 %v2214_v59  ;;  %v2268_v19 = vadd.f32 1.0, %v3604_v31  ;;  %v2212_v39 = vmul.f32 0.70710677, %v2140_v7  ;;  %v2302_v33 = vmul.f32 %v2270_v9, %v2174_v28 }
 0x61c   : > { %v2180_v9 = vmul.f32 0.5, %v2140_v7  ;;  %v2181_v59 = vmul.f32 0.5, %v5181_v51 }
 0x61d   : > { %v2300_v10 = vmul.f32 %v2268_v19, %v2172_v40  ;;  %3619 = verf.f32 %v2212_v39  ;;  %v2322_v63 = vpack.c.bf16 %v2302_v33, %v2301_v42  ;;  %v2329_v40 = vsub.s32 5, %v5500_v0 }
 0x61e   : > { %v3606_v8 = vpop.eup %3605 }
 0x61f   : > { %v3608_v58 = vpop.eup %3607  ;;  %v2321_v56 = vpack.c.bf16 %v2300_v10, %v2299_v52  ;;  %v2271_v46 = vadd.f32 1.0, %v3606_v8  ;;  %v5204_v25 = vrot.slane %v3626_v27, %v2329_v40 }
 0x620   : > { %v3610_v24 = vpop.eup %3609  ;;  %v2273_v6 = vadd.f32 1.0, %v3608_v58 }
 0x621   : > { %v2274_v36 = vadd.f32 1.0, %v3610_v24  ;;  %3254 = vmatprep.mubr.bf16.mxu1 %v2321_v56  ;;  %v2303_v4 = vmul.f32 %v2271_v46, %v2175_v45 }
 0x622   : > { %v3612_v23 = vpop.eup %3611  ;;  %3255 = vmatmul.mubr.bf16.gmra.mxu1 %v2322_v63  ;;  %v2305_v38 = vmul.f32 %v2273_v6, %v2177_v30 }
 0x623   : > { %v2272_v48 = vadd.f32 1.0, %v3612_v23  ;;  %v2306_v11 = vmul.f32 %v2274_v36, %v2178_v53 }
 0x624   : > { %v3614_v32 = vpop.eup %3613 }
 0x625   : > { %v2304_v54 = vmul.f32 %v2272_v48, %v2176_v43  ;;  %v2324_v12 = vpack.c.bf16 %v2306_v11, %v2305_v38  ;;  %v2277_v50 = vadd.f32 1.0, %v3614_v32 }
 0x626   : > { %v3616_v21 = vpop.eup %3615 }
 0x627   : > { %v2323_v37 = vpack.c.bf16 %v2304_v54, %v2303_v4  ;;  %v2275_v29 = vadd.f32 1.0, %v3616_v21  ;;  %v2309_v34 = vmul.f32 %v2277_v50, %v2181_v59 }
 0x628   : > { %v3618_v18 = vpop.eup %3617 }
 0x629   : > { %v2278_v62 = vadd.f32 1.0, %v3618_v18  ;;  %3258 = vmatprep.mubr.bf16.mxu1 %v2323_v37  ;;  %v2307_v41 = vmul.f32 %v2275_v29, %v2179_v14 }
 0x62a   : > { %v3620_v2 = vpop.eup %3619  ;;  %3259 = vmatmul.mubr.bf16.gmra.mxu1 %v2324_v12 }
 0x62b   : > { %v2276_v57 = vadd.f32 1.0, %v3620_v2  ;;  %v2310_v26 = vmul.f32 %v2278_v62, %v2182_v44 }
 0x62d   : > { %v2308_v31 = vmul.f32 %v2276_v57, %v2180_v9  ;;  %v2326_v61 = vpack.c.bf16 %v2310_v26, %v2309_v34  ;;  %v5501_v9 = vld [vmem:[#allocation33_spill] sm:$0xff] }
 0x62e   : > { %v5502_v26 = vld [vmem:[#allocation41_spill] sm:$0xff] }
 0x62f   : > { %v2325_v28 = vpack.c.bf16 %v2308_v31, %v2307_v41  ;;  %v5503_v34 = vld [vmem:[#allocation37_spill] sm:$0xff] }
 0x631   : > { %3262 = vmatprep.mubr.bf16.mxu1 %v2325_v28 }
 0x632   : > { %3263 = vmatmul.mubr.bf16.gmra.mxu1 %v2326_v61 }
 0x6a1   : > { %v3236_v7 = vpop.f32.mrf.mxu1 }
 0x6a2   : > { %v2422_v51 = vadd.f32 %v3236_v7, %v5204_v25 }
 0x6a3   : > { %v2413_v19 = vpop.f32.mrf.mxu1 }
 0x6a4   : > { %v2414_v5 = vadd.f32 %v2413_v19, %v5204_v25  ;;  %v2542_v10 = vadd.f32 %v2422_v51, %v4661_v16 }
 0x6a5   : > { %v3237_v39 = vpop.f32.mrf.mxu1 }
 0x6a6   : > { %v2425_v33 = vadd.f32 %v3237_v39, %v5204_v25  ;;  %v2540_v42 = vadd.f32 %v2414_v5, %v4645_v3  ;;  %v5504_v39 = vld [vmem:[#allocation29_spill] sm:$0xff] }
 0x6a7   : > { %v2416_v52 = vpop.f32.mrf.mxu1 }
 0x6a8   : > { %v2543_v0 = vadd.f32 %v2425_v33, %v4670_v22  ;;  %v2417_v8 = vadd.f32 %v2416_v52, %v5204_v25  ;;  %v5505_v33 = vld [vmem:[#allocation30_spill] sm:$0xff] }
 0x6aa   : > { %v3020_v58 = vpack.c.bf16 %v2543_v0, %v2542_v10  ;;  %v2541_v56 = vadd.f32 %v2417_v8, %v4654_v13  ;;  %v5506_v8 = vld [vmem:[#allocation38_spill] sm:$0xff] }
 0x6ac   : > { %3107 = vst [vmem:[%s5216_s23 + $0x8] sm:$0xff] %v3020_v58   ;;  %v3015_v24 = vpack.c.bf16 %v2541_v56, %v2540_v42  ;;  %v5507_v56 = vld [vmem:[#allocation34_spill] sm:$0xff] }
 0x6ae   : > { %3016 = vst [vmem:[%s5216_s23] sm:$0xff] %v3015_v24  }
 0x6b1   : > { %v3240_v16 = vpop.f32.mrf.mxu1 }
 0x6b2   : > { %v2438_v22 = vadd.f32 %v3240_v16, %v5204_v25 }
 0x6b3   : > { %v2429_v46 = vpop.f32.mrf.mxu1 }
 0x6b4   : > { %v2430_v3 = vadd.f32 %v2429_v46, %v5204_v25  ;;  %v2546_v45 = vadd.f32 %v2438_v22, %v4697_v20 }
 0x6b5   : > { %v3241_v63 = vpop.f32.mrf.mxu1 }
 0x6b6   : > { %v2441_v23 = vadd.f32 %v3241_v63, %v5204_v25  ;;  %v2544_v53 = vadd.f32 %v2430_v3, %v4679_v17 }
 0x6b7   : > { %v2432_v13 = vpop.f32.mrf.mxu1 }
 0x6b8   : > { %v2547_v36 = vadd.f32 %v2441_v23, %v4706_v55  ;;  %v2433_v6 = vadd.f32 %v2432_v13, %v5204_v25 }
 0x6ba   : > { %v3030_v43 = vpack.c.bf16 %v2547_v36, %v2546_v45  ;;  %v2545_v48 = vadd.f32 %v2433_v6, %v4688_v15  ;;  %v5508_v45 = vld [vmem:[#allocation21_spill] sm:$0xff]  ;;  %v5509_v6 = vld [vmem:[#allocation22_spill] sm:$0xff] }
 0x6bc   : > { %3109 = vst [vmem:[%s5216_s23 + $0x18] sm:$0xff] %v3030_v43   ;;  %v3025_v30 = vpack.c.bf16 %v2545_v48, %v2544_v53 }
 0x6be   : > { %3108 = vst [vmem:[%s5216_s23 + $0x10] sm:$0xff] %v3025_v30   ;;  %v5510_v30 = vld [vmem:[#allocation25_spill] sm:$0xff] }
 0x6c1   : > { %v3244_v4 = vpop.f32.mrf.mxu1 }
 0x6c2   : > { %v2454_v54 = vadd.f32 %v3244_v4, %v5204_v25 }
 0x6c3   : > { %v2445_v11 = vpop.f32.mrf.mxu1 }
 0x6c4   : > { %v2446_v20 = vadd.f32 %v2445_v11, %v5204_v25  ;;  %v2550_v17 = vadd.f32 %v2454_v54, %v4728_v49  ;;  %v5511_v54 = vld [vmem:[#allocation26_spill] sm:$0xff] }
 0x6c5   : > { %v3245_v32 = vpop.f32.mrf.mxu1 }
 0x6c6   : > { %v2457_v55 = vadd.f32 %v3245_v32, %v5204_v25  ;;  %v2548_v37 = vadd.f32 %v2446_v20, %v4715_v1 }
 0x6c7   : > { %v2448_v21 = vpop.f32.mrf.mxu1 }
 0x6c8   : > { %v2551_v38 = vadd.f32 %v2457_v55, %v4732_v47  ;;  %v2449_v15 = vadd.f32 %v2448_v21, %v5204_v25 }
 0x6ca   : > { %v3040_v18 = vpack.c.bf16 %v2551_v38, %v2550_v17  ;;  %v2549_v62 = vadd.f32 %v2449_v15, %v4724_v35 }
 0x6cc   : > { %3111 = vst [vmem:[%s5216_s23 + $0x28] sm:$0xff] %v3040_v18   ;;  %v3035_v12 = vpack.c.bf16 %v2549_v62, %v2548_v37  ;;  %v5512_v18 = vld [vmem:[#allocation12_spill] sm:$0xff] }
 0x6ce   : > { %3110 = vst [vmem:[%s5216_s23 + $0x20] sm:$0xff] %v3035_v12   ;;  %v5513_v12 = vld [vmem:[#allocation39_spill] sm:$0xff] }
 0x6d2   : > { %v3248_v29 = vpop.f32.mrf.mxu1 }
 0x6d3   : > { %v2470_v50 = vadd.f32 %v3248_v29, %v5204_v25 }
 0x6d4   : > { %v2461_v2 = vpop.f32.mrf.mxu1 }
 0x6d5   : > { %v2462_v49 = vadd.f32 %v2461_v2, %v5204_v25  ;;  %v2554_v1 = vadd.f32 %v2470_v50, %v4746_v60 }
 0x6d6   : > { %v3249_v44 = vpop.f32.mrf.mxu1 }
 0x6d7   : > { %v2473_v47 = vadd.f32 %v3249_v44, %v5204_v25  ;;  %v2552_v41 = vadd.f32 %v2462_v49, %v5502_v26  ;;  %v5514_v44 = vld [vmem:[#allocation17_spill] sm:$0xff] }
 0x6d8   : > { %v2464_v14 = vpop.f32.mrf.mxu1 }
 0x6d9   : > { %v2555_v57 = vadd.f32 %v2473_v47, %v5501_v9  ;;  %v2465_v35 = vadd.f32 %v2464_v14, %v5204_v25  ;;  %v5515_v14 = vld [vmem:[#allocation18_spill] sm:$0xff] }
 0x6da   : > { %v3252_v59 = vpop.f32.mrf.mxu1 }
 0x6db   : > { %v3050_v31 = vpack.c.bf16 %v2555_v57, %v2554_v1  ;;  %v2553_v28 = vadd.f32 %v2465_v35, %v5503_v34  ;;  %v2486_v27 = vadd.f32 %v3252_v59, %v5204_v25  ;;  %v5516_v34 = vld [vmem:[#allocation35_spill] sm:$0xff] }
 0x6dc   : > { %v2477_v61 = vpop.f32.mrf.mxu1 }
 0x6dd   : > { %3113 = vst [vmem:[%s5216_s23 + $0x38] sm:$0xff] %v3050_v31   ;;  %v3045_v40 = vpack.c.bf16 %v2553_v28, %v2552_v41  ;;  %v2478_v60 = vadd.f32 %v2477_v61, %v5204_v25  ;;  %v2558_v5 = vadd.f32 %v2486_v27, %v5504_v39  ;;  %v5517_v61 = vld [vmem:[#allocation36_spill] sm:$0xff] }
 0x6de   : > { %v3253_v7 = vpop.f32.mrf.mxu1 }
 0x6df   : > { %3112 = vst [vmem:[%s5216_s23 + $0x30] sm:$0xff] %v3045_v40   ;;  %v2489_v19 = vadd.f32 %v3253_v7, %v5204_v25  ;;  %v2556_v42 = vadd.f32 %v2478_v60, %v5506_v8  ;;  %v5518_v7 = vld [vmem:[#allocation14_spill] sm:$0xff] }
 0x6e0   : > { %v2480_v51 = vpop.f32.mrf.mxu1 }
 0x6e1   : > { %v2559_v52 = vadd.f32 %v2489_v19, %v5505_v33  ;;  %v2481_v10 = vadd.f32 %v2480_v51, %v5204_v25  ;;  %v5519_v51 = vld [vmem:[#allocation40_spill] sm:$0xff] }
 0x6e2   : > { %v3256_v0 = vpop.f32.mrf.mxu1 }
 0x6e3   : > { %v3060_v58 = vpack.c.bf16 %v2559_v52, %v2558_v5  ;;  %v2557_v24 = vadd.f32 %v2481_v10, %v5507_v56  ;;  %v2502_v22 = vadd.f32 %v3256_v0, %v5204_v25 }
 0x6e4   : > { %v2493_v16 = vpop.f32.mrf.mxu1 }
 0x6e5   : > { %3115 = vst [vmem:[%s5216_s23 + $0x48] sm:$0xff] %v3060_v58   ;;  %v3055_v46 = vpack.c.bf16 %v2557_v24, %v2556_v42  ;;  %v2494_v3 = vadd.f32 %v2493_v16, %v5204_v25  ;;  %v2562_v36 = vadd.f32 %v2502_v22, %v5508_v45 }
 0x6e6   : > { %v3257_v63 = vpop.f32.mrf.mxu1 }
 0x6e7   : > { %3114 = vst [vmem:[%s5216_s23 + $0x40] sm:$0xff] %v3055_v46   ;;  %v2505_v23 = vadd.f32 %v3257_v63, %v5204_v25  ;;  %v2560_v4 = vadd.f32 %v2494_v3, %v5510_v30 }
 0x6e8   : > { %v2496_v13 = vpop.f32.mrf.mxu1 }
 0x6e9   : > { %v2563_v53 = vadd.f32 %v2505_v23, %v5509_v6  ;;  %v2497_v43 = vadd.f32 %v2496_v13, %v5204_v25 }
 0x6ea   : > { %v3260_v48 = vpop.f32.mrf.mxu1 }
 0x6eb   : > { %v3070_v11 = vpack.c.bf16 %v2563_v53, %v2562_v36  ;;  %v2561_v32 = vadd.f32 %v2497_v43, %v5511_v54  ;;  %v2518_v21 = vadd.f32 %v3260_v48, %v5204_v25 }
 0x6ec   : > { %v2509_v20 = vpop.f32.mrf.mxu1 }
 0x6ed   : > { %3117 = vst [vmem:[%s5216_s23 + $0x58] sm:$0xff] %v3070_v11   ;;  %v3065_v55 = vpack.c.bf16 %v2561_v32, %v2560_v4  ;;  %v2510_v38 = vadd.f32 %v2509_v20, %v5204_v25  ;;  %v2566_v62 = vadd.f32 %v2518_v21, %v5512_v18 }
 0x6ee   : > { %v3261_v17 = vpop.f32.mrf.mxu1 }
 0x6ef   : > { %3116 = vst [vmem:[%s5216_s23 + $0x50] sm:$0xff] %v3065_v55   ;;  %v2521_v15 = vadd.f32 %v3261_v17, %v5204_v25  ;;  %v2564_v49 = vadd.f32 %v2510_v38, %v5514_v44 }
 0x6f0   : > { %v2512_v37 = vpop.f32.mrf.mxu1 }
 0x6f1   : > { %v2567_v29 = vadd.f32 %v2521_v15, %v5513_v12  ;;  %v2513_v2 = vadd.f32 %v2512_v37, %v5204_v25 }
 0x6f2   : > { %v3264_v50 = vpop.f32.mrf.mxu1 }
 0x6f3   : > { %v3080_v47 = vpack.c.bf16 %v2567_v29, %v2566_v62  ;;  %v2565_v1 = vadd.f32 %v2513_v2, %v5515_v14  ;;  %v2534_v35 = vadd.f32 %v3264_v50, %v5204_v25 }
 0x6f4   : > { %v2525_v9 = vpop.f32.mrf.mxu1 }
 0x6f5   : > { %3119 = vst [vmem:[%s5216_s23 + $0x68] sm:$0xff] %v3080_v47   ;;  %v3075_v57 = vpack.c.bf16 %v2565_v1, %v2564_v49  ;;  %v2526_v26 = vadd.f32 %v2525_v9, %v5204_v25  ;;  %v2570_v28 = vadd.f32 %v2534_v35, %v5516_v34 }
 0x6f6   : > { %v3265_v59 = vpop.f32.mrf.mxu1 }
 0x6f7   : > { %3118 = vst [vmem:[%s5216_s23 + $0x60] sm:$0xff] %v3075_v57   ;;  %v2537_v41 = vadd.f32 %v3265_v59, %v5204_v25  ;;  %v2568_v60 = vadd.f32 %v2526_v26, %v5518_v7 }
 0x6f8   : > { %v2528_v31 = vpop.f32.mrf.mxu1 }
 0x6f9   : > { %v2571_v40 = vadd.f32 %v2537_v41, %v5517_v61  ;;  %v2529_v27 = vadd.f32 %v2528_v31, %v5204_v25 }
 0x6fb   : > { %v3090_v19 = vpack.c.bf16 %v2571_v40, %v2570_v28  ;;  %v2569_v39 = vadd.f32 %v2529_v27, %v5519_v51 }
 0x6fd   : > { %3121 = vst [vmem:[%s5216_s23 + $0x78] sm:$0xff] %v3090_v19   ;;  %v3085_v5 = vpack.c.bf16 %v2569_v39, %v2568_v60 }
 0x6ff   : > { %3120 = vst [vmem:[%s5216_s23 + $0x70] sm:$0xff] %v3085_v5  }
 0x700   : > { %3694 = shalt.err (!%p3691_p0)
}
 0x701   : > { %s3695_s20 = scalar_lea.hbm %s5293_s26, 2048  ;;  %s3699_s12 = scalar_lea.hbm %s5343_s4, 8192 }
 0x702   : > { %p3696_p5 = scmp.ne.s32.totalorder %s5293_s26, %s3695_s20  ;;  %p3700_p4 = scmp.lt.s32.totalorder %s5293_s26, %s5343_s4 }
 0x703   : > { %p3701_p6 = scmp.lt.s32.totalorder %s3699_s12, %s3695_s20 }
 0x704   : > { %p3697_p2 = pnand %p3696_p5, %p5520_p10 }
 0x705   : > { %p3702_p8 = por %p3701_p6, %p3700_p4 }
 0x706   : > { %p3698_p1 = pneg %p3697_p2 }
 0x708   : > { %p3703_p3 = pnand %p3702_p8, %p3698_p1 }
 0x70a   : > { %3706 = shalt.err (!%p3703_p3)
}
 0x70b   : > { %s3758_s23 = smov 64   ;;  %s3759_s8 = smov 4  }
 0x70c   : > { %3272 = dma.vmem_to_hbm [thread:$0]  (%p5520_p10), %s5295_s5, 2048, %s5293_s26, %s2733_s19, %s3758_s23, %s3758_s23, %s3759_s8  }
 0x70d PF: > { %p3289_p7 = scmp.ge.s32.totalorder %s3749_s18, 2  ;;  %s2762_s6 = sand.u32 1, %s3737_s15  }
 0x70e   : > { %p5521_p9 = scmp.ne.s32.totalorder %s5403_s22, 0  ;;  %s2763_s24 = scalar_lea.sflag [#allocation4], %s2762_s6 }
 0x710   : > { %p3283_p11 = pnand %p3289_p7, %p5521_p9 }
 0x712   : > { %p3284_p12 = pneg %p3283_p11 }
 0x714   : > { %3732 = dma.done.wait (%p3284_p12), %s2763_s24, 2048  }
 0x715   : > { %3734 = vsyncadd (%p3284_p12), %s2763_s24, 4294965248  ;;  %p18_p13 = scmp.ge.s32.totalorder %s3838_s27, 6   ;;  %s5522_s15 = smov %s3741_s16 }
 0x716   : > { %s5523_s16 = smov %s3745_s17  ;;  %s5524_s17 = smov %s3858_s9 }
 0x717   : > { %s5525_s18 = smov %s3838_s27  ;;  %20 = sbr.rel (!%p18_p13) target bundleno = 6 (0x6), region = 88 }
 0x71c   :  { %2768 = vsyncpa [#allocation3], 1 }
 0x71d   :  { %2770 = vsyncpa [#allocation3 + $0x1], 1 }
 0x71e   :  { %2771 = vsyncpa [#allocation6], 1 }
 0x71f   :  { %2772 = vsyncpa [#allocation4], 1 }
 0x720   :  { %2774 = vsyncpa [#allocation4 + $0x1], 1 }

</bundles_post_ra>
